<compile_context>
chip_gen: v5e
topology: v5e:2x2
jax: 0.10.0
libtpu: 0.0.40
codegen_flags: <defaults>
</compile_context>

<pallas_src>
import functools

import jax
import jax.numpy as jnp
from jax import lax
from jax.experimental import pallas as pl
from jax.experimental.pallas import tpu as pltpu

EPS = 1e-5
PAD = 2
DIL = 2


def _bn_relu_conv_kernel(x_ref, s1_ref, b1_ref, w_ref,
                         y_ref, csum_ref, csq_ref,
                         act_ref, slabs_ref,
                         *, H, W, C_in, C_half, pad, dil, strip_h):
    """Fused BN1(affine form) + ReLU + dilated 3x3 conv for one image (NHWC),
    producing one C_out half plus per-image channel sum / sum-of-squares.

    x_ref     : (1, H, W, C_in)        raw input block (unpadded), f32
    s1/b1     : (1, C_in)              folded BN1 scale / bias, f32
    w_ref     : (9, C_in, C_half)      conv taps (index kh*3+kw), bf16
    y_ref     : (1, H, W, C_half)      conv output (pre-BN2), bf16
    csum_ref  : (1, 1, C_half)         per-image channel sum of y (f32)
    csq_ref   : (1, 1, C_half)         per-image channel sum of y*y (f32)
    act_ref   : (H+2p, W+2p, C_in)     bf16 padded BN1+ReLU activation scratch
    slabs_ref : (3, H+2p, W, C_in)     bf16 per-kw aligned slab scratch
    """
    # --- BN1 + ReLU written into the interior of the zero-padded scratch.
    # Conv zero-padding is applied AFTER BN+ReLU, so the border stays 0.
    s1 = s1_ref[...].reshape(1, 1, C_in)
    b1 = b1_ref[...].reshape(1, 1, C_in)
    act_ref[...] = jnp.zeros_like(act_ref)
    act_ref[pad:pad + H, pad:pad + W, :] = jnp.maximum(
        x_ref[0] * s1 + b1, 0.0).astype(act_ref.dtype)

    # --- One sublane-unaligned W shift per kw into an aligned slab; the kh
    # offsets below only slice the (free) outermost axis.
    for kw in range(3):
        slabs_ref[kw] = act_ref[:, kw * dil:kw * dil + W, :]

    # --- Dilated 3x3 conv: row strips of (strip_h*W, C_in) @ (C_in, C_half)
    # MXU matmuls.  Each strip's 9-tap accumulator stays in vregs (no VMEM
    # accumulator RMW); csum/csq partial sums are folded into the same loop.
    rows = strip_h * W
    csum = jnp.zeros((1, C_half), jnp.float32)
    csq = jnp.zeros((1, C_half), jnp.float32)
    for h0 in range(0, H, strip_h):
        acc = None
        for kw in range(3):
            for kh in range(3):
                patch = slabs_ref[kw,
                                  h0 + kh * dil:h0 + kh * dil + strip_h, :, :]
                contrib = jnp.dot(patch.reshape(rows, C_in),
                                  w_ref[kh * 3 + kw],
                                  preferred_element_type=jnp.float32)
                acc = contrib if acc is None else acc + contrib
        y_ref[0, h0:h0 + strip_h, :, :] = (
            acc.reshape(strip_h, W, C_half).astype(y_ref.dtype))
        csum = csum + jnp.sum(acc, axis=0, keepdims=True)
        csq = csq + jnp.sum(acc * acc, axis=0, keepdims=True)

    csum_ref[...] = csum.reshape(1, 1, C_half)
    csq_ref[...] = csq.reshape(1, 1, C_half)


def _largest_strip(H, W, max_rows=128):
    """Largest divisor of H whose strip (strip_h*W rows) accumulator stays in
    a comfortable number of vregs (<= max_rows x 128 lanes of f32)."""
    best = 1
    for s in range(1, H + 1):
        if H % s == 0 and s * W <= max_rows:
            best = s
    return best


@jax.jit
def fused_forward(x_nchw, gamma1, beta1, w_conv, gamma2, beta2):
    N, C, H, W = x_nchw.shape
    C_out = w_conv.shape[0]
    pad, dil = PAD, DIL
    Hp, Wp = H + 2 * pad, W + 2 * pad
    cnt = N * H * W

    xf = x_nchw.astype(jnp.float32)

    # BatchNorm2d #1 (training mode): batch statistics reduced straight from
    # the NCHW input (no extra pass over the transposed copy), folded into a
    # per-channel scale/bias for the kernel.
    mean1 = jnp.mean(xf, axis=(0, 2, 3))
    var1 = jnp.var(xf, axis=(0, 2, 3))          # biased variance (training BN)
    scale1 = gamma1 * lax.rsqrt(var1 + EPS)
    bias1 = beta1 - mean1 * scale1

    x = jnp.transpose(xf, (0, 2, 3, 1))          # NHWC for the kernel

    # (C_out, C_in, kh, kw) -> (kh*3+kw, C_in, C_out); bf16 for the MXU.
    w_k = jnp.transpose(w_conv, (2, 3, 1, 0)).reshape(9, C, C_out)
    w_k = w_k.astype(jnp.bfloat16)

    # Split C_out across a parallel grid axis: lane-dense 128-channel halves,
    # >=2*N pipeline steps, and >=2 work units for v7x's two TensorCores.
    n_j = 2 if (C_out % 2 == 0 and (C_out // 2) % 128 == 0) else 1
    c_half = C_out // n_j
    strip_h = _largest_strip(H, W)

    # NOTE(v7x): total per-step VMEM here is ~2.5 MiB so defaults are fine; for
    # larger H/W set pltpu.CompilerParams(vmem_limit_bytes=...) and consider
    # pipeline_mode=pl.Buffered(1) on the grid-invariant weight block.
    conv, csum, csq = pl.pallas_call(
        functools.partial(_bn_relu_conv_kernel, H=H, W=W, C_in=C,
                          C_half=c_half, pad=pad, dil=dil, strip_h=strip_h),
        out_shape=(
            jax.ShapeDtypeStruct((N, H, W, C_out), jnp.bfloat16),
            jax.ShapeDtypeStruct((N, 1, C_out), jnp.float32),
            jax.ShapeDtypeStruct((N, 1, C_out), jnp.float32),
        ),
        grid_spec=pltpu.PrefetchScalarGridSpec(
            num_scalar_prefetch=0,
            # C_out-half outermost: weight block re-fetched once per half; the
            # x block fetch is skipped whenever its block index repeats.
            grid=(n_j, N),
            in_specs=[
                pl.BlockSpec((1, H, W, C), lambda j, n: (n, 0, 0, 0)),
                pl.BlockSpec((1, C), lambda j, n: (0, 0)),
                pl.BlockSpec((1, C), lambda j, n: (0, 0)),
                pl.BlockSpec((9, C, c_half), lambda j, n: (0, 0, j)),
            ],
            out_specs=[
                pl.BlockSpec((1, H, W, c_half), lambda j, n: (n, 0, 0, j)),
                pl.BlockSpec((1, 1, c_half), lambda j, n: (n, 0, j)),
                pl.BlockSpec((1, 1, c_half), lambda j, n: (n, 0, j)),
            ],
            scratch_shapes=[
                pltpu.VMEM((Hp, Wp, C), jnp.bfloat16),    # padded BN1+ReLU act
                pltpu.VMEM((3, Hp, W, C), jnp.bfloat16),  # per-kw aligned slabs
            ],
        ),
        compiler_params=pltpu.CompilerParams(
            dimension_semantics=("parallel", "parallel")),
    )(x, scale1.reshape(1, C), bias1.reshape(1, C), w_k)

    # BatchNorm2d #2 (training mode): finalize batch stats from the per-image
    # channel sums emitted by the conv kernel (f32; no extra HBM pass).
    mean2 = jnp.sum(csum[:, 0, :], axis=0) / cnt
    var2 = jnp.maximum(jnp.sum(csq[:, 0, :], axis=0) / cnt - mean2 * mean2, 0.0)
    scale2 = gamma2 * lax.rsqrt(var2 + EPS)
    bias2 = beta2 - mean2 * scale2

    # BN2 + ReLU + NCHW transpose in plain jnp: XLA fuses these into a single
    # read of the bf16 conv intermediate and one write of the final output.
    out = jnp.maximum(conv.astype(jnp.float32) * scale2 + bias2, 0.0)
    return jnp.transpose(out, (0, 3, 1, 2))


@jax.jit
def reference_forward(x_nchw, gamma1, beta1, w_conv, gamma2, beta2):
    """Pure-JAX reference (same semantics as the PyTorch module in train mode)."""
    x = jnp.transpose(x_nchw, (0, 2, 3, 1))
    mean1 = jnp.mean(x, axis=(0, 1, 2))
    var1 = jnp.var(x, axis=(0, 1, 2))
    a = jnp.maximum((x - mean1) / jnp.sqrt(var1 + EPS) * gamma1 + beta1, 0.0)
    w = jnp.transpose(w_conv, (2, 3, 1, 0))
    y = lax.conv_general_dilated(
        a, w, window_strides=(1, 1), padding=((PAD, PAD), (PAD, PAD)),
        rhs_dilation=(DIL, DIL), dimension_numbers=("NHWC", "HWIO", "NHWC"))
    mean2 = jnp.mean(y, axis=(0, 1, 2))
    var2 = jnp.var(y, axis=(0, 1, 2))
    o = jnp.maximum((y - mean2) / jnp.sqrt(var2 + EPS) * gamma2 + beta2, 0.0)
    return jnp.transpose(o, (0, 3, 1, 2))


if __name__ == "__main__":
    # Channel count (256) is fixed by the module; keep batch/spatial small.
    N, C, H, W = 2, 256, 16, 16

    key = jax.random.PRNGKey(0)
    kx, kg1, kb1, kw, kg2, kb2 = jax.random.split(key, 6)

    x = jax.random.normal(kx, (N, C, H, W), jnp.float32)              # NCHW
    gamma1 = 1.0 + 0.1 * jax.random.normal(kg1, (C,), jnp.float32)
    beta1 = 0.1 * jax.random.normal(kb1, (C,), jnp.float32)
    w_conv = 0.05 * jax.random.normal(kw, (C, C, 3, 3), jnp.float32)  # (Cout,Cin,kh,kw)
    gamma2 = 1.0 + 0.1 * jax.random.normal(kg2, (C,), jnp.float32)
    beta2 = 0.1 * jax.random.normal(kb2, (C,), jnp.float32)

    out = jax.block_until_ready(
        fused_forward(x, gamma1, beta1, w_conv, gamma2, beta2))
    ref = jax.block_until_ready(
        reference_forward(x, gamma1, beta1, w_conv, gamma2, beta2))

    assert out.shape == (N, C, H, W), out.shape
    err = float(jnp.max(jnp.abs(out - ref)))
    assert jnp.allclose(out, ref, atol=2e-2, rtol=2e-2), err

    print("KERNEL_OK")
</pallas_src>

<mosaic_0001>
module attributes {stable_mosaic.version = 11 : i64} {
  func.func @_bn_relu_conv_kernel(%arg0: i32, %arg1: i32, %arg2: memref<1x16x16x256xf32, #tpu.memory_space<vmem>>, %arg3: memref<1x256xf32, #tpu.memory_space<vmem>>, %arg4: memref<1x256xf32, #tpu.memory_space<vmem>>, %arg5: memref<9x256x128xbf16, #tpu.memory_space<vmem>>, %arg6: memref<1x16x16x128xbf16, #tpu.memory_space<vmem>>, %arg7: memref<1x1x128xf32, #tpu.memory_space<vmem>>, %arg8: memref<1x1x128xf32, #tpu.memory_space<vmem>>, %arg9: memref<20x20x256xbf16, #tpu.memory_space<vmem>>, %arg10: memref<3x20x16x256xbf16, #tpu.memory_space<vmem>>) attributes {dimension_semantics = [#tpu.dimension_semantics<parallel>, #tpu.dimension_semantics<parallel>], iteration_bounds = array<i64: 2, 2>, scalar_prefetch = 0 : i64, scratch_operands = 2 : i64, tpu.core_type = #tpu.core_type<tc>, window_params = [{transform_indices = @transform_0, window_bounds = array<i64: 1, 16, 16, 256>}, {pipeline_mode = #tpu.pipeline_mode<synchronous>, transform_indices = @transform_1, window_bounds = array<i64: 1, 256>}, {pipeline_mode = #tpu.pipeline_mode<synchronous>, transform_indices = @transform_2, window_bounds = array<i64: 1, 256>}, {transform_indices = @transform_3, window_bounds = array<i64: 9, 256, 128>}, {transform_indices = @transform_4, window_bounds = array<i64: 1, 16, 16, 128>}, {transform_indices = @transform_5, window_bounds = array<i64: 1, 1, 128>}, {transform_indices = @transform_6, window_bounds = array<i64: 1, 1, 128>}]} {
    %c0 = arith.constant 0 : index
    %c0_0 = arith.constant 0 : index
    %0 = vector.load %arg3[%c0, %c0_0] : memref<1x256xf32, #tpu.memory_space<vmem>>, vector<1x256xf32>
    %1 = vector.shape_cast %0 : vector<1x256xf32> to vector<1x1x256xf32>
    %c0_1 = arith.constant 0 : index
    %c0_2 = arith.constant 0 : index
    %2 = vector.load %arg4[%c0_1, %c0_2] : memref<1x256xf32, #tpu.memory_space<vmem>>, vector<1x256xf32>
    %3 = vector.shape_cast %2 : vector<1x256xf32> to vector<1x1x256xf32>
    %cst = arith.constant 0.000000e+00 : bf16
    %4 = vector.broadcast %cst : bf16 to vector<20x20x256xbf16>
    %c0_3 = arith.constant 0 : index
    %c0_4 = arith.constant 0 : index
    %c0_5 = arith.constant 0 : index
    %5 = vector.load %arg9[%c0_3, %c0_4, %c0_5] : memref<20x20x256xbf16, #tpu.memory_space<vmem>>, vector<20x20x256xbf16>
    tpu.vector_store %arg9[%c0_3, %c0_4, %c0_5], %4 {strides = array<i32>} : memref<20x20x256xbf16, #tpu.memory_space<vmem>>, vector<20x20x256xbf16>,
    %c0_6 = arith.constant 0 : index
    %c0_7 = arith.constant 0 : index
    %c0_8 = arith.constant 0 : index
    %c0_9 = arith.constant 0 : index
    %6 = vector.load %arg2[%c0_6, %c0_7, %c0_8, %c0_9] : memref<1x16x16x256xf32, #tpu.memory_space<vmem>>, vector<1x16x16x256xf32>
    %7 = vector.shape_cast %6 : vector<1x16x16x256xf32> to vector<16x16x256xf32>
    %8 = vector.broadcast %1 : vector<1x1x256xf32> to vector<16x16x256xf32>
    %9 = arith.mulf %7, %8 : vector<16x16x256xf32>
    %10 = vector.broadcast %3 : vector<1x1x256xf32> to vector<16x16x256xf32>
    %11 = arith.addf %9, %10 : vector<16x16x256xf32>
    %cst_10 = arith.constant 0.000000e+00 : f32
    %12 = vector.broadcast %cst_10 : f32 to vector<16x16x256xf32>
    %13 = arith.maximumf %11, %12 : vector<16x16x256xf32>
    %14 = arith.truncf %13 : vector<16x16x256xf32> to vector<16x16x256xbf16>
    %c2 = arith.constant 2 : index
    %c2_11 = arith.constant 2 : index
    %c0_12 = arith.constant 0 : index
    %15 = vector.load %arg9[%c2, %c2_11, %c0_12] : memref<20x20x256xbf16, #tpu.memory_space<vmem>>, vector<16x16x256xbf16>
    tpu.vector_store %arg9[%c2, %c2_11, %c0_12], %14 {strides = array<i32>} : memref<20x20x256xbf16, #tpu.memory_space<vmem>>, vector<16x16x256xbf16>,
    %c0_13 = arith.constant 0 : index
    %c0_14 = arith.constant 0 : index
    %c0_15 = arith.constant 0 : index
    %16 = vector.load %arg9[%c0_13, %c0_14, %c0_15] : memref<20x20x256xbf16, #tpu.memory_space<vmem>>, vector<20x16x256xbf16>
    %c0_16 = arith.constant 0 : index
    %c0_17 = arith.constant 0 : index
    %c0_18 = arith.constant 0 : index
    %c0_19 = arith.constant 0 : index
    %17 = vector.load %arg10[%c0_16, %c0_17, %c0_18, %c0_19] : memref<3x20x16x256xbf16, #tpu.memory_space<vmem>>, vector<1x20x16x256xbf16>
    %18 = vector.shape_cast %17 : vector<1x20x16x256xbf16> to vector<20x16x256xbf16>
    %19 = vector.shape_cast %16 : vector<20x16x256xbf16> to vector<1x20x16x256xbf16>
    tpu.vector_store %arg10[%c0_16, %c0_17, %c0_18, %c0_19], %19 {strides = array<i32>} : memref<3x20x16x256xbf16, #tpu.memory_space<vmem>>, vector<1x20x16x256xbf16>,
    %c0_20 = arith.constant 0 : index
    %c2_21 = arith.constant 2 : index
    %c0_22 = arith.constant 0 : index
    %20 = vector.load %arg9[%c0_20, %c2_21, %c0_22] : memref<20x20x256xbf16, #tpu.memory_space<vmem>>, vector<20x16x256xbf16>
    %c1 = arith.constant 1 : index
    %c0_23 = arith.constant 0 : index
    %c0_24 = arith.constant 0 : index
    %c0_25 = arith.constant 0 : index
    %21 = vector.load %arg10[%c1, %c0_23, %c0_24, %c0_25] : memref<3x20x16x256xbf16, #tpu.memory_space<vmem>>, vector<1x20x16x256xbf16>
    %22 = vector.shape_cast %21 : vector<1x20x16x256xbf16> to vector<20x16x256xbf16>
    %23 = vector.shape_cast %20 : vector<20x16x256xbf16> to vector<1x20x16x256xbf16>
    tpu.vector_store %arg10[%c1, %c0_23, %c0_24, %c0_25], %23 {strides = array<i32>} : memref<3x20x16x256xbf16, #tpu.memory_space<vmem>>, vector<1x20x16x256xbf16>,
    %c0_26 = arith.constant 0 : index
    %c4 = arith.constant 4 : index
    %c0_27 = arith.constant 0 : index
    %24 = vector.load %arg9[%c0_26, %c4, %c0_27] : memref<20x20x256xbf16, #tpu.memory_space<vmem>>, vector<20x16x256xbf16>
    %c2_28 = arith.constant 2 : index
    %c0_29 = arith.constant 0 : index
    %c0_30 = arith.constant 0 : index
    %c0_31 = arith.constant 0 : index
    %25 = vector.load %arg10[%c2_28, %c0_29, %c0_30, %c0_31] : memref<3x20x16x256xbf16, #tpu.memory_space<vmem>>, vector<1x20x16x256xbf16>
    %26 = vector.shape_cast %25 : vector<1x20x16x256xbf16> to vector<20x16x256xbf16>
    %27 = vector.shape_cast %24 : vector<20x16x256xbf16> to vector<1x20x16x256xbf16>
    tpu.vector_store %arg10[%c2_28, %c0_29, %c0_30, %c0_31], %27 {strides = array<i32>} : memref<3x20x16x256xbf16, #tpu.memory_space<vmem>>, vector<1x20x16x256xbf16>,
    %cst_32 = arith.constant 0.000000e+00 : f32
    %28 = vector.broadcast %cst_32 : f32 to vector<1x128xf32>
    %cst_33 = arith.constant 0.000000e+00 : f32
    %29 = vector.broadcast %cst_33 : f32 to vector<1x128xf32>
    %c0_34 = arith.constant 0 : index
    %c0_35 = arith.constant 0 : index
    %c0_36 = arith.constant 0 : index
    %c0_37 = arith.constant 0 : index
    %30 = vector.load %arg10[%c0_34, %c0_35, %c0_36, %c0_37] : memref<3x20x16x256xbf16, #tpu.memory_space<vmem>>, vector<1x8x16x256xbf16>
    %31 = vector.shape_cast %30 : vector<1x8x16x256xbf16> to vector<8x16x256xbf16>
    %32 = vector.shape_cast %31 : vector<8x16x256xbf16> to vector<128x256xbf16>
    %c0_38 = arith.constant 0 : index
    %c0_39 = arith.constant 0 : index
    %c0_40 = arith.constant 0 : index
    %33 = vector.load %arg5[%c0_38, %c0_39, %c0_40] : memref<9x256x128xbf16, #tpu.memory_space<vmem>>, vector<1x256x128xbf16>
    %34 = vector.shape_cast %33 : vector<1x256x128xbf16> to vector<256x128xbf16>
    %cst_41 = arith.constant dense<0.000000e+00> : vector<128x128xf32>
    %35 = tpu.matmul %32, %34, %cst_41 {dimension_numbers = #tpu.dot_dimension_numbers<[1], [0], [0], [1], [0, 0, 1, 1], [], []>} : vector<128x256xbf16>, vector<256x128xbf16>, vector<128x128xf32> -> vector<128x128xf32>
    %c0_42 = arith.constant 0 : index
    %c2_43 = arith.constant 2 : index
    %c0_44 = arith.constant 0 : index
    %c0_45 = arith.constant 0 : index
    %36 = vector.load %arg10[%c0_42, %c2_43, %c0_44, %c0_45] : memref<3x20x16x256xbf16, #tpu.memory_space<vmem>>, vector<1x8x16x256xbf16>
    %37 = vector.shape_cast %36 : vector<1x8x16x256xbf16> to vector<8x16x256xbf16>
    %38 = vector.shape_cast %37 : vector<8x16x256xbf16> to vector<128x256xbf16>
    %c3 = arith.constant 3 : index
    %c0_46 = arith.constant 0 : index
    %c0_47 = arith.constant 0 : index
    %39 = vector.load %arg5[%c3, %c0_46, %c0_47] : memref<9x256x128xbf16, #tpu.memory_space<vmem>>, vector<1x256x128xbf16>
    %40 = vector.shape_cast %39 : vector<1x256x128xbf16> to vector<256x128xbf16>
    %cst_48 = arith.constant dense<0.000000e+00> : vector<128x128xf32>
    %41 = tpu.matmul %38, %40, %cst_48 {dimension_numbers = #tpu.dot_dimension_numbers<[1], [0], [0], [1], [0, 0, 1, 1], [], []>} : vector<128x256xbf16>, vector<256x128xbf16>, vector<128x128xf32> -> vector<128x128xf32>
    %42 = arith.addf %35, %41 : vector<128x128xf32>
    %c0_49 = arith.constant 0 : index
    %c4_50 = arith.constant 4 : index
    %c0_51 = arith.constant 0 : index
    %c0_52 = arith.constant 0 : index
    %43 = vector.load %arg10[%c0_49, %c4_50, %c0_51, %c0_52] : memref<3x20x16x256xbf16, #tpu.memory_space<vmem>>, vector<1x8x16x256xbf16>
    %44 = vector.shape_cast %43 : vector<1x8x16x256xbf16> to vector<8x16x256xbf16>
    %45 = vector.shape_cast %44 : vector<8x16x256xbf16> to vector<128x256xbf16>
    %c6 = arith.constant 6 : index
    %c0_53 = arith.constant 0 : index
    %c0_54 = arith.constant 0 : index
    %46 = vector.load %arg5[%c6, %c0_53, %c0_54] : memref<9x256x128xbf16, #tpu.memory_space<vmem>>, vector<1x256x128xbf16>
    %47 = vector.shape_cast %46 : vector<1x256x128xbf16> to vector<256x128xbf16>
    %cst_55 = arith.constant dense<0.000000e+00> : vector<128x128xf32>
    %48 = tpu.matmul %45, %47, %cst_55 {dimension_numbers = #tpu.dot_dimension_numbers<[1], [0], [0], [1], [0, 0, 1, 1], [], []>} : vector<128x256xbf16>, vector<256x128xbf16>, vector<128x128xf32> -> vector<128x128xf32>
    %49 = arith.addf %42, %48 : vector<128x128xf32>
    %c1_56 = arith.constant 1 : index
    %c0_57 = arith.constant 0 : index
    %c0_58 = arith.constant 0 : index
    %c0_59 = arith.constant 0 : index
    %50 = vector.load %arg10[%c1_56, %c0_57, %c0_58, %c0_59] : memref<3x20x16x256xbf16, #tpu.memory_space<vmem>>, vector<1x8x16x256xbf16>
    %51 = vector.shape_cast %50 : vector<1x8x16x256xbf16> to vector<8x16x256xbf16>
    %52 = vector.shape_cast %51 : vector<8x16x256xbf16> to vector<128x256xbf16>
    %c1_60 = arith.constant 1 : index
    %c0_61 = arith.constant 0 : index
    %c0_62 = arith.constant 0 : index
    %53 = vector.load %arg5[%c1_60, %c0_61, %c0_62] : memref<9x256x128xbf16, #tpu.memory_space<vmem>>, vector<1x256x128xbf16>
    %54 = vector.shape_cast %53 : vector<1x256x128xbf16> to vector<256x128xbf16>
    %cst_63 = arith.constant dense<0.000000e+00> : vector<128x128xf32>
    %55 = tpu.matmul %52, %54, %cst_63 {dimension_numbers = #tpu.dot_dimension_numbers<[1], [0], [0], [1], [0, 0, 1, 1], [], []>} : vector<128x256xbf16>, vector<256x128xbf16>, vector<128x128xf32> -> vector<128x128xf32>
    %56 = arith.addf %49, %55 : vector<128x128xf32>
    %c1_64 = arith.constant 1 : index
    %c2_65 = arith.constant 2 : index
    %c0_66 = arith.constant 0 : index
    %c0_67 = arith.constant 0 : index
    %57 = vector.load %arg10[%c1_64, %c2_65, %c0_66, %c0_67] : memref<3x20x16x256xbf16, #tpu.memory_space<vmem>>, vector<1x8x16x256xbf16>
    %58 = vector.shape_cast %57 : vector<1x8x16x256xbf16> to vector<8x16x256xbf16>
    %59 = vector.shape_cast %58 : vector<8x16x256xbf16> to vector<128x256xbf16>
    %c4_68 = arith.constant 4 : index
    %c0_69 = arith.constant 0 : index
    %c0_70 = arith.constant 0 : index
    %60 = vector.load %arg5[%c4_68, %c0_69, %c0_70] : memref<9x256x128xbf16, #tpu.memory_space<vmem>>, vector<1x256x128xbf16>
    %61 = vector.shape_cast %60 : vector<1x256x128xbf16> to vector<256x128xbf16>
    %cst_71 = arith.constant dense<0.000000e+00> : vector<128x128xf32>
    %62 = tpu.matmul %59, %61, %cst_71 {dimension_numbers = #tpu.dot_dimension_numbers<[1], [0], [0], [1], [0, 0, 1, 1], [], []>} : vector<128x256xbf16>, vector<256x128xbf16>, vector<128x128xf32> -> vector<128x128xf32>
    %63 = arith.addf %56, %62 : vector<128x128xf32>
    %c1_72 = arith.constant 1 : index
    %c4_73 = arith.constant 4 : index
    %c0_74 = arith.constant 0 : index
    %c0_75 = arith.constant 0 : index
    %64 = vector.load %arg10[%c1_72, %c4_73, %c0_74, %c0_75] : memref<3x20x16x256xbf16, #tpu.memory_space<vmem>>, vector<1x8x16x256xbf16>
    %65 = vector.shape_cast %64 : vector<1x8x16x256xbf16> to vector<8x16x256xbf16>
    %66 = vector.shape_cast %65 : vector<8x16x256xbf16> to vector<128x256xbf16>
    %c7 = arith.constant 7 : index
    %c0_76 = arith.constant 0 : index
    %c0_77 = arith.constant 0 : index
    %67 = vector.load %arg5[%c7, %c0_76, %c0_77] : memref<9x256x128xbf16, #tpu.memory_space<vmem>>, vector<1x256x128xbf16>
    %68 = vector.shape_cast %67 : vector<1x256x128xbf16> to vector<256x128xbf16>
    %cst_78 = arith.constant dense<0.000000e+00> : vector<128x128xf32>
    %69 = tpu.matmul %66, %68, %cst_78 {dimension_numbers = #tpu.dot_dimension_numbers<[1], [0], [0], [1], [0, 0, 1, 1], [], []>} : vector<128x256xbf16>, vector<256x128xbf16>, vector<128x128xf32> -> vector<128x128xf32>
    %70 = arith.addf %63, %69 : vector<128x128xf32>
    %c2_79 = arith.constant 2 : index
    %c0_80 = arith.constant 0 : index
    %c0_81 = arith.constant 0 : index
    %c0_82 = arith.constant 0 : index
    %71 = vector.load %arg10[%c2_79, %c0_80, %c0_81, %c0_82] : memref<3x20x16x256xbf16, #tpu.memory_space<vmem>>, vector<1x8x16x256xbf16>
    %72 = vector.shape_cast %71 : vector<1x8x16x256xbf16> to vector<8x16x256xbf16>
    %73 = vector.shape_cast %72 : vector<8x16x256xbf16> to vector<128x256xbf16>
    %c2_83 = arith.constant 2 : index
    %c0_84 = arith.constant 0 : index
    %c0_85 = arith.constant 0 : index
    %74 = vector.load %arg5[%c2_83, %c0_84, %c0_85] : memref<9x256x128xbf16, #tpu.memory_space<vmem>>, vector<1x256x128xbf16>
    %75 = vector.shape_cast %74 : vector<1x256x128xbf16> to vector<256x128xbf16>
    %cst_86 = arith.constant dense<0.000000e+00> : vector<128x128xf32>
    %76 = tpu.matmul %73, %75, %cst_86 {dimension_numbers = #tpu.dot_dimension_numbers<[1], [0], [0], [1], [0, 0, 1, 1], [], []>} : vector<128x256xbf16>, vector<256x128xbf16>, vector<128x128xf32> -> vector<128x128xf32>
    %77 = arith.addf %70, %76 : vector<128x128xf32>
    %c2_87 = arith.constant 2 : index
    %c2_88 = arith.constant 2 : index
    %c0_89 = arith.constant 0 : index
    %c0_90 = arith.constant 0 : index
    %78 = vector.load %arg10[%c2_87, %c2_88, %c0_89, %c0_90] : memref<3x20x16x256xbf16, #tpu.memory_space<vmem>>, vector<1x8x16x256xbf16>
    %79 = vector.shape_cast %78 : vector<1x8x16x256xbf16> to vector<8x16x256xbf16>
    %80 = vector.shape_cast %79 : vector<8x16x256xbf16> to vector<128x256xbf16>
    %c5 = arith.constant 5 : index
    %c0_91 = arith.constant 0 : index
    %c0_92 = arith.constant 0 : index
    %81 = vector.load %arg5[%c5, %c0_91, %c0_92] : memref<9x256x128xbf16, #tpu.memory_space<vmem>>, vector<1x256x128xbf16>
    %82 = vector.shape_cast %81 : vector<1x256x128xbf16> to vector<256x128xbf16>
    %cst_93 = arith.constant dense<0.000000e+00> : vector<128x128xf32>
    %83 = tpu.matmul %80, %82, %cst_93 {dimension_numbers = #tpu.dot_dimension_numbers<[1], [0], [0], [1], [0, 0, 1, 1], [], []>} : vector<128x256xbf16>, vector<256x128xbf16>, vector<128x128xf32> -> vector<128x128xf32>
    %84 = arith.addf %77, %83 : vector<128x128xf32>
    %c2_94 = arith.constant 2 : index
    %c4_95 = arith.constant 4 : index
    %c0_96 = arith.constant 0 : index
    %c0_97 = arith.constant 0 : index
    %85 = vector.load %arg10[%c2_94, %c4_95, %c0_96, %c0_97] : memref<3x20x16x256xbf16, #tpu.memory_space<vmem>>, vector<1x8x16x256xbf16>
    %86 = vector.shape_cast %85 : vector<1x8x16x256xbf16> to vector<8x16x256xbf16>
    %87 = vector.shape_cast %86 : vector<8x16x256xbf16> to vector<128x256xbf16>
    %c8 = arith.constant 8 : index
    %c0_98 = arith.constant 0 : index
    %c0_99 = arith.constant 0 : index
    %88 = vector.load %arg5[%c8, %c0_98, %c0_99] : memref<9x256x128xbf16, #tpu.memory_space<vmem>>, vector<1x256x128xbf16>
    %89 = vector.shape_cast %88 : vector<1x256x128xbf16> to vector<256x128xbf16>
    %cst_100 = arith.constant dense<0.000000e+00> : vector<128x128xf32>
    %90 = tpu.matmul %87, %89, %cst_100 {dimension_numbers = #tpu.dot_dimension_numbers<[1], [0], [0], [1], [0, 0, 1, 1], [], []>} : vector<128x256xbf16>, vector<256x128xbf16>, vector<128x128xf32> -> vector<128x128xf32>
    %91 = arith.addf %84, %90 : vector<128x128xf32>
    %92 = vector.shape_cast %91 : vector<128x128xf32> to vector<8x16x128xf32>
    %93 = arith.truncf %92 : vector<8x16x128xf32> to vector<8x16x128xbf16>
    %c0_101 = arith.constant 0 : index
    %c0_102 = arith.constant 0 : index
    %c0_103 = arith.constant 0 : index
    %c0_104 = arith.constant 0 : index
    %94 = vector.load %arg6[%c0_101, %c0_102, %c0_103, %c0_104] : memref<1x16x16x128xbf16, #tpu.memory_space<vmem>>, vector<1x8x16x128xbf16>
    %95 = vector.shape_cast %94 : vector<1x8x16x128xbf16> to vector<8x16x128xbf16>
    %96 = vector.shape_cast %93 : vector<8x16x128xbf16> to vector<1x8x16x128xbf16>
    tpu.vector_store %arg6[%c0_101, %c0_102, %c0_103, %c0_104], %96 {strides = array<i32>} : memref<1x16x16x128xbf16, #tpu.memory_space<vmem>>, vector<1x8x16x128xbf16>,
    %cst_105 = arith.constant dense<0.000000e+00> : vector<128xf32>
    %97 = vector.multi_reduction <add>, %91, %cst_105 [0] : vector<128x128xf32> to vector<128xf32>
    %98 = vector.shape_cast %97 : vector<128xf32> to vector<1x128xf32>
    %99 = arith.addf %28, %98 : vector<1x128xf32>
    %100 = arith.mulf %91, %91 : vector<128x128xf32>
    %cst_106 = arith.constant dense<0.000000e+00> : vector<128xf32>
    %101 = vector.multi_reduction <add>, %100, %cst_106 [0] : vector<128x128xf32> to vector<128xf32>
    %102 = vector.shape_cast %101 : vector<128xf32> to vector<1x128xf32>
    %103 = arith.addf %29, %102 : vector<1x128xf32>
    %c0_107 = arith.constant 0 : index
    %c8_108 = arith.constant 8 : index
    %c0_109 = arith.constant 0 : index
    %c0_110 = arith.constant 0 : index
    %104 = vector.load %arg10[%c0_107, %c8_108, %c0_109, %c0_110] : memref<3x20x16x256xbf16, #tpu.memory_space<vmem>>, vector<1x8x16x256xbf16>
    %105 = vector.shape_cast %104 : vector<1x8x16x256xbf16> to vector<8x16x256xbf16>
    %106 = vector.shape_cast %105 : vector<8x16x256xbf16> to vector<128x256xbf16>
    %c0_111 = arith.constant 0 : index
    %c0_112 = arith.constant 0 : index
    %c0_113 = arith.constant 0 : index
    %107 = vector.load %arg5[%c0_111, %c0_112, %c0_113] : memref<9x256x128xbf16, #tpu.memory_space<vmem>>, vector<1x256x128xbf16>
    %108 = vector.shape_cast %107 : vector<1x256x128xbf16> to vector<256x128xbf16>
    %cst_114 = arith.constant dense<0.000000e+00> : vector<128x128xf32>
    %109 = tpu.matmul %106, %108, %cst_114 {dimension_numbers = #tpu.dot_dimension_numbers<[1], [0], [0], [1], [0, 0, 1, 1], [], []>} : vector<128x256xbf16>, vector<256x128xbf16>, vector<128x128xf32> -> vector<128x128xf32>
    %c0_115 = arith.constant 0 : index
    %c10 = arith.constant 10 : index
    %c0_116 = arith.constant 0 : index
    %c0_117 = arith.constant 0 : index
    %110 = vector.load %arg10[%c0_115, %c10, %c0_116, %c0_117] : memref<3x20x16x256xbf16, #tpu.memory_space<vmem>>, vector<1x8x16x256xbf16>
    %111 = vector.shape_cast %110 : vector<1x8x16x256xbf16> to vector<8x16x256xbf16>
    %112 = vector.shape_cast %111 : vector<8x16x256xbf16> to vector<128x256xbf16>
    %c3_118 = arith.constant 3 : index
    %c0_119 = arith.constant 0 : index
    %c0_120 = arith.constant 0 : index
    %113 = vector.load %arg5[%c3_118, %c0_119, %c0_120] : memref<9x256x128xbf16, #tpu.memory_space<vmem>>, vector<1x256x128xbf16>
    %114 = vector.shape_cast %113 : vector<1x256x128xbf16> to vector<256x128xbf16>
    %cst_121 = arith.constant dense<0.000000e+00> : vector<128x128xf32>
    %115 = tpu.matmul %112, %114, %cst_121 {dimension_numbers = #tpu.dot_dimension_numbers<[1], [0], [0], [1], [0, 0, 1, 1], [], []>} : vector<128x256xbf16>, vector<256x128xbf16>, vector<128x128xf32> -> vector<128x128xf32>
    %116 = arith.addf %109, %115 : vector<128x128xf32>
    %c0_122 = arith.constant 0 : index
    %c12 = arith.constant 12 : index
    %c0_123 = arith.constant 0 : index
    %c0_124 = arith.constant 0 : index
    %117 = vector.load %arg10[%c0_122, %c12, %c0_123, %c0_124] : memref<3x20x16x256xbf16, #tpu.memory_space<vmem>>, vector<1x8x16x256xbf16>
    %118 = vector.shape_cast %117 : vector<1x8x16x256xbf16> to vector<8x16x256xbf16>
    %119 = vector.shape_cast %118 : vector<8x16x256xbf16> to vector<128x256xbf16>
    %c6_125 = arith.constant 6 : index
    %c0_126 = arith.constant 0 : index
    %c0_127 = arith.constant 0 : index
    %120 = vector.load %arg5[%c6_125, %c0_126, %c0_127] : memref<9x256x128xbf16, #tpu.memory_space<vmem>>, vector<1x256x128xbf16>
    %121 = vector.shape_cast %120 : vector<1x256x128xbf16> to vector<256x128xbf16>
    %cst_128 = arith.constant dense<0.000000e+00> : vector<128x128xf32>
    %122 = tpu.matmul %119, %121, %cst_128 {dimension_numbers = #tpu.dot_dimension_numbers<[1], [0], [0], [1], [0, 0, 1, 1], [], []>} : vector<128x256xbf16>, vector<256x128xbf16>, vector<128x128xf32> -> vector<128x128xf32>
    %123 = arith.addf %116, %122 : vector<128x128xf32>
    %c1_129 = arith.constant 1 : index
    %c8_130 = arith.constant 8 : index
    %c0_131 = arith.constant 0 : index
    %c0_132 = arith.constant 0 : index
    %124 = vector.load %arg10[%c1_129, %c8_130, %c0_131, %c0_132] : memref<3x20x16x256xbf16, #tpu.memory_space<vmem>>, vector<1x8x16x256xbf16>
    %125 = vector.shape_cast %124 : vector<1x8x16x256xbf16> to vector<8x16x256xbf16>
    %126 = vector.shape_cast %125 : vector<8x16x256xbf16> to vector<128x256xbf16>
    %c1_133 = arith.constant 1 : index
    %c0_134 = arith.constant 0 : index
    %c0_135 = arith.constant 0 : index
    %127 = vector.load %arg5[%c1_133, %c0_134, %c0_135] : memref<9x256x128xbf16, #tpu.memory_space<vmem>>, vector<1x256x128xbf16>
    %128 = vector.shape_cast %127 : vector<1x256x128xbf16> to vector<256x128xbf16>
    %cst_136 = arith.constant dense<0.000000e+00> : vector<128x128xf32>
    %129 = tpu.matmul %126, %128, %cst_136 {dimension_numbers = #tpu.dot_dimension_numbers<[1], [0], [0], [1], [0, 0, 1, 1], [], []>} : vector<128x256xbf16>, vector<256x128xbf16>, vector<128x128xf32> -> vector<128x128xf32>
    %130 = arith.addf %123, %129 : vector<128x128xf32>
    %c1_137 = arith.constant 1 : index
    %c10_138 = arith.constant 10 : index
    %c0_139 = arith.constant 0 : index
    %c0_140 = arith.constant 0 : index
    %131 = vector.load %arg10[%c1_137, %c10_138, %c0_139, %c0_140] : memref<3x20x16x256xbf16, #tpu.memory_space<vmem>>, vector<1x8x16x256xbf16>
    %132 = vector.shape_cast %131 : vector<1x8x16x256xbf16> to vector<8x16x256xbf16>
    %133 = vector.shape_cast %132 : vector<8x16x256xbf16> to vector<128x256xbf16>
    %c4_141 = arith.constant 4 : index
    %c0_142 = arith.constant 0 : index
    %c0_143 = arith.constant 0 : index
    %134 = vector.load %arg5[%c4_141, %c0_142, %c0_143] : memref<9x256x128xbf16, #tpu.memory_space<vmem>>, vector<1x256x128xbf16>
    %135 = vector.shape_cast %134 : vector<1x256x128xbf16> to vector<256x128xbf16>
    %cst_144 = arith.constant dense<0.000000e+00> : vector<128x128xf32>
    %136 = tpu.matmul %133, %135, %cst_144 {dimension_numbers = #tpu.dot_dimension_numbers<[1], [0], [0], [1], [0, 0, 1, 1], [], []>} : vector<128x256xbf16>, vector<256x128xbf16>, vector<128x128xf32> -> vector<128x128xf32>
    %137 = arith.addf %130, %136 : vector<128x128xf32>
    %c1_145 = arith.constant 1 : index
    %c12_146 = arith.constant 12 : index
    %c0_147 = arith.constant 0 : index
    %c0_148 = arith.constant 0 : index
    %138 = vector.load %arg10[%c1_145, %c12_146, %c0_147, %c0_148] : memref<3x20x16x256xbf16, #tpu.memory_space<vmem>>, vector<1x8x16x256xbf16>
    %139 = vector.shape_cast %138 : vector<1x8x16x256xbf16> to vector<8x16x256xbf16>
    %140 = vector.shape_cast %139 : vector<8x16x256xbf16> to vector<128x256xbf16>
    %c7_149 = arith.constant 7 : index
    %c0_150 = arith.constant 0 : index
    %c0_151 = arith.constant 0 : index
    %141 = vector.load %arg5[%c7_149, %c0_150, %c0_151] : memref<9x256x128xbf16, #tpu.memory_space<vmem>>, vector<1x256x128xbf16>
    %142 = vector.shape_cast %141 : vector<1x256x128xbf16> to vector<256x128xbf16>
    %cst_152 = arith.constant dense<0.000000e+00> : vector<128x128xf32>
    %143 = tpu.matmul %140, %142, %cst_152 {dimension_numbers = #tpu.dot_dimension_numbers<[1], [0], [0], [1], [0, 0, 1, 1], [], []>} : vector<128x256xbf16>, vector<256x128xbf16>, vector<128x128xf32> -> vector<128x128xf32>
    %144 = arith.addf %137, %143 : vector<128x128xf32>
    %c2_153 = arith.constant 2 : index
    %c8_154 = arith.constant 8 : index
    %c0_155 = arith.constant 0 : index
    %c0_156 = arith.constant 0 : index
    %145 = vector.load %arg10[%c2_153, %c8_154, %c0_155, %c0_156] : memref<3x20x16x256xbf16, #tpu.memory_space<vmem>>, vector<1x8x16x256xbf16>
    %146 = vector.shape_cast %145 : vector<1x8x16x256xbf16> to vector<8x16x256xbf16>
    %147 = vector.shape_cast %146 : vector<8x16x256xbf16> to vector<128x256xbf16>
    %c2_157 = arith.constant 2 : index
    %c0_158 = arith.constant 0 : index
    %c0_159 = arith.constant 0 : index
    %148 = vector.load %arg5[%c2_157, %c0_158, %c0_159] : memref<9x256x128xbf16, #tpu.memory_space<vmem>>, vector<1x256x128xbf16>
    %149 = vector.shape_cast %148 : vector<1x256x128xbf16> to vector<256x128xbf16>
    %cst_160 = arith.constant dense<0.000000e+00> : vector<128x128xf32>
    %150 = tpu.matmul %147, %149, %cst_160 {dimension_numbers = #tpu.dot_dimension_numbers<[1], [0], [0], [1], [0, 0, 1, 1], [], []>} : vector<128x256xbf16>, vector<256x128xbf16>, vector<128x128xf32> -> vector<128x128xf32>
    %151 = arith.addf %144, %150 : vector<128x128xf32>
    %c2_161 = arith.constant 2 : index
    %c10_162 = arith.constant 10 : index
    %c0_163 = arith.constant 0 : index
    %c0_164 = arith.constant 0 : index
    %152 = vector.load %arg10[%c2_161, %c10_162, %c0_163, %c0_164] : memref<3x20x16x256xbf16, #tpu.memory_space<vmem>>, vector<1x8x16x256xbf16>
    %153 = vector.shape_cast %152 : vector<1x8x16x256xbf16> to vector<8x16x256xbf16>
    %154 = vector.shape_cast %153 : vector<8x16x256xbf16> to vector<128x256xbf16>
    %c5_165 = arith.constant 5 : index
    %c0_166 = arith.constant 0 : index
    %c0_167 = arith.constant 0 : index
    %155 = vector.load %arg5[%c5_165, %c0_166, %c0_167] : memref<9x256x128xbf16, #tpu.memory_space<vmem>>, vector<1x256x128xbf16>
    %156 = vector.shape_cast %155 : vector<1x256x128xbf16> to vector<256x128xbf16>
    %cst_168 = arith.constant dense<0.000000e+00> : vector<128x128xf32>
    %157 = tpu.matmul %154, %156, %cst_168 {dimension_numbers = #tpu.dot_dimension_numbers<[1], [0], [0], [1], [0, 0, 1, 1], [], []>} : vector<128x256xbf16>, vector<256x128xbf16>, vector<128x128xf32> -> vector<128x128xf32>
    %158 = arith.addf %151, %157 : vector<128x128xf32>
    %c2_169 = arith.constant 2 : index
    %c12_170 = arith.constant 12 : index
    %c0_171 = arith.constant 0 : index
    %c0_172 = arith.constant 0 : index
    %159 = vector.load %arg10[%c2_169, %c12_170, %c0_171, %c0_172] : memref<3x20x16x256xbf16, #tpu.memory_space<vmem>>, vector<1x8x16x256xbf16>
    %160 = vector.shape_cast %159 : vector<1x8x16x256xbf16> to vector<8x16x256xbf16>
    %161 = vector.shape_cast %160 : vector<8x16x256xbf16> to vector<128x256xbf16>
    %c8_173 = arith.constant 8 : index
    %c0_174 = arith.constant 0 : index
    %c0_175 = arith.constant 0 : index
    %162 = vector.load %arg5[%c8_173, %c0_174, %c0_175] : memref<9x256x128xbf16, #tpu.memory_space<vmem>>, vector<1x256x128xbf16>
    %163 = vector.shape_cast %162 : vector<1x256x128xbf16> to vector<256x128xbf16>
    %cst_176 = arith.constant dense<0.000000e+00> : vector<128x128xf32>
    %164 = tpu.matmul %161, %163, %cst_176 {dimension_numbers = #tpu.dot_dimension_numbers<[1], [0], [0], [1], [0, 0, 1, 1], [], []>} : vector<128x256xbf16>, vector<256x128xbf16>, vector<128x128xf32> -> vector<128x128xf32>
    %165 = arith.addf %158, %164 : vector<128x128xf32>
    %166 = vector.shape_cast %165 : vector<128x128xf32> to vector<8x16x128xf32>
    %167 = arith.truncf %166 : vector<8x16x128xf32> to vector<8x16x128xbf16>
    %c0_177 = arith.constant 0 : index
    %c8_178 = arith.constant 8 : index
    %c0_179 = arith.constant 0 : index
    %c0_180 = arith.constant 0 : index
    %168 = vector.load %arg6[%c0_177, %c8_178, %c0_179, %c0_180] : memref<1x16x16x128xbf16, #tpu.memory_space<vmem>>, vector<1x8x16x128xbf16>
    %169 = vector.shape_cast %168 : vector<1x8x16x128xbf16> to vector<8x16x128xbf16>
    %170 = vector.shape_cast %167 : vector<8x16x128xbf16> to vector<1x8x16x128xbf16>
    tpu.vector_store %arg6[%c0_177, %c8_178, %c0_179, %c0_180], %170 {strides = array<i32>} : memref<1x16x16x128xbf16, #tpu.memory_space<vmem>>, vector<1x8x16x128xbf16>,
    %cst_181 = arith.constant dense<0.000000e+00> : vector<128xf32>
    %171 = vector.multi_reduction <add>, %165, %cst_181 [0] : vector<128x128xf32> to vector<128xf32>
    %172 = vector.shape_cast %171 : vector<128xf32> to vector<1x128xf32>
    %173 = arith.addf %99, %172 : vector<1x128xf32>
    %174 = arith.mulf %165, %165 : vector<128x128xf32>
    %cst_182 = arith.constant dense<0.000000e+00> : vector<128xf32>
    %175 = vector.multi_reduction <add>, %174, %cst_182 [0] : vector<128x128xf32> to vector<128xf32>
    %176 = vector.shape_cast %175 : vector<128xf32> to vector<1x128xf32>
    %177 = arith.addf %103, %176 : vector<1x128xf32>
    %178 = vector.shape_cast %173 : vector<1x128xf32> to vector<1x1x128xf32>
    %c0_183 = arith.constant 0 : index
    %c0_184 = arith.constant 0 : index
    %c0_185 = arith.constant 0 : index
    %179 = vector.load %arg7[%c0_183, %c0_184, %c0_185] : memref<1x1x128xf32, #tpu.memory_space<vmem>>, vector<1x1x128xf32>
    tpu.vector_store %arg7[%c0_183, %c0_184, %c0_185], %178 {strides = array<i32>} : memref<1x1x128xf32, #tpu.memory_space<vmem>>, vector<1x1x128xf32>,
    %180 = vector.shape_cast %177 : vector<1x128xf32> to vector<1x1x128xf32>
    %c0_186 = arith.constant 0 : index
    %c0_187 = arith.constant 0 : index
    %c0_188 = arith.constant 0 : index
    %181 = vector.load %arg8[%c0_186, %c0_187, %c0_188] : memref<1x1x128xf32, #tpu.memory_space<vmem>>, vector<1x1x128xf32>
    tpu.vector_store %arg8[%c0_186, %c0_187, %c0_188], %180 {strides = array<i32>} : memref<1x1x128xf32, #tpu.memory_space<vmem>>, vector<1x1x128xf32>,
    return
  }
  func.func @transform_0(%arg0: i32, %arg1: i32) -> (i32, i32, i32, i32) {
    %c0_i32 = arith.constant 0 : i32
    %c0_i32_0 = arith.constant 0 : i32
    %c0_i32_1 = arith.constant 0 : i32
    %c0_i32_2 = arith.constant 0 : i32
    return %arg1, %c0_i32, %c0_i32_0, %c0_i32_1 : i32, i32, i32, i32
  }
  func.func @transform_1(%arg0: i32, %arg1: i32) -> (i32, i32) {
    %c0_i32 = arith.constant 0 : i32
    %c0_i32_0 = arith.constant 0 : i32
    %c0_i32_1 = arith.constant 0 : i32
    return %c0_i32, %c0_i32_0 : i32, i32
  }
  func.func @transform_2(%arg0: i32, %arg1: i32) -> (i32, i32) {
    %c0_i32 = arith.constant 0 : i32
    %c0_i32_0 = arith.constant 0 : i32
    %c0_i32_1 = arith.constant 0 : i32
    return %c0_i32, %c0_i32_0 : i32, i32
  }
  func.func @transform_3(%arg0: i32, %arg1: i32) -> (i32, i32, i32) {
    %c0_i32 = arith.constant 0 : i32
    %c0_i32_0 = arith.constant 0 : i32
    %c0_i32_1 = arith.constant 0 : i32
    return %c0_i32, %c0_i32_0, %arg0 : i32, i32, i32
  }
  func.func @transform_4(%arg0: i32, %arg1: i32) -> (i32, i32, i32, i32) {
    %c0_i32 = arith.constant 0 : i32
    %c0_i32_0 = arith.constant 0 : i32
    %c0_i32_1 = arith.constant 0 : i32
    return %arg1, %c0_i32, %c0_i32_0, %arg0 : i32, i32, i32, i32
  }
  func.func @transform_5(%arg0: i32, %arg1: i32) -> (i32, i32, i32) {
    %c0_i32 = arith.constant 0 : i32
    %c0_i32_0 = arith.constant 0 : i32
    return %arg1, %c0_i32, %arg0 : i32, i32, i32
  }
  func.func @transform_6(%arg0: i32, %arg1: i32) -> (i32, i32, i32) {
    %c0_i32 = arith.constant 0 : i32
    %c0_i32_0 = arith.constant 0 : i32
    return %arg1, %c0_i32, %arg0 : i32, i32, i32
  }
}

</mosaic_0001>

<bundles_post_ra>
// kernel: fused_forward.1
= control target key start
LH: loop header
LB: loop body
LE: loop exit
PB: predicated region body
PF: predicated region fallthrough
CT: control target
= control target key end

     0   :  { %s14351_s21 = smov 0   ;;  %s14353_s22 = smov 0   ;;  %s16406_s0 = inlined_call_operand.vmem [shape: f32[2,16,16,256], index: 0, kind: input, shape index: {}]   ;;  %s16407_s1 = inlined_call_operand.vmem [shape: f32[1,256], index: 1, kind: input, shape index: {}]   ;;  %s16408_s2 = inlined_call_operand.vmem [shape: f32[1,256], index: 2, kind: input, shape index: {}]   ;;  %s16409_s3 = inlined_call_operand.vmem [shape: bf16[9,256,256], index: 3, kind: input, shape index: {}]   ;;  %s16410_s4 = inlined_call_operand.vmem [shape: bf16[2,16,16,256], index: 4, kind: output, shape index: {0}]   ;;  %s16411_s5 = inlined_call_operand.vmem [shape: f32[2,1,256], index: 5, kind: output, shape index: {1}]   ;;  %s16412_s6 = inlined_call_operand.vmem [shape: f32[2,1,256], index: 6, kind: output, shape index: {2}]  }
   0x1   :  { %s14355_s23 = smov 0   ;;  %s14357_s24 = smov 0  }
   0x2   :  { %s14359_s25 = smov 0   ;;  %s14361_s26 = smov 0  }
   0x3   :  { %s14363_s27 = smov 0   ;;  %s14365_s28 = smov 0  }
   0x4   :  { %s14367_s29 = smov 0  }
   0x5 LB: > { %s26_s30 = sadd.s32 1, %s14305_s27  ;;  %s29_s7 = sadd.s32 1, %s14309_s28  ;;  %s14313_s29 = sphi %s14367_s29, %s17_s29   ;;  %s14309_s28 = sphi %s14365_s28, %s16428_s28   ;;  %s14305_s27 = sphi %s14363_s27, %s16427_s27   ;;  %s14301_s26 = sphi %s14361_s26, %s16426_s26   ;;  %s14297_s25 = sphi %s14359_s25, %s16425_s25   ;;  %s14293_s24 = sphi %s14357_s24, %s16424_s24   ;;  %s14289_s23 = sphi %s14355_s23, %s16423_s23   ;;  %s14285_s22 = sphi %s14353_s22, %s16422_s22   ;;  %s14281_s21 = sphi %s14351_s21, %s16421_s21  }
   0x6   : > { %p27_p0 = scmp.ge.s32.totalorder %s26_s30, 2  ;;  %p111_p1 = scmp.ne.s32.totalorder %s14293_s24, %s14289_s23 }
   0x7   : > { %s10605_s8 = sadd.s32 4294967295, %s14313_s29   ;;  %p112_p2 = scmp.eq.s32.totalorder %s14313_s29, 0 }
   0x8   : > { %s16430_s30 = smov (%p27_p0, %s26_s30), 0  ;;  %s16432_s7 = smov (!%p27_p0, %s29_s7), %s14309_s28 }
   0x9   : > { %p31_p3 = scmp.ge.s32.totalorder %s16432_s7, 2  ;;  %s127_s9 = ssub.s32 %s14305_s27, %s16430_s30 }
   0xa   : > { %p14407_p4 = por %p112_p2, %p111_p1  ;;  %p142_p5 = scmp.ne.s32.totalorder %s14285_s22, %s14281_s21 }
   0xb   : > { %s16434_s7 = smov (%p31_p3, %s16432_s7), 0  ;;  %s104_s11 = sadd.s32 1, %s14293_s24 }
   0xc   : > { %p143_p6 = scmp.eq.s32.totalorder %s10605_s8, 3  ;;  %s101_s12 = ssub.s32 %s14309_s28, %s16434_s7 }
   0xd   : > { %s132_s13 = sadd.s32 1, %s14285_s22  ;;  %p102_p7 = scmp.eq.s32.totalorder %s101_s12, 0 }
   0xe   : > { %s129_s14 = sor.u32 %s127_s9, %s101_s12  ;;  %p14419_p9 = por %p143_p6, %p142_p5 }
   0xf   : > { %p130_p8 = scmp.eq.s32.totalorder %s129_s14, 0  ;;  %p10608_p10 = scmp.ge.s32.totalorder %s14313_s29, 4 }
  0x10   : > { %s14424_s16 = scalar_select %p102_p7, %s14293_s24, %s104_s11  }
  0x11   : > { %s14427_s17 = scalar_select %p130_p8, %s14285_s22, %s132_s13  }
  0x12   : > { %227 = sbr.rel (%p10608_p10) target bundleno = 316 (0x13c), region = 24 }
  0x17   : > { %238 = sbr.rel (!%p14407_p4) target bundleno = 316 (0x13c), region = 32  ;;  %s240_s18 = sand.u32 (%p14407_p4), 1, %s14293_s24  }
  0x18   : > { %s10609_s19 = sshll.u32 (%p14407_p4), %s14309_s28, 2  ;;  %s14165_s20 = smul.u32 (%p14407_p4), 1152, %s240_s18 }
  0x19   : > { %s14437_s12 = scalar_lea.vmem (%p14407_p4), %s16409_s3, %s10609_s19 }
  0x1a   : > { %v261_v0 = vld [vmem:[%s14437_s12] sm:$0xf] (%p14407_p4)  ;;  %v263_v1 = vld [vmem:[%s14437_s12 + $0x8] sm:$0xf] (%p14407_p4)  ;;  %v265_v2 = vld [vmem:[%s14437_s12 + $0x10] sm:$0xf] (%p14407_p4) }
  0x1b   : > { %s14442_s10 = scalar_lea.vmem (%p14407_p4), [#allocation4], %s14165_s20  ;;  %v267_v3 = vld [vmem:[%s14437_s12 + $0x18] sm:$0xf] (%p14407_p4)  ;;  %v269_v4 = vld [vmem:[%s14437_s12 + $0x20] sm:$0xf] (%p14407_p4) }
  0x1c   : > { %262 = vst [vmem:[%s14442_s10] sm:$0xf] %v261_v0  ;;  %v271_v5 = vld [vmem:[%s14437_s12 + $0x28] sm:$0xf]  ;;  %v273_v6 = vld [vmem:[%s14437_s12 + $0x30] sm:$0xf] }
  0x1d   : > { %264 = vst [vmem:[%s14442_s10 + $0x4] sm:$0xf] %v263_v1  ;;  %v275_v7 = vld [vmem:[%s14437_s12 + $0x38] sm:$0xf]  ;;  %v277_v8 = vld [vmem:[%s14437_s12 + $0x40] sm:$0xf] }
  0x1e   : > { %266 = vst [vmem:[%s14442_s10 + $0x8] sm:$0xf] %v265_v2  ;;  %v279_v9 = vld [vmem:[%s14437_s12 + $0x48] sm:$0xf]  ;;  %v281_v10 = vld [vmem:[%s14437_s12 + $0x50] sm:$0xf] }
  0x1f   : > { %268 = vst [vmem:[%s14442_s10 + $0xc] sm:$0xf] %v267_v3  ;;  %v283_v11 = vld [vmem:[%s14437_s12 + $0x58] sm:$0xf]  ;;  %v285_v12 = vld [vmem:[%s14437_s12 + $0x60] sm:$0xf] }
  0x20   : > { %270 = vst [vmem:[%s14442_s10 + $0x10] sm:$0xf] %v269_v4  ;;  %v287_v13 = vld [vmem:[%s14437_s12 + $0x68] sm:$0xf]  ;;  %v289_v14 = vld [vmem:[%s14437_s12 + $0x70] sm:$0xf] }
  0x21   : > { %272 = vst [vmem:[%s14442_s10 + $0x14] sm:$0xf] %v271_v5  ;;  %v291_v15 = vld [vmem:[%s14437_s12 + $0x78] sm:$0xf]  ;;  %v293_v16 = vld [vmem:[%s14437_s12 + $0x80] sm:$0xf] }
  0x22   : > { %274 = vst [vmem:[%s14442_s10 + $0x18] sm:$0xf] %v273_v6  ;;  %v295_v17 = vld [vmem:[%s14437_s12 + $0x88] sm:$0xf]  ;;  %v297_v18 = vld [vmem:[%s14437_s12 + $0x90] sm:$0xf] }
  0x23   : > { %276 = vst [vmem:[%s14442_s10 + $0x1c] sm:$0xf] %v275_v7  ;;  %v299_v19 = vld [vmem:[%s14437_s12 + $0x98] sm:$0xf]  ;;  %v301_v20 = vld [vmem:[%s14437_s12 + $0xa0] sm:$0xf] }
  0x24   : > { %278 = vst [vmem:[%s14442_s10 + $0x20] sm:$0xf] %v277_v8  ;;  %v303_v21 = vld [vmem:[%s14437_s12 + $0xa8] sm:$0xf]  ;;  %v305_v22 = vld [vmem:[%s14437_s12 + $0xb0] sm:$0xf] }
  0x25   : > { %280 = vst [vmem:[%s14442_s10 + $0x24] sm:$0xf] %v279_v9  ;;  %v307_v23 = vld [vmem:[%s14437_s12 + $0xb8] sm:$0xf]  ;;  %v309_v24 = vld [vmem:[%s14437_s12 + $0xc0] sm:$0xf] }
  0x26   : > { %282 = vst [vmem:[%s14442_s10 + $0x28] sm:$0xf] %v281_v10  ;;  %v311_v25 = vld [vmem:[%s14437_s12 + $0xc8] sm:$0xf]  ;;  %v313_v26 = vld [vmem:[%s14437_s12 + $0xd0] sm:$0xf] }
  0x27   : > { %284 = vst [vmem:[%s14442_s10 + $0x2c] sm:$0xf] %v283_v11  ;;  %v315_v27 = vld [vmem:[%s14437_s12 + $0xd8] sm:$0xf]  ;;  %v317_v28 = vld [vmem:[%s14437_s12 + $0xe0] sm:$0xf] }
  0x28   : > { %286 = vst [vmem:[%s14442_s10 + $0x30] sm:$0xf] %v285_v12  ;;  %v319_v29 = vld [vmem:[%s14437_s12 + $0xe8] sm:$0xf]  ;;  %v321_v30 = vld [vmem:[%s14437_s12 + $0xf0] sm:$0xf] }
  0x29   : > { %288 = vst [vmem:[%s14442_s10 + $0x34] sm:$0xf] %v287_v13  ;;  %v323_v31 = vld [vmem:[%s14437_s12 + $0xf8] sm:$0xf]  ;;  %v325_v32 = vld [vmem:[%s14437_s12 + $0x100] sm:$0xf] }
  0x2a   : > { %290 = vst [vmem:[%s14442_s10 + $0x38] sm:$0xf] %v289_v14  ;;  %v327_v33 = vld [vmem:[%s14437_s12 + $0x108] sm:$0xf]  ;;  %v329_v34 = vld [vmem:[%s14437_s12 + $0x110] sm:$0xf] }
  0x2b   : > { %292 = vst [vmem:[%s14442_s10 + $0x3c] sm:$0xf] %v291_v15  ;;  %v331_v35 = vld [vmem:[%s14437_s12 + $0x118] sm:$0xf]  ;;  %v333_v36 = vld [vmem:[%s14437_s12 + $0x120] sm:$0xf] }
  0x2c   : > { %294 = vst [vmem:[%s14442_s10 + $0x40] sm:$0xf] %v293_v16  ;;  %v335_v37 = vld [vmem:[%s14437_s12 + $0x128] sm:$0xf]  ;;  %v337_v38 = vld [vmem:[%s14437_s12 + $0x130] sm:$0xf] }
  0x2d   : > { %296 = vst [vmem:[%s14442_s10 + $0x44] sm:$0xf] %v295_v17  ;;  %v339_v39 = vld [vmem:[%s14437_s12 + $0x138] sm:$0xf]  ;;  %v341_v40 = vld [vmem:[%s14437_s12 + $0x140] sm:$0xf] }
  0x2e   : > { %298 = vst [vmem:[%s14442_s10 + $0x48] sm:$0xf] %v297_v18  ;;  %v343_v41 = vld [vmem:[%s14437_s12 + $0x148] sm:$0xf]  ;;  %v345_v42 = vld [vmem:[%s14437_s12 + $0x150] sm:$0xf] }
  0x2f   : > { %300 = vst [vmem:[%s14442_s10 + $0x4c] sm:$0xf] %v299_v19  ;;  %v347_v43 = vld [vmem:[%s14437_s12 + $0x158] sm:$0xf]  ;;  %v349_v44 = vld [vmem:[%s14437_s12 + $0x160] sm:$0xf] }
  0x30   : > { %302 = vst [vmem:[%s14442_s10 + $0x50] sm:$0xf] %v301_v20  ;;  %v351_v45 = vld [vmem:[%s14437_s12 + $0x168] sm:$0xf]  ;;  %v353_v46 = vld [vmem:[%s14437_s12 + $0x170] sm:$0xf] }
  0x31   : > { %304 = vst [vmem:[%s14442_s10 + $0x54] sm:$0xf] %v303_v21  ;;  %v355_v47 = vld [vmem:[%s14437_s12 + $0x178] sm:$0xf]  ;;  %v357_v48 = vld [vmem:[%s14437_s12 + $0x180] sm:$0xf] }
  0x32   : > { %306 = vst [vmem:[%s14442_s10 + $0x58] sm:$0xf] %v305_v22  ;;  %v359_v49 = vld [vmem:[%s14437_s12 + $0x188] sm:$0xf]  ;;  %v361_v50 = vld [vmem:[%s14437_s12 + $0x190] sm:$0xf] }
  0x33   : > { %308 = vst [vmem:[%s14442_s10 + $0x5c] sm:$0xf] %v307_v23  ;;  %v363_v51 = vld [vmem:[%s14437_s12 + $0x198] sm:$0xf]  ;;  %v365_v52 = vld [vmem:[%s14437_s12 + $0x1a0] sm:$0xf] }
  0x34   : > { %310 = vst [vmem:[%s14442_s10 + $0x60] sm:$0xf] %v309_v24  ;;  %v367_v53 = vld [vmem:[%s14437_s12 + $0x1a8] sm:$0xf]  ;;  %v369_v54 = vld [vmem:[%s14437_s12 + $0x1b0] sm:$0xf] }
  0x35   : > { %312 = vst [vmem:[%s14442_s10 + $0x64] sm:$0xf] %v311_v25  ;;  %v371_v55 = vld [vmem:[%s14437_s12 + $0x1b8] sm:$0xf]  ;;  %v373_v56 = vld [vmem:[%s14437_s12 + $0x1c0] sm:$0xf] }
  0x36   : > { %314 = vst [vmem:[%s14442_s10 + $0x68] sm:$0xf] %v313_v26  ;;  %v375_v57 = vld [vmem:[%s14437_s12 + $0x1c8] sm:$0xf]  ;;  %v377_v58 = vld [vmem:[%s14437_s12 + $0x1d0] sm:$0xf] }
  0x37   : > { %316 = vst [vmem:[%s14442_s10 + $0x6c] sm:$0xf] %v315_v27  ;;  %v379_v59 = vld [vmem:[%s14437_s12 + $0x1d8] sm:$0xf]  ;;  %v381_v60 = vld [vmem:[%s14437_s12 + $0x1e0] sm:$0xf] }
  0x38   : > { %318 = vst [vmem:[%s14442_s10 + $0x70] sm:$0xf] %v317_v28  ;;  %v383_v61 = vld [vmem:[%s14437_s12 + $0x1e8] sm:$0xf]  ;;  %v385_v62 = vld [vmem:[%s14437_s12 + $0x1f0] sm:$0xf] }
  0x39   : > { %320 = vst [vmem:[%s14442_s10 + $0x74] sm:$0xf] %v319_v29  ;;  %v387_v63 = vld [vmem:[%s14437_s12 + $0x1f8] sm:$0xf]  ;;  %v389_v0 = vld [vmem:[%s14437_s12 + $0x200] sm:$0xf] }
  0x3a   : > { %322 = vst [vmem:[%s14442_s10 + $0x78] sm:$0xf] %v321_v30  ;;  %v391_v1 = vld [vmem:[%s14437_s12 + $0x208] sm:$0xf]  ;;  %v393_v2 = vld [vmem:[%s14437_s12 + $0x210] sm:$0xf] }
  0x3b   : > { %324 = vst [vmem:[%s14442_s10 + $0x7c] sm:$0xf] %v323_v31  ;;  %v395_v3 = vld [vmem:[%s14437_s12 + $0x218] sm:$0xf]  ;;  %v397_v4 = vld [vmem:[%s14437_s12 + $0x220] sm:$0xf] }
  0x3c   : > { %326 = vst [vmem:[%s14442_s10 + $0x80] sm:$0xf] %v325_v32  ;;  %v399_v5 = vld [vmem:[%s14437_s12 + $0x228] sm:$0xf]  ;;  %v401_v6 = vld [vmem:[%s14437_s12 + $0x230] sm:$0xf] }
  0x3d   : > { %328 = vst [vmem:[%s14442_s10 + $0x84] sm:$0xf] %v327_v33  ;;  %v403_v7 = vld [vmem:[%s14437_s12 + $0x238] sm:$0xf]  ;;  %v405_v8 = vld [vmem:[%s14437_s12 + $0x240] sm:$0xf] }
  0x3e   : > { %330 = vst [vmem:[%s14442_s10 + $0x88] sm:$0xf] %v329_v34  ;;  %v407_v9 = vld [vmem:[%s14437_s12 + $0x248] sm:$0xf]  ;;  %v409_v10 = vld [vmem:[%s14437_s12 + $0x250] sm:$0xf] }
  0x3f   : > { %332 = vst [vmem:[%s14442_s10 + $0x8c] sm:$0xf] %v331_v35  ;;  %v411_v11 = vld [vmem:[%s14437_s12 + $0x258] sm:$0xf]  ;;  %v413_v12 = vld [vmem:[%s14437_s12 + $0x260] sm:$0xf] }
  0x40   : > { %334 = vst [vmem:[%s14442_s10 + $0x90] sm:$0xf] %v333_v36  ;;  %v415_v13 = vld [vmem:[%s14437_s12 + $0x268] sm:$0xf]  ;;  %v417_v14 = vld [vmem:[%s14437_s12 + $0x270] sm:$0xf] }
  0x41   : > { %336 = vst [vmem:[%s14442_s10 + $0x94] sm:$0xf] %v335_v37  ;;  %v419_v15 = vld [vmem:[%s14437_s12 + $0x278] sm:$0xf]  ;;  %v421_v16 = vld [vmem:[%s14437_s12 + $0x280] sm:$0xf] }
  0x42   : > { %338 = vst [vmem:[%s14442_s10 + $0x98] sm:$0xf] %v337_v38  ;;  %v423_v17 = vld [vmem:[%s14437_s12 + $0x288] sm:$0xf]  ;;  %v425_v18 = vld [vmem:[%s14437_s12 + $0x290] sm:$0xf] }
  0x43   : > { %340 = vst [vmem:[%s14442_s10 + $0x9c] sm:$0xf] %v339_v39  ;;  %v427_v19 = vld [vmem:[%s14437_s12 + $0x298] sm:$0xf]  ;;  %v429_v20 = vld [vmem:[%s14437_s12 + $0x2a0] sm:$0xf] }
  0x44   : > { %342 = vst [vmem:[%s14442_s10 + $0xa0] sm:$0xf] %v341_v40  ;;  %v431_v21 = vld [vmem:[%s14437_s12 + $0x2a8] sm:$0xf]  ;;  %v433_v22 = vld [vmem:[%s14437_s12 + $0x2b0] sm:$0xf] }
  0x45   : > { %344 = vst [vmem:[%s14442_s10 + $0xa4] sm:$0xf] %v343_v41  ;;  %v435_v23 = vld [vmem:[%s14437_s12 + $0x2b8] sm:$0xf]  ;;  %v437_v24 = vld [vmem:[%s14437_s12 + $0x2c0] sm:$0xf] }
  0x46   : > { %346 = vst [vmem:[%s14442_s10 + $0xa8] sm:$0xf] %v345_v42  ;;  %v439_v25 = vld [vmem:[%s14437_s12 + $0x2c8] sm:$0xf]  ;;  %v441_v26 = vld [vmem:[%s14437_s12 + $0x2d0] sm:$0xf] }
  0x47   : > { %348 = vst [vmem:[%s14442_s10 + $0xac] sm:$0xf] %v347_v43  ;;  %v443_v27 = vld [vmem:[%s14437_s12 + $0x2d8] sm:$0xf]  ;;  %v445_v28 = vld [vmem:[%s14437_s12 + $0x2e0] sm:$0xf] }
  0x48   : > { %350 = vst [vmem:[%s14442_s10 + $0xb0] sm:$0xf] %v349_v44  ;;  %v447_v29 = vld [vmem:[%s14437_s12 + $0x2e8] sm:$0xf]  ;;  %v449_v30 = vld [vmem:[%s14437_s12 + $0x2f0] sm:$0xf] }
  0x49   : > { %352 = vst [vmem:[%s14442_s10 + $0xb4] sm:$0xf] %v351_v45  ;;  %v451_v31 = vld [vmem:[%s14437_s12 + $0x2f8] sm:$0xf]  ;;  %v453_v32 = vld [vmem:[%s14437_s12 + $0x300] sm:$0xf] }
  0x4a   : > { %354 = vst [vmem:[%s14442_s10 + $0xb8] sm:$0xf] %v353_v46  ;;  %v455_v33 = vld [vmem:[%s14437_s12 + $0x308] sm:$0xf]  ;;  %v457_v34 = vld [vmem:[%s14437_s12 + $0x310] sm:$0xf] }
  0x4b   : > { %356 = vst [vmem:[%s14442_s10 + $0xbc] sm:$0xf] %v355_v47  ;;  %v459_v35 = vld [vmem:[%s14437_s12 + $0x318] sm:$0xf]  ;;  %v461_v36 = vld [vmem:[%s14437_s12 + $0x320] sm:$0xf] }
  0x4c   : > { %358 = vst [vmem:[%s14442_s10 + $0xc0] sm:$0xf] %v357_v48  ;;  %v463_v37 = vld [vmem:[%s14437_s12 + $0x328] sm:$0xf]  ;;  %v465_v38 = vld [vmem:[%s14437_s12 + $0x330] sm:$0xf] }
  0x4d   : > { %360 = vst [vmem:[%s14442_s10 + $0xc4] sm:$0xf] %v359_v49  ;;  %v467_v39 = vld [vmem:[%s14437_s12 + $0x338] sm:$0xf]  ;;  %v469_v40 = vld [vmem:[%s14437_s12 + $0x340] sm:$0xf] }
  0x4e   : > { %362 = vst [vmem:[%s14442_s10 + $0xc8] sm:$0xf] %v361_v50  ;;  %v471_v41 = vld [vmem:[%s14437_s12 + $0x348] sm:$0xf]  ;;  %v473_v42 = vld [vmem:[%s14437_s12 + $0x350] sm:$0xf] }
  0x4f   : > { %364 = vst [vmem:[%s14442_s10 + $0xcc] sm:$0xf] %v363_v51  ;;  %v475_v43 = vld [vmem:[%s14437_s12 + $0x358] sm:$0xf]  ;;  %v477_v44 = vld [vmem:[%s14437_s12 + $0x360] sm:$0xf] }
  0x50   : > { %366 = vst [vmem:[%s14442_s10 + $0xd0] sm:$0xf] %v365_v52  ;;  %v479_v45 = vld [vmem:[%s14437_s12 + $0x368] sm:$0xf]  ;;  %v481_v46 = vld [vmem:[%s14437_s12 + $0x370] sm:$0xf] }
  0x51   : > { %368 = vst [vmem:[%s14442_s10 + $0xd4] sm:$0xf] %v367_v53  ;;  %v483_v47 = vld [vmem:[%s14437_s12 + $0x378] sm:$0xf]  ;;  %v485_v48 = vld [vmem:[%s14437_s12 + $0x380] sm:$0xf] }
  0x52   : > { %370 = vst [vmem:[%s14442_s10 + $0xd8] sm:$0xf] %v369_v54  ;;  %v487_v49 = vld [vmem:[%s14437_s12 + $0x388] sm:$0xf]  ;;  %v489_v50 = vld [vmem:[%s14437_s12 + $0x390] sm:$0xf] }
  0x53   : > { %372 = vst [vmem:[%s14442_s10 + $0xdc] sm:$0xf] %v371_v55  ;;  %v491_v51 = vld [vmem:[%s14437_s12 + $0x398] sm:$0xf]  ;;  %v493_v52 = vld [vmem:[%s14437_s12 + $0x3a0] sm:$0xf] }
  0x54   : > { %374 = vst [vmem:[%s14442_s10 + $0xe0] sm:$0xf] %v373_v56  ;;  %v495_v53 = vld [vmem:[%s14437_s12 + $0x3a8] sm:$0xf]  ;;  %v497_v54 = vld [vmem:[%s14437_s12 + $0x3b0] sm:$0xf] }
  0x55   : > { %376 = vst [vmem:[%s14442_s10 + $0xe4] sm:$0xf] %v375_v57  ;;  %v499_v55 = vld [vmem:[%s14437_s12 + $0x3b8] sm:$0xf]  ;;  %v501_v56 = vld [vmem:[%s14437_s12 + $0x3c0] sm:$0xf] }
  0x56   : > { %378 = vst [vmem:[%s14442_s10 + $0xe8] sm:$0xf] %v377_v58  ;;  %v503_v57 = vld [vmem:[%s14437_s12 + $0x3c8] sm:$0xf]  ;;  %v505_v58 = vld [vmem:[%s14437_s12 + $0x3d0] sm:$0xf] }
  0x57   : > { %380 = vst [vmem:[%s14442_s10 + $0xec] sm:$0xf] %v379_v59  ;;  %v507_v59 = vld [vmem:[%s14437_s12 + $0x3d8] sm:$0xf] }
  0x58   : > { %382 = vst [vmem:[%s14442_s10 + $0xf0] sm:$0xf] %v381_v60  ;;  %v509_v60 = vld [vmem:[%s14437_s12 + $0x3e0] sm:$0xf] }
  0x59   : > { %384 = vst [vmem:[%s14442_s10 + $0xf4] sm:$0xf] %v383_v61  ;;  %v511_v61 = vld [vmem:[%s14437_s12 + $0x3e8] sm:$0xf] }
  0x5a   : > { %386 = vst [vmem:[%s14442_s10 + $0xf8] sm:$0xf] %v385_v62  ;;  %v513_v62 = vld [vmem:[%s14437_s12 + $0x3f0] sm:$0xf] }
  0x5b   : > { %388 = vst [vmem:[%s14442_s10 + $0xfc] sm:$0xf] %v387_v63  ;;  %v515_v63 = vld [vmem:[%s14437_s12 + $0x3f8] sm:$0xf] }
  0x5c   : > { %390 = vst [vmem:[%s14442_s10 + $0x100] sm:$0xf] %v389_v0  ;;  %v517_v0 = vld [vmem:[%s14437_s12 + $0x400] sm:$0xf] }
  0x5d   : > { %392 = vst [vmem:[%s14442_s10 + $0x104] sm:$0xf] %v391_v1  ;;  %v519_v1 = vld [vmem:[%s14437_s12 + $0x408] sm:$0xf] }
  0x5e   : > { %394 = vst [vmem:[%s14442_s10 + $0x108] sm:$0xf] %v393_v2  ;;  %v521_v2 = vld [vmem:[%s14437_s12 + $0x410] sm:$0xf] }
  0x5f   : > { %396 = vst [vmem:[%s14442_s10 + $0x10c] sm:$0xf] %v395_v3  ;;  %v523_v3 = vld [vmem:[%s14437_s12 + $0x418] sm:$0xf] }
  0x60   : > { %398 = vst [vmem:[%s14442_s10 + $0x110] sm:$0xf] %v397_v4  ;;  %v525_v4 = vld [vmem:[%s14437_s12 + $0x420] sm:$0xf] }
  0x61   : > { %400 = vst [vmem:[%s14442_s10 + $0x114] sm:$0xf] %v399_v5  ;;  %v527_v5 = vld [vmem:[%s14437_s12 + $0x428] sm:$0xf] }
  0x62   : > { %402 = vst [vmem:[%s14442_s10 + $0x118] sm:$0xf] %v401_v6  ;;  %v529_v6 = vld [vmem:[%s14437_s12 + $0x430] sm:$0xf] }
  0x63   : > { %404 = vst [vmem:[%s14442_s10 + $0x11c] sm:$0xf] %v403_v7  ;;  %v531_v7 = vld [vmem:[%s14437_s12 + $0x438] sm:$0xf] }
  0x64   : > { %406 = vst [vmem:[%s14442_s10 + $0x120] sm:$0xf] %v405_v8  ;;  %v533_v8 = vld [vmem:[%s14437_s12 + $0x440] sm:$0xf] }
  0x65   : > { %408 = vst [vmem:[%s14442_s10 + $0x124] sm:$0xf] %v407_v9  ;;  %v535_v9 = vld [vmem:[%s14437_s12 + $0x448] sm:$0xf] }
  0x66   : > { %410 = vst [vmem:[%s14442_s10 + $0x128] sm:$0xf] %v409_v10  ;;  %v537_v10 = vld [vmem:[%s14437_s12 + $0x450] sm:$0xf] }
  0x67   : > { %412 = vst [vmem:[%s14442_s10 + $0x12c] sm:$0xf] %v411_v11  ;;  %v539_v11 = vld [vmem:[%s14437_s12 + $0x458] sm:$0xf] }
  0x68   : > { %414 = vst [vmem:[%s14442_s10 + $0x130] sm:$0xf] %v413_v12  ;;  %v541_v12 = vld [vmem:[%s14437_s12 + $0x460] sm:$0xf] }
  0x69   : > { %416 = vst [vmem:[%s14442_s10 + $0x134] sm:$0xf] %v415_v13  ;;  %v543_v13 = vld [vmem:[%s14437_s12 + $0x468] sm:$0xf] }
  0x6a   : > { %418 = vst [vmem:[%s14442_s10 + $0x138] sm:$0xf] %v417_v14  ;;  %v545_v14 = vld [vmem:[%s14437_s12 + $0x470] sm:$0xf] }
  0x6b   : > { %420 = vst [vmem:[%s14442_s10 + $0x13c] sm:$0xf] %v419_v15  ;;  %v547_v15 = vld [vmem:[%s14437_s12 + $0x478] sm:$0xf] }
  0x6c   : > { %422 = vst [vmem:[%s14442_s10 + $0x140] sm:$0xf] %v421_v16  ;;  %v549_v16 = vld [vmem:[%s14437_s12 + $0x480] sm:$0xf] }
  0x6d   : > { %424 = vst [vmem:[%s14442_s10 + $0x144] sm:$0xf] %v423_v17  ;;  %v551_v17 = vld [vmem:[%s14437_s12 + $0x488] sm:$0xf] }
  0x6e   : > { %426 = vst [vmem:[%s14442_s10 + $0x148] sm:$0xf] %v425_v18  ;;  %v553_v18 = vld [vmem:[%s14437_s12 + $0x490] sm:$0xf] }
  0x6f   : > { %428 = vst [vmem:[%s14442_s10 + $0x14c] sm:$0xf] %v427_v19  ;;  %v555_v19 = vld [vmem:[%s14437_s12 + $0x498] sm:$0xf] }
  0x70   : > { %430 = vst [vmem:[%s14442_s10 + $0x150] sm:$0xf] %v429_v20  ;;  %v557_v20 = vld [vmem:[%s14437_s12 + $0x4a0] sm:$0xf] }
  0x71   : > { %432 = vst [vmem:[%s14442_s10 + $0x154] sm:$0xf] %v431_v21  ;;  %v559_v21 = vld [vmem:[%s14437_s12 + $0x4a8] sm:$0xf] }
  0x72   : > { %434 = vst [vmem:[%s14442_s10 + $0x158] sm:$0xf] %v433_v22  ;;  %v561_v22 = vld [vmem:[%s14437_s12 + $0x4b0] sm:$0xf] }
  0x73   : > { %436 = vst [vmem:[%s14442_s10 + $0x15c] sm:$0xf] %v435_v23  ;;  %v563_v23 = vld [vmem:[%s14437_s12 + $0x4b8] sm:$0xf] }
  0x74   : > { %438 = vst [vmem:[%s14442_s10 + $0x160] sm:$0xf] %v437_v24  ;;  %v565_v24 = vld [vmem:[%s14437_s12 + $0x4c0] sm:$0xf] }
  0x75   : > { %440 = vst [vmem:[%s14442_s10 + $0x164] sm:$0xf] %v439_v25  ;;  %v567_v25 = vld [vmem:[%s14437_s12 + $0x4c8] sm:$0xf] }
  0x76   : > { %442 = vst [vmem:[%s14442_s10 + $0x168] sm:$0xf] %v441_v26  ;;  %v569_v26 = vld [vmem:[%s14437_s12 + $0x4d0] sm:$0xf] }
  0x77   : > { %444 = vst [vmem:[%s14442_s10 + $0x16c] sm:$0xf] %v443_v27  ;;  %v571_v27 = vld [vmem:[%s14437_s12 + $0x4d8] sm:$0xf] }
  0x78   : > { %446 = vst [vmem:[%s14442_s10 + $0x170] sm:$0xf] %v445_v28  ;;  %v573_v28 = vld [vmem:[%s14437_s12 + $0x4e0] sm:$0xf] }
  0x79   : > { %448 = vst [vmem:[%s14442_s10 + $0x174] sm:$0xf] %v447_v29  ;;  %v575_v29 = vld [vmem:[%s14437_s12 + $0x4e8] sm:$0xf] }
  0x7a   : > { %450 = vst [vmem:[%s14442_s10 + $0x178] sm:$0xf] %v449_v30  ;;  %v577_v30 = vld [vmem:[%s14437_s12 + $0x4f0] sm:$0xf] }
  0x7b   : > { %452 = vst [vmem:[%s14442_s10 + $0x17c] sm:$0xf] %v451_v31  ;;  %v579_v31 = vld [vmem:[%s14437_s12 + $0x4f8] sm:$0xf] }
  0x7c   : > { %454 = vst [vmem:[%s14442_s10 + $0x180] sm:$0xf] %v453_v32  ;;  %v581_v32 = vld [vmem:[%s14437_s12 + $0x500] sm:$0xf] }
  0x7d   : > { %456 = vst [vmem:[%s14442_s10 + $0x184] sm:$0xf] %v455_v33  ;;  %v583_v33 = vld [vmem:[%s14437_s12 + $0x508] sm:$0xf] }
  0x7e   : > { %458 = vst [vmem:[%s14442_s10 + $0x188] sm:$0xf] %v457_v34  ;;  %v585_v34 = vld [vmem:[%s14437_s12 + $0x510] sm:$0xf] }
  0x7f   : > { %460 = vst [vmem:[%s14442_s10 + $0x18c] sm:$0xf] %v459_v35  ;;  %v587_v35 = vld [vmem:[%s14437_s12 + $0x518] sm:$0xf] }
  0x80   : > { %462 = vst [vmem:[%s14442_s10 + $0x190] sm:$0xf] %v461_v36  ;;  %v589_v36 = vld [vmem:[%s14437_s12 + $0x520] sm:$0xf] }
  0x81   : > { %464 = vst [vmem:[%s14442_s10 + $0x194] sm:$0xf] %v463_v37  ;;  %v591_v37 = vld [vmem:[%s14437_s12 + $0x528] sm:$0xf] }
  0x82   : > { %466 = vst [vmem:[%s14442_s10 + $0x198] sm:$0xf] %v465_v38  ;;  %v593_v38 = vld [vmem:[%s14437_s12 + $0x530] sm:$0xf] }
  0x83   : > { %468 = vst [vmem:[%s14442_s10 + $0x19c] sm:$0xf] %v467_v39  ;;  %v595_v39 = vld [vmem:[%s14437_s12 + $0x538] sm:$0xf] }
  0x84   : > { %470 = vst [vmem:[%s14442_s10 + $0x1a0] sm:$0xf] %v469_v40  ;;  %v597_v40 = vld [vmem:[%s14437_s12 + $0x540] sm:$0xf] }
  0x85   : > { %472 = vst [vmem:[%s14442_s10 + $0x1a4] sm:$0xf] %v471_v41  ;;  %v599_v41 = vld [vmem:[%s14437_s12 + $0x548] sm:$0xf] }
  0x86   : > { %474 = vst [vmem:[%s14442_s10 + $0x1a8] sm:$0xf] %v473_v42  ;;  %v601_v42 = vld [vmem:[%s14437_s12 + $0x550] sm:$0xf] }
  0x87   : > { %476 = vst [vmem:[%s14442_s10 + $0x1ac] sm:$0xf] %v475_v43  ;;  %v603_v43 = vld [vmem:[%s14437_s12 + $0x558] sm:$0xf] }
  0x88   : > { %478 = vst [vmem:[%s14442_s10 + $0x1b0] sm:$0xf] %v477_v44  ;;  %v605_v44 = vld [vmem:[%s14437_s12 + $0x560] sm:$0xf] }
  0x89   : > { %480 = vst [vmem:[%s14442_s10 + $0x1b4] sm:$0xf] %v479_v45  ;;  %v607_v45 = vld [vmem:[%s14437_s12 + $0x568] sm:$0xf] }
  0x8a   : > { %482 = vst [vmem:[%s14442_s10 + $0x1b8] sm:$0xf] %v481_v46  ;;  %v609_v46 = vld [vmem:[%s14437_s12 + $0x570] sm:$0xf] }
  0x8b   : > { %484 = vst [vmem:[%s14442_s10 + $0x1bc] sm:$0xf] %v483_v47  ;;  %v611_v47 = vld [vmem:[%s14437_s12 + $0x578] sm:$0xf] }
  0x8c   : > { %486 = vst [vmem:[%s14442_s10 + $0x1c0] sm:$0xf] %v485_v48  ;;  %v613_v48 = vld [vmem:[%s14437_s12 + $0x580] sm:$0xf] }
  0x8d   : > { %488 = vst [vmem:[%s14442_s10 + $0x1c4] sm:$0xf] %v487_v49  ;;  %v615_v49 = vld [vmem:[%s14437_s12 + $0x588] sm:$0xf] }
  0x8e   : > { %490 = vst [vmem:[%s14442_s10 + $0x1c8] sm:$0xf] %v489_v50  ;;  %v617_v50 = vld [vmem:[%s14437_s12 + $0x590] sm:$0xf] }
  0x8f   : > { %492 = vst [vmem:[%s14442_s10 + $0x1cc] sm:$0xf] %v491_v51  ;;  %v619_v51 = vld [vmem:[%s14437_s12 + $0x598] sm:$0xf] }
  0x90   : > { %494 = vst [vmem:[%s14442_s10 + $0x1d0] sm:$0xf] %v493_v52  ;;  %v621_v52 = vld [vmem:[%s14437_s12 + $0x5a0] sm:$0xf] }
  0x91   : > { %496 = vst [vmem:[%s14442_s10 + $0x1d4] sm:$0xf] %v495_v53  ;;  %v623_v53 = vld [vmem:[%s14437_s12 + $0x5a8] sm:$0xf] }
  0x92   : > { %498 = vst [vmem:[%s14442_s10 + $0x1d8] sm:$0xf] %v497_v54  ;;  %v625_v54 = vld [vmem:[%s14437_s12 + $0x5b0] sm:$0xf] }
  0x93   : > { %500 = vst [vmem:[%s14442_s10 + $0x1dc] sm:$0xf] %v499_v55  ;;  %v627_v55 = vld [vmem:[%s14437_s12 + $0x5b8] sm:$0xf] }
  0x94   : > { %502 = vst [vmem:[%s14442_s10 + $0x1e0] sm:$0xf] %v501_v56  ;;  %v629_v56 = vld [vmem:[%s14437_s12 + $0x5c0] sm:$0xf] }
  0x95   : > { %504 = vst [vmem:[%s14442_s10 + $0x1e4] sm:$0xf] %v503_v57  ;;  %v631_v57 = vld [vmem:[%s14437_s12 + $0x5c8] sm:$0xf] }
  0x96   : > { %506 = vst [vmem:[%s14442_s10 + $0x1e8] sm:$0xf] %v505_v58  ;;  %v633_v58 = vld [vmem:[%s14437_s12 + $0x5d0] sm:$0xf] }
  0x97   : > { %508 = vst [vmem:[%s14442_s10 + $0x1ec] sm:$0xf] %v507_v59  ;;  %v635_v59 = vld [vmem:[%s14437_s12 + $0x5d8] sm:$0xf] }
  0x98   : > { %510 = vst [vmem:[%s14442_s10 + $0x1f0] sm:$0xf] %v509_v60  ;;  %v637_v60 = vld [vmem:[%s14437_s12 + $0x5e0] sm:$0xf] }
  0x99   : > { %512 = vst [vmem:[%s14442_s10 + $0x1f4] sm:$0xf] %v511_v61  ;;  %v639_v61 = vld [vmem:[%s14437_s12 + $0x5e8] sm:$0xf] }
  0x9a   : > { %514 = vst [vmem:[%s14442_s10 + $0x1f8] sm:$0xf] %v513_v62  ;;  %v641_v62 = vld [vmem:[%s14437_s12 + $0x5f0] sm:$0xf] }
  0x9b   : > { %516 = vst [vmem:[%s14442_s10 + $0x1fc] sm:$0xf] %v515_v63  ;;  %v643_v63 = vld [vmem:[%s14437_s12 + $0x5f8] sm:$0xf] }
  0x9c   : > { %518 = vst [vmem:[%s14442_s10 + $0x200] sm:$0xf] %v517_v0  ;;  %v645_v0 = vld [vmem:[%s14437_s12 + $0x600] sm:$0xf] }
  0x9d   : > { %520 = vst [vmem:[%s14442_s10 + $0x204] sm:$0xf] %v519_v1  ;;  %v647_v1 = vld [vmem:[%s14437_s12 + $0x608] sm:$0xf] }
  0x9e   : > { %522 = vst [vmem:[%s14442_s10 + $0x208] sm:$0xf] %v521_v2  ;;  %v649_v2 = vld [vmem:[%s14437_s12 + $0x610] sm:$0xf] }
  0x9f   : > { %524 = vst [vmem:[%s14442_s10 + $0x20c] sm:$0xf] %v523_v3  ;;  %v651_v3 = vld [vmem:[%s14437_s12 + $0x618] sm:$0xf] }
  0xa0   : > { %526 = vst [vmem:[%s14442_s10 + $0x210] sm:$0xf] %v525_v4  ;;  %v653_v4 = vld [vmem:[%s14437_s12 + $0x620] sm:$0xf] }
  0xa1   : > { %528 = vst [vmem:[%s14442_s10 + $0x214] sm:$0xf] %v527_v5  ;;  %v655_v5 = vld [vmem:[%s14437_s12 + $0x628] sm:$0xf] }
  0xa2   : > { %530 = vst [vmem:[%s14442_s10 + $0x218] sm:$0xf] %v529_v6  ;;  %v657_v6 = vld [vmem:[%s14437_s12 + $0x630] sm:$0xf] }
  0xa3   : > { %532 = vst [vmem:[%s14442_s10 + $0x21c] sm:$0xf] %v531_v7  ;;  %v659_v7 = vld [vmem:[%s14437_s12 + $0x638] sm:$0xf] }
  0xa4   : > { %534 = vst [vmem:[%s14442_s10 + $0x220] sm:$0xf] %v533_v8  ;;  %v661_v8 = vld [vmem:[%s14437_s12 + $0x640] sm:$0xf] }
  0xa5   : > { %536 = vst [vmem:[%s14442_s10 + $0x224] sm:$0xf] %v535_v9  ;;  %v663_v9 = vld [vmem:[%s14437_s12 + $0x648] sm:$0xf] }
  0xa6   : > { %538 = vst [vmem:[%s14442_s10 + $0x228] sm:$0xf] %v537_v10  ;;  %v665_v10 = vld [vmem:[%s14437_s12 + $0x650] sm:$0xf] }
  0xa7   : > { %540 = vst [vmem:[%s14442_s10 + $0x22c] sm:$0xf] %v539_v11  ;;  %v667_v11 = vld [vmem:[%s14437_s12 + $0x658] sm:$0xf] }
  0xa8   : > { %542 = vst [vmem:[%s14442_s10 + $0x230] sm:$0xf] %v541_v12  ;;  %v669_v12 = vld [vmem:[%s14437_s12 + $0x660] sm:$0xf] }
  0xa9   : > { %544 = vst [vmem:[%s14442_s10 + $0x234] sm:$0xf] %v543_v13  ;;  %v671_v13 = vld [vmem:[%s14437_s12 + $0x668] sm:$0xf] }
  0xaa   : > { %546 = vst [vmem:[%s14442_s10 + $0x238] sm:$0xf] %v545_v14  ;;  %v673_v14 = vld [vmem:[%s14437_s12 + $0x670] sm:$0xf] }
  0xab   : > { %548 = vst [vmem:[%s14442_s10 + $0x23c] sm:$0xf] %v547_v15  ;;  %v675_v15 = vld [vmem:[%s14437_s12 + $0x678] sm:$0xf] }
  0xac   : > { %550 = vst [vmem:[%s14442_s10 + $0x240] sm:$0xf] %v549_v16  ;;  %v677_v16 = vld [vmem:[%s14437_s12 + $0x680] sm:$0xf] }
  0xad   : > { %552 = vst [vmem:[%s14442_s10 + $0x244] sm:$0xf] %v551_v17  ;;  %v679_v17 = vld [vmem:[%s14437_s12 + $0x688] sm:$0xf] }
  0xae   : > { %554 = vst [vmem:[%s14442_s10 + $0x248] sm:$0xf] %v553_v18  ;;  %v681_v18 = vld [vmem:[%s14437_s12 + $0x690] sm:$0xf] }
  0xaf   : > { %556 = vst [vmem:[%s14442_s10 + $0x24c] sm:$0xf] %v555_v19  ;;  %v683_v19 = vld [vmem:[%s14437_s12 + $0x698] sm:$0xf] }
  0xb0   : > { %558 = vst [vmem:[%s14442_s10 + $0x250] sm:$0xf] %v557_v20  ;;  %v685_v20 = vld [vmem:[%s14437_s12 + $0x6a0] sm:$0xf] }
  0xb1   : > { %560 = vst [vmem:[%s14442_s10 + $0x254] sm:$0xf] %v559_v21  ;;  %v687_v21 = vld [vmem:[%s14437_s12 + $0x6a8] sm:$0xf] }
  0xb2   : > { %562 = vst [vmem:[%s14442_s10 + $0x258] sm:$0xf] %v561_v22  ;;  %v689_v22 = vld [vmem:[%s14437_s12 + $0x6b0] sm:$0xf] }
  0xb3   : > { %564 = vst [vmem:[%s14442_s10 + $0x25c] sm:$0xf] %v563_v23  ;;  %v691_v23 = vld [vmem:[%s14437_s12 + $0x6b8] sm:$0xf] }
  0xb4   : > { %566 = vst [vmem:[%s14442_s10 + $0x260] sm:$0xf] %v565_v24  ;;  %v693_v24 = vld [vmem:[%s14437_s12 + $0x6c0] sm:$0xf] }
  0xb5   : > { %568 = vst [vmem:[%s14442_s10 + $0x264] sm:$0xf] %v567_v25  ;;  %v695_v25 = vld [vmem:[%s14437_s12 + $0x6c8] sm:$0xf] }
  0xb6   : > { %570 = vst [vmem:[%s14442_s10 + $0x268] sm:$0xf] %v569_v26  ;;  %v697_v26 = vld [vmem:[%s14437_s12 + $0x6d0] sm:$0xf] }
  0xb7   : > { %572 = vst [vmem:[%s14442_s10 + $0x26c] sm:$0xf] %v571_v27  ;;  %v699_v27 = vld [vmem:[%s14437_s12 + $0x6d8] sm:$0xf] }
  0xb8   : > { %574 = vst [vmem:[%s14442_s10 + $0x270] sm:$0xf] %v573_v28  ;;  %v701_v28 = vld [vmem:[%s14437_s12 + $0x6e0] sm:$0xf] }
  0xb9   : > { %576 = vst [vmem:[%s14442_s10 + $0x274] sm:$0xf] %v575_v29  ;;  %v703_v29 = vld [vmem:[%s14437_s12 + $0x6e8] sm:$0xf] }
  0xba   : > { %578 = vst [vmem:[%s14442_s10 + $0x278] sm:$0xf] %v577_v30  ;;  %v705_v30 = vld [vmem:[%s14437_s12 + $0x6f0] sm:$0xf] }
  0xbb   : > { %580 = vst [vmem:[%s14442_s10 + $0x27c] sm:$0xf] %v579_v31  ;;  %v707_v31 = vld [vmem:[%s14437_s12 + $0x6f8] sm:$0xf] }
  0xbc   : > { %582 = vst [vmem:[%s14442_s10 + $0x280] sm:$0xf] %v581_v32  ;;  %v709_v32 = vld [vmem:[%s14437_s12 + $0x700] sm:$0xf] }
  0xbd   : > { %584 = vst [vmem:[%s14442_s10 + $0x284] sm:$0xf] %v583_v33  ;;  %v711_v33 = vld [vmem:[%s14437_s12 + $0x708] sm:$0xf] }
  0xbe   : > { %586 = vst [vmem:[%s14442_s10 + $0x288] sm:$0xf] %v585_v34  ;;  %v713_v34 = vld [vmem:[%s14437_s12 + $0x710] sm:$0xf] }
  0xbf   : > { %588 = vst [vmem:[%s14442_s10 + $0x28c] sm:$0xf] %v587_v35  ;;  %v715_v35 = vld [vmem:[%s14437_s12 + $0x718] sm:$0xf] }
  0xc0   : > { %590 = vst [vmem:[%s14442_s10 + $0x290] sm:$0xf] %v589_v36  ;;  %v717_v36 = vld [vmem:[%s14437_s12 + $0x720] sm:$0xf] }
  0xc1   : > { %592 = vst [vmem:[%s14442_s10 + $0x294] sm:$0xf] %v591_v37  ;;  %v719_v37 = vld [vmem:[%s14437_s12 + $0x728] sm:$0xf] }
  0xc2   : > { %594 = vst [vmem:[%s14442_s10 + $0x298] sm:$0xf] %v593_v38  ;;  %v721_v38 = vld [vmem:[%s14437_s12 + $0x730] sm:$0xf] }
  0xc3   : > { %596 = vst [vmem:[%s14442_s10 + $0x29c] sm:$0xf] %v595_v39  ;;  %v723_v39 = vld [vmem:[%s14437_s12 + $0x738] sm:$0xf] }
  0xc4   : > { %598 = vst [vmem:[%s14442_s10 + $0x2a0] sm:$0xf] %v597_v40  ;;  %v725_v40 = vld [vmem:[%s14437_s12 + $0x740] sm:$0xf] }
  0xc5   : > { %600 = vst [vmem:[%s14442_s10 + $0x2a4] sm:$0xf] %v599_v41  ;;  %v727_v41 = vld [vmem:[%s14437_s12 + $0x748] sm:$0xf] }
  0xc6   : > { %602 = vst [vmem:[%s14442_s10 + $0x2a8] sm:$0xf] %v601_v42  ;;  %v729_v42 = vld [vmem:[%s14437_s12 + $0x750] sm:$0xf] }
  0xc7   : > { %604 = vst [vmem:[%s14442_s10 + $0x2ac] sm:$0xf] %v603_v43  ;;  %v731_v43 = vld [vmem:[%s14437_s12 + $0x758] sm:$0xf] }
  0xc8   : > { %606 = vst [vmem:[%s14442_s10 + $0x2b0] sm:$0xf] %v605_v44  ;;  %v733_v44 = vld [vmem:[%s14437_s12 + $0x760] sm:$0xf] }
  0xc9   : > { %608 = vst [vmem:[%s14442_s10 + $0x2b4] sm:$0xf] %v607_v45  ;;  %v735_v45 = vld [vmem:[%s14437_s12 + $0x768] sm:$0xf] }
  0xca   : > { %610 = vst [vmem:[%s14442_s10 + $0x2b8] sm:$0xf] %v609_v46  ;;  %v737_v46 = vld [vmem:[%s14437_s12 + $0x770] sm:$0xf] }
  0xcb   : > { %612 = vst [vmem:[%s14442_s10 + $0x2bc] sm:$0xf] %v611_v47  ;;  %v739_v47 = vld [vmem:[%s14437_s12 + $0x778] sm:$0xf] }
  0xcc   : > { %614 = vst [vmem:[%s14442_s10 + $0x2c0] sm:$0xf] %v613_v48  ;;  %v741_v48 = vld [vmem:[%s14437_s12 + $0x780] sm:$0xf] }
  0xcd   : > { %616 = vst [vmem:[%s14442_s10 + $0x2c4] sm:$0xf] %v615_v49  ;;  %v743_v49 = vld [vmem:[%s14437_s12 + $0x788] sm:$0xf] }
  0xce   : > { %618 = vst [vmem:[%s14442_s10 + $0x2c8] sm:$0xf] %v617_v50  ;;  %v745_v50 = vld [vmem:[%s14437_s12 + $0x790] sm:$0xf] }
  0xcf   : > { %620 = vst [vmem:[%s14442_s10 + $0x2cc] sm:$0xf] %v619_v51  ;;  %v747_v51 = vld [vmem:[%s14437_s12 + $0x798] sm:$0xf] }
  0xd0   : > { %622 = vst [vmem:[%s14442_s10 + $0x2d0] sm:$0xf] %v621_v52  ;;  %v749_v52 = vld [vmem:[%s14437_s12 + $0x7a0] sm:$0xf] }
  0xd1   : > { %624 = vst [vmem:[%s14442_s10 + $0x2d4] sm:$0xf] %v623_v53  ;;  %v751_v53 = vld [vmem:[%s14437_s12 + $0x7a8] sm:$0xf] }
  0xd2   : > { %626 = vst [vmem:[%s14442_s10 + $0x2d8] sm:$0xf] %v625_v54  ;;  %v753_v54 = vld [vmem:[%s14437_s12 + $0x7b0] sm:$0xf] }
  0xd3   : > { %628 = vst [vmem:[%s14442_s10 + $0x2dc] sm:$0xf] %v627_v55  ;;  %v755_v55 = vld [vmem:[%s14437_s12 + $0x7b8] sm:$0xf] }
  0xd4   : > { %630 = vst [vmem:[%s14442_s10 + $0x2e0] sm:$0xf] %v629_v56  ;;  %v757_v56 = vld [vmem:[%s14437_s12 + $0x7c0] sm:$0xf] }
  0xd5   : > { %632 = vst [vmem:[%s14442_s10 + $0x2e4] sm:$0xf] %v631_v57  ;;  %v759_v57 = vld [vmem:[%s14437_s12 + $0x7c8] sm:$0xf] }
  0xd6   : > { %634 = vst [vmem:[%s14442_s10 + $0x2e8] sm:$0xf] %v633_v58  ;;  %v761_v58 = vld [vmem:[%s14437_s12 + $0x7d0] sm:$0xf] }
  0xd7   : > { %636 = vst [vmem:[%s14442_s10 + $0x2ec] sm:$0xf] %v635_v59  ;;  %v763_v59 = vld [vmem:[%s14437_s12 + $0x7d8] sm:$0xf] }
  0xd8   : > { %638 = vst [vmem:[%s14442_s10 + $0x2f0] sm:$0xf] %v637_v60  ;;  %v765_v60 = vld [vmem:[%s14437_s12 + $0x7e0] sm:$0xf] }
  0xd9   : > { %640 = vst [vmem:[%s14442_s10 + $0x2f4] sm:$0xf] %v639_v61  ;;  %v767_v61 = vld [vmem:[%s14437_s12 + $0x7e8] sm:$0xf] }
  0xda   : > { %642 = vst [vmem:[%s14442_s10 + $0x2f8] sm:$0xf] %v641_v62  ;;  %v769_v62 = vld [vmem:[%s14437_s12 + $0x7f0] sm:$0xf] }
  0xdb   : > { %644 = vst [vmem:[%s14442_s10 + $0x2fc] sm:$0xf] %v643_v63  ;;  %v771_v63 = vld [vmem:[%s14437_s12 + $0x7f8] sm:$0xf] }
  0xdc   : > { %646 = vst [vmem:[%s14442_s10 + $0x300] sm:$0xf] %v645_v0  ;;  %v773_v0 = vld [vmem:[%s14437_s12 + $0x800] sm:$0xf] }
  0xdd   : > { %648 = vst [vmem:[%s14442_s10 + $0x304] sm:$0xf] %v647_v1  ;;  %v775_v1 = vld [vmem:[%s14437_s12 + $0x808] sm:$0xf] }
  0xde   : > { %650 = vst [vmem:[%s14442_s10 + $0x308] sm:$0xf] %v649_v2  ;;  %v777_v2 = vld [vmem:[%s14437_s12 + $0x810] sm:$0xf] }
  0xdf   : > { %652 = vst [vmem:[%s14442_s10 + $0x30c] sm:$0xf] %v651_v3  ;;  %v779_v3 = vld [vmem:[%s14437_s12 + $0x818] sm:$0xf] }
  0xe0   : > { %654 = vst [vmem:[%s14442_s10 + $0x310] sm:$0xf] %v653_v4  ;;  %v781_v4 = vld [vmem:[%s14437_s12 + $0x820] sm:$0xf] }
  0xe1   : > { %656 = vst [vmem:[%s14442_s10 + $0x314] sm:$0xf] %v655_v5  ;;  %v783_v5 = vld [vmem:[%s14437_s12 + $0x828] sm:$0xf] }
  0xe2   : > { %658 = vst [vmem:[%s14442_s10 + $0x318] sm:$0xf] %v657_v6  ;;  %v785_v6 = vld [vmem:[%s14437_s12 + $0x830] sm:$0xf] }
  0xe3   : > { %660 = vst [vmem:[%s14442_s10 + $0x31c] sm:$0xf] %v659_v7  ;;  %v787_v7 = vld [vmem:[%s14437_s12 + $0x838] sm:$0xf] }
  0xe4   : > { %662 = vst [vmem:[%s14442_s10 + $0x320] sm:$0xf] %v661_v8  ;;  %v789_v8 = vld [vmem:[%s14437_s12 + $0x840] sm:$0xf] }
  0xe5   : > { %664 = vst [vmem:[%s14442_s10 + $0x324] sm:$0xf] %v663_v9  ;;  %v791_v9 = vld [vmem:[%s14437_s12 + $0x848] sm:$0xf] }
  0xe6   : > { %666 = vst [vmem:[%s14442_s10 + $0x328] sm:$0xf] %v665_v10  ;;  %v793_v10 = vld [vmem:[%s14437_s12 + $0x850] sm:$0xf] }
  0xe7   : > { %668 = vst [vmem:[%s14442_s10 + $0x32c] sm:$0xf] %v667_v11  ;;  %v795_v11 = vld [vmem:[%s14437_s12 + $0x858] sm:$0xf] }
  0xe8   : > { %670 = vst [vmem:[%s14442_s10 + $0x330] sm:$0xf] %v669_v12  ;;  %v797_v12 = vld [vmem:[%s14437_s12 + $0x860] sm:$0xf] }
  0xe9   : > { %672 = vst [vmem:[%s14442_s10 + $0x334] sm:$0xf] %v671_v13  ;;  %v799_v13 = vld [vmem:[%s14437_s12 + $0x868] sm:$0xf] }
  0xea   : > { %674 = vst [vmem:[%s14442_s10 + $0x338] sm:$0xf] %v673_v14  ;;  %v801_v14 = vld [vmem:[%s14437_s12 + $0x870] sm:$0xf] }
  0xeb   : > { %676 = vst [vmem:[%s14442_s10 + $0x33c] sm:$0xf] %v675_v15  ;;  %v803_v15 = vld [vmem:[%s14437_s12 + $0x878] sm:$0xf] }
  0xec   : > { %678 = vst [vmem:[%s14442_s10 + $0x340] sm:$0xf] %v677_v16  ;;  %v805_v16 = vld [vmem:[%s14437_s12 + $0x880] sm:$0xf] }
  0xed   : > { %680 = vst [vmem:[%s14442_s10 + $0x344] sm:$0xf] %v679_v17  ;;  %v807_v17 = vld [vmem:[%s14437_s12 + $0x888] sm:$0xf] }
  0xee   : > { %682 = vst [vmem:[%s14442_s10 + $0x348] sm:$0xf] %v681_v18  ;;  %v809_v18 = vld [vmem:[%s14437_s12 + $0x890] sm:$0xf] }
  0xef   : > { %684 = vst [vmem:[%s14442_s10 + $0x34c] sm:$0xf] %v683_v19  ;;  %v811_v19 = vld [vmem:[%s14437_s12 + $0x898] sm:$0xf] }
  0xf0   : > { %686 = vst [vmem:[%s14442_s10 + $0x350] sm:$0xf] %v685_v20  ;;  %v813_v20 = vld [vmem:[%s14437_s12 + $0x8a0] sm:$0xf] }
  0xf1   : > { %688 = vst [vmem:[%s14442_s10 + $0x354] sm:$0xf] %v687_v21  ;;  %v815_v21 = vld [vmem:[%s14437_s12 + $0x8a8] sm:$0xf] }
  0xf2   : > { %690 = vst [vmem:[%s14442_s10 + $0x358] sm:$0xf] %v689_v22  ;;  %v817_v22 = vld [vmem:[%s14437_s12 + $0x8b0] sm:$0xf] }
  0xf3   : > { %692 = vst [vmem:[%s14442_s10 + $0x35c] sm:$0xf] %v691_v23  ;;  %v819_v23 = vld [vmem:[%s14437_s12 + $0x8b8] sm:$0xf] }
  0xf4   : > { %694 = vst [vmem:[%s14442_s10 + $0x360] sm:$0xf] %v693_v24  ;;  %v821_v24 = vld [vmem:[%s14437_s12 + $0x8c0] sm:$0xf] }
  0xf5   : > { %696 = vst [vmem:[%s14442_s10 + $0x364] sm:$0xf] %v695_v25  ;;  %v823_v25 = vld [vmem:[%s14437_s12 + $0x8c8] sm:$0xf] }
  0xf6   : > { %698 = vst [vmem:[%s14442_s10 + $0x368] sm:$0xf] %v697_v26  ;;  %v825_v26 = vld [vmem:[%s14437_s12 + $0x8d0] sm:$0xf] }
  0xf7   : > { %700 = vst [vmem:[%s14442_s10 + $0x36c] sm:$0xf] %v699_v27  ;;  %v827_v27 = vld [vmem:[%s14437_s12 + $0x8d8] sm:$0xf] }
  0xf8   : > { %702 = vst [vmem:[%s14442_s10 + $0x370] sm:$0xf] %v701_v28  ;;  %v829_v28 = vld [vmem:[%s14437_s12 + $0x8e0] sm:$0xf] }
  0xf9   : > { %704 = vst [vmem:[%s14442_s10 + $0x374] sm:$0xf] %v703_v29  ;;  %v831_v29 = vld [vmem:[%s14437_s12 + $0x8e8] sm:$0xf] }
  0xfa   : > { %706 = vst [vmem:[%s14442_s10 + $0x378] sm:$0xf] %v705_v30  ;;  %v833_v30 = vld [vmem:[%s14437_s12 + $0x8f0] sm:$0xf] }
  0xfb   : > { %708 = vst [vmem:[%s14442_s10 + $0x37c] sm:$0xf] %v707_v31  ;;  %v835_v31 = vld [vmem:[%s14437_s12 + $0x8f8] sm:$0xf] }
  0xfc   : > { %710 = vst [vmem:[%s14442_s10 + $0x380] sm:$0xf] %v709_v32 }
  0xfd   : > { %712 = vst [vmem:[%s14442_s10 + $0x384] sm:$0xf] %v711_v33 }
  0xfe   : > { %714 = vst [vmem:[%s14442_s10 + $0x388] sm:$0xf] %v713_v34 }
  0xff   : > { %716 = vst [vmem:[%s14442_s10 + $0x38c] sm:$0xf] %v715_v35 }
 0x100   : > { %718 = vst [vmem:[%s14442_s10 + $0x390] sm:$0xf] %v717_v36 }
 0x101   : > { %720 = vst [vmem:[%s14442_s10 + $0x394] sm:$0xf] %v719_v37 }
 0x102   : > { %722 = vst [vmem:[%s14442_s10 + $0x398] sm:$0xf] %v721_v38 }
 0x103   : > { %724 = vst [vmem:[%s14442_s10 + $0x39c] sm:$0xf] %v723_v39 }
 0x104   : > { %726 = vst [vmem:[%s14442_s10 + $0x3a0] sm:$0xf] %v725_v40 }
 0x105   : > { %728 = vst [vmem:[%s14442_s10 + $0x3a4] sm:$0xf] %v727_v41 }
 0x106   : > { %730 = vst [vmem:[%s14442_s10 + $0x3a8] sm:$0xf] %v729_v42 }
 0x107   : > { %732 = vst [vmem:[%s14442_s10 + $0x3ac] sm:$0xf] %v731_v43 }
 0x108   : > { %734 = vst [vmem:[%s14442_s10 + $0x3b0] sm:$0xf] %v733_v44 }
 0x109   : > { %736 = vst [vmem:[%s14442_s10 + $0x3b4] sm:$0xf] %v735_v45 }
 0x10a   : > { %738 = vst [vmem:[%s14442_s10 + $0x3b8] sm:$0xf] %v737_v46 }
 0x10b   : > { %740 = vst [vmem:[%s14442_s10 + $0x3bc] sm:$0xf] %v739_v47 }
 0x10c   : > { %742 = vst [vmem:[%s14442_s10 + $0x3c0] sm:$0xf] %v741_v48 }
 0x10d   : > { %744 = vst [vmem:[%s14442_s10 + $0x3c4] sm:$0xf] %v743_v49 }
 0x10e   : > { %746 = vst [vmem:[%s14442_s10 + $0x3c8] sm:$0xf] %v745_v50 }
 0x10f   : > { %748 = vst [vmem:[%s14442_s10 + $0x3cc] sm:$0xf] %v747_v51 }
 0x110   : > { %750 = vst [vmem:[%s14442_s10 + $0x3d0] sm:$0xf] %v749_v52 }
 0x111   : > { %752 = vst [vmem:[%s14442_s10 + $0x3d4] sm:$0xf] %v751_v53 }
 0x112   : > { %754 = vst [vmem:[%s14442_s10 + $0x3d8] sm:$0xf] %v753_v54 }
 0x113   : > { %756 = vst [vmem:[%s14442_s10 + $0x3dc] sm:$0xf] %v755_v55 }
 0x114   : > { %758 = vst [vmem:[%s14442_s10 + $0x3e0] sm:$0xf] %v757_v56 }
 0x115   : > { %760 = vst [vmem:[%s14442_s10 + $0x3e4] sm:$0xf] %v759_v57 }
 0x116   : > { %762 = vst [vmem:[%s14442_s10 + $0x3e8] sm:$0xf] %v761_v58 }
 0x117   : > { %764 = vst [vmem:[%s14442_s10 + $0x3ec] sm:$0xf] %v763_v59 }
 0x118   : > { %766 = vst [vmem:[%s14442_s10 + $0x3f0] sm:$0xf] %v765_v60 }
 0x119   : > { %768 = vst [vmem:[%s14442_s10 + $0x3f4] sm:$0xf] %v767_v61 }
 0x11a   : > { %770 = vst [vmem:[%s14442_s10 + $0x3f8] sm:$0xf] %v769_v62 }
 0x11b   : > { %772 = vst [vmem:[%s14442_s10 + $0x3fc] sm:$0xf] %v771_v63 }
 0x11c   : > { %774 = vst [vmem:[%s14442_s10 + $0x400] sm:$0xf] %v773_v0 }
 0x11d   : > { %776 = vst [vmem:[%s14442_s10 + $0x404] sm:$0xf] %v775_v1 }
 0x11e   : > { %778 = vst [vmem:[%s14442_s10 + $0x408] sm:$0xf] %v777_v2 }
 0x11f   : > { %780 = vst [vmem:[%s14442_s10 + $0x40c] sm:$0xf] %v779_v3 }
 0x120   : > { %782 = vst [vmem:[%s14442_s10 + $0x410] sm:$0xf] %v781_v4 }
 0x121   : > { %784 = vst [vmem:[%s14442_s10 + $0x414] sm:$0xf] %v783_v5 }
 0x122   : > { %786 = vst [vmem:[%s14442_s10 + $0x418] sm:$0xf] %v785_v6 }
 0x123   : > { %788 = vst [vmem:[%s14442_s10 + $0x41c] sm:$0xf] %v787_v7 }
 0x124   : > { %790 = vst [vmem:[%s14442_s10 + $0x420] sm:$0xf] %v789_v8 }
 0x125   : > { %792 = vst [vmem:[%s14442_s10 + $0x424] sm:$0xf] %v791_v9 }
 0x126   : > { %794 = vst [vmem:[%s14442_s10 + $0x428] sm:$0xf] %v793_v10 }
 0x127   : > { %796 = vst [vmem:[%s14442_s10 + $0x42c] sm:$0xf] %v795_v11 }
 0x128   : > { %798 = vst [vmem:[%s14442_s10 + $0x430] sm:$0xf] %v797_v12 }
 0x129   : > { %800 = vst [vmem:[%s14442_s10 + $0x434] sm:$0xf] %v799_v13 }
 0x12a   : > { %802 = vst [vmem:[%s14442_s10 + $0x438] sm:$0xf] %v801_v14 }
 0x12b   : > { %804 = vst [vmem:[%s14442_s10 + $0x43c] sm:$0xf] %v803_v15 }
 0x12c   : > { %806 = vst [vmem:[%s14442_s10 + $0x440] sm:$0xf] %v805_v16 }
 0x12d   : > { %808 = vst [vmem:[%s14442_s10 + $0x444] sm:$0xf] %v807_v17 }
 0x12e   : > { %810 = vst [vmem:[%s14442_s10 + $0x448] sm:$0xf] %v809_v18 }
 0x12f   : > { %812 = vst [vmem:[%s14442_s10 + $0x44c] sm:$0xf] %v811_v19 }
 0x130   : > { %814 = vst [vmem:[%s14442_s10 + $0x450] sm:$0xf] %v813_v20 }
 0x131   : > { %816 = vst [vmem:[%s14442_s10 + $0x454] sm:$0xf] %v815_v21 }
 0x132   : > { %818 = vst [vmem:[%s14442_s10 + $0x458] sm:$0xf] %v817_v22 }
 0x133   : > { %820 = vst [vmem:[%s14442_s10 + $0x45c] sm:$0xf] %v819_v23 }
 0x134   : > { %822 = vst [vmem:[%s14442_s10 + $0x460] sm:$0xf] %v821_v24 }
 0x135   : > { %824 = vst [vmem:[%s14442_s10 + $0x464] sm:$0xf] %v823_v25 }
 0x136   : > { %826 = vst [vmem:[%s14442_s10 + $0x468] sm:$0xf] %v825_v26 }
 0x137   : > { %828 = vst [vmem:[%s14442_s10 + $0x46c] sm:$0xf] %v827_v27 }
 0x138   : > { %830 = vst [vmem:[%s14442_s10 + $0x470] sm:$0xf] %v829_v28 }
 0x139   : > { %832 = vst [vmem:[%s14442_s10 + $0x474] sm:$0xf] %v831_v29 }
 0x13a   : > { %834 = vst [vmem:[%s14442_s10 + $0x478] sm:$0xf] %v833_v30 }
 0x13b   : > { %836 = vst [vmem:[%s14442_s10 + $0x47c] sm:$0xf] %v835_v31 }
 0x13c PF: > { %p10610_p11 = scmp.ge.s32.totalorder %s14313_s29, 1  ;;  %p2613_p12 = scmp.lt.s32.totalorder %s14313_s29, 5 }
 0x13e   : > { %p2614_p13 = pnand %p10610_p11, %p2613_p12 }
 0x13f   : > { %s2620_s11 = sand.u32 (!%p2614_p13), 1, %s14289_s23   ;;  %p2667_p0 = scmp.lt.s32.totalorder (!%p2614_p13), %s14297_s25, 1 }
 0x140   : > { %2617 = sbr.rel (%p2614_p13) target bundleno = 1680 (0x690), region = 84  ;;  %p2674_p1 = scmp.lt.s32.totalorder (!%p2614_p13), %s14301_s26, 1 }
 0x141   : > { %s14166_s13 = smul.u32 (!%p2614_p13), 1152, %s2620_s11 }
 0x143   : > { %s15023_s14 = scalar_lea.vmem (!%p2614_p13), [#allocation4], %s14166_s13  ;;  %s2646_s13 = sand.u32 (!%p2614_p13), 1, %s14281_s21  }
 0x145   : > { %v14315_v32 = vmov 0   ;;  %v13549_v33 = vld [vmem:[%s15023_s14 + $0x1b8] sm:$0xff]  ;;  %s15029_s23 = scalar_select %p2667_p0, %s14297_s25, 1  ;;  %v13548_v37 = vld [vmem:[%s15023_s14 + $0x1b0] sm:$0xff]  ;;  %v2687_v41 = vld [vmem:[%s16407_s1] sm:$0x3] }
 0x146   : > { %2695 = vst [vmem:[#allocation2 + $0x130] sm:$0xff] %v14315_v32  ;;  %v13557_v34 = vld [vmem:[%s15023_s14 + $0x1f8] sm:$0xff]  ;;  %4301 = vmatpush.bf16.msra.mxu0 %v13549_v33  ;;  %v13556_v38 = vld [vmem:[%s15023_s14 + $0x1f0] sm:$0xff]  ;;  %v13547_v42 = vld [vmem:[%s15023_s14 + $0x1a8] sm:$0xff]  ;;  %v15057_v47 = vperm.slane %v2687_v41, 0  ;;  %v15060_v48 = vperm.slane %v2687_v41, 1 }
 0x147   : > { %2689 = vst [vmem:[#allocation2 + $0xb0] sm:$0xff] %v14315_v32  ;;  %v13517_v35 = vld [vmem:[%s15023_s14 + $0x38] sm:$0xff]  ;;  %4350 = vmatpush.bf16.msra.mxu1 %v13557_v34  ;;  %v13516_v39 = vld [vmem:[%s15023_s14 + $0x30] sm:$0xff]  ;;  %s13493_s18 = sshll.u32 %s15029_s23, 9  ;;  %v13555_v43 = vld [vmem:[%s15023_s14 + $0x1e8] sm:$0xff]  ;;  %vm3079_vm0 = vcmask 1040384  }
 0x148   : > { %v13525_v36 = vld [vmem:[%s15023_s14 + $0x78] sm:$0xff]  ;;  %2691 = vst [vmem:[#allocation2 + $0xd8] sm:$0x33] %v14315_v32  ;;  %4575 = vmatpush.bf16.msra.mxu2 %v13517_v35  ;;  %v13524_v40 = vld [vmem:[%s15023_s14 + $0x70] sm:$0xff]  ;;  %v2688_v44 = vld [vmem:[%s16408_s2] sm:$0x3]  ;;  %s15055_s11 = scalar_lea.vmem %s16406_s0, %s13493_s18 }
 0x149   : > { %2692 = vst [vmem:[#allocation2 + $0x18] sm:$0xff] %v14315_v32  ;;  %4624 = vmatpush.bf16.msra.mxu3 %v13525_v36  ;;  %v13515_v45 = vld [vmem:[%s15023_s14 + $0x28] sm:$0xff]  ;;  %v13546_v49 = vld [vmem:[%s15023_s14 + $0x1a0] sm:$0xff]  ;;  %v15065_v51 = vperm.slane %v2688_v44, 0  ;;  %v15071_v55 = vperm.slane %v2688_v44, 1  ;;  %v2751_v57 = vld [vmem:[%s15055_s11 + $0x10] sm:$0xff] }
 0x14a   : > { %2694 = vst [vmem:[#allocation2 + $0x168] sm:$0x33] %v14315_v32  ;;  %4302 = vmatpush.bf16.msra.mxu0 %v13548_v37  ;;  %v13523_v46 = vld [vmem:[%s15023_s14 + $0x68] sm:$0xff]  ;;  %v13554_v50 = vld [vmem:[%s15023_s14 + $0x1e0] sm:$0xff]  ;;  %v2752_v58 = vld [vmem:[%s15055_s11 + $0x18] sm:$0xff]  ;;  %v2820_v61 = vmul.f32 %v15057_v47, %v2751_v57  ;;  %vm3080_vm1 = vcmask 1044484  }
 0x14b   : > { %2697 = vst [vmem:[#allocation2 + $0x180] sm:$0x33] %v14315_v32  ;;  %4351 = vmatpush.bf16.msra.mxu1 %v13556_v38  ;;  %v13514_v52 = vld [vmem:[%s15023_s14 + $0x20] sm:$0xff]  ;;  %v2750_v56 = vld [vmem:[%s15055_s11 + $0x8] sm:$0xff]  ;;  %v2821_v62 = vmul.f32 %v15060_v48, %v2752_v58  ;;  %v13545_v0 = vld [vmem:[%s15023_s14 + $0x198] sm:$0xff]  ;;  %vm3459_vm3 = vcmask 1042432  }
 0x14c   : > { %2698 = vst [vmem:[#allocation2 + $0x110] sm:$0xff] %v14315_v32  ;;  %4576 = vmatpush.bf16.msra.mxu2 %v13516_v39  ;;  %v13522_v53 = vld [vmem:[%s15023_s14 + $0x60] sm:$0xff]  ;;  %v2819_v60 = vmul.f32 %v15060_v48, %v2750_v56  ;;  %v13553_v1 = vld [vmem:[%s15023_s14 + $0x1d8] sm:$0xff]  ;;  %v2889_v3 = vadd.f32 %v15065_v51, %v2820_v61  ;;  %v13544_v11 = vld [vmem:[%s15023_s14 + $0x190] sm:$0xff]  ;;  %vm3460_vm4 = vcmask 1046532   ;;  %vm3803_vm6 = vcmask 1041408  }
 0x14d   : > { %4625 = vmatpush.bf16.msra.mxu3 %v13524_v40  ;;  %2700 = vst [vmem:[#allocation2 + $0x98] sm:$0x33] %v14315_v32  ;;  %v2749_v54 = vld [vmem:[%s15055_s11] sm:$0xff]  ;;  %v2890_v4 = vadd.f32 %v15071_v55, %v2821_v62  ;;  %v13513_v5 = vld [vmem:[%s15023_s14 + $0x18] sm:$0xff]  ;;  %v13552_v12 = vld [vmem:[%s15023_s14 + $0x1d0] sm:$0xff]  ;;  %vm3804_vm7 = vcmask 1045508  }
 0x14e   : > { %2701 = vst [vmem:[#allocation2 + $0x120] sm:$0xff] %v14315_v32  ;;  %4303 = vmatpush.bf16.msra.mxu0 %v13547_v42  ;;  %v2818_v59 = vmul.f32 %v15057_v47, %v2749_v54  ;;  %v2888_v2 = vadd.f32 %v15071_v55, %v2819_v60  ;;  %v13521_v6 = vld [vmem:[%s15023_s14 + $0x58] sm:$0xff]  ;;  %v2953_v9 = vmax.f32 %v2889_v3, 0.0  ;;  %v13512_v15 = vld [vmem:[%s15023_s14 + $0x10] sm:$0xff]  ;;  %v2753_v19 = vld [vmem:[%s15055_s11 + $0x20] sm:$0xff]  ;;  %s10611_s18 = sshll.u32 %s2646_s13, 7 }
 0x14f   : > { %2703 = vst [vmem:[#allocation2 + $0x108] sm:$0x33] %v14315_v32  ;;  %4352 = vmatpush.bf16.msra.mxu1 %v13555_v43  ;;  %v2954_v10 = vmax.f32 %v2890_v4, 0.0  ;;  %v13520_v16 = vld [vmem:[%s15023_s14 + $0x50] sm:$0xff]  ;;  %v2754_v20 = vld [vmem:[%s15055_s11 + $0x28] sm:$0xff]  ;;  %vm15109_vm2 = vmor %vm3079_vm0, %vm3080_vm1  ;;  %v2822_v29 = vmul.f32 %v15057_v47, %v2753_v19  ;;  %s15894_s21 = scalar_lea.vmem [#allocation5], %s10611_s18 }
 0x150   : > { %2704 = vst [vmem:[#allocation2 + $0x60] sm:$0xff] %v14315_v32  ;;  %4577 = vmatpush.bf16.msra.mxu2 %v13515_v45  ;;  %v2887_v63 = vadd.f32 %v15065_v51, %v2818_v59  ;;  %v2952_v8 = vmax.f32 %v2888_v2, 0.0  ;;  %v13543_v21 = vld [vmem:[%s15023_s14 + $0x188] sm:$0xff]  ;;  %v2755_v25 = vld [vmem:[%s15055_s11 + $0x30] sm:$0xff]  ;;  %v2756_v26 = vld [vmem:[%s15055_s11 + $0x38] sm:$0xff]  ;;  %v2823_v30 = vmul.f32 %v15060_v48, %v2754_v20  ;;  %s10614_s19 = sshll.u32 %s15029_s23, 1 }
 0x151   : > { %4626 = vmatpush.bf16.msra.mxu3 %v13523_v46  ;;  %2706 = vst [vmem:[#allocation2 + $0x188] sm:$0x33] %v14315_v32  ;;  %v15098_v14 = vpack.c.bf16 %v2954_v10, %v2953_v9  ;;  %v13551_v23 = vld [vmem:[%s15023_s14 + $0x1c8] sm:$0xff]  ;;  %v2824_v33 = vmul.f32 %v15057_v47, %v2755_v25  ;;  %v2825_v34 = vmul.f32 %v15060_v48, %v2756_v26  ;;  %v13542_v35 = vld [vmem:[%s15023_s14 + $0x180] sm:$0xff]  ;;  %v13613_v39 = vld [vmem:[%s15023_s14 + $0xb8] sm:$0xff]  ;;  %s13489_s13 = sshll.u32 (%p14419_p9), %s14297_s25, 6 }
 0x152   : > { %2707 = vst [vmem:[#allocation2 + $0x138] sm:$0xff] %v14315_v32  ;;  %4304 = vmatpush.bf16.msra.mxu0 %v13546_v49  ;;  %v2951_v7 = vmax.f32 %v2887_v63, 0.0  ;;  %v13511_v27 = vld [vmem:[%s15023_s14 + $0x8] sm:$0xff]  ;;  %v13550_v36 = vld [vmem:[%s15023_s14 + $0x1c0] sm:$0xff]  ;;  %v2891_v40 = vadd.f32 %v15065_v51, %v2822_v29  ;;  %v2892_v41 = vadd.f32 %v15071_v55, %v2823_v30  ;;  %v13621_v42 = vld [vmem:[%s15023_s14 + $0xf8] sm:$0xff]  ;;  %s10279_s18 = sadd.s32 (%p14419_p9), %s14301_s26, %s13489_s13 }
 0x153   : > { %2709 = vst [vmem:[#allocation2 + $0x80] sm:$0x33] %v14315_v32  ;;  %4353 = vmatpush.bf16.msra.mxu1 %v13554_v50  ;;  %v3084_v18 = vrot.slane %v15098_v14, 7  ;;  %v13519_v28 = vld [vmem:[%s15023_s14 + $0x48] sm:$0xff]  ;;  %v13510_v37 = vld [vmem:[%s15023_s14] sm:$0xff]  ;;  %v13581_v46 = vld [vmem:[%s15023_s14 + $0x338] sm:$0xff]  ;;  %v2893_v50 = vadd.f32 %v15065_v51, %v2824_v33 }
 0x154   : > { %2710 = vst [vmem:[#allocation2 + $0x1a8] sm:$0xff] %v14315_v32  ;;  %4578 = vmatpush.bf16.msra.mxu2 %v13514_v52  ;;  %v3015_v13 = vpack.c.bf16 %v2952_v8, %v2951_v7  ;;  %v13518_v38 = vld [vmem:[%s15023_s14 + $0x40] sm:$0xff]  ;;  %v2758_v44 = vld [vmem:[%s15055_s11 + $0x48] sm:$0xff]  ;;  %v13589_v49 = vld [vmem:[%s15023_s14 + $0x378] sm:$0xff]  ;;  %v2894_v52 = vadd.f32 %v15071_v55, %v2825_v34  ;;  %v2955_v56 = vmax.f32 %v2891_v40, 0.0  ;;  %v2956_v57 = vmax.f32 %v2892_v41, 0.0 }
 0x155   : > { %4627 = vmatpush.bf16.msra.mxu3 %v13522_v53  ;;  %2712 = vst [vmem:[#allocation2 + $0x28] sm:$0x33] %v14315_v32  ;;  %v2757_v43 = vld [vmem:[%s15055_s11 + $0x40] sm:$0xff]  ;;  %v2827_v54 = vmul.f32 %v15060_v48, %v2758_v44  ;;  %v2957_v60 = vmax.f32 %v2893_v50, 0.0  ;;  %v2760_v2 = vld [vmem:[%s15055_s11 + $0x58] sm:$0xff]  ;;  %v13612_v19 = vld [vmem:[%s15023_s14 + $0xb0] sm:$0xff] }
 0x156   : > { %2713 = vst [vmem:[#allocation2 + $0xf0] sm:$0xff] %v14315_v32  ;;  %4305 = vmatpush.bf16.msra.mxu0 %v13545_v0  ;;  %v3082_v17 = vrot.slane %v3015_v13, 7  ;;  %v2826_v53 = vmul.f32 %v15057_v47, %v2757_v43  ;;  %v2958_v61 = vmax.f32 %v2894_v52, 0.0  ;;  %v3017_v0 = vpack.c.bf16 %v2956_v57, %v2955_v56  ;;  %v13620_v20 = vld [vmem:[%s15023_s14 + $0xf0] sm:$0xff]  ;;  %v2762_v29 = vld [vmem:[%s15055_s11 + $0x68] sm:$0xff]  ;;  %v2764_v43 = vld [vmem:[%s15055_s11 + $0x78] sm:$0xff] }
 0x157   : > { %2715 = vst [vmem:[#allocation2 + $0x128] sm:$0x33] %v14315_v32  ;;  %4354 = vmatpush.bf16.msra.mxu1 %v13553_v1  ;;  %v2896_v59 = vadd.f32 %v15071_v55, %v2827_v54  ;;  %v2759_v1 = vld [vmem:[%s15055_s11 + $0x50] sm:$0xff]  ;;  %v2829_v4 = vmul.f32 %v15060_v48, %v2760_v2  ;;  %v2831_v33 = vmul.f32 %v15060_v48, %v2762_v29  ;;  %vm15284_vm5 = vmor %vm3459_vm3, %vm3460_vm4 }
 0x158   : > { %2716 = vst [vmem:[#allocation2 + $0x1d8] sm:$0xff] %v14315_v32  ;;  %4579 = vmatpush.bf16.msra.mxu2 %v13513_v5  ;;  %v3083_v24 = vrot.slane %v3082_v17, 4  ;;  %v2895_v58 = vadd.f32 %v15065_v51, %v2826_v53  ;;  %v2828_v3 = vmul.f32 %v15057_v47, %v2759_v1  ;;  %v15161_v9 = vpack.c.bf16 %v2958_v61, %v2957_v60  ;;  %v13588_v26 = vld [vmem:[%s15023_s14 + $0x370] sm:$0xff]  ;;  %vm15524_vm8 = vmor %vm3803_vm6, %vm3804_vm7 }
 0x159   : > { %4628 = vmatpush.bf16.msra.mxu3 %v13521_v6  ;;  %2718 = vst [vmem:[#allocation2 + $0x170] sm:$0x33] %v14315_v32  ;;  %v2960_v6 = vmax.f32 %v2896_v59, 0.0  ;;  %v2898_v13 = vadd.f32 %v15071_v55, %v2829_v4  ;;  %v13619_v4 = vld [vmem:[%s15023_s14 + $0xe8] sm:$0xff] }
 0x15a   : > { %2719 = vst [vmem:[#allocation2 + $0xc0] sm:$0xff] %v14315_v32  ;;  %4306 = vmatpush.bf16.msra.mxu0 %v13544_v11  ;;  %v3085_v31 = vsel %vm15109_vm2, %v3083_v24, %v3084_v18  ;;  %v2959_v5 = vmax.f32 %v2895_v58, 0.0  ;;  %v3089_v25 = vrot.slane %v15161_v9, 7 }
 0x15b   : > { %2721 = vst [vmem:[#allocation2 + $0x148] sm:$0x33] %v14315_v32  ;;  %4355 = vmatpush.bf16.msra.mxu1 %v13552_v12  ;;  %v2897_v12 = vadd.f32 %v15065_v51, %v2828_v3 }
 0x15c   : > { %3211 = vst [vmem:[#allocation2 + $0x130] sm:$0xee] %v3082_v17  ;;  %4580 = vmatpush.bf16.msra.mxu2 %v13512_v15  ;;  %v3087_v15 = vrot.slane %v3017_v0, 7  ;;  %v2962_v17 = vmax.f32 %v2898_v13, 0.0  ;;  %v13611_v0 = vld [vmem:[%s15023_s14 + $0xa8] sm:$0xff] }
 0x15d   : > { %4629 = vmatpush.bf16.msra.mxu3 %v13520_v16  ;;  %2722 = vst [vmem:[#allocation2 + $0x1d0] sm:$0xff] %v14315_v32  ;;  %v2961_v16 = vmax.f32 %v2897_v12, 0.0  ;;  %v2766_v12 = vld [vmem:[%s15055_s11 + $0x88] sm:$0xff] }
 0x15e   : > { %2724 = vst [vmem:[#allocation2 + $0xf8] sm:$0x33] %v14315_v32  ;;  %4307 = vmatpush.bf16.msra.mxu0 %v13543_v21  ;;  %v13580_v21 = vld [vmem:[%s15023_s14 + $0x330] sm:$0xff]  ;;  %v3088_v24 = vrot.slane %v3087_v15, 4 }
 0x15f   : > { %3212 = vst [vmem:[#allocation2 + $0x48] sm:$0xff] %v3085_v31  ;;  %4356 = vmatpush.bf16.msra.mxu1 %v13551_v23  ;;  %v3019_v23 = vpack.c.bf16 %v2960_v6, %v2959_v5  ;;  %v13579_v6 = vld [vmem:[%s15023_s14 + $0x328] sm:$0xff] }
 0x160   : > { %3304 = vst [vmem:[#allocation3 + $0x28] sm:$0xff] %v3085_v31  ;;  %4581 = vmatpush.bf16.msra.mxu2 %v13511_v27  ;;  %v3020_v27 = vpack.c.bf16 %v2962_v17, %v2961_v16  ;;  %v3090_v34 = vsel %vm15109_vm2, %v3088_v24, %v3089_v25  ;;  %v2835_v17 = vmul.f32 %v15060_v48, %v2766_v12 }
 0x161   : > { %4630 = vmatpush.bf16.msra.mxu3 %v13519_v28  ;;  %2725 = vst [vmem:[#allocation2 + $0x40] sm:$0xff] %v14315_v32  ;;  %v2761_v28 = vld [vmem:[%s15055_s11 + $0x60] sm:$0xff]  ;;  %v3092_v30 = vrot.slane %v3019_v23, 7 }
 0x162   : > { %2727 = vst [vmem:[#allocation2 + $0x190] sm:$0x33] %v14315_v32  ;;  %4308 = vmatpush.bf16.msra.mxu0 %v13542_v35  ;;  %v2830_v31 = vmul.f32 %v15057_v47, %v2761_v28 }
 0x163   : > { %v3263_v45 = vld [vmem:[#allocation2 + $0x130] sm:$0xff]  ;;  %2728 = vst [vmem:[#allocation2 + $0x1a0] sm:$0xff] %v14315_v32  ;;  %4357 = vmatpush.bf16.msra.mxu1 %v13550_v36  ;;  %v3093_v35 = vrot.slane %v3092_v30, 4  ;;  %v3094_v36 = vrot.slane %v3020_v27, 7 }
 0x164   : > { %3303 = vst [vmem:[#allocation3 + $0x20] sm:$0xff] %v3263_v45  ;;  %4582 = vmatpush.bf16.msra.mxu2 %v13510_v37  ;;  %v2899_v37 = vadd.f32 %v15065_v51, %v2830_v31  ;;  %v3345_v14 = vld [vmem:[#allocation2 + $0x130] sm:$0xee] }
 0x165   : > { %4631 = vmatpush.bf16.msra.mxu3 %v13518_v38  ;;  %2730 = vst [vmem:[#allocation2] sm:$0x33] %v14315_v32  ;;  %v2900_v38 = vadd.f32 %v15071_v55, %v2831_v33  ;;  %v3095_v41 = vsel %vm15109_vm2, %v3093_v35, %v3094_v36  ;;  %v3096_v44 = vrot.slane %v3094_v36, 4  ;;  %v2767_v35 = vld [vmem:[%s15055_s11 + $0x90] sm:$0xff]  ;;  %v2768_v36 = vld [vmem:[%s15055_s11 + $0x98] sm:$0xff] }
 0x166   : > { %2731 = vst [vmem:[#allocation2 + $0x38] sm:$0xff] %v14315_v32  ;;  %4899 = vmatpush.bf16.msrb.mxu0 %v13581_v46  ;;  %v2833_v46 = vmul.f32 %v15060_v48, %v2764_v43 }
 0x167   : > { %2733 = vst [vmem:[#allocation2 + $0x10] sm:$0x33] %v14315_v32  ;;  %4948 = vmatpush.bf16.msrb.mxu1 %v13589_v49  ;;  %v13527_v62 = vld [vmem:[#allocation3 + $0x24] sm:$0xf0]  ;;  %v10692_v63 = vld [vmem:[#allocation3 + $0x28] sm:$0xf0] }
 0x168   : > { %5238 = vmatpush.bf16.msrb.mxu2 %v13613_v39  ;;  %2734 = vst [vmem:[#allocation2 + $0x58] sm:$0xff] %v14315_v32  ;;  %v2963_v39 = vmax.f32 %v2899_v37, 0.0  ;;  %v2964_v40 = vmax.f32 %v2900_v38, 0.0  ;;  %v2902_v57 = vadd.f32 %v15071_v55, %v2833_v46  ;;  %v2836_v37 = vmul.f32 %v15057_v47, %v2767_v35 }
 0x169   : > { %5287 = vmatpush.bf16.msrb.mxu3 %v13621_v42  ;;  %2736 = vst [vmem:[#allocation2 + $0xd0] sm:$0x33] %v14315_v32  ;;  %v2763_v42 = vld [vmem:[%s15055_s11 + $0x70] sm:$0xff]  ;;  %v2837_v38 = vmul.f32 %v15060_v48, %v2768_v36  ;;  %v13585_v36 = vld [vmem:[%s15023_s14 + $0x358] sm:$0xff] }
 0x16a   : > { %2737 = vst [vmem:[#allocation2 + $0x68] sm:$0xff] %v14315_v32  ;;  %4900 = vmatpush.bf16.msrb.mxu0 %v13580_v21  ;;  %v2832_v45 = vmul.f32 %v15057_v47, %v2763_v42  ;;  %v3021_v49 = vpack.c.bf16 %v2964_v40, %v2963_v39  ;;  %v2905_v42 = vadd.f32 %v15065_v51, %v2836_v37 }
 0x16b   : > { %v10690_v7 = vld [vmem:[#allocation3 + $0x20] sm:$0xf]  ;;  %2739 = vst [vmem:[#allocation2 + $0x198] sm:$0x33] %v14315_v32  ;;  %v13526_v8 = vld [vmem:[#allocation3 + $0x24] sm:$0xf]  ;;  %4949 = vmatpush.bf16.msrb.mxu1 %v13588_v26  ;;  %v2904_v26 = vadd.f32 %v15071_v55, %v2835_v17  ;;  %v2906_v43 = vadd.f32 %v15071_v55, %v2837_v38 }
 0x16c   : > { %v10691_v10 = vor.u32 %v13527_v62, %v10690_v7  ;;  %2740 = vst [vmem:[#allocation2 + $0xe8] sm:$0xff] %v14315_v32  ;;  %v10695_v11 = vor.u32 %v13526_v8, %v10692_v63  ;;  %5239 = vmatpush.bf16.msrb.mxu2 %v13612_v19  ;;  %v2901_v56 = vadd.f32 %v15065_v51, %v2832_v45  ;;  %v2966_v62 = vmax.f32 %v2902_v57, 0.0  ;;  %v13587_v7 = vld [vmem:[%s15023_s14 + $0x368] sm:$0xff]  ;;  %v2772_v17 = vld [vmem:[%s15055_s11 + $0xb8] sm:$0xff] }
 0x16d   : > { %2742 = vst [vmem:[#allocation2 + $0x70] sm:$0x33] %v14315_v32  ;;  %5288 = vmatpush.bf16.msrb.mxu3 %v13620_v20  ;;  %v3097_v63 = vrot.slane %v3021_v49, 7  ;;  %v2968_v33 = vmax.f32 %v2904_v26, 0.0  ;;  %v2969_v45 = vmax.f32 %v2905_v42, 0.0  ;;  %v2970_v46 = vmax.f32 %v2906_v43, 0.0 }
 0x16e   : > { %4309 = vmatmul.bf16.vlgmr.msra.gmra.mxu0 %v10691_v10  ;;  %2743 = vst [vmem:[#allocation2 + $0x1c8] sm:$0xff] %v14315_v32  ;;  %4358 = vmatmul.bf16.vlgmr.msra.gmra.mxu1 %v10695_v11  ;;  %v2965_v61 = vmax.f32 %v2901_v56, 0.0  ;;  %v2765_v11 = vld [vmem:[%s15055_s11 + $0x80] sm:$0xff] }
 0x16f   : > { %2745 = vst [vmem:[#allocation2 + $0x160] sm:$0x33] %v14315_v32  ;;  %v3098_v2 = vrot.slane %v3097_v63, 4  ;;  %4901 = vmatpush.bf16.msrb.mxu0 %v13579_v6  ;;  %4950 = vmatpush.bf16.msrb.mxu1 %v13587_v7  ;;  %v2834_v16 = vmul.f32 %v15057_v47, %v2765_v11  ;;  %v13610_v49 = vld [vmem:[%s15023_s14 + $0xa0] sm:$0xff]  ;;  %v3024_v56 = vpack.c.bf16 %v2970_v46, %v2969_v45 }
 0x170   : > { %2746 = vst [vmem:[#allocation2 + $0x30] sm:$0xff] %v14315_v32  ;;  %v3022_v1 = vpack.c.bf16 %v2966_v62, %v2965_v61  ;;  %5240 = vmatpush.bf16.msrb.mxu2 %v13611_v0  ;;  %v2769_v61 = vld [vmem:[%s15055_s11 + $0xa0] sm:$0xff]  ;;  %v2770_v62 = vld [vmem:[%s15055_s11 + $0xa8] sm:$0xff] }
 0x171   : > { %2748 = vst [vmem:[#allocation2 + $0x1c0] sm:$0x33] %v14315_v32  ;;  %5289 = vmatpush.bf16.msrb.mxu3 %v13619_v4  ;;  %v2903_v24 = vadd.f32 %v15065_v51, %v2834_v16  ;;  %v2839_v0 = vmul.f32 %v15060_v48, %v2770_v62  ;;  %v2771_v16 = vld [vmem:[%s15055_s11 + $0xb0] sm:$0xff]  ;;  %v2773_v43 = vld [vmem:[%s15055_s11 + $0xc0] sm:$0xff] }
 0x172   : > { %3299 = vst [vmem:[#allocation3] sm:$0xff] %v14315_v32  ;;  %v3099_v8 = vrot.slane %v3022_v1, 7  ;;  %v2842_v45 = vmul.f32 %v15057_v47, %v2773_v43 }
 0x173   : > { %3300 = vst [vmem:[#allocation3 + $0x8] sm:$0xff] %v14315_v32  ;;  %v2967_v31 = vmax.f32 %v2903_v24, 0.0  ;;  %v2908_v7 = vadd.f32 %v15071_v55, %v2839_v0  ;;  %v2776_v0 = vld [vmem:[%s15055_s11 + $0xd8] sm:$0xff] }
 0x174   : > { %3214 = vst [vmem:[#allocation2 + $0x110] sm:$0xee] %v3087_v15  ;;  %v3100_v13 = vsel %vm15109_vm2, %v3098_v2, %v3099_v8  ;;  %v3101_v15 = vrot.slane %v3099_v8, 4  ;;  %5241 = vmatpush.bf16.msrb.mxu2 %v13610_v49  ;;  %v10834_v8 = vld [vmem:[#allocation3 + $0x20] sm:$0xf] }
 0x175   : > { %3215 = vst [vmem:[#allocation2 + $0x118] sm:$0xff] %v3090_v34  ;;  %v3023_v39 = vpack.c.bf16 %v2968_v33, %v2967_v31  ;;  %v2972_v12 = vmax.f32 %v2908_v7, 0.0  ;;  %v13609_v31 = vld [vmem:[%s15023_s14 + $0x98] sm:$0xff] }
 0x176   : > { %3306 = vst [vmem:[#allocation3 + $0x38] sm:$0xff] %v3090_v34  ;;  %v13617_v33 = vld [vmem:[%s15023_s14 + $0xd8] sm:$0xff] }
 0x177   : > { %3301 = vst [vmem:[#allocation3 + $0x10] sm:$0xff] %v14315_v32 }
 0x178   : > { %3302 = vst [vmem:[#allocation3 + $0x18] sm:$0xff] %v14315_v32  ;;  %5242 = vmatpush.bf16.msrb.mxu2 %v13609_v31 }
 0x179   : > { %v10818_v50 = vld [vmem:[#allocation3] sm:$0xf]  ;;  %v13494_v52 = vld [vmem:[#allocation3 + $0x4] sm:$0xf]  ;;  %3217 = vst [vmem:[#allocation2 + $0x120] sm:$0xee] %v3092_v30 }
 0x17a   : > { %v13495_v53 = vld [vmem:[#allocation3 + $0x4] sm:$0xf0]  ;;  %v10820_v54 = vld [vmem:[#allocation3 + $0x8] sm:$0xf0]  ;;  %3218 = vst [vmem:[#allocation2 + $0x150] sm:$0xff] %v3095_v41 }
 0x17b   : > { %v10819_v58 = vor.u32 %v13495_v53, %v10818_v50  ;;  %v10823_v59 = vor.u32 %v13494_v52, %v10820_v54  ;;  %v3265_v60 = vld [vmem:[#allocation2 + $0x110] sm:$0xff]  ;;  %3308 = vst [vmem:[#allocation3 + $0x48] sm:$0xff] %v3095_v41  ;;  %v13618_v50 = vld [vmem:[%s15023_s14 + $0xe0] sm:$0xff] }
 0x17c   : > { %3305 = vst [vmem:[#allocation3 + $0x30] sm:$0xff] %v3265_v60  ;;  %v13578_v52 = vld [vmem:[%s15023_s14 + $0x320] sm:$0xff]  ;;  %5290 = vmatpush.bf16.msrb.mxu3 %v13618_v50  ;;  %v3348_v9 = vld [vmem:[#allocation2 + $0x110] sm:$0xee] }
 0x17d   : > { %4583 = vmatmul.bf16.vlgmr.msra.gmra.mxu2 %v10819_v58  ;;  %4632 = vmatmul.bf16.vlgmr.msra.gmra.mxu3 %v10823_v59  ;;  %3219 = vst [vmem:[#allocation2 + $0x108] sm:$0x11] %v3096_v44  ;;  %v13529_v3 = vld [vmem:[#allocation3 + $0x34] sm:$0xf0]  ;;  %v10700_v10 = vld [vmem:[#allocation3 + $0x38] sm:$0xf0] }
 0x17e   : > { %3335 = vst [vmem:[#allocation3 + $0x120] sm:$0xff] %v14315_v32  ;;  %v10826_v27 = vld [vmem:[#allocation3 + $0x10] sm:$0xf]  ;;  %v13496_v28 = vld [vmem:[#allocation3 + $0x14] sm:$0xf]  ;;  %v3102_v44 = vrot.slane %v3023_v39, 7  ;;  %4902 = vmatpush.bf16.msrb.mxu0 %v13578_v52 }
 0x17f   : > { %3220 = vst [vmem:[#allocation2 + $0x60] sm:$0xee] %v3097_v63  ;;  %v13497_v29 = vld [vmem:[#allocation3 + $0x14] sm:$0xf0]  ;;  %v10828_v30 = vld [vmem:[#allocation3 + $0x18] sm:$0xf0]  ;;  %v2838_v63 = vmul.f32 %v15057_v47, %v2769_v61 }
 0x180   : > { %v3267_v5 = vld [vmem:[#allocation2 + $0x120] sm:$0xff]  ;;  %3221 = vst [vmem:[#allocation2 + $0xe0] sm:$0xff] %v3100_v13  ;;  %v10827_v40 = vor.u32 %v13497_v29, %v10826_v27  ;;  %v10831_v41 = vor.u32 %v13496_v28, %v10828_v30  ;;  %v3103_v57 = vrot.slane %v3102_v44, 4  ;;  %5291 = vmatpush.bf16.msrb.mxu3 %v13617_v33  ;;  %v10844_v62 = vld [vmem:[#allocation3 + $0x38] sm:$0xf0] }
 0x181   : > { %3307 = vst [vmem:[#allocation3 + $0x40] sm:$0xff] %v3267_v5  ;;  %v13586_v54 = vld [vmem:[%s15023_s14 + $0x360] sm:$0xff]  ;;  %v2907_v6 = vadd.f32 %v15065_v51, %v2838_v63  ;;  %v2775_v63 = vld [vmem:[%s15055_s11 + $0xd0] sm:$0xff] }
 0x182   : > { %3310 = vst [vmem:[#allocation3 + $0x58] sm:$0xff] %v3100_v13  ;;  %v13531_v53 = vld [vmem:[#allocation3 + $0x44] sm:$0xf0]  ;;  %v10708_v60 = vld [vmem:[#allocation3 + $0x48] sm:$0xf0]  ;;  %4951 = vmatpush.bf16.msrb.mxu1 %v13586_v54 }
 0x183   : > { %v10698_v19 = vld [vmem:[#allocation3 + $0x30] sm:$0xf]  ;;  %v13528_v20 = vld [vmem:[#allocation3 + $0x34] sm:$0xf]  ;;  %3222 = vst [vmem:[#allocation2 + $0x188] sm:$0x11] %v3101_v15 }
 0x184   : > { %v10699_v21 = vor.u32 %v13529_v3, %v10698_v19  ;;  %v10703_v23 = vor.u32 %v13528_v20, %v10700_v10  ;;  %3336 = vst [vmem:[#allocation3 + $0x128] sm:$0xff] %v14315_v32  ;;  %v13499_v10 = vld [vmem:[#allocation3 + $0x24] sm:$0xf0]  ;;  %v2971_v11 = vmax.f32 %v2907_v6, 0.0  ;;  %v13498_v13 = vld [vmem:[#allocation3 + $0x24] sm:$0xf]  ;;  %v2840_v20 = vmul.f32 %v15057_v47, %v2771_v16 }
 0x185   : > { %3337 = vst [vmem:[#allocation3 + $0x130] sm:$0xff] %v14315_v32  ;;  %v10836_v15 = vld [vmem:[#allocation3 + $0x28] sm:$0xf0]  ;;  %v13500_v61 = vld [vmem:[#allocation3 + $0x34] sm:$0xf] }
 0x186   : > { %4314 = vmatmul.bf16.gmra.mxu0 %v10699_v21  ;;  %4363 = vmatmul.bf16.gmra.mxu1 %v10703_v23  ;;  %v3269_v34 = vld [vmem:[#allocation2 + $0x60] sm:$0xff]  ;;  %3338 = vst [vmem:[#allocation3 + $0x138] sm:$0xff] %v14315_v32  ;;  %v3104_v32 = vrot.slane %v3024_v56, 7  ;;  %v3025_v19 = vpack.c.bf16 %v2972_v12, %v2971_v11  ;;  %v2841_v21 = vmul.f32 %v15060_v48, %v2772_v17  ;;  %v13608_v12 = vld [vmem:[%s15023_s14 + $0x90] sm:$0xff] }
 0x187   : > { %3309 = vst [vmem:[#allocation3 + $0x50] sm:$0xff] %v3269_v34  ;;  %v10835_v23 = vor.u32 %v13499_v10, %v10834_v8  ;;  %v10839_v24 = vor.u32 %v13498_v13, %v10836_v15  ;;  %v2909_v27 = vadd.f32 %v15065_v51, %v2840_v20  ;;  %v13577_v34 = vld [vmem:[%s15023_s14 + $0x318] sm:$0xff]  ;;  %4952 = vmatpush.bf16.msrb.mxu1 %v13585_v36  ;;  %v13616_v13 = vld [vmem:[%s15023_s14 + $0xd0] sm:$0xff] }
 0x188   : > { %3223 = vst [vmem:[#allocation2 + $0x138] sm:$0xee] %v3102_v44  ;;  %v10706_v58 = vld [vmem:[#allocation3 + $0x40] sm:$0xf]  ;;  %v13530_v59 = vld [vmem:[#allocation3 + $0x44] sm:$0xf]  ;;  %v3105_v3 = vsel %vm15109_vm2, %v3103_v57, %v3104_v32  ;;  %v2910_v28 = vadd.f32 %v15071_v55, %v2841_v21  ;;  %4903 = vmatpush.bf16.msrb.mxu0 %v13577_v34  ;;  %v2911_v56 = vadd.f32 %v15065_v51, %v2842_v45 }
 0x189   : > { %v10707_v1 = vor.u32 %v13531_v53, %v10706_v58  ;;  %v10711_v2 = vor.u32 %v13530_v59, %v10708_v60  ;;  %v3106_v4 = vrot.slane %v3104_v32, 4  ;;  %3224 = vst [vmem:[#allocation2 + $0x140] sm:$0xff] %v3105_v3  ;;  %v3107_v26 = vrot.slane %v3025_v19, 7  ;;  %v13533_v35 = vld [vmem:[#allocation3 + $0x54] sm:$0xf0]  ;;  %v2774_v44 = vld [vmem:[%s15055_s11 + $0xc8] sm:$0xff]  ;;  %5243 = vmatpush.bf16.msrb.mxu2 %v13608_v12  ;;  %5292 = vmatpush.bf16.msrb.mxu3 %v13616_v13 }
 0x18a   : > { %3312 = vst [vmem:[#allocation3 + $0x68] sm:$0xff] %v3105_v3  ;;  %v2973_v29 = vmax.f32 %v2909_v27, 0.0  ;;  %v2974_v30 = vmax.f32 %v2910_v28, 0.0  ;;  %v2843_v46 = vmul.f32 %v15060_v48, %v2774_v44  ;;  %v10842_v58 = vld [vmem:[#allocation3 + $0x30] sm:$0xf]  ;;  %v2975_v60 = vmax.f32 %v2911_v56, 0.0 }
 0x18b   : > { %3225 = vst [vmem:[#allocation2 + $0x80] sm:$0x11] %v3106_v4  ;;  %v3108_v38 = vrot.slane %v3107_v26, 4  ;;  %v13501_v59 = vld [vmem:[#allocation3 + $0x34] sm:$0xf0]  ;;  %v2845_v3 = vmul.f32 %v15060_v48, %v2776_v0  ;;  %v13576_v15 = vld [vmem:[%s15023_s14 + $0x310] sm:$0xff] }
 0x18c   : > { %3226 = vst [vmem:[#allocation2 + $0x1a8] sm:$0xee] %v3107_v26  ;;  %v3026_v37 = vpack.c.bf16 %v2974_v30, %v2973_v29  ;;  %v2912_v57 = vadd.f32 %v15071_v55, %v2843_v46  ;;  %v10843_v4 = vor.u32 %v13501_v59, %v10842_v58  ;;  %v13584_v17 = vld [vmem:[%s15023_s14 + $0x350] sm:$0xff]  ;;  %4904 = vmatpush.bf16.msrb.mxu0 %v13576_v15  ;;  %v2777_v27 = vld [vmem:[%s15055_s11 + $0xe0] sm:$0xff]  ;;  %v2778_v28 = vld [vmem:[%s15055_s11 + $0xe8] sm:$0xff] }
 0x18d   : > { %4588 = vmatmul.bf16.gmra.mxu2 %v10827_v40  ;;  %4637 = vmatmul.bf16.gmra.mxu3 %v10831_v41  ;;  %v10716_v41 = vld [vmem:[#allocation3 + $0x58] sm:$0xf0]  ;;  %v2914_v8 = vadd.f32 %v15071_v55, %v2845_v3  ;;  %v2846_v29 = vmul.f32 %v15057_v47, %v2777_v27  ;;  %v2847_v30 = vmul.f32 %v15060_v48, %v2778_v28  ;;  %v13502_v43 = vld [vmem:[#allocation3 + $0x44] sm:$0xf]  ;;  %v10852_v44 = vld [vmem:[#allocation3 + $0x48] sm:$0xf0] }
 0x18e   : > { %v10714_v39 = vld [vmem:[#allocation3 + $0x50] sm:$0xf]  ;;  %v13532_v40 = vld [vmem:[#allocation3 + $0x54] sm:$0xf]  ;;  %v3109_v42 = vrot.slane %v3026_v37, 7  ;;  %v2976_v32 = vmax.f32 %v2912_v57, 0.0  ;;  %4953 = vmatpush.bf16.msrb.mxu1 %v13584_v17 }
 0x18f   : > { %v3271_v5 = vld [vmem:[#allocation2 + $0x138] sm:$0xff]  ;;  %v10715_v49 = vor.u32 %v13533_v35, %v10714_v39  ;;  %v10719_v50 = vor.u32 %v13532_v40, %v10716_v41  ;;  %v2978_v11 = vmax.f32 %v2914_v8, 0.0  ;;  %v2915_v37 = vadd.f32 %v15065_v51, %v2846_v29  ;;  %v10850_v39 = vld [vmem:[#allocation3 + $0x40] sm:$0xf]  ;;  %v13503_v40 = vld [vmem:[#allocation3 + $0x44] sm:$0xf0] }
 0x190   : > { %3311 = vst [vmem:[#allocation3 + $0x60] sm:$0xff] %v3271_v5  ;;  %v3110_v52 = vsel %vm15109_vm2, %v3108_v38, %v3109_v42  ;;  %v3111_v53 = vrot.slane %v3109_v42, 4  ;;  %v10847_v5 = vor.u32 %v13500_v61, %v10844_v62  ;;  %v2916_v38 = vadd.f32 %v15071_v55, %v2847_v30  ;;  %v2779_v45 = vld [vmem:[%s15055_s11 + $0xf0] sm:$0xff]  ;;  %v2780_v46 = vld [vmem:[%s15055_s11 + $0xf8] sm:$0xff]  ;;  %v13615_v61 = vld [vmem:[%s15023_s14 + $0xc8] sm:$0xff] }
 0x191   : > { %3227 = vst [vmem:[#allocation2 + $0x1b8] sm:$0xff] %v3110_v52  ;;  %v13535_v21 = vld [vmem:[#allocation3 + $0x64] sm:$0xf0]  ;;  %v2979_v41 = vmax.f32 %v2915_v37, 0.0  ;;  %5293 = vmatpush.bf16.msrb.mxu3 %v13615_v61  ;;  %v10858_v13 = vld [vmem:[#allocation3 + $0x50] sm:$0xf] }
 0x192   : > { %3314 = vst [vmem:[#allocation3 + $0x78] sm:$0xff] %v3110_v52  ;;  %v2980_v42 = vmax.f32 %v2916_v38, 0.0  ;;  %v2849_v52 = vmul.f32 %v15060_v48, %v2780_v46  ;;  %v13575_v62 = vld [vmem:[%s15023_s14 + $0x308] sm:$0xff]  ;;  %v13505_v15 = vld [vmem:[#allocation3 + $0x54] sm:$0xf0]  ;;  %v13582_v29 = vld [vmem:[%s15023_s14 + $0x340] sm:$0xff] }
 0x193   : > { %v3273_v54 = vld [vmem:[#allocation2 + $0x1a8] sm:$0xff]  ;;  %3228 = vst [vmem:[#allocation2 + $0x28] sm:$0x11] %v3111_v53  ;;  %v10851_v53 = vor.u32 %v13503_v40, %v10850_v39  ;;  %4905 = vmatpush.bf16.msrb.mxu0 %v13575_v62  ;;  %v10860_v17 = vld [vmem:[#allocation3 + $0x58] sm:$0xf0]  ;;  %v14240_v30 = vld [vmem:[#allocation2 + $0xb0] sm:$0xff] }
 0x194   : > { %3313 = vst [vmem:[#allocation3 + $0x70] sm:$0xff] %v3273_v54  ;;  %v10855_v54 = vor.u32 %v13502_v43, %v10852_v44  ;;  %v2918_v58 = vadd.f32 %v15071_v55, %v2849_v52  ;;  %v13583_v0 = vld [vmem:[%s15023_s14 + $0x348] sm:$0xff] }
 0x195   : > { %4954 = vmatpush.bf16.msrb.mxu1 %v13583_v0 }
 0x196   : > { %4319 = vmatmul.bf16.gmra.mxu0 %v10707_v1  ;;  %4368 = vmatmul.bf16.gmra.mxu1 %v10711_v2  ;;  %v3027_v1 = vpack.c.bf16 %v2976_v32, %v2975_v60  ;;  %v2844_v2 = vmul.f32 %v15057_v47, %v2775_v63  ;;  %v2982_v60 = vmax.f32 %v2918_v58, 0.0  ;;  %v13607_v32 = vld [vmem:[%s15023_s14 + $0x88] sm:$0xff] }
 0x197   : > { %v10722_v16 = vld [vmem:[#allocation3 + $0x60] sm:$0xf]  ;;  %5244 = vmatpush.bf16.msrb.mxu2 %v13607_v32  ;;  %v13506_v46 = vld [vmem:[#allocation3 + $0x64] sm:$0xf]  ;;  %v3344_v32 = vld [vmem:[#allocation2 + $0x168] sm:$0x11] }
 0x198   : > { %v3112_v6 = vrot.slane %v3027_v1, 7  ;;  %v2913_v7 = vadd.f32 %v15065_v51, %v2844_v2  ;;  %v10723_v31 = vor.u32 %v13535_v21, %v10722_v16  ;;  %v13504_v16 = vld [vmem:[#allocation3 + $0x54] sm:$0xf]  ;;  %v10866_v44 = vld [vmem:[#allocation3 + $0x60] sm:$0xf]  ;;  %v3474_v62 = vrot.slane %v3344_v32, 5 }
 0x199   : > { %v13537_v3 = vld [vmem:[#allocation3 + $0x74] sm:$0xf0]  ;;  %4955 = vmatpush.bf16.msrb.mxu1 %v13582_v29 }
 0x19a   : > { %3229 = vst [vmem:[#allocation2 + $0xf0] sm:$0xee] %v3112_v6  ;;  %v2977_v10 = vmax.f32 %v2913_v7, 0.0  ;;  %v3113_v20 = vrot.slane %v3112_v6, 4 }
 0x19b   : > { %v10730_v63 = vld [vmem:[#allocation3 + $0x70] sm:$0xf] }
 0x19c   : > { %v3028_v19 = vpack.c.bf16 %v2978_v11, %v2977_v10  ;;  %v10731_v7 = vor.u32 %v13537_v3, %v10730_v63  ;;  %v13645_v3 = vld [vmem:[%s15023_s14 + $0x238] sm:$0xff] }
 0x19d   : > { %4593 = vmatmul.bf16.gmra.mxu2 %v10835_v23  ;;  %4642 = vmatmul.bf16.gmra.mxu3 %v10839_v24  ;;  %v13534_v23 = vld [vmem:[#allocation3 + $0x64] sm:$0xf]  ;;  %v10724_v24 = vld [vmem:[#allocation3 + $0x68] sm:$0xf0] }
 0x19e   : > { %v3114_v26 = vrot.slane %v3028_v19, 7  ;;  %v10727_v33 = vor.u32 %v13534_v23, %v10724_v24  ;;  %v10859_v19 = vor.u32 %v13505_v15, %v10858_v13  ;;  %v13606_v23 = vld [vmem:[%s15023_s14 + $0x80] sm:$0xff] }
 0x19f   : > { %v13614_v24 = vld [vmem:[%s15023_s14 + $0xc0] sm:$0xff]  ;;  %5245 = vmatpush.bf16.msrb.mxu2 %v13606_v23  ;;  %v13559_v23 = vld [vmem:[#allocation3 + $0x44] sm:$0xf0] }
 0x1a0   : > { %v3115_v34 = vsel %vm15109_vm2, %v3113_v20, %v3114_v26  ;;  %v3116_v35 = vrot.slane %v3114_v26, 4  ;;  %v10863_v20 = vor.u32 %v13504_v16, %v10860_v17  ;;  %v13574_v26 = vld [vmem:[%s15023_s14 + $0x300] sm:$0xff]  ;;  %5294 = vmatpush.bf16.msrb.mxu3 %v13614_v24 }
 0x1a1   : > { %v3275_v36 = vld [vmem:[#allocation2 + $0xf0] sm:$0xff]  ;;  %3230 = vst [vmem:[#allocation2 + $0x158] sm:$0xff] %v3115_v34  ;;  %4906 = vmatpush.bf16.msrb.mxu0 %v13574_v26  ;;  %v10978_v17 = vld [vmem:[#allocation3 + $0x40] sm:$0xf]  ;;  %v13558_v24 = vld [vmem:[#allocation3 + $0x44] sm:$0xf] }
 0x1a2   : > { %3315 = vst [vmem:[#allocation3 + $0x80] sm:$0xff] %v3275_v36 }
 0x1a3   : > { %3316 = vst [vmem:[#allocation3 + $0x88] sm:$0xff] %v3115_v34  ;;  %v3339_v34 = vld [vmem:[#allocation2 + $0xb0] sm:$0xee] }
 0x1a4   : > { %3231 = vst [vmem:[#allocation2 + $0x128] sm:$0x11] %v3116_v35  ;;  %v3341_v35 = vld [vmem:[#allocation2 + $0xd8] sm:$0x11]  ;;  %v10616_v36 = vrot.slane %v3339_v34, 9 }
 0x1a5   : > { %v3467_v39 = vrot.slane %v3341_v35, 5  ;;  %5578 = vmatpush.bf16.msra.mxu0 %v13645_v3 }
 0x1a6   : > { %4324 = vmatmul.bf16.gmra.mxu0 %v10715_v49  ;;  %4373 = vmatmul.bf16.gmra.mxu1 %v10719_v50  ;;  %v3029_v49 = vpack.c.bf16 %v2980_v42, %v2979_v41  ;;  %v2848_v50 = vmul.f32 %v15057_v47, %v2779_v45  ;;  %v13507_v45 = vld [vmem:[#allocation3 + $0x64] sm:$0xf0] }
 0x1a8   : > { %v3117_v56 = vrot.slane %v3029_v49, 7  ;;  %v2917_v57 = vadd.f32 %v15065_v51, %v2848_v50  ;;  %v10868_v49 = vld [vmem:[#allocation3 + $0x68] sm:$0xf0]  ;;  %v10867_v50 = vor.u32 %v13507_v45, %v10866_v44 }
 0x1a9   : > { %v10738_v21 = vld [vmem:[#allocation3 + $0x80] sm:$0xf]  ;;  %v13538_v28 = vld [vmem:[#allocation3 + $0x84] sm:$0xf]  ;;  %v10871_v52 = vor.u32 %v13506_v46, %v10868_v49 }
 0x1aa   : > { %3232 = vst [vmem:[#allocation2 + $0x1d8] sm:$0xee] %v3117_v56  ;;  %v2981_v59 = vmax.f32 %v2917_v57, 0.0  ;;  %v3118_v2 = vrot.slane %v3117_v56, 4  ;;  %v13539_v27 = vld [vmem:[#allocation3 + $0x84] sm:$0xf0] }
 0x1ab   : > { %v10739_v40 = vor.u32 %v13539_v27, %v10738_v21  ;;  %v3346_v21 = vld [vmem:[#allocation2 + $0x48] sm:$0xff] }
 0x1ac   : > { %v3030_v1 = vpack.c.bf16 %v2982_v60, %v2981_v59  ;;  %v3342_v60 = vld [vmem:[#allocation2 + $0x18] sm:$0xee]  ;;  %v3478_v26 = vrot.slane %v3346_v21, 5  ;;  %v10980_v27 = vld [vmem:[#allocation3 + $0x48] sm:$0xf0] }
 0x1ad   : > { %4598 = vmatmul.bf16.gmra.mxu2 %v10843_v4  ;;  %4647 = vmatmul.bf16.gmra.mxu3 %v10847_v5  ;;  %v13536_v4 = vld [vmem:[#allocation3 + $0x74] sm:$0xf]  ;;  %v10732_v5 = vld [vmem:[#allocation3 + $0x78] sm:$0xf0]  ;;  %v10617_v61 = vrot.slane %v3342_v60, 9 }
 0x1ae   : > { %v3119_v6 = vrot.slane %v3030_v1, 7  ;;  %v10735_v8 = vor.u32 %v13536_v4, %v10732_v5  ;;  %v13653_v4 = vld [vmem:[%s15023_s14 + $0x278] sm:$0xff]  ;;  %v10874_v5 = vld [vmem:[#allocation3 + $0x70] sm:$0xf]  ;;  %v3480_v29 = vrot.slane %v3478_v26, 4 }
 0x1af   : > { %5627 = vmatpush.bf16.msra.mxu1 %v13653_v4 }
 0x1b0   : > { %v3120_v10 = vsel %vm15109_vm2, %v3118_v2, %v3119_v6  ;;  %v3121_v11 = vrot.slane %v3119_v6, 4  ;;  %v13509_v6 = vld [vmem:[#allocation3 + $0x74] sm:$0xf0] }
 0x1b1   : > { %v3277_v12 = vld [vmem:[#allocation2 + $0x1d8] sm:$0xff]  ;;  %3233 = vst [vmem:[#allocation2 + $0x8] sm:$0xff] %v3120_v10 }
 0x1b2   : > { %3317 = vst [vmem:[#allocation3 + $0x90] sm:$0xff] %v3277_v12 }
 0x1b3   : > { %3318 = vst [vmem:[#allocation3 + $0x98] sm:$0xff] %v3120_v10  ;;  %v3086_v10 = vrot.slane %v3084_v18, 4 }
 0x1b4   : > { %3234 = vst [vmem:[#allocation2 + $0x170] sm:$0x11] %v3121_v11  ;;  %v10875_v11 = vor.u32 %v13509_v6, %v10874_v5 }
 0x1b5   : > { %3213 = vst [vmem:[#allocation2 + $0x180] sm:$0x11] %v3086_v10  ;;  %v13651_v10 = vld [vmem:[%s15023_s14 + $0x268] sm:$0xff] }
 0x1b6   : > { %4329 = vmatmul.bf16.gmra.mxu0 %v10723_v31  ;;  %4378 = vmatmul.bf16.gmra.mxu1 %v10727_v33  ;;  %v3464_v31 = vrot.slane %v14240_v30, 5  ;;  %v10740_v33 = vld [vmem:[#allocation3 + $0x88] sm:$0xf0] }
 0x1b7   : > { %v10743_v41 = vor.u32 %v13538_v28, %v10740_v33  ;;  %v10618_v28 = vrot.slane %v3345_v14, 9  ;;  %v10983_v33 = vor.u32 %v13558_v24, %v10980_v27 }
 0x1b8   : > { %v3466_v37 = vrot.slane %v3464_v31, 4  ;;  %v3465_v42 = vsel %vm15284_vm5, %v10616_v36, %v3464_v31  ;;  %v3472_v1 = vsel %vm15284_vm5, %v10617_v61, %v3464_v31  ;;  %v10979_v31 = vor.u32 %v13559_v23, %v10978_v17  ;;  %v13644_v36 = vld [vmem:[%s15023_s14 + $0x230] sm:$0xff] }
 0x1b9   : > { %3643 = vst [vmem:[#allocation3 + $0x140] sm:$0xff] %v3465_v42  ;;  %v10746_v56 = vld [vmem:[#allocation3 + $0x90] sm:$0xf]  ;;  %v13540_v58 = vld [vmem:[#allocation3 + $0x94] sm:$0xf]  ;;  %v3479_v34 = vsel %vm15284_vm5, %v10618_v28, %v3478_v26  ;;  %5579 = vmatpush.bf16.msra.mxu0 %v13644_v36  ;;  %v10619_v61 = vrot.slane %v3348_v9, 9 }
 0x1ba   : > { %v3468_v43 = vsel %vm15284_vm5, %v3466_v37, %v3467_v39  ;;  %v13541_v57 = vld [vmem:[#allocation3 + $0x94] sm:$0xf0]  ;;  %v10748_v59 = vld [vmem:[#allocation3 + $0x98] sm:$0xf0]  ;;  %v3475_v2 = vsel %vm15284_vm5, %v3466_v37, %v3474_v62  ;;  %3645 = vst [vmem:[#allocation3 + $0x150] sm:$0xff] %v3472_v1  ;;  %v13652_v37 = vld [vmem:[%s15023_s14 + $0x270] sm:$0xff] }
 0x1bb   : > { %3644 = vst [vmem:[#allocation3 + $0x148] sm:$0xff] %v3468_v43  ;;  %v10747_v63 = vor.u32 %v13541_v57, %v10746_v56  ;;  %v10751_v0 = vor.u32 %v13540_v58, %v10748_v59  ;;  %5628 = vmatpush.bf16.msra.mxu1 %v13652_v37  ;;  %v3091_v43 = vrot.slane %v3089_v25, 4  ;;  %v13561_v56 = vld [vmem:[#allocation3 + $0x54] sm:$0xf0]  ;;  %v13560_v57 = vld [vmem:[#allocation3 + $0x54] sm:$0xf] }
 0x1bc   : > { %3646 = vst [vmem:[#allocation3 + $0x158] sm:$0xff] %v3475_v2  ;;  %v3347_v18 = vld [vmem:[#allocation2 + $0x180] sm:$0x11]  ;;  %v10988_v59 = vld [vmem:[#allocation3 + $0x58] sm:$0xf0] }
 0x1bd   : > { %4603 = vmatmul.bf16.gmra.mxu2 %v10851_v53  ;;  %4652 = vmatmul.bf16.gmra.mxu3 %v10855_v54  ;;  %v13677_v53 = vld [vmem:[%s15023_s14 + $0x3b8] sm:$0xff]  ;;  %v3481_v30 = vrot.slane %v3347_v18, 5  ;;  %3647 = vst [vmem:[#allocation3 + $0x160] sm:$0xff] %v3479_v34  ;;  %v10991_v2 = vor.u32 %v13560_v57, %v10988_v59  ;;  %v10994_v28 = vld [vmem:[#allocation3 + $0x60] sm:$0xf] }
 0x1be   : > { %v13685_v54 = vld [vmem:[%s15023_s14 + $0x3f8] sm:$0xff]  ;;  %5918 = vmatpush.bf16.msra.mxu2 %v13677_v53  ;;  %3216 = vst [vmem:[#allocation2 + $0x98] sm:$0x11] %v3091_v43  ;;  %v13683_v53 = vld [vmem:[%s15023_s14 + $0x3e8] sm:$0xff]  ;;  %v13562_v34 = vld [vmem:[#allocation3 + $0x64] sm:$0xf] }
 0x1bf   : > { %5967 = vmatpush.bf16.msra.mxu3 %v13685_v54  ;;  %v3482_v35 = vsel %vm15284_vm5, %v3480_v29, %v3481_v30  ;;  %v3349_v54 = vld [vmem:[#allocation2 + $0x118] sm:$0xff]  ;;  %5629 = vmatpush.bf16.msra.mxu1 %v13651_v10  ;;  %v13674_v29 = vld [vmem:[%s15023_s14 + $0x3a0] sm:$0xff]  ;;  %v10996_v36 = vld [vmem:[#allocation3 + $0x68] sm:$0xf0] }
 0x1c0   : > { %3648 = vst [vmem:[#allocation3 + $0x168] sm:$0xff] %v3482_v35  ;;  %v11138_v39 = vld [vmem:[#allocation3 + $0x140] sm:$0xf]  ;;  %v3485_v58 = vrot.slane %v3349_v54, 5  ;;  %v13681_v10 = vld [vmem:[%s15023_s14 + $0x3d8] sm:$0xff] }
 0x1c1   : > { %v13682_v30 = vld [vmem:[%s15023_s14 + $0x3e0] sm:$0xff] }
 0x1c2   : > { %v11140_v42 = vld [vmem:[#allocation3 + $0x148] sm:$0xf0]  ;;  %v3487_v62 = vrot.slane %v3485_v58, 4  ;;  %v3486_v3 = vsel %vm15284_vm5, %v10619_v61, %v3485_v58  ;;  %v3351_v37 = vld [vmem:[#allocation2 + $0x120] sm:$0xee] }
 0x1c3   : > { %3649 = vst [vmem:[#allocation3 + $0x170] sm:$0xff] %v3486_v3  ;;  %v13642_v57 = vld [vmem:[%s15023_s14 + $0x220] sm:$0xff] }
 0x1c4   : > { %v13650_v58 = vld [vmem:[%s15023_s14 + $0x260] sm:$0xff] }
 0x1c5   : > { %v3350_v25 = vld [vmem:[#allocation2 + $0x98] sm:$0x11]  ;;  %v11154_v9 = vld [vmem:[#allocation3 + $0x160] sm:$0xf]  ;;  %5630 = vmatpush.bf16.msra.mxu1 %v13650_v58 }
 0x1c6   : > { %4334 = vmatmul.bf16.gmra.mxu0 %v10731_v7  ;;  %4383 = vmatmul.bf16.gmra.mxu1 %v10735_v8  ;;  %v13508_v7 = vld [vmem:[#allocation3 + $0x74] sm:$0xf]  ;;  %v10876_v8 = vld [vmem:[#allocation3 + $0x78] sm:$0xf0] }
 0x1c7   : > { %v10879_v12 = vor.u32 %v13508_v7, %v10876_v8  ;;  %v13643_v8 = vld [vmem:[%s15023_s14 + $0x228] sm:$0xff] }
 0x1c8   : > { %5580 = vmatpush.bf16.msra.mxu0 %v13643_v8  ;;  %v13673_v8 = vld [vmem:[%s15023_s14 + $0x398] sm:$0xff] }
 0x1cc   : > { %5581 = vmatpush.bf16.msra.mxu0 %v13642_v57  ;;  %v2784_v57 = vld [vmem:[%s15055_s11 + $0x118] sm:$0xff] }
 0x1cd   : > { %4608 = vmatmul.bf16.gmra.mxu2 %v10859_v19  ;;  %4657 = vmatmul.bf16.gmra.mxu3 %v10863_v20  ;;  %v13676_v19 = vld [vmem:[%s15023_s14 + $0x3b0] sm:$0xff] }
 0x1ce   : > { %v13684_v20 = vld [vmem:[%s15023_s14 + $0x3f0] sm:$0xff]  ;;  %5919 = vmatpush.bf16.msra.mxu2 %v13676_v19 }
 0x1cf   : > { %5968 = vmatpush.bf16.msra.mxu3 %v13684_v20 }
 0x1d3   : > { %5969 = vmatpush.bf16.msra.mxu3 %v13683_v53 }
 0x1d6   : > { %4339 = vmatmul.bf16.gmra.mxu0 %v10739_v40  ;;  %4388 = vmatmul.bf16.gmra.mxu1 %v10743_v41  ;;  %v13590_v40 = vld [vmem:[#allocation3 + $0x144] sm:$0xf]  ;;  %v13591_v41 = vld [vmem:[#allocation3 + $0x144] sm:$0xf0] }
 0x1d7   : > { %v11139_v44 = vor.u32 %v13591_v41, %v11138_v39  ;;  %v11143_v45 = vor.u32 %v13590_v40, %v11140_v42  ;;  %5970 = vmatpush.bf16.msra.mxu3 %v13682_v30  ;;  %v3353_v39 = vld [vmem:[#allocation2 + $0x108] sm:$0x11]  ;;  %v10620_v42 = vrot.slane %v3351_v37, 9 }
 0x1db   : > { %5971 = vmatpush.bf16.msra.mxu3 %v13681_v10 }
 0x1dd   : > { %4613 = vmatmul.bf16.gmra.mxu2 %v10867_v50  ;;  %4662 = vmatmul.bf16.gmra.mxu3 %v10871_v52  ;;  %v10986_v50 = vld [vmem:[#allocation3 + $0x50] sm:$0xf]  ;;  %v13675_v52 = vld [vmem:[%s15023_s14 + $0x3a8] sm:$0xff] }
 0x1de   : > { %5920 = vmatpush.bf16.msra.mxu2 %v13675_v52  ;;  %v10987_v1 = vor.u32 %v13561_v56, %v10986_v50 }
 0x1e2   : > { %5921 = vmatpush.bf16.msra.mxu2 %v13674_v29 }
 0x1e6   : > { %4344 = vmatmul.bf16.gmra.mxu0 %v10747_v63  ;;  %4393 = vmatmul.bf16.gmra.mxu1 %v10751_v0  ;;  %v3488_v63 = vrot.slane %v3350_v25, 5  ;;  %v13595_v25 = vld [vmem:[#allocation3 + $0x164] sm:$0xf0] }
 0x1e7   : > { %5922 = vmatpush.bf16.msra.mxu2 %v13673_v8 }
 0x1e8   : > { %v3489_v4 = vsel %vm15284_vm5, %v3487_v62, %v3488_v63 }
 0x1e9   : > { %3650 = vst [vmem:[#allocation3 + $0x178] sm:$0xff] %v3489_v4 }
 0x1eb   : > { %v4310_v13 = vpop.f32.mrf.mxu0  ;;  %v4359_v15 = vpop.f32.mrf.mxu1 }
 0x1ec   : > { %v4360_v16 = vadd.f32 %v4359_v15, %v4310_v13  ;;  %v13593_v13 = vld [vmem:[#allocation3 + $0x154] sm:$0xf0]  ;;  %v13592_v15 = vld [vmem:[#allocation3 + $0x154] sm:$0xf] }
 0x1ed   : > { %4618 = vmatmul.bf16.gmra.mxu2 %v10875_v11  ;;  %4667 = vmatmul.bf16.gmra.mxu3 %v10879_v12  ;;  %v11146_v12 = vld [vmem:[#allocation3 + $0x150] sm:$0xf] }
 0x1ee   : > { %v11147_v23 = vor.u32 %v13593_v13, %v11146_v12  ;;  %v13565_v12 = vld [vmem:[#allocation3 + $0x74] sm:$0xf0]  ;;  %v13564_v13 = vld [vmem:[#allocation3 + $0x74] sm:$0xf] }
 0x1f3   : > { %v4312_v46 = vpop.f32.mrf.mxu0  ;;  %v4361_v49 = vpop.f32.mrf.mxu1 }
 0x1f4   : > { %v4362_v17 = vadd.f32 %v4361_v49, %v4312_v46  ;;  %v10999_v49 = vor.u32 %v13562_v34, %v10996_v36 }
 0x1f6   : > { %4907 = vmatmul.bf16.vlgmr.msrb.gmra.mxu0 %v10979_v31  ;;  %4956 = vmatmul.bf16.vlgmr.msrb.gmra.mxu1 %v10983_v33  ;;  %v3352_v31 = vld [vmem:[#allocation2 + $0x150] sm:$0xff]  ;;  %v13563_v33 = vld [vmem:[#allocation3 + $0x64] sm:$0xf0] }
 0x1f7   : > { %v3492_v35 = vrot.slane %v3352_v31, 5  ;;  %v10995_v46 = vor.u32 %v13563_v33, %v10994_v28 }
 0x1f9   : > { %v3494_v43 = vrot.slane %v3492_v35, 4  ;;  %v3493_v50 = vsel %vm15284_vm5, %v10620_v42, %v3492_v35 }
 0x1fa   : > { %3651 = vst [vmem:[#allocation3 + $0x180] sm:$0xff] %v3493_v50  ;;  %v13597_v50 = vld [vmem:[#allocation3 + $0x174] sm:$0xf0] }
 0x1fd   : > { %5246 = vmatmul.bf16.vlgmr.msrb.gmra.mxu2 %v11139_v44  ;;  %5295 = vmatmul.bf16.vlgmr.msrb.gmra.mxu3 %v11143_v45  ;;  %v3495_v44 = vrot.slane %v3353_v39, 5 }
 0x1ff   : > { %v3496_v52 = vsel %vm15284_vm5, %v3494_v43, %v3495_v44 }
 0x200   : > { %v4584_v60 = vpop.f32.mrf.mxu2  ;;  %v4633_v32 = vpop.f32.mrf.mxu3  ;;  %3652 = vst [vmem:[#allocation3 + $0x188] sm:$0xff] %v3496_v52  ;;  %v13596_v52 = vld [vmem:[#allocation3 + $0x174] sm:$0xf] }
 0x201   : > { %v4585_v0 = vadd.f32 %v4584_v60, %v4360_v16  ;;  %v11148_v16 = vld [vmem:[#allocation3 + $0x158] sm:$0xf0]  ;;  %v13594_v60 = vld [vmem:[#allocation3 + $0x164] sm:$0xf] }
 0x202   : > { %v11151_v24 = vor.u32 %v13592_v15, %v11148_v16  ;;  %v11004_v16 = vld [vmem:[#allocation3 + $0x78] sm:$0xf0] }
 0x203   : > { %v15318_v5 = vadd.f32 %v4633_v32, %v4585_v0  ;;  %v4315_v6 = vpop.f32.mrf.mxu0  ;;  %v4364_v7 = vpop.f32.mrf.mxu1  ;;  %v11156_v32 = vld [vmem:[#allocation3 + $0x168] sm:$0xf0]  ;;  %v11155_v0 = vor.u32 %v13595_v25, %v11154_v9  ;;  %v11007_v33 = vor.u32 %v13564_v13, %v11004_v16  ;;  %v13680_v13 = vld [vmem:[%s15023_s14 + $0x3d0] sm:$0xff]  ;;  %v13567_v16 = vld [vmem:[#allocation3 + $0x84] sm:$0xf0] }
 0x204   : > { %v4365_v11 = vadd.f32 %v4364_v7, %v4315_v6  ;;  %v11002_v7 = vld [vmem:[#allocation3 + $0x70] sm:$0xf]  ;;  %5972 = vmatpush.bf16.msra.mxu3 %v13680_v13 }
 0x205   : > { %v11003_v31 = vor.u32 %v13565_v12, %v11002_v7  ;;  %v13672_v12 = vld [vmem:[%s15023_s14 + $0x390] sm:$0xff] }
 0x206   : > { %4912 = vmatmul.bf16.gmra.mxu0 %v10987_v1  ;;  %4961 = vmatmul.bf16.gmra.mxu1 %v10991_v2  ;;  %v11159_v1 = vor.u32 %v13594_v60, %v11156_v32  ;;  %v2853_v60 = vmul.f32 %v15060_v48, %v2784_v57  ;;  %v11170_v57 = vld [vmem:[#allocation3 + $0x180] sm:$0xf] }
 0x207   : > { %5923 = vmatpush.bf16.msra.mxu2 %v13672_v12 }
 0x208   : > { %v4586_v19 = vpop.f32.mrf.mxu2  ;;  %v4635_v20 = vpop.f32.mrf.mxu3 }
 0x209   : > { %v4587_v21 = vadd.f32 %v4586_v19, %v4362_v17  ;;  %v3354_v17 = vld [vmem:[#allocation2 + $0x60] sm:$0xee]  ;;  %v3356_v19 = vld [vmem:[#allocation2 + $0x188] sm:$0x11] }
 0x20b   : > { %v15322_v26 = vadd.f32 %v4635_v20, %v4587_v21  ;;  %v4317_v27 = vpop.f32.mrf.mxu0  ;;  %v4366_v14 = vpop.f32.mrf.mxu1 }
 0x20c   : > { %v4367_v18 = vadd.f32 %v4366_v14, %v4317_v27  ;;  %v3502_v27 = vrot.slane %v3356_v19, 5  ;;  %v2781_v14 = vld [vmem:[%s15055_s11 + $0x100] sm:$0xff] }
 0x20d   : > { %5251 = vmatmul.bf16.gmra.mxu2 %v11147_v23  ;;  %5300 = vmatmul.bf16.gmra.mxu3 %v11151_v24  ;;  %v10621_v23 = vrot.slane %v3354_v17, 9  ;;  %v2850_v29 = vmul.f32 %v15057_v47, %v2781_v14  ;;  %v13566_v17 = vld [vmem:[#allocation3 + $0x84] sm:$0xf] }
 0x20f   : > { %v2919_v42 = vadd.f32 %v15065_v51, %v2850_v29 }
 0x210   : > { %v4589_v40 = vpop.f32.mrf.mxu2  ;;  %v4638_v41 = vpop.f32.mrf.mxu3 }
 0x211   : > { %v4590_v45 = vadd.f32 %v4589_v40, %v4365_v11  ;;  %v3355_v11 = vld [vmem:[#allocation2 + $0xe0] sm:$0xff]  ;;  %v13641_v40 = vld [vmem:[%s15023_s14 + $0x218] sm:$0xff] }
 0x212   : > { %v3499_v15 = vrot.slane %v3355_v11, 5  ;;  %5582 = vmatpush.bf16.msra.mxu0 %v13641_v40  ;;  %v11010_v11 = vld [vmem:[#allocation3 + $0x80] sm:$0xf] }
 0x213   : > { %v15330_v53 = vadd.f32 %v4638_v41, %v4590_v45  ;;  %v4320_v54 = vpop.f32.mrf.mxu0  ;;  %v4369_v56 = vpop.f32.mrf.mxu1  ;;  %v13649_v41 = vld [vmem:[%s15023_s14 + $0x258] sm:$0xff]  ;;  %v11162_v45 = vld [vmem:[#allocation3 + $0x170] sm:$0xf]  ;;  %v11011_v40 = vor.u32 %v13567_v16, %v11010_v11 }
 0x214   : > { %v4370_v59 = vadd.f32 %v4369_v56, %v4320_v54  ;;  %v3501_v24 = vrot.slane %v3499_v15, 4  ;;  %v3500_v34 = vsel %vm15284_vm5, %v10621_v23, %v3499_v15  ;;  %5631 = vmatpush.bf16.msra.mxu1 %v13649_v41  ;;  %v11164_v54 = vld [vmem:[#allocation3 + $0x178] sm:$0xf0]  ;;  %v2783_v56 = vld [vmem:[%s15055_s11 + $0x110] sm:$0xff]  ;;  %v3358_v15 = vld [vmem:[#allocation2 + $0x140] sm:$0xff] }
 0x215   : > { %3653 = vst [vmem:[#allocation3 + $0x190] sm:$0xff] %v3500_v34  ;;  %v2852_v25 = vmul.f32 %v15057_v47, %v2783_v56  ;;  %v3506_v19 = vrot.slane %v3358_v15, 5  ;;  %v3357_v23 = vld [vmem:[#allocation2 + $0x138] sm:$0xee] }
 0x216   : > { %4917 = vmatmul.bf16.gmra.mxu0 %v10995_v46  ;;  %4966 = vmatmul.bf16.gmra.mxu1 %v10999_v49  ;;  %v3503_v35 = vsel %vm15284_vm5, %v3501_v24, %v3502_v27  ;;  %v2983_v46 = vmax.f32 %v2919_v42, 0.0  ;;  %v3359_v24 = vld [vmem:[#allocation2 + $0x80] sm:$0x11] }
 0x217   : > { %3654 = vst [vmem:[#allocation3 + $0x198] sm:$0xff] %v3503_v35  ;;  %v3508_v29 = vrot.slane %v3506_v19, 4 }
 0x218   : > { %v4591_v61 = vpop.f32.mrf.mxu2  ;;  %v4640_v62 = vpop.f32.mrf.mxu3 }
 0x219   : > { %v4592_v63 = vadd.f32 %v4591_v61, %v4367_v18  ;;  %v2782_v18 = vld [vmem:[%s15055_s11 + $0x108] sm:$0xff]  ;;  %v11163_v61 = vor.u32 %v13597_v50, %v11162_v45  ;;  %v13648_v50 = vld [vmem:[%s15023_s14 + $0x250] sm:$0xff] }
 0x21a   : > { %v2851_v30 = vmul.f32 %v15060_v48, %v2782_v18  ;;  %5632 = vmatpush.bf16.msra.mxu1 %v13648_v50 }
 0x21b   : > { %v15334_v2 = vadd.f32 %v4640_v62, %v4592_v63  ;;  %v4322_v3 = vpop.f32.mrf.mxu0  ;;  %v4371_v4 = vpop.f32.mrf.mxu1  ;;  %v11167_v62 = vor.u32 %v13596_v52, %v11164_v54 }
 0x21c   : > { %v4372_v6 = vadd.f32 %v4371_v4, %v4322_v3  ;;  %v2920_v43 = vadd.f32 %v15071_v55, %v2851_v30  ;;  %v3509_v30 = vrot.slane %v3359_v24, 5 }
 0x21d   : > { %5256 = vmatmul.bf16.gmra.mxu2 %v11155_v0  ;;  %5305 = vmatmul.bf16.gmra.mxu3 %v11159_v1  ;;  %v2921_v0 = vadd.f32 %v15065_v51, %v2852_v25  ;;  %v2922_v1 = vadd.f32 %v15071_v55, %v2853_v60 }
 0x21e   : > { %v2984_v49 = vmax.f32 %v2920_v43, 0.0 }
 0x21f   : > { %v2985_v10 = vmax.f32 %v2921_v0, 0.0 }
 0x220   : > { %v4594_v20 = vpop.f32.mrf.mxu2  ;;  %v4643_v21 = vpop.f32.mrf.mxu3  ;;  %v3031_v58 = vpack.c.bf16 %v2984_v49, %v2983_v46  ;;  %v13640_v49 = vld [vmem:[%s15023_s14 + $0x210] sm:$0xff] }
 0x221   : > { %v4595_v28 = vadd.f32 %v4594_v20, %v4370_v59  ;;  %v11012_v20 = vld [vmem:[#allocation3 + $0x88] sm:$0xf0]  ;;  %5583 = vmatpush.bf16.msra.mxu0 %v13640_v49 }
 0x222   : > { %v3122_v63 = vrot.slane %v3031_v58, 7  ;;  %v11015_v41 = vor.u32 %v13566_v17, %v11012_v20 }
 0x223   : > { %v15346_v36 = vadd.f32 %v4643_v21, %v4595_v28  ;;  %v4325_v37 = vpop.f32.mrf.mxu0  ;;  %v4374_v39 = vpop.f32.mrf.mxu1  ;;  %v10622_v28 = vrot.slane %v3357_v23, 9 }
 0x224   : > { %v4375_v44 = vadd.f32 %v4374_v39, %v4325_v37  ;;  %3235 = vst [vmem:[#allocation2 + $0xc0] sm:$0xee] %v3122_v63  ;;  %v3123_v18 = vrot.slane %v3122_v63, 4  ;;  %v2788_v63 = vld [vmem:[%s15055_s11 + $0x138] sm:$0xff] }
 0x225   : > { %v3507_v42 = vsel %vm15284_vm5, %v10622_v28, %v3506_v19  ;;  %v13568_v28 = vld [vmem:[#allocation3 + $0x94] sm:$0xf] }
 0x226   : > { %4922 = vmatmul.bf16.gmra.mxu0 %v11003_v31  ;;  %4971 = vmatmul.bf16.gmra.mxu1 %v11007_v33  ;;  %v2785_v31 = vld [vmem:[%s15055_s11 + $0x120] sm:$0xff]  ;;  %v2786_v33 = vld [vmem:[%s15055_s11 + $0x128] sm:$0xff]  ;;  %3655 = vst [vmem:[#allocation3 + $0x1a0] sm:$0xff] %v3507_v42 }
 0x227   : > { %v2854_v37 = vmul.f32 %v15057_v47, %v2785_v31  ;;  %v2855_v39 = vmul.f32 %v15060_v48, %v2786_v33  ;;  %v3360_v33 = vld [vmem:[#allocation2 + $0x1a8] sm:$0xee] }
 0x228   : > { %v4596_v59 = vpop.f32.mrf.mxu2  ;;  %v4645_v9 = vpop.f32.mrf.mxu3 }
 0x229   : > { %v4597_v32 = vadd.f32 %v4596_v59, %v4372_v6  ;;  %v2986_v6 = vmax.f32 %v2922_v1, 0.0  ;;  %v2923_v52 = vadd.f32 %v15065_v51, %v2854_v37  ;;  %v2924_v54 = vadd.f32 %v15071_v55, %v2855_v39  ;;  %v3362_v37 = vld [vmem:[#allocation2 + $0x28] sm:$0x11] }
 0x22a   : > { %v3510_v59 = vsel %vm15284_vm5, %v3508_v29, %v3509_v30  ;;  %v11020_v29 = vld [vmem:[#allocation3 + $0x98] sm:$0xf0]  ;;  %v13679_v30 = vld [vmem:[%s15023_s14 + $0x3c8] sm:$0xff]  ;;  %v3516_v50 = vrot.slane %v3362_v37, 5 }
 0x22b   : > { %v15358_v3 = vadd.f32 %v4645_v9, %v4597_v32  ;;  %v4327_v4 = vpop.f32.mrf.mxu0  ;;  %v4376_v7 = vpop.f32.mrf.mxu1  ;;  %v15364_v21 = vpack.c.bf16 %v2986_v6, %v2985_v10  ;;  %v3279_v58 = vld [vmem:[#allocation2 + $0xc0] sm:$0xff]  ;;  %v13599_v9 = vld [vmem:[#allocation3 + $0x184] sm:$0xf0]  ;;  %v2987_v25 = vmax.f32 %v2923_v52, 0.0  ;;  %v2988_v60 = vmax.f32 %v2924_v54, 0.0  ;;  %3656 = vst [vmem:[#allocation3 + $0x1a8] sm:$0xff] %v3510_v59  ;;  %5973 = vmatpush.bf16.msra.mxu3 %v13679_v30 }
 0x22c   : > { %v15360_v8 = vadd.f32 %v4376_v7, %v4327_v4  ;;  %3319 = vst [vmem:[#allocation3 + $0xa0] sm:$0xff] %v3279_v58  ;;  %v13598_v32 = vld [vmem:[#allocation3 + $0x184] sm:$0xf]  ;;  %v2857_v10 = vmul.f32 %v15060_v48, %v2788_v63  ;;  %v11171_v12 = vor.u32 %v13599_v9, %v11170_v57  ;;  %v11023_v54 = vor.u32 %v13568_v28, %v11020_v29 }
 0x22d   : > { %5261 = vmatmul.bf16.gmra.mxu2 %v11163_v61  ;;  %5310 = vmatmul.bf16.gmra.mxu3 %v11167_v62  ;;  %v3124_v35 = vrot.slane %v15364_v21, 7  ;;  %v11172_v61 = vld [vmem:[#allocation3 + $0x188] sm:$0xf0]  ;;  %v2787_v62 = vld [vmem:[%s15055_s11 + $0x130] sm:$0xff]  ;;  %v3033_v0 = vpack.c.bf16 %v2988_v60, %v2987_v25 }
 0x22e   : > { %v2856_v7 = vmul.f32 %v15057_v47, %v2787_v62  ;;  %v11175_v13 = vor.u32 %v13598_v32, %v11172_v61  ;;  %v2926_v16 = vadd.f32 %v15071_v55, %v2857_v10  ;;  %v13639_v32 = vld [vmem:[%s15023_s14 + $0x208] sm:$0xff] }
 0x22f   : > { %v3127_v6 = vrot.slane %v3033_v0, 7  ;;  %v13647_v61 = vld [vmem:[%s15023_s14 + $0x248] sm:$0xff]  ;;  %v11178_v0 = vld [vmem:[#allocation3 + $0x190] sm:$0xf]  ;;  %5584 = vmatpush.bf16.msra.mxu0 %v13639_v32 }
 0x230   : > { %v4599_v27 = vpop.f32.mrf.mxu2  ;;  %v4648_v14 = vpop.f32.mrf.mxu3  ;;  %v2925_v15 = vadd.f32 %v15065_v51, %v2856_v7  ;;  %5633 = vmatpush.bf16.msra.mxu1 %v13647_v61  ;;  %v11180_v7 = vld [vmem:[#allocation3 + $0x198] sm:$0xf0] }
 0x231   : > { %v4600_v34 = vadd.f32 %v4599_v27, %v4375_v44  ;;  %v15381_v44 = vsel %vm15109_vm2, %v3123_v18, %v3124_v35  ;;  %3238 = vst [vmem:[#allocation2 + $0x1d0] sm:$0xee] %v3127_v6  ;;  %v2990_v27 = vmax.f32 %v2926_v16, 0.0  ;;  %v13671_v18 = vld [vmem:[%s15023_s14 + $0x388] sm:$0xff] }
 0x232   : > { %3236 = vst [vmem:[#allocation2 + $0xa0] sm:$0xff] %v15381_v44  ;;  %v2989_v24 = vmax.f32 %v2925_v15, 0.0  ;;  %5924 = vmatpush.bf16.msra.mxu2 %v13671_v18 }
 0x233   : > { %v15373_v43 = vadd.f32 %v4648_v14, %v4600_v34  ;;  %v4330_v45 = vpop.f32.mrf.mxu0  ;;  %v4379_v46 = vpop.f32.mrf.mxu1  ;;  %3320 = vst [vmem:[#allocation3 + $0xa8] sm:$0xff] %v15381_v44  ;;  %v13569_v14 = vld [vmem:[#allocation3 + $0x94] sm:$0xf0]  ;;  %v13570_v18 = vld [vmem:[#allocation3 + $0xa4] sm:$0xf] }
 0x234   : > { %v4380_v56 = vadd.f32 %v4379_v46, %v4330_v45  ;;  %v15400_v31 = vpack.c.bf16 %v2990_v27, %v2989_v24  ;;  %v3361_v34 = vld [vmem:[#allocation2 + $0x1b8] sm:$0xff]  ;;  %v10623_v45 = vrot.slane %v3360_v33, 9  ;;  %v13670_v24 = vld [vmem:[%s15023_s14 + $0x380] sm:$0xff] }
 0x235   : > { %v3513_v46 = vrot.slane %v3361_v34, 5  ;;  %v11026_v27 = vld [vmem:[#allocation3 + $0xa0] sm:$0xf] }
 0x236   : > { %4927 = vmatmul.bf16.gmra.mxu0 %v11011_v40  ;;  %4976 = vmatmul.bf16.gmra.mxu1 %v11015_v41  ;;  %v3128_v41 = vrot.slane %v3127_v6, 4  ;;  %v3129_v42 = vrot.slane %v15400_v31, 7 }
 0x237   : > { %v3515_v59 = vrot.slane %v3513_v46, 4  ;;  %5925 = vmatpush.bf16.msra.mxu2 %v13670_v24 }
 0x238   : > { %v4601_v1 = vpop.f32.mrf.mxu2  ;;  %v4650_v4 = vpop.f32.mrf.mxu3  ;;  %v15407_v57 = vsel %vm15109_vm2, %v3128_v41, %v3129_v42  ;;  %v3281_v58 = vld [vmem:[#allocation2 + $0x1d0] sm:$0xff]  ;;  %v13638_v41 = vld [vmem:[%s15023_s14 + $0x200] sm:$0xff] }
 0x239   : > { %v4602_v11 = vadd.f32 %v4601_v1, %v15360_v8  ;;  %v11018_v8 = vld [vmem:[#allocation3 + $0x90] sm:$0xf]  ;;  %3239 = vst [vmem:[#allocation2 + $0x100] sm:$0xff] %v15407_v57  ;;  %v3517_v63 = vsel %vm15284_vm5, %v3515_v59, %v3516_v50  ;;  %v13601_v1 = vld [vmem:[#allocation3 + $0x194] sm:$0xf0]  ;;  %5585 = vmatpush.bf16.msra.mxu0 %v13638_v41 }
 0x23a   : > { %v11019_v52 = vor.u32 %v13569_v14, %v11018_v8  ;;  %3321 = vst [vmem:[#allocation3 + $0xb0] sm:$0xff] %v3281_v58  ;;  %v13678_v8 = vld [vmem:[%s15023_s14 + $0x3c0] sm:$0xff]  ;;  %v13571_v14 = vld [vmem:[#allocation3 + $0xa4] sm:$0xf0]  ;;  %v11028_v28 = vld [vmem:[#allocation3 + $0xa8] sm:$0xf0] }
 0x23b   : > { %v15396_v17 = vadd.f32 %v4650_v4, %v4602_v11  ;;  %v4332_v19 = vpop.f32.mrf.mxu0  ;;  %v4381_v20 = vpop.f32.mrf.mxu1  ;;  %3322 = vst [vmem:[#allocation3 + $0xb8] sm:$0xff] %v15407_v57  ;;  %v13600_v4 = vld [vmem:[#allocation3 + $0x194] sm:$0xf]  ;;  %5974 = vmatpush.bf16.msra.mxu3 %v13678_v8  ;;  %v11027_v33 = vor.u32 %v13571_v14, %v11026_v27  ;;  %v11031_v34 = vor.u32 %v13570_v18, %v11028_v28  ;;  %v13603_v50 = vld [vmem:[#allocation3 + $0x1a4] sm:$0xf0]  ;;  %v13709_v8 = vld [vmem:[%s15023_s14 + $0x138] sm:$0xff] }
 0x23c   : > { %v4382_v23 = vadd.f32 %v4381_v20, %v4332_v19  ;;  %3658 = vst [vmem:[#allocation3 + $0x1b8] sm:$0xff] %v3517_v63  ;;  %v11183_v6 = vor.u32 %v13600_v4, %v11180_v7  ;;  %v13717_v14 = vld [vmem:[%s15023_s14 + $0x178] sm:$0xff] }
 0x23d   : > { %5266 = vmatmul.bf16.gmra.mxu2 %v11171_v12  ;;  %5315 = vmatmul.bf16.gmra.mxu3 %v11175_v13  ;;  %v11179_v13 = vor.u32 %v13601_v1, %v11178_v0  ;;  %v13741_v0 = vld [vmem:[%s15023_s14 + $0x2b8] sm:$0xff] }
 0x23e   : > { %v13749_v1 = vld [vmem:[%s15023_s14 + $0x2f8] sm:$0xff]  ;;  %6597 = vmatpush.bf16.msrb.mxu2 %v13741_v0  ;;  %6257 = vmatpush.bf16.msrb.mxu0 %v13709_v8 }
 0x23f   : > { %6646 = vmatpush.bf16.msrb.mxu3 %v13749_v1 }
 0x240   : > { %v4604_v39 = vpop.f32.mrf.mxu2  ;;  %v4653_v40 = vpop.f32.mrf.mxu3 }
 0x241   : > { %v4605_v49 = vadd.f32 %v4604_v39, %v4380_v56  ;;  %v3514_v56 = vsel %vm15284_vm5, %v10623_v45, %v3513_v46  ;;  %v13646_v45 = vld [vmem:[%s15023_s14 + $0x240] sm:$0xff]  ;;  %v11034_v4 = vld [vmem:[#allocation3 + $0xb0] sm:$0xf] }
 0x242   : > { %3657 = vst [vmem:[#allocation3 + $0x1b0] sm:$0xff] %v3514_v56  ;;  %5634 = vmatpush.bf16.msra.mxu1 %v13646_v45  ;;  %v13573_v7 = vld [vmem:[#allocation3 + $0xb4] sm:$0xf0] }
 0x243   : > { %v15409_v9 = vadd.f32 %v4653_v40, %v4605_v49  ;;  %v4335_v25 = vpop.f32.mrf.mxu0  ;;  %v4384_v60 = vpop.f32.mrf.mxu1  ;;  %v11186_v49 = vld [vmem:[#allocation3 + $0x1a0] sm:$0xf] }
 0x244   : > { %v4385_v62 = vadd.f32 %v4384_v60, %v4335_v25  ;;  %v11187_v60 = vor.u32 %v13603_v50, %v11186_v49 }
 0x246   : > { %4932 = vmatmul.bf16.gmra.mxu0 %v11019_v52  ;;  %4981 = vmatmul.bf16.gmra.mxu1 %v11023_v54  ;;  %v13602_v52 = vld [vmem:[#allocation3 + $0x1a4] sm:$0xf]  ;;  %v11188_v54 = vld [vmem:[#allocation3 + $0x1a8] sm:$0xf0] }
 0x247   : > { %v11191_v32 = vor.u32 %v13602_v52, %v11188_v54  ;;  %6306 = vmatpush.bf16.msrb.mxu1 %v13717_v14  ;;  %v13740_v52 = vld [vmem:[%s15023_s14 + $0x2b0] sm:$0xff] }
 0x248   : > { %v4606_v10 = vpop.f32.mrf.mxu2  ;;  %v4655_v11 = vpop.f32.mrf.mxu3  ;;  %v13748_v54 = vld [vmem:[%s15023_s14 + $0x2f0] sm:$0xff]  ;;  %6598 = vmatpush.bf16.msrb.mxu2 %v13740_v52 }
 0x249   : > { %v4607_v12 = vadd.f32 %v4606_v10, %v4382_v23  ;;  %v13572_v10 = vld [vmem:[#allocation3 + $0xb4] sm:$0xf]  ;;  %v11194_v28 = vld [vmem:[#allocation3 + $0x1b0] sm:$0xf]  ;;  %6647 = vmatpush.bf16.msrb.mxu3 %v13748_v54 }
 0x24b   : > { %v15419_v15 = vadd.f32 %v4655_v11, %v4607_v12  ;;  %v4337_v16 = vpop.f32.mrf.mxu0  ;;  %v4386_v19 = vpop.f32.mrf.mxu1  ;;  %v11036_v11 = vld [vmem:[#allocation3 + $0xb8] sm:$0xf0] }
 0x24c   : > { %v4387_v20 = vadd.f32 %v4386_v19, %v4337_v16  ;;  %v11035_v16 = vor.u32 %v13573_v7, %v11034_v4  ;;  %v11039_v19 = vor.u32 %v13572_v10, %v11036_v11  ;;  %v13708_v10 = vld [vmem:[%s15023_s14 + $0x130] sm:$0xff] }
 0x24d   : > { %5271 = vmatmul.bf16.gmra.mxu2 %v11179_v13  ;;  %5320 = vmatmul.bf16.gmra.mxu3 %v11183_v6  ;;  %v13716_v11 = vld [vmem:[%s15023_s14 + $0x170] sm:$0xff] }
 0x24e   : > { %6258 = vmatpush.bf16.msrb.mxu0 %v13708_v10  ;;  %6307 = vmatpush.bf16.msrb.mxu1 %v13716_v11  ;;  %v11468_v10 = vld [vmem:[#allocation3 + $0x198] sm:$0xf0] }
 0x250   : > { %v4609_v29 = vpop.f32.mrf.mxu2  ;;  %v4658_v23 = vpop.f32.mrf.mxu3 }
 0x251   : > { %v4610_v30 = vadd.f32 %v4609_v29, %v4385_v62  ;;  %v13605_v29 = vld [vmem:[#allocation3 + $0x1b4] sm:$0xf0] }
 0x253   : > { %v15423_v37 = vadd.f32 %v4658_v23, %v4610_v30  ;;  %v4340_v39 = vpop.f32.mrf.mxu0  ;;  %v4389_v40 = vpop.f32.mrf.mxu1  ;;  %v13604_v23 = vld [vmem:[#allocation3 + $0x1b4] sm:$0xf]  ;;  %v11196_v30 = vld [vmem:[#allocation3 + $0x1b8] sm:$0xf0] }
 0x254   : > { %v4390_v46 = vadd.f32 %v4389_v40, %v4340_v39  ;;  %v11195_v40 = vor.u32 %v13605_v29, %v11194_v28  ;;  %v11199_v41 = vor.u32 %v13604_v23, %v11196_v30 }
 0x256   : > { %4937 = vmatmul.bf16.gmra.mxu0 %v11027_v33  ;;  %4986 = vmatmul.bf16.gmra.mxu1 %v11031_v34 }
 0x258   : > { %v4611_v58 = vpop.f32.mrf.mxu2  ;;  %v4660_v59 = vpop.f32.mrf.mxu3 }
 0x259   : > { %v4612_v25 = vadd.f32 %v4611_v58, %v4387_v20  ;;  %v11298_v58 = vld [vmem:[#allocation3 + $0x160] sm:$0xf] }
 0x25b   : > { %v15427_v61 = vadd.f32 %v4660_v59, %v4612_v25  ;;  %v4342_v56 = vpop.f32.mrf.mxu0  ;;  %v4391_v62 = vpop.f32.mrf.mxu1  ;;  %v13623_v59 = vld [vmem:[#allocation3 + $0x164] sm:$0xf0]  ;;  %v13622_v25 = vld [vmem:[#allocation3 + $0x164] sm:$0xf] }
 0x25c   : > { %v4392_v63 = vadd.f32 %v4391_v62, %v4342_v56 }
 0x25d   : > { %5276 = vmatmul.bf16.gmra.mxu2 %v11187_v60  ;;  %5325 = vmatmul.bf16.gmra.mxu3 %v11191_v32  ;;  %v11300_v60 = vld [vmem:[#allocation3 + $0x168] sm:$0xf0] }
 0x25e   : > { %v11303_v0 = vor.u32 %v13622_v25, %v11300_v60 }
 0x260   : > { %v4614_v12 = vpop.f32.mrf.mxu2  ;;  %v4663_v13 = vpop.f32.mrf.mxu3 }
 0x261   : > { %v4615_v6 = vadd.f32 %v4614_v12, %v4390_v46 }
 0x263   : > { %v15431_v20 = vadd.f32 %v4663_v13, %v4615_v6  ;;  %v4345_v24 = vpop.f32.mrf.mxu0  ;;  %v4394_v27 = vpop.f32.mrf.mxu1  ;;  %v11458_v13 = vld [vmem:[#allocation3 + $0x180] sm:$0xf] }
 0x264   : > { %v4395_v18 = vadd.f32 %v4394_v27, %v4345_v24  ;;  %v11460_v24 = vld [vmem:[#allocation3 + $0x188] sm:$0xf0] }
 0x266   : > { %4942 = vmatmul.bf16.gmra.mxu0 %v11035_v16  ;;  %4991 = vmatmul.bf16.gmra.mxu1 %v11039_v19  ;;  %v13655_v16 = vld [vmem:[#allocation3 + $0x184] sm:$0xf0]  ;;  %v13654_v19 = vld [vmem:[#allocation3 + $0x184] sm:$0xf] }
 0x267   : > { %v11463_v28 = vor.u32 %v13654_v19, %v11460_v24 }
 0x268   : > { %v4616_v33 = vpop.f32.mrf.mxu2  ;;  %v4665_v34 = vpop.f32.mrf.mxu3 }
 0x269   : > { %v4617_v39 = vadd.f32 %v4616_v33, %v4392_v63  ;;  %v11299_v63 = vor.u32 %v13623_v59, %v11298_v58 }
 0x26b   : > { %v15435_v45 = vadd.f32 %v4665_v34, %v4617_v39  ;;  %v4347_v46 = vpop.f32.mrf.mxu0  ;;  %v4396_v49 = vpop.f32.mrf.mxu1  ;;  %v13747_v34 = vld [vmem:[%s15023_s14 + $0x2e8] sm:$0xff] }
 0x26c   : > { %v4397_v50 = vadd.f32 %v4396_v49, %v4347_v46  ;;  %v13624_v46 = vld [vmem:[#allocation3 + $0x174] sm:$0xf]  ;;  %v11308_v49 = vld [vmem:[#allocation3 + $0x178] sm:$0xf0]  ;;  %6648 = vmatpush.bf16.msrb.mxu3 %v13747_v34  ;;  %v11316_v34 = vld [vmem:[#allocation3 + $0x188] sm:$0xf0] }
 0x26d   : > { %5281 = vmatmul.bf16.gmra.mxu2 %v11195_v40  ;;  %5330 = vmatmul.bf16.gmra.mxu3 %v11199_v41  ;;  %v11306_v40 = vld [vmem:[#allocation3 + $0x170] sm:$0xf]  ;;  %v13625_v41 = vld [vmem:[#allocation3 + $0x174] sm:$0xf0]  ;;  %v11311_v59 = vor.u32 %v13624_v46, %v11308_v49 }
 0x26e   : > { %v11307_v58 = vor.u32 %v13625_v41, %v11306_v40  ;;  %v3365_v40 = vld [vmem:[#allocation2 + $0x128] sm:$0x11] }
 0x270   : > { %v4619_v32 = vpop.f32.mrf.mxu2  ;;  %v4668_v56 = vpop.f32.mrf.mxu3 }
 0x271   : > { %v4620_v62 = vadd.f32 %v4619_v32, %v4395_v18  ;;  %v11459_v18 = vor.u32 %v13655_v16, %v11458_v13 }
 0x273   : > { %v15439_v1 = vadd.f32 %v4668_v56, %v4620_v62  ;;  %v4908_v4 = vpop.f32.mrf.mxu0  ;;  %v4957_v7 = vpop.f32.mrf.mxu1  ;;  %v13707_v56 = vld [vmem:[%s15023_s14 + $0x128] sm:$0xff] }
 0x274   : > { %v4958_v12 = vadd.f32 %v4957_v7, %v4908_v4  ;;  %v13715_v62 = vld [vmem:[%s15023_s14 + $0x168] sm:$0xff]  ;;  %6259 = vmatpush.bf16.msrb.mxu0 %v13707_v56  ;;  %v13657_v4 = vld [vmem:[#allocation3 + $0x194] sm:$0xf0]  ;;  %v13656_v7 = vld [vmem:[#allocation3 + $0x194] sm:$0xf] }
 0x275   : > { %6308 = vmatpush.bf16.msrb.mxu1 %v13715_v62  ;;  %v11471_v16 = vor.u32 %v13656_v7, %v11468_v10  ;;  %v11474_v7 = vld [vmem:[#allocation3 + $0x1a0] sm:$0xf] }
 0x276   : > { %v4997_v6 = vadd.f32 %v4958_v12, %v15318_v5  ;;  %5586 = vmatmul.bf16.vlgmr.msra.gmra.mxu0 %v11299_v63  ;;  %5635 = vmatmul.bf16.vlgmr.msra.gmra.mxu1 %v11303_v0  ;;  %v13739_v5 = vld [vmem:[%s15023_s14 + $0x2a8] sm:$0xff] }
 0x277   : > { %6599 = vmatpush.bf16.msrb.mxu2 %v13739_v5 }
 0x278   : > { %v4621_v27 = vpop.f32.mrf.mxu2  ;;  %v4670_v8 = vpop.f32.mrf.mxu3 }
 0x279   : > { %v4622_v14 = vadd.f32 %v4621_v27, %v4397_v50 }
 0x27b   : > { %v15444_v29 = vadd.f32 %v4670_v8, %v4622_v14  ;;  %v4910_v23 = vpop.f32.mrf.mxu0  ;;  %v4959_v30 = vpop.f32.mrf.mxu1  ;;  %v13738_v14 = vld [vmem:[%s15023_s14 + $0x2a0] sm:$0xff] }
 0x27c   : > { %v4960_v33 = vadd.f32 %v4959_v30, %v4910_v23  ;;  %v13627_v30 = vld [vmem:[#allocation3 + $0x184] sm:$0xf0]  ;;  %6600 = vmatpush.bf16.msrb.mxu2 %v13738_v14 }
 0x27d   : > { %5926 = vmatmul.bf16.vlgmr.msra.gmra.mxu2 %v11459_v18  ;;  %5975 = vmatmul.bf16.vlgmr.msra.gmra.mxu3 %v11463_v28  ;;  %v13746_v18 = vld [vmem:[%s15023_s14 + $0x2e0] sm:$0xff]  ;;  %v3364_v28 = vld [vmem:[#allocation2 + $0x158] sm:$0xff] }
 0x27e   : > { %v4998_v39 = vadd.f32 %v4960_v33, %v15322_v26  ;;  %v11466_v26 = vld [vmem:[#allocation3 + $0x190] sm:$0xf]  ;;  %v13626_v33 = vld [vmem:[#allocation3 + $0x184] sm:$0xf]  ;;  %v3520_v5 = vrot.slane %v3364_v28, 5  ;;  %6649 = vmatpush.bf16.msrb.mxu3 %v13746_v18  ;;  %v13737_v28 = vld [vmem:[%s15023_s14 + $0x298] sm:$0xff] }
 0x280   : > { %v5247_v50 = vpop.f32.mrf.mxu2  ;;  %v5296_v52 = vpop.f32.mrf.mxu3  ;;  %6601 = vmatpush.bf16.msrb.mxu2 %v13737_v28 }
 0x281   : > { %v5297_v54 = vadd.f32 %v5296_v52, %v5247_v50  ;;  %v3522_v50 = vrot.slane %v3520_v5, 4  ;;  %v3523_v52 = vrot.slane %v3365_v40, 5 }
 0x283   : > { %v15449_v25 = vadd.f32 %v5297_v54, %v4997_v6  ;;  %v4913_v60 = vpop.f32.mrf.mxu0  ;;  %v4962_v32 = vpop.f32.mrf.mxu1  ;;  %v11467_v6 = vor.u32 %v13657_v4, %v11466_v26  ;;  %v13714_v26 = vld [vmem:[%s15023_s14 + $0x160] sm:$0xff] }
 0x284   : > { %v4963_v63 = vadd.f32 %v4962_v32, %v4913_v60  ;;  %v3524_v60 = vsel %vm15284_vm5, %v3522_v50, %v3523_v52  ;;  %6309 = vmatpush.bf16.msrb.mxu1 %v13714_v26 }
 0x285   : > { %3660 = vst [vmem:[#allocation3 + $0x1c8] sm:$0xff] %v3524_v60 }
 0x286   : > { %v4999_v0 = vadd.f32 %v4963_v63, %v15330_v53  ;;  %5591 = vmatmul.bf16.gmra.mxu0 %v11307_v58  ;;  %5640 = vmatmul.bf16.gmra.mxu1 %v11311_v59  ;;  %v11314_v53 = vld [vmem:[#allocation3 + $0x180] sm:$0xf]  ;;  %v11319_v59 = vor.u32 %v13626_v33, %v11316_v34  ;;  %v3367_v33 = vld [vmem:[#allocation2 + $0x8] sm:$0xff]  ;;  %v13629_v34 = vld [vmem:[#allocation3 + $0x194] sm:$0xf0] }
 0x287   : > { %v11315_v58 = vor.u32 %v13627_v30, %v11314_v53  ;;  %v13706_v63 = vld [vmem:[%s15023_s14 + $0x120] sm:$0xff]  ;;  %v13745_v30 = vld [vmem:[%s15023_s14 + $0x2d8] sm:$0xff]  ;;  %v3527_v40 = vrot.slane %v3367_v33, 5 }
 0x288   : > { %v5249_v11 = vpop.f32.mrf.mxu2  ;;  %v5298_v12 = vpop.f32.mrf.mxu3  ;;  %6260 = vmatpush.bf16.msrb.mxu0 %v13706_v63  ;;  %6650 = vmatpush.bf16.msrb.mxu3 %v13745_v30  ;;  %v11330_v33 = vld [vmem:[#allocation3 + $0x1a0] sm:$0xf] }
 0x289   : > { %v5299_v13 = vadd.f32 %v5298_v12, %v5249_v11  ;;  %v13659_v11 = vld [vmem:[#allocation3 + $0x1a4] sm:$0xf0]  ;;  %v13658_v12 = vld [vmem:[#allocation3 + $0x1a4] sm:$0xf] }
 0x28b   : > { %v15454_v19 = vadd.f32 %v5299_v13, %v4998_v39  ;;  %v4915_v24 = vpop.f32.mrf.mxu0  ;;  %v4964_v27 = vpop.f32.mrf.mxu1  ;;  %v3363_v39 = vld [vmem:[#allocation2 + $0xf0] sm:$0xee] }
 0x28c   : > { %v4965_v8 = vadd.f32 %v4964_v27, %v4915_v24  ;;  %v10624_v49 = vrot.slane %v3363_v39, 9  ;;  %v11475_v24 = vor.u32 %v13659_v11, %v11474_v7  ;;  %v13628_v39 = vld [vmem:[#allocation3 + $0x194] sm:$0xf]  ;;  %v13713_v7 = vld [vmem:[%s15023_s14 + $0x158] sm:$0xff] }
 0x28d   : > { %5931 = vmatmul.bf16.gmra.mxu2 %v11467_v6  ;;  %5980 = vmatmul.bf16.gmra.mxu3 %v11471_v16 }
 0x28e   : > { %v5000_v23 = vadd.f32 %v4965_v8, %v15334_v2  ;;  %v3521_v2 = vsel %vm15284_vm5, %v10624_v49, %v3520_v5  ;;  %6310 = vmatpush.bf16.msrb.mxu1 %v13713_v7 }
 0x28f   : > { %3659 = vst [vmem:[#allocation3 + $0x1c0] sm:$0xff] %v3521_v2 }
 0x290   : > { %v5252_v41 = vpop.f32.mrf.mxu2  ;;  %v5301_v46 = vpop.f32.mrf.mxu3 }
 0x291   : > { %v5302_v54 = vadd.f32 %v5301_v46, %v5252_v41  ;;  %v11324_v41 = vld [vmem:[#allocation3 + $0x198] sm:$0xf0]  ;;  %v3368_v46 = vld [vmem:[#allocation2 + $0x170] sm:$0x11] }
 0x292   : > { %v11327_v60 = vor.u32 %v13628_v39, %v11324_v41  ;;  %v13744_v39 = vld [vmem:[%s15023_s14 + $0x2d0] sm:$0xff]  ;;  %v3534_v41 = vrot.slane %v15381_v44, 5 }
 0x293   : > { %v15463_v32 = vadd.f32 %v5302_v54, %v4999_v0  ;;  %v4918_v56 = vpop.f32.mrf.mxu0  ;;  %v4967_v62 = vpop.f32.mrf.mxu1  ;;  %v11476_v0 = vld [vmem:[#allocation3 + $0x1a8] sm:$0xf0]  ;;  %v3529_v54 = vrot.slane %v3527_v40, 4  ;;  %6651 = vmatpush.bf16.msrb.mxu3 %v13744_v39  ;;  %v13633_v39 = vld [vmem:[#allocation3 + $0x1b4] sm:$0xf0] }
 0x294   : > { %v4968_v4 = vadd.f32 %v4967_v62, %v4918_v56  ;;  %v11479_v27 = vor.u32 %v13658_v12, %v11476_v0  ;;  %v11482_v12 = vld [vmem:[#allocation3 + $0x1b0] sm:$0xf]  ;;  %v13661_v0 = vld [vmem:[#allocation3 + $0x1b4] sm:$0xf0] }
 0x296   : > { %v5001_v10 = vadd.f32 %v4968_v4, %v15346_v36  ;;  %5596 = vmatmul.bf16.gmra.mxu0 %v11315_v58  ;;  %5645 = vmatmul.bf16.gmra.mxu1 %v11319_v59  ;;  %v11322_v36 = vld [vmem:[#allocation3 + $0x190] sm:$0xf]  ;;  %v3530_v58 = vrot.slane %v3368_v46, 5  ;;  %v13705_v4 = vld [vmem:[%s15023_s14 + $0x118] sm:$0xff] }
 0x297   : > { %v11323_v2 = vor.u32 %v13629_v34, %v11322_v36  ;;  %6261 = vmatpush.bf16.msrb.mxu0 %v13705_v4  ;;  %v13736_v34 = vld [vmem:[%s15023_s14 + $0x290] sm:$0xff] }
 0x298   : > { %v5254_v13 = vpop.f32.mrf.mxu2  ;;  %v5303_v6 = vpop.f32.mrf.mxu3  ;;  %v3531_v56 = vsel %vm15284_vm5, %v3529_v54, %v3530_v58  ;;  %6602 = vmatpush.bf16.msrb.mxu2 %v13736_v34  ;;  %v3536_v54 = vrot.slane %v3534_v41, 4  ;;  %v13712_v4 = vld [vmem:[%s15023_s14 + $0x150] sm:$0xff]  ;;  %v13743_v34 = vld [vmem:[%s15023_s14 + $0x2c8] sm:$0xff] }
 0x299   : > { %v5304_v16 = vadd.f32 %v5303_v6, %v5254_v13  ;;  %3662 = vst [vmem:[#allocation3 + $0x1d8] sm:$0xff] %v3531_v56  ;;  %v13660_v6 = vld [vmem:[#allocation3 + $0x1b4] sm:$0xf]  ;;  %6311 = vmatpush.bf16.msrb.mxu1 %v13712_v4  ;;  %6652 = vmatpush.bf16.msrb.mxu3 %v13743_v34  ;;  %v11348_v34 = vld [vmem:[#allocation3 + $0x1c8] sm:$0xf0] }
 0x29b   : > { %v15468_v8 = vadd.f32 %v5304_v16, %v5000_v23  ;;  %v4920_v53 = vpop.f32.mrf.mxu0  ;;  %v4969_v14 = vpop.f32.mrf.mxu1  ;;  %v3366_v23 = vld [vmem:[#allocation2 + $0x1d8] sm:$0xee] }
 0x29c   : > { %v4970_v18 = vadd.f32 %v4969_v14, %v4920_v53  ;;  %v10625_v52 = vrot.slane %v3366_v23, 9  ;;  %v11484_v16 = vld [vmem:[#allocation3 + $0x1b8] sm:$0xf0]  ;;  %v11483_v14 = vor.u32 %v13661_v0, %v11482_v12  ;;  %v11332_v23 = vld [vmem:[#allocation3 + $0x1a8] sm:$0xf0] }
 0x29d   : > { %5936 = vmatmul.bf16.gmra.mxu2 %v11475_v24  ;;  %5985 = vmatmul.bf16.gmra.mxu3 %v11479_v27  ;;  %v13663_v12 = vld [vmem:[#allocation3 + $0x1c4] sm:$0xf0] }
 0x29e   : > { %v5002_v5 = vadd.f32 %v4970_v18, %v15358_v3  ;;  %v3528_v3 = vsel %vm15284_vm5, %v10625_v52, %v3527_v40  ;;  %v11487_v18 = vor.u32 %v13660_v6, %v11484_v16  ;;  %v13631_v40 = vld [vmem:[#allocation3 + $0x1a4] sm:$0xf0]  ;;  %v13662_v6 = vld [vmem:[#allocation3 + $0x1c4] sm:$0xf]  ;;  %v11492_v16 = vld [vmem:[#allocation3 + $0x1c8] sm:$0xf0] }
 0x29f   : > { %3661 = vst [vmem:[#allocation3 + $0x1d0] sm:$0xff] %v3528_v3 }
 0x2a0   : > { %v5257_v49 = vpop.f32.mrf.mxu2  ;;  %v5306_v50 = vpop.f32.mrf.mxu3  ;;  %v13665_v4 = vld [vmem:[#allocation3 + $0x1d4] sm:$0xf0] }
 0x2a1   : > { %v5307_v59 = vadd.f32 %v5306_v50, %v5257_v49 }
 0x2a3   : > { %v15477_v62 = vadd.f32 %v5307_v59, %v5001_v10  ;;  %v4923_v63 = vpop.f32.mrf.mxu0  ;;  %v4972_v26 = vpop.f32.mrf.mxu1  ;;  %v3126_v10 = vrot.slane %v3124_v35, 4  ;;  %v13630_v35 = vld [vmem:[#allocation3 + $0x1a4] sm:$0xf] }
 0x2a4   : > { %v4973_v11 = vadd.f32 %v4972_v26, %v4923_v63  ;;  %v13704_v26 = vld [vmem:[%s15023_s14 + $0x110] sm:$0xff] }
 0x2a5   : > { %3237 = vst [vmem:[#allocation2 + $0x148] sm:$0x11] %v3126_v10  ;;  %6262 = vmatpush.bf16.msrb.mxu0 %v13704_v26 }
 0x2a6   : > { %v5003_v13 = vadd.f32 %v4973_v11, %v15373_v43  ;;  %5601 = vmatmul.bf16.gmra.mxu0 %v11323_v2  ;;  %5650 = vmatmul.bf16.gmra.mxu1 %v11327_v60  ;;  %v11331_v2 = vor.u32 %v13631_v40, %v11330_v33  ;;  %v11335_v60 = vor.u32 %v13630_v35, %v11332_v23  ;;  %v11490_v11 = vld [vmem:[#allocation3 + $0x1c0] sm:$0xf]  ;;  %v13735_v33 = vld [vmem:[%s15023_s14 + $0x288] sm:$0xff]  ;;  %v3541_v40 = vrot.slane %v15407_v57, 5  ;;  %v11340_v35 = vld [vmem:[#allocation3 + $0x1b8] sm:$0xf0] }
 0x2a7   : > { %6603 = vmatpush.bf16.msrb.mxu2 %v13735_v33  ;;  %v13634_v33 = vld [vmem:[#allocation3 + $0x1c4] sm:$0xf] }
 0x2a8   : > { %v5259_v24 = vpop.f32.mrf.mxu2  ;;  %v5308_v27 = vpop.f32.mrf.mxu3 }
 0x2a9   : > { %v5309_v53 = vadd.f32 %v5308_v27, %v5259_v24 }
 0x2ab   : > { %v15484_v36 = vadd.f32 %v5309_v53, %v5002_v5  ;;  %v4925_v28 = vpop.f32.mrf.mxu0  ;;  %v4974_v30 = vpop.f32.mrf.mxu1  ;;  %v3369_v5 = vld [vmem:[#allocation2 + $0xc0] sm:$0xee]  ;;  %v11491_v53 = vor.u32 %v13663_v12, %v11490_v11  ;;  %v11500_v11 = vld [vmem:[#allocation3 + $0x1d8] sm:$0xf0] }
 0x2ac   : > { %v4975_v43 = vadd.f32 %v4974_v30, %v4925_v28  ;;  %v3371_v46 = vld [vmem:[#allocation2 + $0x148] sm:$0x11]  ;;  %v10626_v52 = vrot.slane %v3369_v5, 9 }
 0x2ad   : > { %5941 = vmatmul.bf16.gmra.mxu2 %v11483_v14  ;;  %5990 = vmatmul.bf16.gmra.mxu3 %v11487_v18  ;;  %v3537_v58 = vrot.slane %v3371_v46, 5  ;;  %v11495_v14 = vor.u32 %v13662_v6, %v11492_v16 }
 0x2ae   : > { %v5004_v21 = vadd.f32 %v4975_v43, %v15396_v17  ;;  %v3535_v17 = vsel %vm15284_vm5, %v10626_v52, %v3534_v41  ;;  %v11338_v43 = vld [vmem:[#allocation3 + $0x1b0] sm:$0xf] }
 0x2af   : > { %v3538_v44 = vsel %vm15284_vm5, %v3536_v54, %v3537_v58  ;;  %3663 = vst [vmem:[#allocation3 + $0x1e0] sm:$0xff] %v3535_v17  ;;  %v11339_v54 = vor.u32 %v13633_v39, %v11338_v43  ;;  %v13703_v17 = vld [vmem:[%s15023_s14 + $0x108] sm:$0xff]  ;;  %v14241_v39 = vld [vmem:[#allocation2 + $0xb0] sm:$0xff] }
 0x2b0   : > { %v5262_v49 = vpop.f32.mrf.mxu2  ;;  %v5311_v50 = vpop.f32.mrf.mxu3  ;;  %3664 = vst [vmem:[#allocation3 + $0x1e8] sm:$0xff] %v3538_v44  ;;  %v13711_v44 = vld [vmem:[%s15023_s14 + $0x148] sm:$0xff]  ;;  %6263 = vmatpush.bf16.msrb.mxu0 %v13703_v17 }
 0x2b1   : > { %v5312_v59 = vadd.f32 %v5311_v50, %v5262_v49  ;;  %v3543_v49 = vrot.slane %v3541_v40, 4  ;;  %6312 = vmatpush.bf16.msrb.mxu1 %v13711_v44 }
 0x2b3   : > { %v15494_v3 = vadd.f32 %v5312_v59, %v5003_v13  ;;  %v4928_v56 = vpop.f32.mrf.mxu0  ;;  %v4977_v63 = vpop.f32.mrf.mxu1  ;;  %v3131_v13 = vrot.slane %v3129_v42, 4  ;;  %v13632_v42 = vld [vmem:[#allocation3 + $0x1b4] sm:$0xf] }
 0x2b4   : > { %v4978_v7 = vadd.f32 %v4977_v63, %v4928_v56  ;;  %v11343_v58 = vor.u32 %v13632_v42, %v11340_v35  ;;  %v11498_v63 = vld [vmem:[#allocation3 + $0x1d0] sm:$0xf]  ;;  %v15521_v42 = vrot.slane %v14241_v39, 6  ;;  %v3685_v35 = vld [vmem:[#allocation2 + $0xd8] sm:$0x33] }
 0x2b5   : > { %3240 = vst [vmem:[#allocation2 + $0xf8] sm:$0x11] %v3131_v13  ;;  %v11499_v16 = vor.u32 %v13665_v4, %v11498_v63  ;;  %v13702_v63 = vld [vmem:[%s15023_s14 + $0x100] sm:$0xff]  ;;  %v11354_v39 = vld [vmem:[#allocation3 + $0x1d0] sm:$0xf] }
 0x2b6   : > { %v5005_v0 = vadd.f32 %v4978_v7, %v15409_v9  ;;  %5606 = vmatmul.bf16.gmra.mxu0 %v11331_v2  ;;  %5655 = vmatmul.bf16.gmra.mxu1 %v11335_v60  ;;  %v13664_v7 = vld [vmem:[#allocation3 + $0x1d4] sm:$0xf]  ;;  %v13710_v4 = vld [vmem:[%s15023_s14 + $0x140] sm:$0xff] }
 0x2b7   : > { %v11503_v13 = vor.u32 %v13664_v7, %v11500_v11  ;;  %6264 = vmatpush.bf16.msrb.mxu0 %v13702_v63  ;;  %6313 = vmatpush.bf16.msrb.mxu1 %v13710_v4 }
 0x2b8   : > { %v5264_v10 = vpop.f32.mrf.mxu2  ;;  %v5313_v24 = vpop.f32.mrf.mxu3 }
 0x2b9   : > { %v5314_v27 = vadd.f32 %v5313_v24, %v5264_v10 }
 0x2bb   : > { %v15501_v18 = vadd.f32 %v5314_v27, %v5004_v21  ;;  %v4930_v28 = vpop.f32.mrf.mxu0  ;;  %v4979_v30 = vpop.f32.mrf.mxu1  ;;  %v3372_v21 = vld [vmem:[#allocation2 + $0x1d0] sm:$0xee] }
 0x2bc   : > { %v4980_v9 = vadd.f32 %v4979_v30, %v4930_v28  ;;  %v3374_v41 = vld [vmem:[#allocation2 + $0xf8] sm:$0x11]  ;;  %v10627_v46 = vrot.slane %v3372_v21, 9  ;;  %v13734_v28 = vld [vmem:[%s15023_s14 + $0x280] sm:$0xff]  ;;  %v3689_v21 = vld [vmem:[#allocation2 + $0x130] sm:$0xcc] }
 0x2bd   : > { %5946 = vmatmul.bf16.gmra.mxu2 %v11491_v53  ;;  %5995 = vmatmul.bf16.gmra.mxu3 %v11495_v14  ;;  %v3544_v50 = vrot.slane %v3374_v41, 5  ;;  %v13635_v14 = vld [vmem:[#allocation3 + $0x1c4] sm:$0xf0]  ;;  %v13742_v30 = vld [vmem:[%s15023_s14 + $0x2c0] sm:$0xff] }
 0x2be   : > { %v5006_v31 = vadd.f32 %v4980_v9, %v15419_v15  ;;  %v3542_v15 = vsel %vm15284_vm5, %v10627_v46, %v3541_v40  ;;  %v3690_v9 = vld [vmem:[#allocation2 + $0x48] sm:$0xff]  ;;  %6604 = vmatpush.bf16.msrb.mxu2 %v13734_v28  ;;  %6653 = vmatpush.bf16.msrb.mxu3 %v13742_v30  ;;  %v3691_v46 = vld [vmem:[#allocation2 + $0x180] sm:$0x33] }
 0x2bf   : > { %v3545_v57 = vsel %vm15284_vm5, %v3543_v49, %v3544_v50  ;;  %3665 = vst [vmem:[#allocation3 + $0x1f0] sm:$0xff] %v3542_v15  ;;  %v3822_v40 = vrot.slane %v3690_v9, 6 }
 0x2c0   : > { %v5267_v23 = vpop.f32.mrf.mxu2  ;;  %v5316_v5 = vpop.f32.mrf.mxu3  ;;  %3666 = vst [vmem:[#allocation3 + $0x1f8] sm:$0xff] %v3545_v57  ;;  %v11351_v57 = vor.u32 %v13634_v33, %v11348_v34 }
 0x2c1   : > { %v5317_v52 = vadd.f32 %v5316_v5, %v5267_v23 }
 0x2c3   : > { %v15511_v59 = vadd.f32 %v5317_v52, %v5005_v0  ;;  %v4933_v2 = vpop.f32.mrf.mxu0  ;;  %v4982_v60 = vpop.f32.mrf.mxu1  ;;  %v3811_v52 = vrot.slane %v3685_v35, 6 }
 0x2c4   : > { %v4983_v56 = vadd.f32 %v4982_v60, %v4933_v2  ;;  %v3825_v60 = vrot.slane %v3691_v46, 6  ;;  %v3688_v46 = vld [vmem:[#allocation2 + $0x168] sm:$0x33] }
 0x2c6   : > { %v5007_v26 = vadd.f32 %v4983_v56, %v15423_v37  ;;  %5611 = vmatmul.bf16.gmra.mxu0 %v11339_v54  ;;  %5660 = vmatmul.bf16.gmra.mxu1 %v11343_v58  ;;  %v11346_v37 = vld [vmem:[#allocation3 + $0x1c0] sm:$0xf]  ;;  %v10638_v54 = vrot.slane %v3689_v21, 10  ;;  %v3824_v58 = vrot.slane %v3822_v40, 4  ;;  %v11356_v21 = vld [vmem:[#allocation3 + $0x1d8] sm:$0xf0] }
 0x2c7   : > { %v11347_v15 = vor.u32 %v13635_v14, %v11346_v37 }
 0x2c8   : > { %v5269_v12 = vpop.f32.mrf.mxu2  ;;  %v5318_v0 = vpop.f32.mrf.mxu3  ;;  %v3823_v11 = vsel %vm15524_vm8, %v10638_v54, %v3822_v40  ;;  %v13636_v40 = vld [vmem:[#allocation3 + $0x1d4] sm:$0xf] }
 0x2c9   : > { %v5319_v6 = vadd.f32 %v5318_v0, %v5269_v12  ;;  %v3826_v0 = vsel %vm15524_vm8, %v3824_v58, %v3825_v60  ;;  %3991 = vst [vmem:[#allocation3 + $0x2a0] sm:$0xff] %v3823_v11  ;;  %v3818_v58 = vrot.slane %v3688_v46, 6 }
 0x2ca   : > { %3992 = vst [vmem:[#allocation3 + $0x2a8] sm:$0xff] %v3826_v0 }
 0x2cb   : > { %v15516_v10 = vadd.f32 %v5319_v6, %v5006_v31  ;;  %v4935_v24 = vpop.f32.mrf.mxu0  ;;  %v4984_v27 = vpop.f32.mrf.mxu1  ;;  %v3683_v31 = vld [vmem:[#allocation2 + $0xb0] sm:$0xcc]  ;;  %v13667_v6 = vld [vmem:[#allocation3 + $0x1e4] sm:$0xf0] }
 0x2cc   : > { %v4985_v53 = vadd.f32 %v4984_v27, %v4935_v24  ;;  %v10636_v5 = vrot.slane %v3683_v31, 10  ;;  %v11508_v24 = vld [vmem:[#allocation3 + $0x1e8] sm:$0xf0]  ;;  %v13837_v31 = vld [vmem:[%s15023_s14 + $0x1b8] sm:$0xff] }
 0x2cd   : > { %5951 = vmatmul.bf16.gmra.mxu2 %v11499_v16  ;;  %6000 = vmatmul.bf16.gmra.mxu3 %v11503_v13  ;;  %v13666_v13 = vld [vmem:[#allocation3 + $0x1e4] sm:$0xf] }
 0x2ce   : > { %v5008_v43 = vadd.f32 %v4985_v53, %v15427_v61  ;;  %v3810_v61 = vrot.slane %v15521_v42, 4  ;;  %v3809_v2 = vsel %vm15524_vm8, %v10636_v5, %v15521_v42  ;;  %v11511_v28 = vor.u32 %v13666_v13, %v11508_v24  ;;  %7417 = vmatpush.bf16.msra.mxu2 %v13837_v31  ;;  %v3686_v5 = vld [vmem:[#allocation2 + $0x18] sm:$0xcc] }
 0x2cf   : > { %3987 = vst [vmem:[#allocation3 + $0x280] sm:$0xff] %v3809_v2  ;;  %v10637_v54 = vrot.slane %v3686_v5, 10  ;;  %v13781_v13 = vld [vmem:[%s15023_s14 + $0x478] sm:$0xff] }
 0x2d0   : > { %v5272_v41 = vpop.f32.mrf.mxu2  ;;  %v5321_v23 = vpop.f32.mrf.mxu3  ;;  %v3812_v7 = vsel %vm15524_vm8, %v3810_v61, %v3811_v52  ;;  %v3819_v4 = vsel %vm15524_vm8, %v3810_v61, %v3818_v58  ;;  %6986 = vmatpush.bf16.msra.mxu1 %v13781_v13  ;;  %v11778_v13 = vld [vmem:[#allocation3 + $0x2a0] sm:$0xf] }
 0x2d1   : > { %v5322_v49 = vadd.f32 %v5321_v23, %v5272_v41  ;;  %3988 = vst [vmem:[#allocation3 + $0x288] sm:$0xff] %v3812_v7  ;;  %v13845_v41 = vld [vmem:[%s15023_s14 + $0x1f8] sm:$0xff]  ;;  %v3816_v63 = vsel %vm15524_vm8, %v10637_v54, %v15521_v42  ;;  %v11514_v42 = vld [vmem:[#allocation3 + $0x1f0] sm:$0xf]  ;;  %v3697_v54 = vld [vmem:[#allocation2 + $0x108] sm:$0x33] }
 0x2d2   : > { %v3693_v23 = vld [vmem:[#allocation2 + $0x118] sm:$0xff]  ;;  %7466 = vmatpush.bf16.msra.mxu3 %v13845_v41  ;;  %3989 = vst [vmem:[#allocation3 + $0x290] sm:$0xff] %v3816_v63 }
 0x2d3   : > { %v15531_v17 = vadd.f32 %v5322_v49, %v5007_v26  ;;  %v4938_v44 = vpop.f32.mrf.mxu0  ;;  %v4987_v56 = vpop.f32.mrf.mxu1  ;;  %v11506_v26 = vld [vmem:[#allocation3 + $0x1e0] sm:$0xf]  ;;  %v3692_v49 = vld [vmem:[#allocation2 + $0x110] sm:$0xcc]  ;;  %v3829_v2 = vrot.slane %v3693_v23, 6  ;;  %3990 = vst [vmem:[#allocation3 + $0x298] sm:$0xff] %v3819_v4 }
 0x2d4   : > { %v4988_v12 = vadd.f32 %v4987_v56, %v4938_v44  ;;  %v11507_v14 = vor.u32 %v13667_v6, %v11506_v26  ;;  %v13773_v6 = vld [vmem:[%s15023_s14 + $0x438] sm:$0xff]  ;;  %v13836_v23 = vld [vmem:[%s15023_s14 + $0x1b0] sm:$0xff] }
 0x2d5   : > { %v3831_v11 = vrot.slane %v3829_v2, 4  ;;  %6937 = vmatpush.bf16.msra.mxu0 %v13773_v6  ;;  %7418 = vmatpush.bf16.msra.mxu2 %v13836_v23 }
 0x2d6   : > { %v5009_v16 = vadd.f32 %v4988_v12, %v15431_v20  ;;  %5616 = vmatmul.bf16.gmra.mxu0 %v11347_v15  ;;  %5665 = vmatmul.bf16.gmra.mxu1 %v11351_v57  ;;  %v13637_v20 = vld [vmem:[#allocation3 + $0x1d4] sm:$0xf0]  ;;  %v10639_v57 = vrot.slane %v3692_v49, 10  ;;  %v13686_v41 = vld [vmem:[#allocation3 + $0x284] sm:$0xf]  ;;  %v13844_v49 = vld [vmem:[%s15023_s14 + $0x1f0] sm:$0xff] }
 0x2d7   : > { %v3694_v15 = vld [vmem:[#allocation2 + $0x98] sm:$0x33]  ;;  %v11355_v44 = vor.u32 %v13637_v20, %v11354_v39  ;;  %7467 = vmatpush.bf16.msra.mxu3 %v13844_v49 }
 0x2d8   : > { %v5274_v27 = vpop.f32.mrf.mxu2  ;;  %v5323_v53 = vpop.f32.mrf.mxu3  ;;  %v3832_v56 = vrot.slane %v3694_v15, 6  ;;  %v3830_v7 = vsel %vm15524_vm8, %v10639_v57, %v3829_v2  ;;  %v11620_v46 = vld [vmem:[#allocation3 + $0x288] sm:$0xf0]  ;;  %v3839_v2 = vrot.slane %v3697_v54, 6 }
 0x2d9   : > { %v5324_v37 = vadd.f32 %v5323_v53, %v5274_v27  ;;  %v13669_v53 = vld [vmem:[#allocation3 + $0x1f4] sm:$0xf0]  ;;  %3993 = vst [vmem:[#allocation3 + $0x2b0] sm:$0xff] %v3830_v7  ;;  %v13688_v23 = vld [vmem:[#allocation3 + $0x294] sm:$0xf] }
 0x2da   : > { %v3833_v27 = vsel %vm15524_vm8, %v3831_v11, %v3832_v56  ;;  %v11623_v56 = vor.u32 %v13686_v41, %v11620_v46  ;;  %v13772_v11 = vld [vmem:[%s15023_s14 + $0x430] sm:$0xff]  ;;  %v13689_v41 = vld [vmem:[#allocation3 + $0x294] sm:$0xf0]  ;;  %v11628_v49 = vld [vmem:[#allocation3 + $0x298] sm:$0xf0] }
 0x2db   : > { %v15544_v30 = vadd.f32 %v5324_v37, %v5008_v43  ;;  %v4940_v9 = vpop.f32.mrf.mxu0  ;;  %v4989_v33 = vpop.f32.mrf.mxu1  ;;  %v11516_v37 = vld [vmem:[#allocation3 + $0x1f8] sm:$0xf0]  ;;  %3994 = vst [vmem:[#allocation3 + $0x2b8] sm:$0xff] %v3833_v27  ;;  %6938 = vmatpush.bf16.msra.mxu0 %v13772_v11  ;;  %v13719_v27 = vld [vmem:[#allocation3 + $0x2a4] sm:$0xf0] }
 0x2dc   : > { %v4990_v34 = vadd.f32 %v4989_v33, %v4940_v9  ;;  %v11515_v33 = vor.u32 %v13669_v53, %v11514_v42  ;;  %v13718_v42 = vld [vmem:[#allocation3 + $0x2a4] sm:$0xf]  ;;  %v11780_v53 = vld [vmem:[#allocation3 + $0x2a8] sm:$0xf0] }
 0x2dd   : > { %5956 = vmatmul.bf16.gmra.mxu2 %v11507_v14  ;;  %6005 = vmatmul.bf16.gmra.mxu3 %v11511_v28 }
 0x2de   : > { %v5010_v35 = vadd.f32 %v4990_v34, %v15435_v45  ;;  %v11359_v45 = vor.u32 %v13636_v40, %v11356_v21  ;;  %v13687_v21 = vld [vmem:[#allocation3 + $0x284] sm:$0xf0] }
 0x2e0   : > { %v5277_v43 = vpop.f32.mrf.mxu2  ;;  %v5326_v52 = vpop.f32.mrf.mxu3 }
 0x2e1   : > { %v5327_v60 = vadd.f32 %v5326_v52, %v5277_v43  ;;  %v3696_v43 = vld [vmem:[#allocation2 + $0x150] sm:$0xff]  ;;  %v3695_v52 = vld [vmem:[#allocation2 + $0x120] sm:$0xcc] }
 0x2e2   : > { %v10640_v57 = vrot.slane %v3695_v52, 10 }
 0x2e3   : > { %v15558_v12 = vadd.f32 %v5327_v60, %v5009_v16  ;;  %v4943_v0 = vpop.f32.mrf.mxu0  ;;  %v4992_v26 = vpop.f32.mrf.mxu1  ;;  %v13668_v16 = vld [vmem:[#allocation3 + $0x1f4] sm:$0xf] }
 0x2e4   : > { %v4993_v24 = vadd.f32 %v4992_v26, %v4943_v0  ;;  %v11519_v34 = vor.u32 %v13668_v16, %v11516_v37  ;;  %v13780_v0 = vld [vmem:[%s15023_s14 + $0x470] sm:$0xff] }
 0x2e5   : > { %6987 = vmatpush.bf16.msra.mxu1 %v13780_v0  ;;  %v11786_v0 = vld [vmem:[#allocation3 + $0x2b0] sm:$0xf] }
 0x2e6   : > { %v5011_v61 = vadd.f32 %v4993_v24, %v15439_v1  ;;  %5621 = vmatmul.bf16.gmra.mxu0 %v11355_v44  ;;  %5670 = vmatmul.bf16.gmra.mxu1 %v11359_v45  ;;  %v11618_v1 = vld [vmem:[#allocation3 + $0x280] sm:$0xf] }
 0x2e7   : > { %v11619_v45 = vor.u32 %v13687_v21, %v11618_v1  ;;  %v3699_v1 = vld [vmem:[#allocation2 + $0xe0] sm:$0xff] }
 0x2e8   : > { %v5279_v14 = vpop.f32.mrf.mxu2  ;;  %v5328_v28 = vpop.f32.mrf.mxu3  ;;  %v3843_v46 = vrot.slane %v3699_v1, 6  ;;  %v13690_v1 = vld [vmem:[#allocation3 + $0x2a4] sm:$0xf] }
 0x2e9   : > { %v5329_v9 = vadd.f32 %v5328_v28, %v5279_v14  ;;  %v11779_v14 = vor.u32 %v13719_v27, %v11778_v13  ;;  %v11783_v28 = vor.u32 %v13718_v42, %v11780_v53  ;;  %v13720_v13 = vld [vmem:[#allocation3 + $0x2b4] sm:$0xf] }
 0x2eb   : > { %v15565_v39 = vadd.f32 %v5329_v9, %v5010_v35  ;;  %v4945_v20 = vpop.f32.mrf.mxu0  ;;  %v4994_v40 = vpop.f32.mrf.mxu1  ;;  %v3836_v35 = vrot.slane %v3696_v43, 6  ;;  %v3700_v43 = vld [vmem:[#allocation2 + $0x188] sm:$0x33] }
 0x2ec   : > { %v4995_v31 = vadd.f32 %v4994_v40, %v4945_v20  ;;  %v13835_v40 = vld [vmem:[%s15023_s14 + $0x1a8] sm:$0xff] }
 0x2ed   : > { %5961 = vmatmul.bf16.gmra.mxu2 %v11515_v33  ;;  %6010 = vmatmul.bf16.gmra.mxu3 %v11519_v34  ;;  %v3838_v44 = vrot.slane %v3836_v35, 4 }
 0x2ee   : > { %v5012_v5 = vadd.f32 %v4995_v31, %v15444_v29  ;;  %v3837_v29 = vsel %vm15524_vm8, %v10640_v57, %v3836_v35  ;;  %v13843_v31 = vld [vmem:[%s15023_s14 + $0x1e8] sm:$0xff]  ;;  %7419 = vmatpush.bf16.msra.mxu2 %v13835_v40 }
 0x2ef   : > { %v3840_v26 = vsel %vm15524_vm8, %v3838_v44, %v3839_v2  ;;  %3995 = vst [vmem:[#allocation3 + $0x2c0] sm:$0xff] %v3837_v29  ;;  %7468 = vmatpush.bf16.msra.mxu3 %v13843_v31  ;;  %v13691_v31 = vld [vmem:[#allocation3 + $0x2a4] sm:$0xf0] }
 0x2f0   : > { %v5282_v58 = vpop.f32.mrf.mxu2  ;;  %v5331_v15 = vpop.f32.mrf.mxu3  ;;  %3996 = vst [vmem:[#allocation3 + $0x2c8] sm:$0xff] %v3840_v26 }
 0x2f1   : > { %v5332_v60 = vadd.f32 %v5331_v15, %v5282_v58  ;;  %v3845_v58 = vrot.slane %v3843_v46, 4  ;;  %v3846_v15 = vrot.slane %v3700_v43, 6 }
 0x2f3   : > { %v15572_v63 = vadd.f32 %v5332_v60, %v5011_v61  ;;  %v5587_v4 = vpop.f32.mrf.mxu0  ;;  %v5636_v7 = vpop.f32.mrf.mxu1  ;;  %v11631_v60 = vor.u32 %v13688_v23, %v11628_v49  ;;  %v3847_v44 = vsel %vm15524_vm8, %v3845_v58, %v3846_v15  ;;  %v11636_v23 = vld [vmem:[#allocation3 + $0x2a8] sm:$0xf0] }
 0x2f4   : > { %v5637_v6 = vadd.f32 %v5636_v7, %v5587_v4  ;;  %v13771_v4 = vld [vmem:[%s15023_s14 + $0x428] sm:$0xff]  ;;  %3998 = vst [vmem:[#allocation3 + $0x2d8] sm:$0xff] %v3847_v44  ;;  %v11639_v15 = vor.u32 %v13690_v1, %v11636_v23  ;;  %v13770_v44 = vld [vmem:[%s15023_s14 + $0x420] sm:$0xff]  ;;  %v11644_v1 = vld [vmem:[#allocation3 + $0x2b8] sm:$0xf0] }
 0x2f5   : > { %v13779_v7 = vld [vmem:[%s15023_s14 + $0x468] sm:$0xff]  ;;  %6939 = vmatpush.bf16.msra.mxu0 %v13771_v4 }
 0x2f6   : > { %v5676_v24 = vadd.f32 %v5637_v6, %v15449_v25  ;;  %6265 = vmatmul.bf16.vlgmr.msrb.gmra.mxu0 %v11619_v45  ;;  %6314 = vmatmul.bf16.vlgmr.msrb.gmra.mxu1 %v11623_v56  ;;  %v11626_v25 = vld [vmem:[#allocation3 + $0x290] sm:$0xf]  ;;  %v13721_v6 = vld [vmem:[#allocation3 + $0x2b4] sm:$0xf0]  ;;  %v11794_v4 = vld [vmem:[#allocation3 + $0x2c0] sm:$0xf] }
 0x2f7   : > { %v11627_v2 = vor.u32 %v13689_v41, %v11626_v25  ;;  %6988 = vmatpush.bf16.msra.mxu1 %v13779_v7  ;;  %v3702_v25 = vld [vmem:[#allocation2 + $0x140] sm:$0xff] }
 0x2f8   : > { %v5284_v61 = vpop.f32.mrf.mxu2  ;;  %v5333_v16 = vpop.f32.mrf.mxu3  ;;  %v3850_v41 = vrot.slane %v3702_v25, 6  ;;  %v13692_v25 = vld [vmem:[#allocation3 + $0x2b4] sm:$0xf] }
 0x2f9   : > { %v5334_v37 = vadd.f32 %v5333_v16, %v5284_v61  ;;  %v11787_v61 = vor.u32 %v13721_v6, %v11786_v0  ;;  %6940 = vmatpush.bf16.msra.mxu0 %v13770_v44  ;;  %v13722_v0 = vld [vmem:[#allocation3 + $0x2c4] sm:$0xf] }
 0x2fb   : > { %v15579_v9 = vadd.f32 %v5334_v37, %v5012_v5  ;;  %v5589_v33 = vpop.f32.mrf.mxu0  ;;  %v5638_v34 = vpop.f32.mrf.mxu1  ;;  %v3698_v5 = vld [vmem:[#allocation2 + $0x60] sm:$0xcc] }
 0x2fc   : > { %v5639_v20 = vadd.f32 %v5638_v34, %v5589_v33  ;;  %v10641_v35 = vrot.slane %v3698_v5, 10  ;;  %v13834_v34 = vld [vmem:[%s15023_s14 + $0x1a0] sm:$0xff] }
 0x2fd   : > { %6605 = vmatmul.bf16.vlgmr.msrb.gmra.mxu2 %v11779_v14  ;;  %6654 = vmatmul.bf16.vlgmr.msrb.gmra.mxu3 %v11783_v28 }
 0x2fe   : > { %v5677_v21 = vadd.f32 %v5639_v20, %v15454_v19  ;;  %v3844_v19 = vsel %vm15524_vm8, %v10641_v35, %v3843_v46  ;;  %v13842_v20 = vld [vmem:[%s15023_s14 + $0x1e0] sm:$0xff]  ;;  %7420 = vmatpush.bf16.msra.mxu2 %v13834_v34 }
 0x2ff   : > { %3997 = vst [vmem:[#allocation3 + $0x2d0] sm:$0xff] %v3844_v19  ;;  %7469 = vmatpush.bf16.msra.mxu3 %v13842_v20  ;;  %v3703_v46 = vld [vmem:[#allocation2 + $0x80] sm:$0x33]  ;;  %v13693_v20 = vld [vmem:[#allocation3 + $0x2b4] sm:$0xf0] }
 0x300   : > { %v5927_v52 = vpop.f32.mrf.mxu2  ;;  %v5976_v54 = vpop.f32.mrf.mxu3 }
 0x301   : > { %v5977_v57 = vadd.f32 %v5976_v54, %v5927_v52  ;;  %v3852_v52 = vrot.slane %v3850_v41, 4  ;;  %v3853_v54 = vrot.slane %v3703_v46, 6 }
 0x303   : > { %v15588_v45 = vadd.f32 %v5977_v57, %v5676_v24  ;;  %v5592_v56 = vpop.f32.mrf.mxu0  ;;  %v5641_v29 = vpop.f32.mrf.mxu1  ;;  %v11788_v24 = vld [vmem:[#allocation3 + $0x2b8] sm:$0xf0]  ;;  %v3854_v57 = vsel %vm15524_vm8, %v3852_v52, %v3853_v54  ;;  %v11647_v54 = vor.u32 %v13692_v25, %v11644_v1  ;;  %v11652_v25 = vld [vmem:[#allocation3 + $0x2c8] sm:$0xf0] }
 0x304   : > { %v5642_v11 = vadd.f32 %v5641_v29, %v5592_v56  ;;  %v11791_v16 = vor.u32 %v13720_v13, %v11788_v24  ;;  %v13778_v56 = vld [vmem:[%s15023_s14 + $0x460] sm:$0xff]  ;;  %4000 = vst [vmem:[#allocation3 + $0x2e8] sm:$0xff] %v3854_v57  ;;  %v13769_v57 = vld [vmem:[%s15023_s14 + $0x418] sm:$0xff] }
 0x305   : > { %6989 = vmatpush.bf16.msra.mxu1 %v13778_v56  ;;  %6941 = vmatpush.bf16.msra.mxu0 %v13769_v57 }
 0x306   : > { %v5678_v26 = vadd.f32 %v5642_v11, %v15463_v32  ;;  %6270 = vmatmul.bf16.gmra.mxu0 %v11627_v2  ;;  %6319 = vmatmul.bf16.gmra.mxu1 %v11631_v60  ;;  %v11634_v32 = vld [vmem:[#allocation3 + $0x2a0] sm:$0xf]  ;;  %v13723_v11 = vld [vmem:[#allocation3 + $0x2c4] sm:$0xf0]  ;;  %v11802_v44 = vld [vmem:[#allocation3 + $0x2d0] sm:$0xf] }
 0x307   : > { %v11635_v58 = vor.u32 %v13691_v31, %v11634_v32  ;;  %v3705_v32 = vld [vmem:[#allocation2 + $0x1b8] sm:$0xff] }
 0x308   : > { %v5929_v27 = vpop.f32.mrf.mxu2  ;;  %v5978_v42 = vpop.f32.mrf.mxu3  ;;  %v3857_v31 = vrot.slane %v3705_v32, 6  ;;  %v13694_v32 = vld [vmem:[#allocation3 + $0x2c4] sm:$0xf] }
 0x309   : > { %v5979_v53 = vadd.f32 %v5978_v42, %v5929_v27  ;;  %v11795_v27 = vor.u32 %v13723_v11, %v11794_v4  ;;  %v13724_v4 = vld [vmem:[#allocation3 + $0x2d4] sm:$0xf] }
 0x30b   : > { %v15593_v37 = vadd.f32 %v5979_v53, %v5677_v21  ;;  %v5594_v14 = vpop.f32.mrf.mxu0  ;;  %v5643_v28 = vpop.f32.mrf.mxu1  ;;  %v3701_v21 = vld [vmem:[#allocation2 + $0x138] sm:$0xcc] }
 0x30c   : > { %v5644_v33 = vadd.f32 %v5643_v28, %v5594_v14  ;;  %v10642_v43 = vrot.slane %v3701_v21, 10  ;;  %v13833_v28 = vld [vmem:[%s15023_s14 + $0x198] sm:$0xff] }
 0x30d   : > { %6610 = vmatmul.bf16.gmra.mxu2 %v11787_v61  ;;  %6659 = vmatmul.bf16.gmra.mxu3 %v11791_v16 }
 0x30e   : > { %v5679_v40 = vadd.f32 %v5644_v33, %v15468_v8  ;;  %v3851_v8 = vsel %vm15524_vm8, %v10642_v43, %v3850_v41  ;;  %v13841_v33 = vld [vmem:[%s15023_s14 + $0x1d8] sm:$0xff]  ;;  %7421 = vmatpush.bf16.msra.mxu2 %v13833_v28  ;;  %v3706_v41 = vld [vmem:[#allocation2 + $0x28] sm:$0x33] }
 0x30f   : > { %3999 = vst [vmem:[#allocation3 + $0x2e0] sm:$0xff] %v3851_v8  ;;  %7470 = vmatpush.bf16.msra.mxu3 %v13841_v33  ;;  %v13695_v33 = vld [vmem:[#allocation3 + $0x2c4] sm:$0xf0] }
 0x310   : > { %v5932_v49 = vpop.f32.mrf.mxu2  ;;  %v5981_v5 = vpop.f32.mrf.mxu3 }
 0x311   : > { %v5982_v35 = vadd.f32 %v5981_v5, %v5932_v49  ;;  %v3859_v49 = vrot.slane %v3857_v31, 4  ;;  %v3860_v5 = vrot.slane %v3706_v41, 6 }
 0x313   : > { %v15602_v2 = vadd.f32 %v5982_v35, %v5678_v26  ;;  %v5597_v60 = vpop.f32.mrf.mxu0  ;;  %v5646_v19 = vpop.f32.mrf.mxu1  ;;  %v11796_v26 = vld [vmem:[#allocation3 + $0x2c8] sm:$0xf0]  ;;  %v3861_v35 = vsel %vm15524_vm8, %v3859_v49, %v3860_v5  ;;  %v11655_v5 = vor.u32 %v13694_v32, %v11652_v25  ;;  %v11660_v32 = vld [vmem:[#allocation3 + $0x2d8] sm:$0xf0] }
 0x314   : > { %v5647_v29 = vadd.f32 %v5646_v19, %v5597_v60  ;;  %v11799_v42 = vor.u32 %v13722_v0, %v11796_v26  ;;  %v13777_v60 = vld [vmem:[%s15023_s14 + $0x458] sm:$0xff]  ;;  %4002 = vst [vmem:[#allocation3 + $0x2f8] sm:$0xff] %v3861_v35  ;;  %v13768_v35 = vld [vmem:[%s15023_s14 + $0x410] sm:$0xff] }
 0x315   : > { %6990 = vmatpush.bf16.msra.mxu1 %v13777_v60  ;;  %6942 = vmatpush.bf16.msra.mxu0 %v13768_v35 }
 0x316   : > { %v5680_v7 = vadd.f32 %v5647_v29, %v15477_v62  ;;  %6275 = vmatmul.bf16.gmra.mxu0 %v11635_v58  ;;  %6324 = vmatmul.bf16.gmra.mxu1 %v11639_v15  ;;  %v11642_v62 = vld [vmem:[#allocation3 + $0x2b0] sm:$0xf]  ;;  %v13725_v29 = vld [vmem:[#allocation3 + $0x2d4] sm:$0xf0]  ;;  %v11810_v57 = vld [vmem:[#allocation3 + $0x2e0] sm:$0xf] }
 0x317   : > { %v11643_v52 = vor.u32 %v13693_v20, %v11642_v62  ;;  %v3708_v62 = vld [vmem:[#allocation2 + $0x158] sm:$0xff] }
 0x318   : > { %v5934_v6 = vpop.f32.mrf.mxu2  ;;  %v5983_v13 = vpop.f32.mrf.mxu3  ;;  %v3864_v20 = vrot.slane %v3708_v62, 6  ;;  %v13696_v62 = vld [vmem:[#allocation3 + $0x2d4] sm:$0xf] }
 0x319   : > { %v5984_v24 = vadd.f32 %v5983_v13, %v5934_v6  ;;  %v11803_v6 = vor.u32 %v13725_v29, %v11802_v44  ;;  %v13726_v44 = vld [vmem:[#allocation3 + $0x2e4] sm:$0xf] }
 0x31b   : > { %v15607_v53 = vadd.f32 %v5984_v24, %v5679_v40  ;;  %v5599_v61 = vpop.f32.mrf.mxu0  ;;  %v5648_v16 = vpop.f32.mrf.mxu1  ;;  %v3704_v40 = vld [vmem:[#allocation2 + $0x1a8] sm:$0xcc] }
 0x31c   : > { %v5649_v14 = vadd.f32 %v5648_v16, %v5599_v61  ;;  %v10643_v46 = vrot.slane %v3704_v40, 10  ;;  %v13832_v16 = vld [vmem:[%s15023_s14 + $0x190] sm:$0xff] }
 0x31d   : > { %6615 = vmatmul.bf16.gmra.mxu2 %v11795_v27  ;;  %6664 = vmatmul.bf16.gmra.mxu3 %v11799_v42 }
 0x31e   : > { %v5681_v34 = vadd.f32 %v5649_v14, %v15484_v36  ;;  %v3858_v36 = vsel %vm15524_vm8, %v10643_v46, %v3857_v31  ;;  %v13840_v14 = vld [vmem:[%s15023_s14 + $0x1d0] sm:$0xff]  ;;  %7422 = vmatpush.bf16.msra.mxu2 %v13832_v16  ;;  %v3709_v31 = vld [vmem:[#allocation2 + $0x128] sm:$0x33] }
 0x31f   : > { %4001 = vst [vmem:[#allocation3 + $0x2f0] sm:$0xff] %v3858_v36  ;;  %7471 = vmatpush.bf16.msra.mxu3 %v13840_v14  ;;  %v13697_v14 = vld [vmem:[#allocation3 + $0x2d4] sm:$0xf0] }
 0x320   : > { %v5937_v23 = vpop.f32.mrf.mxu2  ;;  %v5986_v21 = vpop.f32.mrf.mxu3 }
 0x321   : > { %v5987_v43 = vadd.f32 %v5986_v21, %v5937_v23  ;;  %v3866_v23 = vrot.slane %v3864_v20, 4  ;;  %v3867_v21 = vrot.slane %v3709_v31, 6 }
 0x323   : > { %v15616_v58 = vadd.f32 %v5987_v43, %v5680_v7  ;;  %v5602_v15 = vpop.f32.mrf.mxu0  ;;  %v5651_v8 = vpop.f32.mrf.mxu1  ;;  %v11804_v7 = vld [vmem:[#allocation3 + $0x2d8] sm:$0xf0]  ;;  %v3868_v43 = vsel %vm15524_vm8, %v3866_v23, %v3867_v21  ;;  %v11663_v21 = vor.u32 %v13696_v62, %v11660_v32 }
 0x324   : > { %v5652_v19 = vadd.f32 %v5651_v8, %v5602_v15  ;;  %v11807_v13 = vor.u32 %v13724_v4, %v11804_v7  ;;  %v13776_v15 = vld [vmem:[%s15023_s14 + $0x450] sm:$0xff]  ;;  %4004 = vst [vmem:[#allocation3 + $0x308] sm:$0xff] %v3868_v43  ;;  %v13767_v43 = vld [vmem:[%s15023_s14 + $0x408] sm:$0xff] }
 0x325   : > { %6991 = vmatpush.bf16.msra.mxu1 %v13776_v15  ;;  %6943 = vmatpush.bf16.msra.mxu0 %v13767_v43 }
 0x326   : > { %v5682_v56 = vadd.f32 %v5652_v19, %v15494_v3  ;;  %6280 = vmatmul.bf16.gmra.mxu0 %v11643_v52  ;;  %6329 = vmatmul.bf16.gmra.mxu1 %v11647_v54  ;;  %v11650_v3 = vld [vmem:[#allocation3 + $0x2c0] sm:$0xf]  ;;  %v13727_v19 = vld [vmem:[#allocation3 + $0x2e4] sm:$0xf0]  ;;  %v11818_v35 = vld [vmem:[#allocation3 + $0x2f0] sm:$0xf] }
 0x327   : > { %v11651_v49 = vor.u32 %v13695_v33, %v11650_v3  ;;  %v3711_v3 = vld [vmem:[#allocation2 + $0x8] sm:$0xff] }
 0x328   : > { %v5939_v11 = vpop.f32.mrf.mxu2  ;;  %v5988_v0 = vpop.f32.mrf.mxu3  ;;  %v3871_v33 = vrot.slane %v3711_v3, 6  ;;  %v11668_v3 = vld [vmem:[#allocation3 + $0x2e8] sm:$0xf0] }
 0x329   : > { %v5989_v26 = vadd.f32 %v5988_v0, %v5939_v11  ;;  %v11811_v11 = vor.u32 %v13727_v19, %v11810_v57  ;;  %v13728_v57 = vld [vmem:[#allocation3 + $0x2f4] sm:$0xf] }
 0x32b   : > { %v15621_v24 = vadd.f32 %v5989_v26, %v5681_v34  ;;  %v5604_v27 = vpop.f32.mrf.mxu0  ;;  %v5653_v42 = vpop.f32.mrf.mxu1  ;;  %v3707_v34 = vld [vmem:[#allocation2 + $0xf0] sm:$0xcc] }
 0x32c   : > { %v5654_v61 = vadd.f32 %v5653_v42, %v5604_v27  ;;  %v10644_v41 = vrot.slane %v3707_v34, 10  ;;  %v13831_v42 = vld [vmem:[%s15023_s14 + $0x188] sm:$0xff] }
 0x32d   : > { %6620 = vmatmul.bf16.gmra.mxu2 %v11803_v6  ;;  %6669 = vmatmul.bf16.gmra.mxu3 %v11807_v13 }
 0x32e   : > { %v5683_v28 = vadd.f32 %v5654_v61, %v15501_v18  ;;  %v3865_v18 = vsel %vm15524_vm8, %v10644_v41, %v3864_v20  ;;  %v13839_v61 = vld [vmem:[%s15023_s14 + $0x1c8] sm:$0xff]  ;;  %7423 = vmatpush.bf16.msra.mxu2 %v13831_v42  ;;  %v3712_v20 = vld [vmem:[#allocation2 + $0x170] sm:$0x33] }
 0x32f   : > { %4003 = vst [vmem:[#allocation3 + $0x300] sm:$0xff] %v3865_v18  ;;  %7472 = vmatpush.bf16.msra.mxu3 %v13839_v61  ;;  %v13699_v42 = vld [vmem:[#allocation3 + $0x2e4] sm:$0xf0]  ;;  %v13698_v61 = vld [vmem:[#allocation3 + $0x2e4] sm:$0xf] }
 0x330   : > { %v5942_v1 = vpop.f32.mrf.mxu2  ;;  %v5991_v40 = vpop.f32.mrf.mxu3  ;;  %v11671_v32 = vor.u32 %v13698_v61, %v11668_v3  ;;  %v13805_v3 = vld [vmem:[%s15023_s14 + $0x38] sm:$0xff] }
 0x331   : > { %v5992_v46 = vadd.f32 %v5991_v40, %v5942_v1  ;;  %v3873_v1 = vrot.slane %v3871_v33, 4  ;;  %v3874_v40 = vrot.slane %v3712_v20, 6 }
 0x333   : > { %v15630_v52 = vadd.f32 %v5992_v46, %v5682_v56  ;;  %v5607_v54 = vpop.f32.mrf.mxu0  ;;  %v5656_v36 = vpop.f32.mrf.mxu1  ;;  %v11812_v56 = vld [vmem:[#allocation3 + $0x2e8] sm:$0xf0]  ;;  %v3875_v46 = vsel %vm15524_vm8, %v3873_v1, %v3874_v40 }
 0x334   : > { %v5657_v8 = vadd.f32 %v5656_v36, %v5607_v54  ;;  %v11815_v0 = vor.u32 %v13726_v44, %v11812_v56  ;;  %v13775_v54 = vld [vmem:[%s15023_s14 + $0x448] sm:$0xff]  ;;  %4006 = vst [vmem:[#allocation3 + $0x318] sm:$0xff] %v3875_v46 }
 0x335   : > { %6992 = vmatpush.bf16.msra.mxu1 %v13775_v54 }
 0x336   : > { %v5684_v60 = vadd.f32 %v5657_v8, %v15511_v59  ;;  %6285 = vmatmul.bf16.gmra.mxu0 %v11651_v49  ;;  %6334 = vmatmul.bf16.gmra.mxu1 %v11655_v5  ;;  %v11658_v59 = vld [vmem:[#allocation3 + $0x2d0] sm:$0xf]  ;;  %v13729_v8 = vld [vmem:[#allocation3 + $0x2f4] sm:$0xf0] }
 0x337   : > { %v11659_v23 = vor.u32 %v13697_v14, %v11658_v59  ;;  %v11666_v59 = vld [vmem:[#allocation3 + $0x2e0] sm:$0xf] }
 0x338   : > { %v5944_v29 = vpop.f32.mrf.mxu2  ;;  %v5993_v4 = vpop.f32.mrf.mxu3 }
 0x339   : > { %v5994_v7 = vadd.f32 %v5993_v4, %v5944_v29  ;;  %v11819_v29 = vor.u32 %v13729_v8, %v11818_v35  ;;  %v13877_v8 = vld [vmem:[%s15023_s14 + $0x378] sm:$0xff] }
 0x33b   : > { %v15635_v26 = vadd.f32 %v5994_v7, %v5683_v28  ;;  %v5609_v6 = vpop.f32.mrf.mxu0  ;;  %v5658_v13 = vpop.f32.mrf.mxu1  ;;  %v3710_v28 = vld [vmem:[#allocation2 + $0x1d8] sm:$0xcc] }
 0x33c   : > { %v5659_v27 = vadd.f32 %v5658_v13, %v5609_v6  ;;  %v10645_v31 = vrot.slane %v3710_v28, 10  ;;  %v13838_v13 = vld [vmem:[%s15023_s14 + $0x1c0] sm:$0xff] }
 0x33d   : > { %6625 = vmatmul.bf16.gmra.mxu2 %v11811_v11  ;;  %6674 = vmatmul.bf16.gmra.mxu3 %v11815_v0 }
 0x33e   : > { %v5685_v16 = vadd.f32 %v5659_v27, %v15516_v10  ;;  %v3872_v10 = vsel %vm15524_vm8, %v10645_v31, %v3871_v33  ;;  %7473 = vmatpush.bf16.msra.mxu3 %v13838_v13  ;;  %v11667_v33 = vor.u32 %v13699_v42, %v11666_v59  ;;  %v13774_v31 = vld [vmem:[%s15023_s14 + $0x440] sm:$0xff] }
 0x33f   : > { %4005 = vst [vmem:[#allocation3 + $0x310] sm:$0xff] %v3872_v10  ;;  %6993 = vmatpush.bf16.msra.mxu1 %v13774_v31  ;;  %v13733_v31 = vld [vmem:[#allocation3 + $0x314] sm:$0xf0] }
 0x340   : > { %v5947_v25 = vpop.f32.mrf.mxu2  ;;  %v5996_v34 = vpop.f32.mrf.mxu3 }
 0x341   : > { %v5997_v41 = vadd.f32 %v5996_v34, %v5947_v25  ;;  %v13766_v34 = vld [vmem:[%s15023_s14 + $0x400] sm:$0xff] }
 0x342   : > { %6944 = vmatpush.bf16.msra.mxu0 %v13766_v34  ;;  %8063 = vmatpush.bf16.msrb.mxu3 %v13877_v8 }
 0x343   : > { %v15644_v49 = vadd.f32 %v5997_v41, %v5684_v60  ;;  %v5612_v5 = vpop.f32.mrf.mxu0  ;;  %v5661_v18 = vpop.f32.mrf.mxu1  ;;  %v11820_v60 = vld [vmem:[#allocation3 + $0x2f8] sm:$0xf0]  ;;  %v13731_v41 = vld [vmem:[#allocation3 + $0x304] sm:$0xf0] }
 0x344   : > { %v5662_v36 = vadd.f32 %v5661_v18, %v5612_v5  ;;  %v11823_v4 = vor.u32 %v13728_v57, %v11820_v60  ;;  %v11674_v60 = vld [vmem:[#allocation3 + $0x2f0] sm:$0xf] }
 0x346   : > { %v5686_v15 = vadd.f32 %v5662_v36, %v15531_v17  ;;  %6290 = vmatmul.bf16.gmra.mxu0 %v11659_v23  ;;  %6339 = vmatmul.bf16.gmra.mxu1 %v11663_v21  ;;  %v13830_v17 = vld [vmem:[%s15023_s14 + $0x180] sm:$0xff]  ;;  %v11828_v21 = vld [vmem:[#allocation3 + $0x308] sm:$0xf0] }
 0x347   : > { %7424 = vmatpush.bf16.msra.mxu2 %v13830_v17  ;;  %v13730_v23 = vld [vmem:[#allocation3 + $0x304] sm:$0xf]  ;;  %7691 = vmatpush.bf16.msrb.mxu0 %v13805_v3  ;;  %v2794_v3 = vld [vmem:[%s15055_s11 + $0x168] sm:$0xff] }
 0x348   : > { %v5949_v19 = vpop.f32.mrf.mxu2  ;;  %v5998_v44 = vpop.f32.mrf.mxu3  ;;  %v11831_v43 = vor.u32 %v13730_v23, %v11828_v21 }
 0x349   : > { %v5999_v56 = vadd.f32 %v5998_v44, %v5949_v19  ;;  %v13701_v19 = vld [vmem:[#allocation3 + $0x2f4] sm:$0xf0]  ;;  %v13700_v44 = vld [vmem:[#allocation3 + $0x2f4] sm:$0xf] }
 0x34b   : > { %v15649_v7 = vadd.f32 %v5999_v56, %v5685_v16  ;;  %v5614_v11 = vpop.f32.mrf.mxu0  ;;  %v5663_v0 = vpop.f32.mrf.mxu1  ;;  %v11676_v56 = vld [vmem:[#allocation3 + $0x2f8] sm:$0xf0] }
 0x34c   : > { %v5664_v6 = vadd.f32 %v5663_v0, %v5614_v11  ;;  %v2789_v11 = vld [vmem:[%s15055_s11 + $0x140] sm:$0xff]  ;;  %v2790_v0 = vld [vmem:[%s15055_s11 + $0x148] sm:$0xff]  ;;  %v11679_v59 = vor.u32 %v13700_v44, %v11676_v56  ;;  %v13868_v56 = vld [vmem:[%s15023_s14 + $0x330] sm:$0xff] }
 0x34d   : > { %6630 = vmatmul.bf16.gmra.mxu2 %v11819_v29  ;;  %6679 = vmatmul.bf16.gmra.mxu3 %v11823_v4  ;;  %v2858_v17 = vmul.f32 %v15057_v47, %v2789_v11  ;;  %v2859_v13 = vmul.f32 %v15060_v48, %v2790_v0  ;;  %v11938_v0 = vld [vmem:[#allocation3 + $0x2c0] sm:$0xf] }
 0x34e   : > { %v5687_v27 = vadd.f32 %v5664_v6, %v15544_v30  ;;  %v11826_v30 = vld [vmem:[#allocation3 + $0x300] sm:$0xf] }
 0x34f   : > { %v11827_v18 = vor.u32 %v13731_v41, %v11826_v30  ;;  %v11836_v30 = vld [vmem:[#allocation3 + $0x318] sm:$0xf0] }
 0x350   : > { %v5952_v14 = vpop.f32.mrf.mxu2  ;;  %v6001_v16 = vpop.f32.mrf.mxu3  ;;  %v2792_v41 = vld [vmem:[%s15055_s11 + $0x158] sm:$0xff] }
 0x351   : > { %v6002_v62 = vadd.f32 %v6001_v16, %v5952_v14  ;;  %v13813_v14 = vld [vmem:[%s15023_s14 + $0x78] sm:$0xff]  ;;  %v2927_v16 = vadd.f32 %v15065_v51, %v2858_v17  ;;  %v13750_v17 = vld [vmem:[#allocation3 + $0x2c4] sm:$0xf] }
 0x352   : > { %7740 = vmatpush.bf16.msrb.mxu1 %v13813_v14 }
 0x353   : > { %v15654_v28 = vadd.f32 %v6002_v62, %v5686_v15  ;;  %v5617_v20 = vpop.f32.mrf.mxu0  ;;  %v5666_v25 = vpop.f32.mrf.mxu1  ;;  %v2928_v62 = vadd.f32 %v15071_v55, %v2859_v13  ;;  %v11940_v13 = vld [vmem:[#allocation3 + $0x2c8] sm:$0xf0] }
 0x354   : > { %v5667_v1 = vadd.f32 %v5666_v25, %v5617_v20  ;;  %v2991_v20 = vmax.f32 %v2927_v16, 0.0 }
 0x355   : > { %v2992_v25 = vmax.f32 %v2928_v62, 0.0  ;;  %v2863_v62 = vmul.f32 %v15060_v48, %v2794_v3 }
 0x356   : > { %v5688_v40 = vadd.f32 %v5667_v1, %v15558_v12  ;;  %6295 = vmatmul.bf16.gmra.mxu0 %v11667_v33  ;;  %6344 = vmatmul.bf16.gmra.mxu1 %v11671_v32  ;;  %v13869_v12 = vld [vmem:[%s15023_s14 + $0x338] sm:$0xff]  ;;  %v11834_v32 = vld [vmem:[#allocation3 + $0x310] sm:$0xf]  ;;  %v13732_v1 = vld [vmem:[#allocation3 + $0x314] sm:$0xf] }
 0x357   : > { %8014 = vmatpush.bf16.msrb.mxu2 %v13869_v12  ;;  %v3035_v23 = vpack.c.bf16 %v2992_v25, %v2991_v20 }
 0x358   : > { %v5954_v10 = vpop.f32.mrf.mxu2  ;;  %v6003_v46 = vpop.f32.mrf.mxu3 }
 0x359   : > { %v6004_v5 = vadd.f32 %v6003_v46, %v5954_v10 }
 0x35b   : > { %v15659_v54 = vadd.f32 %v6004_v5, %v5687_v27  ;;  %v5619_v36 = vpop.f32.mrf.mxu0  ;;  %v5668_v35 = vpop.f32.mrf.mxu1  ;;  %v11675_v27 = vor.u32 %v13701_v19, %v11674_v60  ;;  %v2861_v5 = vmul.f32 %v15060_v48, %v2792_v41  ;;  %8015 = vmatpush.bf16.msrb.mxu2 %v13868_v56 }
 0x35c   : > { %v5669_v15 = vadd.f32 %v5668_v35, %v5619_v36  ;;  %v11839_v36 = vor.u32 %v13732_v1, %v11836_v30  ;;  %v13804_v1 = vld [vmem:[%s15023_s14 + $0x30] sm:$0xff] }
 0x35d   : > { %6635 = vmatmul.bf16.gmra.mxu2 %v11827_v18  ;;  %6684 = vmatmul.bf16.gmra.mxu3 %v11831_v43  ;;  %v11835_v43 = vor.u32 %v13733_v31, %v11834_v32  ;;  %v11943_v32 = vor.u32 %v13750_v17, %v11940_v13  ;;  %v13812_v30 = vld [vmem:[%s15023_s14 + $0x70] sm:$0xff] }
 0x35e   : > { %v5689_v57 = vadd.f32 %v5669_v15, %v15565_v39  ;;  %v2930_v15 = vadd.f32 %v15071_v55, %v2861_v5  ;;  %7692 = vmatpush.bf16.msrb.mxu0 %v13804_v1  ;;  %7741 = vmatpush.bf16.msrb.mxu1 %v13812_v30 }
 0x360   : > { %v5957_v29 = vpop.f32.mrf.mxu2  ;;  %v6006_v4 = vpop.f32.mrf.mxu3 }
 0x361   : > { %v6007_v6 = vadd.f32 %v6006_v4, %v5957_v29  ;;  %v13876_v29 = vld [vmem:[%s15023_s14 + $0x370] sm:$0xff]  ;;  %v2994_v4 = vmax.f32 %v2930_v15, 0.0  ;;  %v2796_v15 = vld [vmem:[%s15055_s11 + $0x178] sm:$0xff] }
 0x362   : > { %8064 = vmatpush.bf16.msrb.mxu3 %v13876_v29  ;;  %v2865_v56 = vmul.f32 %v15060_v48, %v2796_v15 }
 0x363   : > { %v15668_v39 = vadd.f32 %v6007_v6, %v5688_v40  ;;  %v5622_v42 = vpop.f32.mrf.mxu0  ;;  %v5671_v61 = vpop.f32.mrf.mxu1  ;;  %v2791_v40 = vld [vmem:[%s15055_s11 + $0x150] sm:$0xff]  ;;  %v13751_v6 = vld [vmem:[#allocation3 + $0x2c4] sm:$0xf0] }
 0x364   : > { %v5672_v33 = vadd.f32 %v5671_v61, %v5622_v42  ;;  %v2860_v46 = vmul.f32 %v15057_v47, %v2791_v40  ;;  %v2793_v61 = vld [vmem:[%s15055_s11 + $0x160] sm:$0xff]  ;;  %v2934_v17 = vadd.f32 %v15071_v55, %v2865_v56 }
 0x366   : > { %v5690_v34 = vadd.f32 %v5672_v33, %v15572_v63  ;;  %6300 = vmatmul.bf16.gmra.mxu0 %v11675_v27  ;;  %6349 = vmatmul.bf16.gmra.mxu1 %v11679_v59  ;;  %v3132_v63 = vrot.slane %v3035_v23, 7  ;;  %v2929_v35 = vadd.f32 %v15065_v51, %v2860_v46  ;;  %v11939_v33 = vor.u32 %v13751_v6, %v11938_v0  ;;  %v13815_v46 = vld [vmem:[#allocation3 + $0xa4] sm:$0xf0] }
 0x367   : > { %v2932_v23 = vadd.f32 %v15071_v55, %v2863_v62  ;;  %v2998_v3 = vmax.f32 %v2934_v17, 0.0  ;;  %v11946_v62 = vld [vmem:[#allocation3 + $0x2d0] sm:$0xf]  ;;  %v12108_v17 = vld [vmem:[#allocation3 + $0xb8] sm:$0xf0] }
 0x368   : > { %v5959_v21 = vpop.f32.mrf.mxu2  ;;  %v6008_v10 = vpop.f32.mrf.mxu3  ;;  %v2993_v44 = vmax.f32 %v2929_v35, 0.0  ;;  %3241 = vst [vmem:[#allocation2 + $0x40] sm:$0xee] %v3132_v63  ;;  %v3133_v42 = vrot.slane %v3132_v63, 4  ;;  %v12100_v63 = vld [vmem:[#allocation3 + $0xa8] sm:$0xf0] }
 0x369   : > { %v6009_v18 = vadd.f32 %v6008_v10, %v5959_v21  ;;  %v12098_v10 = vld [vmem:[#allocation3 + $0xa0] sm:$0xf]  ;;  %v2795_v35 = vld [vmem:[%s15055_s11 + $0x170] sm:$0xff] }
 0x36b   : > { %v15681_v12 = vadd.f32 %v6009_v18, %v5689_v57  ;;  %v5624_v8 = vpop.f32.mrf.mxu0  ;;  %v5673_v60 = vpop.f32.mrf.mxu1  ;;  %v15686_v57 = vpack.c.bf16 %v2994_v4, %v2993_v44  ;;  %v2996_v18 = vmax.f32 %v2932_v23, 0.0  ;;  %v2864_v44 = vmul.f32 %v15057_v47, %v2795_v35  ;;  %v2797_v23 = vld [vmem:[%s15055_s11 + $0x180] sm:$0xff] }
 0x36c   : > { %v5674_v19 = vadd.f32 %v5673_v60, %v5624_v8  ;;  %v12099_v4 = vor.u32 %v13815_v46, %v12098_v10 }
 0x36d   : > { %6640 = vmatmul.bf16.gmra.mxu2 %v11835_v43  ;;  %6689 = vmatmul.bf16.gmra.mxu3 %v11839_v36  ;;  %v3134_v16 = vrot.slane %v15686_v57, 7  ;;  %v13814_v36 = vld [vmem:[#allocation3 + $0xa4] sm:$0xf]  ;;  %v2933_v6 = vadd.f32 %v15065_v51, %v2864_v44  ;;  %v13996_v57 = vld [vmem:[%s15023_s14 + $0x130] sm:$0xff] }
 0x36e   : > { %v5691_v11 = vadd.f32 %v5674_v19, %v15579_v9  ;;  %v2862_v9 = vmul.f32 %v15057_v47, %v2793_v61  ;;  %v12103_v0 = vor.u32 %v13814_v36, %v12100_v63 }
 0x36f   : > { %v3135_v40 = vsel %vm15109_vm2, %v3133_v42, %v3134_v16  ;;  %v2997_v61 = vmax.f32 %v2933_v6, 0.0  ;;  %v13816_v6 = vld [vmem:[#allocation3 + $0xb4] sm:$0xf] }
 0x370   : > { %v5962_v27 = vpop.f32.mrf.mxu2  ;;  %v6011_v59 = vpop.f32.mrf.mxu3  ;;  %v2931_v41 = vadd.f32 %v15065_v51, %v2862_v9  ;;  %3242 = vst [vmem:[#allocation2 + $0xa8] sm:$0xff] %v3135_v40 }
 0x371   : > { %v6012_v14 = vadd.f32 %v6011_v59, %v5962_v27  ;;  %3324 = vst [vmem:[#allocation3 + $0xc8] sm:$0xff] %v3135_v40 }
 0x372   : > { %v2995_v5 = vmax.f32 %v2931_v41, 0.0 }
 0x373   : > { %v15693_v20 = vadd.f32 %v6012_v14, %v5690_v34  ;;  %v6266_v25 = vpop.f32.mrf.mxu0  ;;  %v6315_v31 = vpop.f32.mrf.mxu1  ;;  %v3283_v34 = vld [vmem:[#allocation2 + $0x40] sm:$0xff]  ;;  %v13867_v14 = vld [vmem:[%s15023_s14 + $0x328] sm:$0xff] }
 0x374   : > { %v6316_v21 = vadd.f32 %v6315_v31, %v6266_v25  ;;  %3323 = vst [vmem:[#allocation3 + $0xc0] sm:$0xff] %v3283_v34  ;;  %v3037_v8 = vpack.c.bf16 %v2996_v18, %v2995_v5  ;;  %v13753_v25 = vld [vmem:[#allocation3 + $0x2d4] sm:$0xf0]  ;;  %v11948_v31 = vld [vmem:[#allocation3 + $0x2d8] sm:$0xf0]  ;;  %8016 = vmatpush.bf16.msrb.mxu2 %v13867_v14 }
 0x375   : > { %v11947_v46 = vor.u32 %v13753_v25, %v11946_v62 }
 0x376   : > { %v6355_v43 = vadd.f32 %v6316_v21, %v15588_v45  ;;  %6945 = vmatmul.bf16.vlgmr.msra.gmra.mxu0 %v11939_v33  ;;  %6994 = vmatmul.bf16.vlgmr.msra.gmra.mxu1 %v11943_v32  ;;  %v3137_v45 = vrot.slane %v3037_v8, 7  ;;  %v13875_v33 = vld [vmem:[%s15023_s14 + $0x368] sm:$0xff]  ;;  %v15715_v32 = vpack.c.bf16 %v2998_v3, %v2997_v61 }
 0x377   : > { %8065 = vmatpush.bf16.msrb.mxu3 %v13875_v33  ;;  %v2798_v21 = vld [vmem:[%s15055_s11 + $0x188] sm:$0xff] }
 0x378   : > { %v5964_v60 = vpop.f32.mrf.mxu2  ;;  %v6013_v19 = vpop.f32.mrf.mxu3  ;;  %3244 = vst [vmem:[#allocation2 + $0x1a0] sm:$0xee] %v3137_v45  ;;  %v3138_v40 = vrot.slane %v3137_v45, 4  ;;  %v3139_v41 = vrot.slane %v15715_v32, 7  ;;  %v2867_v34 = vmul.f32 %v15060_v48, %v2798_v21  ;;  %v13803_v8 = vld [vmem:[%s15023_s14 + $0x28] sm:$0xff] }
 0x379   : > { %v6014_v29 = vadd.f32 %v6013_v19, %v5964_v60  ;;  %v13811_v60 = vld [vmem:[%s15023_s14 + $0x68] sm:$0xff]  ;;  %7693 = vmatpush.bf16.msrb.mxu0 %v13803_v8  ;;  %v13817_v45 = vld [vmem:[#allocation3 + $0xb4] sm:$0xf0] }
 0x37a   : > { %v3140_v18 = vsel %vm15109_vm2, %v3138_v40, %v3139_v41  ;;  %v2936_v44 = vadd.f32 %v15071_v55, %v2867_v34  ;;  %7742 = vmatpush.bf16.msrb.mxu1 %v13811_v60  ;;  %v13866_v34 = vld [vmem:[%s15023_s14 + $0x320] sm:$0xff] }
 0x37b   : > { %v15710_v13 = vadd.f32 %v6014_v29, %v5691_v11  ;;  %v6268_v27 = vpop.f32.mrf.mxu0  ;;  %v6317_v59 = vpop.f32.mrf.mxu1  ;;  %v13752_v11 = vld [vmem:[#allocation3 + $0x2d4] sm:$0xf]  ;;  %3245 = vst [vmem:[#allocation2 + $0xb8] sm:$0xff] %v3140_v18  ;;  %v12106_v29 = vld [vmem:[#allocation3 + $0xb0] sm:$0xf]  ;;  %8017 = vmatpush.bf16.msrb.mxu2 %v13866_v34 }
 0x37c   : > { %v6318_v42 = vadd.f32 %v6317_v59, %v6268_v27  ;;  %v11951_v5 = vor.u32 %v13752_v11, %v11948_v31  ;;  %3326 = vst [vmem:[#allocation3 + $0xd8] sm:$0xff] %v3140_v18  ;;  %v2799_v27 = vld [vmem:[%s15055_s11 + $0x190] sm:$0xff]  ;;  %v2800_v59 = vld [vmem:[%s15055_s11 + $0x198] sm:$0xff]  ;;  %v12107_v25 = vor.u32 %v13817_v45, %v12106_v29  ;;  %v12111_v11 = vor.u32 %v13816_v6, %v12108_v17  ;;  %v11954_v18 = vld [vmem:[#allocation3 + $0x2e0] sm:$0xf] }
 0x37d   : > { %7425 = vmatmul.bf16.vlgmr.msra.gmra.mxu2 %v12099_v4  ;;  %7474 = vmatmul.bf16.vlgmr.msra.gmra.mxu3 %v12103_v0  ;;  %v2868_v14 = vmul.f32 %v15057_v47, %v2799_v27  ;;  %v2869_v62 = vmul.f32 %v15060_v48, %v2800_v59  ;;  %v2802_v29 = vld [vmem:[%s15055_s11 + $0x1a8] sm:$0xff] }
 0x37e   : > { %v6356_v9 = vadd.f32 %v6318_v42, %v15593_v37  ;;  %v2866_v37 = vmul.f32 %v15057_v47, %v2797_v23 }
 0x37f   : > { %v3285_v36 = vld [vmem:[#allocation2 + $0x1a0] sm:$0xff]  ;;  %v2937_v31 = vadd.f32 %v15065_v51, %v2868_v14 }
 0x380   : > { %v6606_v1 = vpop.f32.mrf.mxu2  ;;  %v6655_v30 = vpop.f32.mrf.mxu3  ;;  %v2935_v19 = vadd.f32 %v15065_v51, %v2866_v37  ;;  %3325 = vst [vmem:[#allocation3 + $0xd0] sm:$0xff] %v3285_v36 }
 0x381   : > { %v6656_v10 = vadd.f32 %v6655_v30, %v6606_v1  ;;  %v2938_v1 = vadd.f32 %v15071_v55, %v2869_v62 }
 0x382   : > { %v2999_v4 = vmax.f32 %v2935_v19, 0.0 }
 0x383   : > { %v15726_v63 = vadd.f32 %v6656_v10, %v6355_v43  ;;  %v6271_v35 = vpop.f32.mrf.mxu0  ;;  %v6320_v15 = vpop.f32.mrf.mxu1  ;;  %v3000_v43 = vmax.f32 %v2936_v44, 0.0  ;;  %v3001_v10 = vmax.f32 %v2937_v31, 0.0  ;;  %v3002_v37 = vmax.f32 %v2938_v1, 0.0  ;;  %v13819_v1 = vld [vmem:[#allocation3 + $0xc4] sm:$0xf0] }
 0x384   : > { %v6321_v56 = vadd.f32 %v6320_v15, %v6271_v35  ;;  %v13755_v35 = vld [vmem:[#allocation3 + $0x2e4] sm:$0xf0]  ;;  %v11956_v15 = vld [vmem:[#allocation3 + $0x2e8] sm:$0xf0] }
 0x385   : > { %v3039_v42 = vpack.c.bf16 %v3000_v43, %v2999_v4  ;;  %v15744_v36 = vpack.c.bf16 %v3002_v37, %v3001_v10  ;;  %v2871_v43 = vmul.f32 %v15060_v48, %v2802_v29  ;;  %v11955_v45 = vor.u32 %v13755_v35, %v11954_v18  ;;  %v2804_v10 = vld [vmem:[%s15055_s11 + $0x1b8] sm:$0xff] }
 0x386   : > { %v6357_v0 = vadd.f32 %v6321_v56, %v15602_v2  ;;  %6950 = vmatmul.bf16.gmra.mxu0 %v11947_v46  ;;  %6999 = vmatmul.bf16.gmra.mxu1 %v11951_v5  ;;  %v13874_v46 = vld [vmem:[%s15023_s14 + $0x360] sm:$0xff]  ;;  %v2873_v35 = vmul.f32 %v15060_v48, %v2804_v10 }
 0x387   : > { %v3142_v2 = vrot.slane %v3039_v42, 7  ;;  %8066 = vmatpush.bf16.msrb.mxu3 %v13874_v46  ;;  %v3144_v44 = vrot.slane %v15744_v36, 7  ;;  %v2801_v56 = vld [vmem:[%s15055_s11 + $0x1a0] sm:$0xff]  ;;  %v2940_v62 = vadd.f32 %v15071_v55, %v2871_v43 }
 0x388   : > { %v6608_v61 = vpop.f32.mrf.mxu2  ;;  %v6657_v3 = vpop.f32.mrf.mxu3 }
 0x389   : > { %v6658_v33 = vadd.f32 %v6657_v3, %v6608_v61  ;;  %3247 = vst [vmem:[#allocation2 + $0x38] sm:$0xee] %v3142_v2  ;;  %v3143_v19 = vrot.slane %v3142_v2, 4  ;;  %v13802_v61 = vld [vmem:[%s15023_s14 + $0x20] sm:$0xff]  ;;  %v3004_v2 = vmax.f32 %v2940_v62, 0.0 }
 0x38a   : > { %v13810_v3 = vld [vmem:[%s15023_s14 + $0x60] sm:$0xff]  ;;  %7694 = vmatpush.bf16.msrb.mxu0 %v13802_v61 }
 0x38b   : > { %v15739_v30 = vadd.f32 %v6658_v33, %v6356_v9  ;;  %v6273_v40 = vpop.f32.mrf.mxu0  ;;  %v6322_v23 = vpop.f32.mrf.mxu1  ;;  %v13754_v9 = vld [vmem:[#allocation3 + $0x2e4] sm:$0xf]  ;;  %v3145_v17 = vsel %vm15109_vm2, %v3143_v19, %v3144_v44  ;;  %7743 = vmatpush.bf16.msrb.mxu1 %v13810_v3  ;;  %v2942_v19 = vadd.f32 %v15071_v55, %v2873_v35  ;;  %v13757_v3 = vld [vmem:[#allocation3 + $0x2f4] sm:$0xf0] }
 0x38c   : > { %v6323_v21 = vadd.f32 %v6322_v23, %v6273_v40  ;;  %v11959_v6 = vor.u32 %v13754_v9, %v11956_v15  ;;  %3248 = vst [vmem:[#allocation2 + $0x20] sm:$0xff] %v3145_v17  ;;  %v13818_v40 = vld [vmem:[#allocation3 + $0xc4] sm:$0xf]  ;;  %v12116_v23 = vld [vmem:[#allocation3 + $0xc8] sm:$0xf0]  ;;  %v13809_v35 = vld [vmem:[%s15023_s14 + $0x58] sm:$0xff] }
 0x38d   : > { %7430 = vmatmul.bf16.gmra.mxu2 %v12107_v25  ;;  %7479 = vmatmul.bf16.gmra.mxu3 %v12111_v11  ;;  %3328 = vst [vmem:[#allocation3 + $0xe8] sm:$0xff] %v3145_v17  ;;  %v12114_v11 = vld [vmem:[#allocation3 + $0xc0] sm:$0xf]  ;;  %v13873_v17 = vld [vmem:[%s15023_s14 + $0x358] sm:$0xff] }
 0x38e   : > { %v6358_v5 = vadd.f32 %v6323_v21, %v15607_v53  ;;  %v2870_v53 = vmul.f32 %v15057_v47, %v2801_v56  ;;  %v2803_v21 = vld [vmem:[%s15055_s11 + $0x1b0] sm:$0xff]  ;;  %v12115_v15 = vor.u32 %v13819_v1, %v12114_v11  ;;  %8067 = vmatpush.bf16.msrb.mxu3 %v13873_v17 }
 0x38f   : > { %v2872_v18 = vmul.f32 %v15057_v47, %v2803_v21  ;;  %7744 = vmatpush.bf16.msrb.mxu1 %v13809_v35  ;;  %v3714_v35 = vld [vmem:[#allocation2 + $0xa0] sm:$0xff] }
 0x390   : > { %v6611_v8 = vpop.f32.mrf.mxu2  ;;  %v6660_v60 = vpop.f32.mrf.mxu3  ;;  %v2939_v14 = vadd.f32 %v15065_v51, %v2870_v53  ;;  %v3287_v25 = vld [vmem:[#allocation2 + $0x38] sm:$0xff] }
 0x391   : > { %v6661_v4 = vadd.f32 %v6660_v60, %v6611_v8  ;;  %3327 = vst [vmem:[#allocation3 + $0xe0] sm:$0xff] %v3287_v25  ;;  %v12119_v8 = vor.u32 %v13818_v40, %v12116_v23  ;;  %v2941_v60 = vadd.f32 %v15065_v51, %v2872_v18  ;;  %v13801_v18 = vld [vmem:[%s15023_s14 + $0x18] sm:$0xff] }
 0x392   : > { %7695 = vmatpush.bf16.msrb.mxu0 %v13801_v18  ;;  %v13872_v18 = vld [vmem:[%s15023_s14 + $0x350] sm:$0xff] }
 0x393   : > { %v15755_v27 = vadd.f32 %v6661_v4, %v6357_v0  ;;  %v6276_v59 = vpop.f32.mrf.mxu0  ;;  %v6325_v42 = vpop.f32.mrf.mxu1  ;;  %v3003_v0 = vmax.f32 %v2939_v14, 0.0  ;;  %v3005_v43 = vmax.f32 %v2941_v60, 0.0  ;;  %v11964_v14 = vld [vmem:[#allocation3 + $0x2f8] sm:$0xf0]  ;;  %v12122_v60 = vld [vmem:[#allocation3 + $0xd0] sm:$0xf]  ;;  %8068 = vmatpush.bf16.msrb.mxu3 %v13872_v18 }
 0x394   : > { %v6326_v33 = vadd.f32 %v6325_v42, %v6276_v59  ;;  %v11962_v42 = vld [vmem:[#allocation3 + $0x2f0] sm:$0xf]  ;;  %v3382_v36 = vld [vmem:[#allocation2 + $0x20] sm:$0xff] }
 0x395   : > { %v3041_v37 = vpack.c.bf16 %v3004_v2, %v3003_v0  ;;  %v2805_v0 = vld [vmem:[%s15055_s11 + $0x1c0] sm:$0xff]  ;;  %v2806_v2 = vld [vmem:[%s15055_s11 + $0x1c8] sm:$0xff]  ;;  %v11963_v23 = vor.u32 %v13757_v3, %v11962_v42 }
 0x396   : > { %v6359_v31 = vadd.f32 %v6326_v33, %v15616_v58  ;;  %6955 = vmatmul.bf16.gmra.mxu0 %v11955_v45  ;;  %7004 = vmatmul.bf16.gmra.mxu1 %v11959_v6  ;;  %v3006_v45 = vmax.f32 %v2942_v19, 0.0  ;;  %v13865_v6 = vld [vmem:[%s15023_s14 + $0x318] sm:$0xff]  ;;  %v2875_v40 = vmul.f32 %v15060_v48, %v2806_v2 }
 0x397   : > { %v3147_v58 = vrot.slane %v3041_v37, 7  ;;  %8018 = vmatpush.bf16.msrb.mxu2 %v13865_v6  ;;  %v2808_v6 = vld [vmem:[%s15055_s11 + $0x1d8] sm:$0xff] }
 0x398   : > { %v6613_v34 = vpop.f32.mrf.mxu2  ;;  %v6662_v46 = vpop.f32.mrf.mxu3  ;;  %v15773_v61 = vpack.c.bf16 %v3006_v45, %v3005_v43  ;;  %v12124_v43 = vld [vmem:[#allocation3 + $0xd8] sm:$0xf0]  ;;  %v2807_v45 = vld [vmem:[%s15055_s11 + $0x1d0] sm:$0xff] }
 0x399   : > { %v6663_v9 = vadd.f32 %v6662_v46, %v6613_v34  ;;  %3250 = vst [vmem:[#allocation2 + $0x58] sm:$0xee] %v3147_v58  ;;  %v3148_v25 = vrot.slane %v3147_v58, 4 }
 0x39a   : > { %v3149_v11 = vrot.slane %v15773_v61, 7 }
 0x39b   : > { %v15768_v56 = vadd.f32 %v6663_v9, %v6358_v5  ;;  %v6278_v29 = vpop.f32.mrf.mxu0  ;;  %v6327_v4 = vpop.f32.mrf.mxu1  ;;  %v13756_v5 = vld [vmem:[#allocation3 + $0x2f4] sm:$0xf] }
 0x39c   : > { %v6328_v53 = vadd.f32 %v6327_v4, %v6278_v29  ;;  %v11967_v21 = vor.u32 %v13756_v5, %v11964_v14  ;;  %v3150_v10 = vsel %vm15109_vm2, %v3148_v25, %v3149_v11  ;;  %v13821_v4 = vld [vmem:[#allocation3 + $0xd4] sm:$0xf0]  ;;  %v2876_v5 = vmul.f32 %v15057_v47, %v2807_v45 }
 0x39d   : > { %7435 = vmatmul.bf16.gmra.mxu2 %v12115_v15  ;;  %7484 = vmatmul.bf16.gmra.mxu3 %v12119_v8  ;;  %3251 = vst [vmem:[#allocation2 + $0x88] sm:$0xff] %v3150_v10  ;;  %v2944_v15 = vadd.f32 %v15071_v55, %v2875_v40  ;;  %v2877_v14 = vmul.f32 %v15060_v48, %v2808_v6 }
 0x39e   : > { %v6360_v59 = vadd.f32 %v6328_v53, %v15621_v24  ;;  %v2874_v24 = vmul.f32 %v15057_v47, %v2805_v0  ;;  %3330 = vst [vmem:[#allocation3 + $0xf8] sm:$0xff] %v3150_v10  ;;  %v13820_v53 = vld [vmem:[#allocation3 + $0xd4] sm:$0xf]  ;;  %v2945_v0 = vadd.f32 %v15065_v51, %v2876_v5 }
 0x39f   : > { %v3008_v19 = vmax.f32 %v2944_v15, 0.0  ;;  %v12127_v25 = vor.u32 %v13820_v53, %v12124_v43  ;;  %v2946_v2 = vadd.f32 %v15071_v55, %v2877_v14  ;;  %v13759_v15 = vld [vmem:[#allocation3 + $0x304] sm:$0xf0] }
 0x3a0   : > { %v6616_v62 = vpop.f32.mrf.mxu2  ;;  %v6665_v33 = vpop.f32.mrf.mxu3  ;;  %v2943_v9 = vadd.f32 %v15065_v51, %v2874_v24  ;;  %v3289_v58 = vld [vmem:[#allocation2 + $0x58] sm:$0xff] }
 0x3a1   : > { %v6666_v1 = vadd.f32 %v6665_v33, %v6616_v62  ;;  %3329 = vst [vmem:[#allocation3 + $0xf0] sm:$0xff] %v3289_v58  ;;  %v12123_v33 = vor.u32 %v13821_v4, %v12122_v60  ;;  %v3010_v10 = vmax.f32 %v2946_v2, 0.0  ;;  %v11972_v60 = vld [vmem:[#allocation3 + $0x308] sm:$0xf0] }
 0x3a3   : > { %v15784_v37 = vadd.f32 %v6666_v1, %v6359_v31  ;;  %v6281_v34 = vpop.f32.mrf.mxu0  ;;  %v6330_v46 = vpop.f32.mrf.mxu1  ;;  %v3007_v31 = vmax.f32 %v2943_v9, 0.0 }
 0x3a4   : > { %v6331_v8 = vadd.f32 %v6330_v46, %v6281_v34  ;;  %v11970_v34 = vld [vmem:[#allocation3 + $0x300] sm:$0xf]  ;;  %v13864_v46 = vld [vmem:[%s15023_s14 + $0x310] sm:$0xff]  ;;  %v3385_v61 = vld [vmem:[#allocation2 + $0x88] sm:$0xff] }
 0x3a5   : > { %v3043_v17 = vpack.c.bf16 %v3008_v19, %v3007_v31  ;;  %8019 = vmatpush.bf16.msrb.mxu2 %v13864_v46  ;;  %v3713_v31 = vld [vmem:[#allocation2 + $0xc0] sm:$0xcc]  ;;  %v3715_v19 = vld [vmem:[#allocation2 + $0x148] sm:$0x33] }
 0x3a6   : > { %v6361_v29 = vadd.f32 %v6331_v8, %v15630_v52  ;;  %6960 = vmatmul.bf16.gmra.mxu0 %v11963_v23  ;;  %7009 = vmatmul.bf16.gmra.mxu1 %v11967_v21  ;;  %v3009_v21 = vmax.f32 %v2945_v0, 0.0  ;;  %v3878_v8 = vrot.slane %v3714_v35, 6  ;;  %v10646_v43 = vrot.slane %v3713_v31, 10  ;;  %v12130_v31 = vld [vmem:[#allocation3 + $0xe0] sm:$0xf] }
 0x3a7   : > { %v3152_v52 = vrot.slane %v3043_v17, 7  ;;  %v3881_v6 = vrot.slane %v3715_v19, 6  ;;  %v2809_v17 = vld [vmem:[%s15055_s11 + $0x1e0] sm:$0xff] }
 0x3a8   : > { %v6618_v42 = vpop.f32.mrf.mxu2  ;;  %v6667_v3 = vpop.f32.mrf.mxu3  ;;  %v15804_v58 = vpack.c.bf16 %v3010_v10, %v3009_v21  ;;  %v3880_v45 = vrot.slane %v3878_v8, 4  ;;  %v2878_v14 = vmul.f32 %v15057_v47, %v2809_v17  ;;  %v3879_v0 = vsel %vm15524_vm8, %v10646_v43, %v3878_v8  ;;  %v13808_v21 = vld [vmem:[%s15023_s14 + $0x50] sm:$0xff]  ;;  %v13822_v19 = vld [vmem:[#allocation3 + $0xe4] sm:$0xf] }
 0x3a9   : > { %v6668_v62 = vadd.f32 %v6667_v3, %v6618_v42  ;;  %3253 = vst [vmem:[#allocation2 + $0x68] sm:$0xee] %v3152_v52  ;;  %v2810_v42 = vld [vmem:[%s15055_s11 + $0x1e8] sm:$0xff]  ;;  %7745 = vmatpush.bf16.msrb.mxu1 %v13808_v21 }
 0x3aa   : > { %v3154_v5 = vrot.slane %v15804_v58, 7  ;;  %v3882_v2 = vsel %vm15524_vm8, %v3880_v45, %v3881_v6  ;;  %4007 = vst [vmem:[#allocation3 + $0x320] sm:$0xff] %v3879_v0  ;;  %v2947_v10 = vadd.f32 %v15065_v51, %v2878_v14 }
 0x3ab   : > { %v15797_v1 = vadd.f32 %v6668_v62, %v6360_v59  ;;  %v6283_v24 = vpop.f32.mrf.mxu0  ;;  %v6332_v40 = vpop.f32.mrf.mxu1  ;;  %v13758_v59 = vld [vmem:[#allocation3 + $0x304] sm:$0xf]  ;;  %v2879_v62 = vmul.f32 %v15060_v48, %v2810_v42  ;;  %4008 = vst [vmem:[#allocation3 + $0x328] sm:$0xff] %v3882_v2 }
 0x3ac   : > { %v6333_v23 = vadd.f32 %v6332_v40, %v6283_v24 }
 0x3ad   : > { %7440 = vmatmul.bf16.gmra.mxu2 %v12123_v33  ;;  %7489 = vmatmul.bf16.gmra.mxu3 %v12127_v25  ;;  %v11971_v33 = vor.u32 %v13759_v15, %v11970_v34  ;;  %v11975_v25 = vor.u32 %v13758_v59, %v11972_v60  ;;  %v2948_v46 = vadd.f32 %v15071_v55, %v2879_v62  ;;  %v13823_v34 = vld [vmem:[#allocation3 + $0xe4] sm:$0xf0]  ;;  %v12132_v15 = vld [vmem:[#allocation3 + $0xe8] sm:$0xf0]  ;;  %v3011_v59 = vmax.f32 %v2947_v10, 0.0 }
 0x3ae   : > { %v15802_v9 = vadd.f32 %v6333_v23, %v15635_v26  ;;  %v3153_v26 = vrot.slane %v3152_v52, 4  ;;  %v13800_v23 = vld [vmem:[%s15023_s14 + $0x10] sm:$0xff]  ;;  %v12135_v14 = vor.u32 %v13822_v19, %v12132_v15 }
 0x3af   : > { %7696 = vmatpush.bf16.msrb.mxu0 %v13800_v23  ;;  %v3012_v8 = vmax.f32 %v2948_v46, 0.0  ;;  %v13863_v23 = vld [vmem:[%s15023_s14 + $0x308] sm:$0xff]  ;;  %v11980_v46 = vld [vmem:[#allocation3 + $0x318] sm:$0xf0] }
 0x3b0   : > { %v6621_v4 = vpop.f32.mrf.mxu2  ;;  %v6670_v53 = vpop.f32.mrf.mxu3  ;;  %v3155_v35 = vsel %vm15109_vm2, %v3153_v26, %v3154_v5  ;;  %8020 = vmatpush.bf16.msrb.mxu2 %v13863_v23 }
 0x3b1   : > { %v6671_v3 = vadd.f32 %v6670_v53, %v6621_v4  ;;  %3254 = vst [vmem:[#allocation2 + $0xc8] sm:$0xff] %v3155_v35  ;;  %v2811_v4 = vld [vmem:[%s15055_s11 + $0x1f0] sm:$0xff]  ;;  %v2812_v53 = vld [vmem:[%s15055_s11 + $0x1f8] sm:$0xff]  ;;  %v3045_v43 = vpack.c.bf16 %v3012_v8, %v3011_v59 }
 0x3b2   : > { %3332 = vst [vmem:[#allocation3 + $0x108] sm:$0xff] %v3155_v35  ;;  %v2880_v26 = vmul.f32 %v15057_v47, %v2811_v4  ;;  %v2881_v17 = vmul.f32 %v15060_v48, %v2812_v53  ;;  %v11978_v48 = vld [vmem:[#allocation3 + $0x310] sm:$0xf] }
 0x3b3   : > { %v15815_v24 = vadd.f32 %v6671_v3, %v6361_v29  ;;  %v6286_v52 = vpop.f32.mrf.mxu0  ;;  %v6335_v40 = vpop.f32.mrf.mxu1  ;;  %v3291_v29 = vld [vmem:[#allocation2 + $0x68] sm:$0xff]  ;;  %v12131_v3 = vor.u32 %v13823_v34, %v12130_v31  ;;  %v3718_v34 = vld [vmem:[#allocation2 + $0xf8] sm:$0x33] }
 0x3b4   : > { %v6336_v18 = vadd.f32 %v6335_v40, %v6286_v52  ;;  %3331 = vst [vmem:[#allocation3 + $0x100] sm:$0xff] %v3291_v29  ;;  %v2949_v62 = vadd.f32 %v15065_v51, %v2880_v26  ;;  %v13761_v40 = vld [vmem:[#allocation3 + $0x314] sm:$0xf0]  ;;  %v13760_v51 = vld [vmem:[#allocation3 + $0x314] sm:$0xf]  ;;  %v3888_v31 = vrot.slane %v3718_v34, 6 }
 0x3b5   : > { %v11979_v53 = vor.u32 %v13761_v40, %v11978_v48  ;;  %v13824_v48 = vld [vmem:[#allocation3 + $0xf4] sm:$0xf] }
 0x3b6   : > { %v6363_v60 = vadd.f32 %v6336_v18, %v15644_v49  ;;  %6965 = vmatmul.bf16.gmra.mxu0 %v11971_v33  ;;  %7014 = vmatmul.bf16.gmra.mxu1 %v11975_v25  ;;  %v3157_v49 = vrot.slane %v3045_v43, 7  ;;  %v2950_v33 = vadd.f32 %v15071_v55, %v2881_v17  ;;  %v3013_v47 = vmax.f32 %v2949_v62, 0.0  ;;  %v13871_v55 = vld [vmem:[%s15023_s14 + $0x348] sm:$0xff]  ;;  %v3716_v18 = vld [vmem:[#allocation2 + $0x1d0] sm:$0xcc] }
 0x3b7   : > { %8069 = vmatpush.bf16.msrb.mxu3 %v13871_v55  ;;  %v10647_v59 = vrot.slane %v3716_v18, 10  ;;  %v11983_v43 = vor.u32 %v13760_v51, %v11980_v46 }
 0x3b8   : > { %v6623_v45 = vpop.f32.mrf.mxu2  ;;  %v6672_v6 = vpop.f32.mrf.mxu3  ;;  %3256 = vst [vmem:[#allocation2 + $0xe8] sm:$0xee] %v3157_v49  ;;  %v3014_v21 = vmax.f32 %v2950_v33, 0.0  ;;  %v3158_v19 = vrot.slane %v3157_v49, 4  ;;  %v3388_v58 = vld [vmem:[#allocation2 + $0xc8] sm:$0xff] }
 0x3b9   : > { %v6673_v42 = vadd.f32 %v6672_v6, %v6623_v45 }
 0x3ba   : > { %v15838_v35 = vpack.c.bf16 %v3014_v21, %v3013_v47  ;;  %v12138_v47 = vld [vmem:[#allocation3 + $0xf0] sm:$0xf] }
 0x3bb   : > { %v15833_v25 = vadd.f32 %v6673_v42, %v15802_v9  ;;  %v6288_v0 = vpop.f32.mrf.mxu0  ;;  %v6337_v2 = vpop.f32.mrf.mxu1  ;;  %v3717_v9 = vld [vmem:[#allocation2 + $0x100] sm:$0xff] }
 0x3bc   : > { %v6338_v52 = vadd.f32 %v6337_v2, %v6288_v0  ;;  %v3885_v8 = vrot.slane %v3717_v9, 6  ;;  %v13825_v2 = vld [vmem:[#allocation3 + $0xf4] sm:$0xf0] }
 0x3bd   : > { %7445 = vmatmul.bf16.gmra.mxu2 %v12131_v3  ;;  %7494 = vmatmul.bf16.gmra.mxu3 %v12135_v14  ;;  %v13799_v3 = vld [vmem:[%s15023_s14 + $0x8] sm:$0xff]  ;;  %v12139_v21 = vor.u32 %v13825_v2, %v12138_v47 }
 0x3be   : > { %v6364_v10 = vadd.f32 %v6338_v52, %v15649_v7  ;;  %v3159_v7 = vrot.slane %v15838_v35, 7  ;;  %v3886_v45 = vsel %vm15524_vm8, %v10647_v59, %v3885_v8  ;;  %v3887_v6 = vrot.slane %v3885_v8, 4  ;;  %v13807_v14 = vld [vmem:[%s15023_s14 + $0x48] sm:$0xff]  ;;  %v12140_v52 = vld [vmem:[#allocation3 + $0xf8] sm:$0xf0]  ;;  %7697 = vmatpush.bf16.msrb.mxu0 %v13799_v3 }
 0x3bf   : > { %4009 = vst [vmem:[#allocation3 + $0x330] sm:$0xff] %v3886_v45  ;;  %v3293_v62 = vld [vmem:[#allocation2 + $0xe8] sm:$0xff]  ;;  %7746 = vmatpush.bf16.msrb.mxu1 %v13807_v14  ;;  %v12143_v51 = vor.u32 %v13824_v48, %v12140_v52  ;;  %v13762_v8 = vld [vmem:[#allocation3 + $0x324] sm:$0xf]  ;;  %v12146_v14 = vld [vmem:[#allocation3 + $0x100] sm:$0xf] }
 0x3c0   : > { %v6626_v29 = vpop.f32.mrf.mxu2  ;;  %v6675_v15 = vpop.f32.mrf.mxu3  ;;  %v3160_v49 = vsel %vm15109_vm2, %v3158_v19, %v3159_v7  ;;  %v3889_v0 = vsel %vm15524_vm8, %v3887_v6, %v3888_v31  ;;  %3333 = vst [vmem:[#allocation3 + $0x110] sm:$0xff] %v3293_v62  ;;  %v13763_v59 = vld [vmem:[#allocation3 + $0x324] sm:$0xf0]  ;;  %v11988_v31 = vld [vmem:[#allocation3 + $0x328] sm:$0xf0] }
 0x3c1   : > { %v6676_v4 = vadd.f32 %v6675_v15, %v6626_v29  ;;  %3257 = vst [vmem:[#allocation2 + $0x178] sm:$0xff] %v3160_v49  ;;  %v11986_v29 = vld [vmem:[#allocation3 + $0x320] sm:$0xf]  ;;  %v13827_v62 = vld [vmem:[#allocation3 + $0x104] sm:$0xf0] }
 0x3c2   : > { %4010 = vst [vmem:[#allocation3 + $0x338] sm:$0xff] %v3889_v0  ;;  %v13870_v15 = vld [vmem:[%s15023_s14 + $0x340] sm:$0xff]  ;;  %v12148_v0 = vld [vmem:[#allocation3 + $0x108] sm:$0xf0]  ;;  %v12147_v47 = vor.u32 %v13827_v62, %v12146_v14 }
 0x3c3   : > { %v15843_v26 = vadd.f32 %v6676_v4, %v6363_v60  ;;  %v6291_v17 = vpop.f32.mrf.mxu0  ;;  %v6340_v42 = vpop.f32.mrf.mxu1  ;;  %3334 = vst [vmem:[#allocation3 + $0x118] sm:$0xff] %v3160_v49  ;;  %8070 = vmatpush.bf16.msrb.mxu3 %v13870_v15 }
 0x3c4   : > { %v6341_v33 = vadd.f32 %v6340_v42, %v6291_v17  ;;  %v13798_v42 = vld [vmem:[%s15023_s14] sm:$0xff] }
 0x3c5   : > { %7698 = vmatpush.bf16.msrb.mxu0 %v13798_v42 }
 0x3c6   : > { %v6365_v60 = vadd.f32 %v6341_v33, %v15654_v28  ;;  %6970 = vmatmul.bf16.gmra.mxu0 %v11979_v53  ;;  %7019 = vmatmul.bf16.gmra.mxu1 %v11983_v43  ;;  %v13862_v28 = vld [vmem:[%s15023_s14 + $0x300] sm:$0xff]  ;;  %v11987_v53 = vor.u32 %v13763_v59, %v11986_v29  ;;  %v11991_v43 = vor.u32 %v13762_v8, %v11988_v31  ;;  %v13901_v8 = vld [vmem:[%s15023_s14 + $0xb8] sm:$0xff] }
 0x3c7   : > { %8021 = vmatpush.bf16.msrb.mxu2 %v13862_v28  ;;  %v13826_v33 = vld [vmem:[#allocation3 + $0x104] sm:$0xf]  ;;  %v13764_v28 = vld [vmem:[#allocation3 + $0x334] sm:$0xf]  ;;  %v13909_v31 = vld [vmem:[%s15023_s14 + $0xf8] sm:$0xff] }
 0x3c8   : > { %v6628_v22 = vpop.f32.mrf.mxu2  ;;  %v6677_v40 = vpop.f32.mrf.mxu3  ;;  %v12151_v48 = vor.u32 %v13826_v33, %v12148_v0  ;;  %v3391_v35 = vld [vmem:[#allocation2 + $0x178] sm:$0xff] }
 0x3c9   : > { %v6678_v23 = vadd.f32 %v6677_v40, %v6628_v22  ;;  %v11996_v29 = vld [vmem:[#allocation3 + $0x338] sm:$0xf0]  ;;  %8353 = vmatpush.bf16.msra.mxu0 %v13901_v8 }
 0x3ca   : > { %v13829_v42 = vld [vmem:[#allocation3 + $0x114] sm:$0xf0] }
 0x3cb   : > { %v15854_v46 = vadd.f32 %v6678_v23, %v6364_v10  ;;  %v6293_v55 = vpop.f32.mrf.mxu0  ;;  %v6342_v18 = vpop.f32.mrf.mxu1 }
 0x3cc   : > { %v6343_v9 = vadd.f32 %v6342_v18, %v6293_v55  ;;  %v11994_v18 = vld [vmem:[#allocation3 + $0x330] sm:$0xf] }
 0x3cd   : > { %7450 = vmatmul.bf16.gmra.mxu2 %v12139_v21  ;;  %7499 = vmatmul.bf16.gmra.mxu3 %v12143_v51  ;;  %v13941_v51 = vld [vmem:[%s15023_s14 + $0x278] sm:$0xff] }
 0x3ce   : > { %v6366_v34 = vadd.f32 %v6343_v9, %v15659_v54  ;;  %v13806_v54 = vld [vmem:[%s15023_s14 + $0x40] sm:$0xff]  ;;  %v13765_v9 = vld [vmem:[#allocation3 + $0x334] sm:$0xf0]  ;;  %8741 = vmatpush.bf16.msra.mxu3 %v13941_v51  ;;  %v12228_v51 = vld [vmem:[#allocation3 + $0x88] sm:$0xf0] }
 0x3cf   : > { %7747 = vmatpush.bf16.msrb.mxu1 %v13806_v54  ;;  %v13828_v54 = vld [vmem:[#allocation3 + $0x114] sm:$0xf] }
 0x3d0   : > { %v6631_v19 = vpop.f32.mrf.mxu2  ;;  %v6680_v4 = vpop.f32.mrf.mxu3 }
 0x3d1   : > { %v6681_v10 = vadd.f32 %v6680_v4, %v6631_v19  ;;  %v11995_v19 = vor.u32 %v13765_v9, %v11994_v18  ;;  %v11999_v4 = vor.u32 %v13764_v28, %v11996_v29  ;;  %v13900_v28 = vld [vmem:[%s15023_s14 + $0xb0] sm:$0xff] }
 0x3d2   : > { %v13908_v29 = vld [vmem:[%s15023_s14 + $0xf0] sm:$0xff]  ;;  %8354 = vmatpush.bf16.msra.mxu0 %v13900_v28  ;;  %v13907_v28 = vld [vmem:[%s15023_s14 + $0xe8] sm:$0xff] }
 0x3d3   : > { %v15859_v45 = vadd.f32 %v6681_v10, %v6365_v60  ;;  %v6296_v6 = vpop.f32.mrf.mxu0  ;;  %v6345_v17 = vpop.f32.mrf.mxu1  ;;  %8402 = vmatpush.bf16.msra.mxu1 %v13909_v31 }
 0x3d4   : > { %v6346_v3 = vadd.f32 %v6345_v17, %v6296_v6  ;;  %v12154_v6 = vld [vmem:[#allocation3 + $0x110] sm:$0xf] }
 0x3d6   : > { %v6367_v49 = vadd.f32 %v6346_v3, %v15668_v39  ;;  %6975 = vmatmul.bf16.gmra.mxu0 %v11987_v53  ;;  %7024 = vmatmul.bf16.gmra.mxu1 %v11991_v43  ;;  %v13933_v39 = vld [vmem:[%s15023_s14 + $0x238] sm:$0xff] }
 0x3d7   : > { %8692 = vmatpush.bf16.msra.mxu2 %v13933_v39  ;;  %v12156_v3 = vld [vmem:[#allocation3 + $0x118] sm:$0xf0]  ;;  %v13782_v39 = vld [vmem:[#allocation3 + $0x84] sm:$0xf]  ;;  %8403 = vmatpush.bf16.msra.mxu1 %v13908_v29 }
 0x3d8   : > { %v6633_v2 = vpop.f32.mrf.mxu2  ;;  %v6682_v52 = vpop.f32.mrf.mxu3  ;;  %v12159_v0 = vor.u32 %v13828_v54, %v12156_v3 }
 0x3d9   : > { %v6683_v60 = vadd.f32 %v6682_v52, %v6633_v2 }
 0x3db   : > { %v15864_v22 = vadd.f32 %v6683_v60, %v6366_v34  ;;  %v6298_v40 = vpop.f32.mrf.mxu0  ;;  %v6347_v23 = vpop.f32.mrf.mxu1  ;;  %8404 = vmatpush.bf16.msra.mxu1 %v13907_v28  ;;  %v13898_v28 = vld [vmem:[%s15023_s14 + $0xa0] sm:$0xff] }
 0x3dc   : > { %v6348_v21 = vadd.f32 %v6347_v23, %v6298_v40  ;;  %v12226_v23 = vld [vmem:[#allocation3 + $0x80] sm:$0xf] }
 0x3dd   : > { %7455 = vmatmul.bf16.gmra.mxu2 %v12147_v47  ;;  %7504 = vmatmul.bf16.gmra.mxu3 %v12151_v48  ;;  %v13940_v48 = vld [vmem:[%s15023_s14 + $0x270] sm:$0xff] }
 0x3de   : > { %v6368_v55 = vadd.f32 %v6348_v21, %v15681_v12  ;;  %v13783_v21 = vld [vmem:[#allocation3 + $0x84] sm:$0xf0]  ;;  %8742 = vmatpush.bf16.msra.mxu3 %v13940_v48  ;;  %v13784_v48 = vld [vmem:[#allocation3 + $0x94] sm:$0xf] }
 0x3e0   : > { %v6636_v15 = vpop.f32.mrf.mxu2  ;;  %v6685_v34 = vpop.f32.mrf.mxu3 }
 0x3e1   : > { %v6686_v59 = vadd.f32 %v6685_v34, %v6636_v15  ;;  %v12227_v15 = vor.u32 %v13783_v21, %v12226_v23  ;;  %v12231_v34 = vor.u32 %v13782_v39, %v12228_v51  ;;  %v12236_v23 = vld [vmem:[#allocation3 + $0x98] sm:$0xf0] }
 0x3e3   : > { %v15871_v10 = vadd.f32 %v6686_v59, %v6367_v49  ;;  %v6301_v53 = vpop.f32.mrf.mxu0  ;;  %v6350_v43 = vpop.f32.mrf.mxu1  ;;  %v12155_v49 = vor.u32 %v13829_v42, %v12154_v6 }
 0x3e4   : > { %v6351_v12 = vadd.f32 %v6350_v43, %v6301_v53  ;;  %v12388_v53 = vld [vmem:[#allocation3 + $0xc8] sm:$0xf0] }
 0x3e6   : > { %v6369_v17 = vadd.f32 %v6351_v12, %v15693_v20  ;;  %6980 = vmatmul.bf16.gmra.mxu0 %v11995_v19  ;;  %7029 = vmatmul.bf16.gmra.mxu1 %v11999_v4  ;;  %v13932_v20 = vld [vmem:[%s15023_s14 + $0x230] sm:$0xff]  ;;  %v13847_v19 = vld [vmem:[#allocation3 + $0xc4] sm:$0xf0]  ;;  %v13846_v4 = vld [vmem:[#allocation3 + $0xc4] sm:$0xf] }
 0x3e7   : > { %8693 = vmatpush.bf16.msra.mxu2 %v13932_v20  ;;  %v13785_v20 = vld [vmem:[#allocation3 + $0x94] sm:$0xf0] }
 0x3e8   : > { %v6638_v14 = vpop.f32.mrf.mxu2  ;;  %v6687_v62 = vpop.f32.mrf.mxu3 }
 0x3e9   : > { %v6688_v33 = vadd.f32 %v6687_v62, %v6638_v14 }
 0x3eb   : > { %v15874_v2 = vadd.f32 %v6688_v33, %v6368_v55  ;;  %v6303_v52 = vpop.f32.mrf.mxu0  ;;  %v6352_v60 = vpop.f32.mrf.mxu1 }
 0x3ec   : > { %v6353_v47 = vadd.f32 %v6352_v60, %v6303_v52  ;;  %v13939_v52 = vld [vmem:[%s15023_s14 + $0x268] sm:$0xff] }
 0x3ed   : > { %7460 = vmatmul.bf16.gmra.mxu2 %v12155_v49  ;;  %7509 = vmatmul.bf16.gmra.mxu3 %v12159_v0  ;;  %v13931_v0 = vld [vmem:[%s15023_s14 + $0x228] sm:$0xff] }
 0x3ee   : > { %v6370_v40 = vadd.f32 %v6353_v47, %v15710_v13  ;;  %v12386_v13 = vld [vmem:[#allocation3 + $0xc0] sm:$0xf]  ;;  %v12234_v47 = vld [vmem:[#allocation3 + $0x90] sm:$0xf]  ;;  %8694 = vmatpush.bf16.msra.mxu2 %v13931_v0  ;;  %8743 = vmatpush.bf16.msra.mxu3 %v13939_v52 }
 0x3ef   : > { %v12387_v54 = vor.u32 %v13847_v19, %v12386_v13  ;;  %v12235_v29 = vor.u32 %v13785_v20, %v12234_v47  ;;  %v12394_v13 = vld [vmem:[#allocation3 + $0xd0] sm:$0xf]  ;;  %v12242_v20 = vld [vmem:[#allocation3 + $0xa0] sm:$0xf] }
 0x3f0   : > { %v6641_v18 = vpop.f32.mrf.mxu2  ;;  %v6690_v55 = vpop.f32.mrf.mxu3 }
 0x3f1   : > { %v6691_v9 = vadd.f32 %v6690_v55, %v6641_v18 }
 0x3f3   : > { %v15881_v59 = vadd.f32 %v6691_v9, %v6369_v17  ;;  %v6946_v8 = vpop.f32.mrf.mxu0  ;;  %v6995_v31 = vpop.f32.mrf.mxu1  ;;  %v12391_v17 = vor.u32 %v13846_v4, %v12388_v53  ;;  %v13899_v9 = vld [vmem:[%s15023_s14 + $0xa8] sm:$0xff]  ;;  %v13849_v4 = vld [vmem:[#allocation3 + $0xd4] sm:$0xf0]  ;;  %v13848_v53 = vld [vmem:[#allocation3 + $0xd4] sm:$0xf] }
 0x3f4   : > { %v6996_v6 = vadd.f32 %v6995_v31, %v6946_v8  ;;  %8355 = vmatpush.bf16.msra.mxu0 %v13899_v9 }
 0x3f6   : > { %7699 = vmatmul.bf16.vlgmr.msrb.gmra.mxu0 %v12227_v15  ;;  %7748 = vmatmul.bf16.vlgmr.msrb.gmra.mxu1 %v12231_v34  ;;  %v7035_v33 = vadd.f32 %v6996_v6, %v15726_v63  ;;  %v12239_v15 = vor.u32 %v13784_v48, %v12236_v23  ;;  %v13787_v48 = vld [vmem:[#allocation3 + $0xa4] sm:$0xf0]  ;;  %v13786_v23 = vld [vmem:[#allocation3 + $0xa4] sm:$0xf] }
 0x3f8   : > { %v6643_v43 = vpop.f32.mrf.mxu2  ;;  %v6692_v12 = vpop.f32.mrf.mxu3  ;;  %8356 = vmatpush.bf16.msra.mxu0 %v13898_v28 }
 0x3f9   : > { %v6693_v42 = vadd.f32 %v6692_v12, %v6643_v43  ;;  %v12396_v43 = vld [vmem:[#allocation3 + $0xd8] sm:$0xf0] }
 0x3fb   : > { %v15884_v3 = vadd.f32 %v6693_v42, %v6370_v40  ;;  %v6948_v14 = vpop.f32.mrf.mxu0  ;;  %v6997_v62 = vpop.f32.mrf.mxu1  ;;  %v7105_v40 = vmul.f32 %v7035_v33, %v7035_v33 }
 0x3fc   : > { %v6998_v49 = vadd.f32 %v6997_v62, %v6948_v14  ;;  %v12395_v14 = vor.u32 %v13849_v4, %v12394_v13  ;;  %v12399_v62 = vor.u32 %v13848_v53, %v12396_v43  ;;  %v12402_v13 = vld [vmem:[#allocation3 + $0xe0] sm:$0xf]  ;;  %v13850_v53 = vld [vmem:[#allocation3 + $0xe4] sm:$0xf]  ;;  %v12404_v43 = vld [vmem:[#allocation3 + $0xe8] sm:$0xf0] }
 0x3fd   : > { %8022 = vmatmul.bf16.vlgmr.msrb.gmra.mxu2 %v12387_v54  ;;  %8071 = vmatmul.bf16.vlgmr.msrb.gmra.mxu3 %v12391_v17 }
 0x3fe   : > { %v7036_v60 = vadd.f32 %v6998_v49, %v15739_v30 }
 0x400   : > { %v7426_v21 = vpop.f32.mrf.mxu2  ;;  %v7475_v39 = vpop.f32.mrf.mxu3  ;;  %v14073_v51 = vpack.c.bf16 %v7036_v60, %v7035_v33  ;;  %v7083_v63 = vadd.f32 %v7036_v60, %v7035_v33  ;;  %v7106_v18 = vmul.f32 %v7036_v60, %v7036_v60  ;;  %v13938_v60 = vld [vmem:[%s15023_s14 + $0x260] sm:$0xff] }
 0x401   : > { %v15890_v55 = vadd.f32 %v7475_v39, %v7426_v21  ;;  %8744 = vmatpush.bf16.msra.mxu3 %v13938_v60  ;;  %v13937_v60 = vld [vmem:[%s15023_s14 + $0x258] sm:$0xff] }
 0x402   : > { %14074 = vst [vmem:[%s15894_s21] sm:$0xff] %v14073_v51   ;;  %v7121_v30 = vadd.f32 %v7106_v18, %v7105_v40  ;;  %v12244_v40 = vld [vmem:[#allocation3 + $0xa8] sm:$0xf0] }
 0x403   : > { %v6951_v34 = vpop.f32.mrf.mxu0  ;;  %v7000_v8 = vpop.f32.mrf.mxu1 }
 0x404   : > { %v7001_v31 = vadd.f32 %v7000_v8, %v6951_v34  ;;  %v12247_v34 = vor.u32 %v13786_v23, %v12244_v40  ;;  %v13788_v23 = vld [vmem:[#allocation3 + $0xb4] sm:$0xf]  ;;  %v12252_v40 = vld [vmem:[#allocation3 + $0xb8] sm:$0xf0] }
 0x405   : > { %8745 = vmatpush.bf16.msra.mxu3 %v13937_v60  ;;  %v13936_v60 = vld [vmem:[%s15023_s14 + $0x250] sm:$0xff] }
 0x406   : > { %v7037_v19 = vadd.f32 %v7001_v31, %v15755_v27  ;;  %7704 = vmatmul.bf16.gmra.mxu0 %v12235_v29  ;;  %7753 = vmatmul.bf16.gmra.mxu1 %v12239_v15  ;;  %v13930_v27 = vld [vmem:[%s15023_s14 + $0x220] sm:$0xff]  ;;  %v12243_v15 = vor.u32 %v13787_v48, %v12242_v20  ;;  %v12250_v20 = vld [vmem:[#allocation3 + $0xb0] sm:$0xf]  ;;  %v13789_v48 = vld [vmem:[#allocation3 + $0xb4] sm:$0xf0] }
 0x407   : > { %8695 = vmatpush.bf16.msra.mxu2 %v13930_v27 }
 0x408   : > { %v7428_v12 = vpop.f32.mrf.mxu2  ;;  %v7477_v6 = vpop.f32.mrf.mxu3  ;;  %v7084_v42 = vadd.f32 %v7083_v63, %v7037_v19  ;;  %v7107_v54 = vmul.f32 %v7037_v19, %v7037_v19 }
 0x409   : > { %v15898_v17 = vadd.f32 %v7477_v6, %v7428_v12  ;;  %8746 = vmatpush.bf16.msra.mxu3 %v13936_v60  ;;  %v13935_v60 = vld [vmem:[%s15023_s14 + $0x248] sm:$0xff] }
 0x40a   : > { %v7122_v33 = vadd.f32 %v7121_v30, %v7107_v54  ;;  %v13906_v30 = vld [vmem:[%s15023_s14 + $0xe0] sm:$0xff] }
 0x40b   : > { %v6953_v49 = vpop.f32.mrf.mxu0  ;;  %v7002_v0 = vpop.f32.mrf.mxu1  ;;  %8405 = vmatpush.bf16.msra.mxu1 %v13906_v30  ;;  %v13897_v30 = vld [vmem:[%s15023_s14 + $0x98] sm:$0xff] }
 0x40c   : > { %v7003_v52 = vadd.f32 %v7002_v0, %v6953_v49  ;;  %8357 = vmatpush.bf16.msra.mxu0 %v13897_v30 }
 0x40d   : > { %8027 = vmatmul.bf16.gmra.mxu2 %v12395_v14  ;;  %8076 = vmatmul.bf16.gmra.mxu3 %v12399_v62 }
 0x40e   : > { %v7038_v47 = vadd.f32 %v7003_v52, %v15768_v56  ;;  %8747 = vmatpush.bf16.msra.mxu3 %v13935_v60  ;;  %v13934_v60 = vld [vmem:[%s15023_s14 + $0x240] sm:$0xff] }
 0x410   : > { %v7431_v21 = vpop.f32.mrf.mxu2  ;;  %v7480_v39 = vpop.f32.mrf.mxu3  ;;  %v14078_v51 = vpack.c.bf16 %v7038_v47, %v7037_v19  ;;  %v7085_v63 = vadd.f32 %v7084_v42, %v7038_v47  ;;  %v7108_v18 = vmul.f32 %v7038_v47, %v7038_v47  ;;  %v13851_v19 = vld [vmem:[#allocation3 + $0xe4] sm:$0xf0] }
 0x411   : > { %v15903_v9 = vadd.f32 %v7480_v39, %v7431_v21  ;;  %v12403_v62 = vor.u32 %v13851_v19, %v12402_v13  ;;  %v12410_v13 = vld [vmem:[#allocation3 + $0xf0] sm:$0xf] }
 0x412   : > { %14150 = vst [vmem:[%s15894_s21 + $0x8] sm:$0xff] %v14078_v51   ;;  %v7123_v29 = vadd.f32 %v7122_v33, %v7108_v18  ;;  %v12407_v33 = vor.u32 %v13850_v53, %v12404_v43  ;;  %v13852_v53 = vld [vmem:[#allocation3 + $0xf4] sm:$0xf]  ;;  %v12412_v43 = vld [vmem:[#allocation3 + $0xf8] sm:$0xf0]  ;;  %8748 = vmatpush.bf16.msra.mxu3 %v13934_v60 }
 0x413   : > { %v6956_v56 = vpop.f32.mrf.mxu0  ;;  %v7005_v8 = vpop.f32.mrf.mxu1  ;;  %v12282_v60 = vld [vmem:[#allocation3 + $0xf0] sm:$0xf] }
 0x414   : > { %v7006_v31 = vadd.f32 %v7005_v8, %v6956_v56  ;;  %v12255_v56 = vor.u32 %v13788_v23, %v12252_v40  ;;  %v13790_v23 = vld [vmem:[#allocation3 + $0xc4] sm:$0xf]  ;;  %v12260_v40 = vld [vmem:[#allocation3 + $0xc8] sm:$0xf0] }
 0x416   : > { %v7039_v4 = vadd.f32 %v7006_v31, %v15784_v37  ;;  %7709 = vmatmul.bf16.gmra.mxu0 %v12243_v15  ;;  %7758 = vmatmul.bf16.gmra.mxu1 %v12247_v34  ;;  %v13929_v37 = vld [vmem:[%s15023_s14 + $0x218] sm:$0xff]  ;;  %v12251_v34 = vor.u32 %v13789_v48, %v12250_v20  ;;  %v12258_v20 = vld [vmem:[#allocation3 + $0xc0] sm:$0xf]  ;;  %v13791_v48 = vld [vmem:[#allocation3 + $0xc4] sm:$0xf0] }
 0x417   : > { %8696 = vmatpush.bf16.msra.mxu2 %v13929_v37 }
 0x418   : > { %v7433_v12 = vpop.f32.mrf.mxu2  ;;  %v7482_v6 = vpop.f32.mrf.mxu3  ;;  %v7086_v42 = vadd.f32 %v7085_v63, %v7039_v4  ;;  %v7109_v54 = vmul.f32 %v7039_v4, %v7039_v4 }
 0x419   : > { %v15909_v14 = vadd.f32 %v7482_v6, %v7433_v12 }
 0x41a   : > { %v7124_v49 = vadd.f32 %v7123_v29, %v7109_v54  ;;  %v13905_v29 = vld [vmem:[%s15023_s14 + $0xd8] sm:$0xff] }
 0x41b   : > { %v6958_v0 = vpop.f32.mrf.mxu0  ;;  %v7007_v52 = vpop.f32.mrf.mxu1  ;;  %8406 = vmatpush.bf16.msra.mxu1 %v13905_v29  ;;  %v13896_v29 = vld [vmem:[%s15023_s14 + $0x90] sm:$0xff] }
 0x41c   : > { %v7008_v27 = vadd.f32 %v7007_v52, %v6958_v0  ;;  %8358 = vmatpush.bf16.msra.mxu0 %v13896_v29 }
 0x41d   : > { %8032 = vmatmul.bf16.gmra.mxu2 %v12403_v62  ;;  %8081 = vmatmul.bf16.gmra.mxu3 %v12407_v33 }
 0x41e   : > { %v7040_v47 = vadd.f32 %v7008_v27, %v15797_v1 }
 0x420   : > { %v7436_v21 = vpop.f32.mrf.mxu2  ;;  %v7485_v39 = vpop.f32.mrf.mxu3  ;;  %v14083_v51 = vpack.c.bf16 %v7040_v47, %v7039_v4  ;;  %v7087_v63 = vadd.f32 %v7086_v42, %v7040_v47  ;;  %v7110_v18 = vmul.f32 %v7040_v47, %v7040_v47  ;;  %v13853_v4 = vld [vmem:[#allocation3 + $0xf4] sm:$0xf0] }
 0x421   : > { %v15914_v28 = vadd.f32 %v7485_v39, %v7436_v21  ;;  %v12411_v33 = vor.u32 %v13853_v4, %v12410_v13  ;;  %v12418_v13 = vld [vmem:[#allocation3 + $0x100] sm:$0xf] }
 0x422   : > { %14151 = vst [vmem:[%s15894_s21 + $0x10] sm:$0xff] %v14083_v51   ;;  %v7125_v15 = vadd.f32 %v7124_v49, %v7110_v18  ;;  %v12415_v49 = vor.u32 %v13852_v53, %v12412_v43  ;;  %v13854_v53 = vld [vmem:[#allocation3 + $0x104] sm:$0xf]  ;;  %v12420_v43 = vld [vmem:[#allocation3 + $0x108] sm:$0xf0] }
 0x423   : > { %v6961_v1 = vpop.f32.mrf.mxu0  ;;  %v7010_v8 = vpop.f32.mrf.mxu1 }
 0x424   : > { %v7011_v31 = vadd.f32 %v7010_v8, %v6961_v1  ;;  %v12263_v1 = vor.u32 %v13790_v23, %v12260_v40  ;;  %v13792_v23 = vld [vmem:[#allocation3 + $0xd4] sm:$0xf]  ;;  %v12268_v40 = vld [vmem:[#allocation3 + $0xd8] sm:$0xf0] }
 0x426   : > { %v7041_v19 = vadd.f32 %v7011_v31, %v15815_v24  ;;  %7714 = vmatmul.bf16.gmra.mxu0 %v12251_v34  ;;  %7763 = vmatmul.bf16.gmra.mxu1 %v12255_v56  ;;  %v13928_v24 = vld [vmem:[%s15023_s14 + $0x210] sm:$0xff]  ;;  %v12259_v56 = vor.u32 %v13791_v48, %v12258_v20  ;;  %v13793_v48 = vld [vmem:[#allocation3 + $0xd4] sm:$0xf0] }
 0x427   : > { %8697 = vmatpush.bf16.msra.mxu2 %v13928_v24  ;;  %v12266_v20 = vld [vmem:[#allocation3 + $0xd0] sm:$0xf] }
 0x428   : > { %v7438_v12 = vpop.f32.mrf.mxu2  ;;  %v7487_v6 = vpop.f32.mrf.mxu3  ;;  %v7088_v42 = vadd.f32 %v7087_v63, %v7041_v19  ;;  %v7111_v54 = vmul.f32 %v7041_v19, %v7041_v19 }
 0x429   : > { %v15920_v62 = vadd.f32 %v7487_v6, %v7438_v12 }
 0x42a   : > { %v7126_v0 = vadd.f32 %v7125_v15, %v7111_v54  ;;  %v13904_v15 = vld [vmem:[%s15023_s14 + $0xd0] sm:$0xff] }
 0x42b   : > { %v6963_v52 = vpop.f32.mrf.mxu0  ;;  %v7012_v27 = vpop.f32.mrf.mxu1  ;;  %8407 = vmatpush.bf16.msra.mxu1 %v13904_v15  ;;  %v13895_v15 = vld [vmem:[%s15023_s14 + $0x88] sm:$0xff] }
 0x42c   : > { %v7013_v37 = vadd.f32 %v7012_v27, %v6963_v52  ;;  %8359 = vmatpush.bf16.msra.mxu0 %v13895_v15 }
 0x42d   : > { %8037 = vmatmul.bf16.gmra.mxu2 %v12411_v33  ;;  %8086 = vmatmul.bf16.gmra.mxu3 %v12415_v49 }
 0x42e   : > { %v7042_v47 = vadd.f32 %v7013_v37, %v15833_v25 }
 0x430   : > { %v7441_v21 = vpop.f32.mrf.mxu2  ;;  %v7490_v39 = vpop.f32.mrf.mxu3  ;;  %v14088_v51 = vpack.c.bf16 %v7042_v47, %v7041_v19  ;;  %v7089_v63 = vadd.f32 %v7088_v42, %v7042_v47  ;;  %v7112_v18 = vmul.f32 %v7042_v47, %v7042_v47  ;;  %v13855_v19 = vld [vmem:[#allocation3 + $0x104] sm:$0xf0] }
 0x431   : > { %v15925_v30 = vadd.f32 %v7490_v39, %v7441_v21  ;;  %v12419_v49 = vor.u32 %v13855_v19, %v12418_v13  ;;  %v12426_v13 = vld [vmem:[#allocation3 + $0x110] sm:$0xf] }
 0x432   : > { %14152 = vst [vmem:[%s15894_s21 + $0x18] sm:$0xff] %v14088_v51   ;;  %v7127_v34 = vadd.f32 %v7126_v0, %v7112_v18  ;;  %v12423_v0 = vor.u32 %v13854_v53, %v12420_v43  ;;  %v13856_v53 = vld [vmem:[#allocation3 + $0x114] sm:$0xf]  ;;  %v12428_v43 = vld [vmem:[#allocation3 + $0x118] sm:$0xf0] }
 0x433   : > { %v6966_v25 = vpop.f32.mrf.mxu0  ;;  %v7015_v8 = vpop.f32.mrf.mxu1 }
 0x434   : > { %v7016_v31 = vadd.f32 %v7015_v8, %v6966_v25  ;;  %v12271_v25 = vor.u32 %v13792_v23, %v12268_v40  ;;  %v13794_v23 = vld [vmem:[#allocation3 + $0xe4] sm:$0xf]  ;;  %v12276_v40 = vld [vmem:[#allocation3 + $0xe8] sm:$0xf0] }
 0x436   : > { %v7043_v4 = vadd.f32 %v7016_v31, %v15843_v26  ;;  %7719 = vmatmul.bf16.gmra.mxu0 %v12259_v56  ;;  %7768 = vmatmul.bf16.gmra.mxu1 %v12263_v1  ;;  %v13927_v26 = vld [vmem:[%s15023_s14 + $0x208] sm:$0xff]  ;;  %v12267_v1 = vor.u32 %v13793_v48, %v12266_v20  ;;  %v12274_v20 = vld [vmem:[#allocation3 + $0xe0] sm:$0xf] }
 0x437   : > { %8698 = vmatpush.bf16.msra.mxu2 %v13927_v26  ;;  %v13795_v48 = vld [vmem:[#allocation3 + $0xe4] sm:$0xf0] }
 0x438   : > { %v7443_v12 = vpop.f32.mrf.mxu2  ;;  %v7492_v6 = vpop.f32.mrf.mxu3  ;;  %v7090_v42 = vadd.f32 %v7089_v63, %v7043_v4  ;;  %v7113_v54 = vmul.f32 %v7043_v4, %v7043_v4 }
 0x439   : > { %v15931_v33 = vadd.f32 %v7492_v6, %v7443_v12 }
 0x43a   : > { %v7128_v52 = vadd.f32 %v7127_v34, %v7113_v54  ;;  %v13903_v34 = vld [vmem:[%s15023_s14 + $0xc8] sm:$0xff] }
 0x43b   : > { %v6968_v27 = vpop.f32.mrf.mxu0  ;;  %v7017_v37 = vpop.f32.mrf.mxu1  ;;  %8408 = vmatpush.bf16.msra.mxu1 %v13903_v34  ;;  %v13894_v34 = vld [vmem:[%s15023_s14 + $0x80] sm:$0xff] }
 0x43c   : > { %v7018_v24 = vadd.f32 %v7017_v37, %v6968_v27  ;;  %8360 = vmatpush.bf16.msra.mxu0 %v13894_v34 }
 0x43d   : > { %8042 = vmatmul.bf16.gmra.mxu2 %v12419_v49  ;;  %8091 = vmatmul.bf16.gmra.mxu3 %v12423_v0 }
 0x43e   : > { %v7044_v47 = vadd.f32 %v7018_v24, %v15854_v46 }
 0x440   : > { %v7446_v21 = vpop.f32.mrf.mxu2  ;;  %v7495_v39 = vpop.f32.mrf.mxu3  ;;  %v14093_v51 = vpack.c.bf16 %v7044_v47, %v7043_v4  ;;  %v7091_v63 = vadd.f32 %v7090_v42, %v7044_v47  ;;  %v7114_v18 = vmul.f32 %v7044_v47, %v7044_v47  ;;  %v13857_v4 = vld [vmem:[#allocation3 + $0x114] sm:$0xf0] }
 0x441   : > { %v15936_v29 = vadd.f32 %v7495_v39, %v7446_v21  ;;  %v12427_v0 = vor.u32 %v13857_v4, %v12426_v13  ;;  %v12434_v13 = vld [vmem:[#allocation3 + $0x120] sm:$0xf] }
 0x442   : > { %14153 = vst [vmem:[%s15894_s21 + $0x20] sm:$0xff] %v14093_v51   ;;  %v7129_v56 = vadd.f32 %v7128_v52, %v7114_v18  ;;  %v12431_v52 = vor.u32 %v13856_v53, %v12428_v43  ;;  %v13858_v53 = vld [vmem:[#allocation3 + $0x124] sm:$0xf]  ;;  %v12436_v43 = vld [vmem:[#allocation3 + $0x128] sm:$0xf0] }
 0x443   : > { %v6971_v46 = vpop.f32.mrf.mxu0  ;;  %v7020_v8 = vpop.f32.mrf.mxu1 }
 0x444   : > { %v7021_v31 = vadd.f32 %v7020_v8, %v6971_v46  ;;  %v12279_v46 = vor.u32 %v13794_v23, %v12276_v40  ;;  %v13796_v23 = vld [vmem:[#allocation3 + $0xf4] sm:$0xf]  ;;  %v12284_v40 = vld [vmem:[#allocation3 + $0xf8] sm:$0xf0] }
 0x446   : > { %v7045_v19 = vadd.f32 %v7021_v31, %v15859_v45  ;;  %7724 = vmatmul.bf16.gmra.mxu0 %v12267_v1  ;;  %7773 = vmatmul.bf16.gmra.mxu1 %v12271_v25  ;;  %v13926_v45 = vld [vmem:[%s15023_s14 + $0x200] sm:$0xff]  ;;  %v12275_v25 = vor.u32 %v13795_v48, %v12274_v20  ;;  %v14005_v20 = vld [vmem:[%s15023_s14 + $0x178] sm:$0xff] }
 0x447   : > { %8699 = vmatpush.bf16.msra.mxu2 %v13926_v45  ;;  %v13797_v48 = vld [vmem:[#allocation3 + $0xf4] sm:$0xf0]  ;;  %9419 = vmatpush.bf16.msrb.mxu3 %v14005_v20 }
 0x448   : > { %v7448_v12 = vpop.f32.mrf.mxu2  ;;  %v7497_v6 = vpop.f32.mrf.mxu3  ;;  %v7092_v42 = vadd.f32 %v7091_v63, %v7045_v19  ;;  %v7115_v54 = vmul.f32 %v7045_v19, %v7045_v19 }
 0x449   : > { %v15942_v49 = vadd.f32 %v7497_v6, %v7448_v12 }
 0x44a   : > { %v7130_v27 = vadd.f32 %v7129_v56, %v7115_v54  ;;  %v13902_v56 = vld [vmem:[%s15023_s14 + $0xc0] sm:$0xff] }
 0x44b   : > { %v6973_v37 = vpop.f32.mrf.mxu0  ;;  %v7022_v24 = vpop.f32.mrf.mxu1  ;;  %8409 = vmatpush.bf16.msra.mxu1 %v13902_v56 }
 0x44c   : > { %v7023_v26 = vadd.f32 %v7022_v24, %v6973_v37 }
 0x44d   : > { %8047 = vmatmul.bf16.gmra.mxu2 %v12427_v0  ;;  %8096 = vmatmul.bf16.gmra.mxu3 %v12431_v52 }
 0x44e   : > { %v7046_v47 = vadd.f32 %v7023_v26, %v15864_v22 }
 0x450   : > { %v7451_v21 = vpop.f32.mrf.mxu2  ;;  %v7500_v39 = vpop.f32.mrf.mxu3  ;;  %v14098_v51 = vpack.c.bf16 %v7046_v47, %v7045_v19  ;;  %v7093_v63 = vadd.f32 %v7092_v42, %v7046_v47  ;;  %v7116_v18 = vmul.f32 %v7046_v47, %v7046_v47  ;;  %v13859_v19 = vld [vmem:[#allocation3 + $0x124] sm:$0xf0]  ;;  %v13997_v47 = vld [vmem:[%s15023_s14 + $0x138] sm:$0xff] }
 0x451   : > { %v15947_v15 = vadd.f32 %v7500_v39, %v7451_v21  ;;  %v12435_v52 = vor.u32 %v13859_v19, %v12434_v13  ;;  %9370 = vmatpush.bf16.msrb.mxu2 %v13997_v47  ;;  %v12442_v13 = vld [vmem:[#allocation3 + $0x130] sm:$0xf]  ;;  %v13861_v19 = vld [vmem:[#allocation3 + $0x134] sm:$0xf0]  ;;  %v3376_v47 = vld [vmem:[#allocation2 + $0xa8] sm:$0xff] }
 0x452   : > { %14154 = vst [vmem:[%s15894_s21 + $0x28] sm:$0xff] %v14098_v51   ;;  %v7131_v1 = vadd.f32 %v7130_v27, %v7116_v18  ;;  %v12439_v27 = vor.u32 %v13858_v53, %v12436_v43  ;;  %v13860_v53 = vld [vmem:[#allocation3 + $0x134] sm:$0xf]  ;;  %v12444_v43 = vld [vmem:[#allocation3 + $0x138] sm:$0xf0] }
 0x453   : > { %v6976_v22 = vpop.f32.mrf.mxu0  ;;  %v7025_v8 = vpop.f32.mrf.mxu1 }
 0x454   : > { %v7026_v31 = vadd.f32 %v7025_v8, %v6976_v22  ;;  %v13965_v22 = vld [vmem:[%s15023_s14 + $0x3b8] sm:$0xff] }
 0x455   : > { %v13973_v8 = vld [vmem:[%s15023_s14 + $0x3f8] sm:$0xff]  ;;  %9031 = vmatpush.bf16.msrb.mxu0 %v13965_v22  ;;  %9371 = vmatpush.bf16.msrb.mxu2 %v13996_v57 }
 0x456   : > { %v7047_v4 = vadd.f32 %v7026_v31, %v15871_v10  ;;  %7729 = vmatmul.bf16.gmra.mxu0 %v12275_v25  ;;  %7778 = vmatmul.bf16.gmra.mxu1 %v12279_v46 }
 0x457   : > { %9080 = vmatpush.bf16.msrb.mxu1 %v13973_v8 }
 0x458   : > { %v7453_v12 = vpop.f32.mrf.mxu2  ;;  %v7502_v6 = vpop.f32.mrf.mxu3  ;;  %v7094_v42 = vadd.f32 %v7093_v63, %v7047_v4  ;;  %v7117_v54 = vmul.f32 %v7047_v4, %v7047_v4 }
 0x459   : > { %v15953_v0 = vadd.f32 %v7502_v6, %v7453_v12  ;;  %v3136_v12 = vrot.slane %v3134_v16, 4  ;;  %v14004_v16 = vld [vmem:[%s15023_s14 + $0x170] sm:$0xff] }
 0x45a   : > { %v7132_v37 = vadd.f32 %v7131_v1, %v7117_v54  ;;  %v12287_v1 = vor.u32 %v13796_v23, %v12284_v40  ;;  %v13878_v23 = vld [vmem:[#allocation3 + $0x1c4] sm:$0xf]  ;;  %v3548_v40 = vrot.slane %v3376_v47, 5  ;;  %9420 = vmatpush.bf16.msrb.mxu3 %v14004_v16 }
 0x45b   : > { %v6978_v24 = vpop.f32.mrf.mxu0  ;;  %v7027_v26 = vpop.f32.mrf.mxu1  ;;  %3243 = vst [vmem:[#allocation2 + $0x190] sm:$0x11] %v3136_v12  ;;  %v13964_v12 = vld [vmem:[%s15023_s14 + $0x3b0] sm:$0xff] }
 0x45c   : > { %v7028_v45 = vadd.f32 %v7027_v26, %v6978_v24  ;;  %v12447_v24 = vor.u32 %v13860_v53, %v12444_v43  ;;  %9032 = vmatpush.bf16.msrb.mxu0 %v13964_v12 }
 0x45d   : > { %8052 = vmatmul.bf16.gmra.mxu2 %v12435_v52  ;;  %8101 = vmatmul.bf16.gmra.mxu3 %v12439_v27 }
 0x45e   : > { %v7048_v10 = vadd.f32 %v7028_v45, %v15874_v2  ;;  %v12283_v2 = vor.u32 %v13797_v48, %v12282_v60  ;;  %v12546_v60 = vld [vmem:[#allocation3 + $0x1c0] sm:$0xf]  ;;  %v13879_v48 = vld [vmem:[#allocation3 + $0x1c4] sm:$0xf0] }
 0x460   : > { %v7456_v21 = vpop.f32.mrf.mxu2  ;;  %v7505_v39 = vpop.f32.mrf.mxu3  ;;  %v14103_v51 = vpack.c.bf16 %v7048_v10, %v7047_v4  ;;  %v7095_v63 = vadd.f32 %v7094_v42, %v7048_v10  ;;  %v7118_v18 = vmul.f32 %v7048_v10, %v7048_v10 }
 0x461   : > { %v15958_v34 = vadd.f32 %v7505_v39, %v7456_v21  ;;  %v12548_v21 = vld [vmem:[#allocation3 + $0x1c8] sm:$0xf0]  ;;  %v3375_v39 = vld [vmem:[#allocation2 + $0x40] sm:$0xee] }
 0x462   : > { %14155 = vst [vmem:[%s15894_s21 + $0x30] sm:$0xff] %v14103_v51   ;;  %v7133_v56 = vadd.f32 %v7132_v37, %v7118_v18  ;;  %v12443_v37 = vor.u32 %v13861_v19, %v12442_v13  ;;  %v3377_v51 = vld [vmem:[#allocation2 + $0x190] sm:$0x11]  ;;  %v12551_v13 = vor.u32 %v13878_v23, %v12548_v21  ;;  %v13881_v23 = vld [vmem:[#allocation3 + $0x1d4] sm:$0xf0]  ;;  %v14003_v21 = vld [vmem:[%s15023_s14 + $0x168] sm:$0xff] }
 0x463   : > { %v6981_v25 = vpop.f32.mrf.mxu0  ;;  %v7030_v46 = vpop.f32.mrf.mxu1  ;;  %v3551_v22 = vrot.slane %v3377_v51, 5  ;;  %v3379_v51 = vld [vmem:[#allocation2 + $0xb8] sm:$0xff]  ;;  %9421 = vmatpush.bf16.msrb.mxu3 %v14003_v21  ;;  %v12562_v21 = vld [vmem:[#allocation3 + $0x1e0] sm:$0xf] }
 0x464   : > { %v7031_v31 = vadd.f32 %v7030_v46, %v6981_v25  ;;  %v10628_v25 = vrot.slane %v3375_v39, 9  ;;  %v13880_v39 = vld [vmem:[#allocation3 + $0x1d4] sm:$0xf] }
 0x466   : > { %v7049_v4 = vadd.f32 %v7031_v31, %v15881_v59  ;;  %7734 = vmatmul.bf16.gmra.mxu0 %v12283_v2  ;;  %7783 = vmatmul.bf16.gmra.mxu1 %v12287_v1  ;;  %v12547_v31 = vor.u32 %v13879_v48, %v12546_v60  ;;  %v3549_v19 = vsel %vm15284_vm5, %v10628_v25, %v3548_v40  ;;  %v12554_v48 = vld [vmem:[#allocation3 + $0x1d0] sm:$0xf] }
 0x467   : > { %3667 = vst [vmem:[#allocation3 + $0x200] sm:$0xff] %v3549_v19 }
 0x468   : > { %v7458_v6 = vpop.f32.mrf.mxu2  ;;  %v7507_v42 = vpop.f32.mrf.mxu3  ;;  %v7096_v54 = vadd.f32 %v7095_v63, %v7049_v4  ;;  %v7119_v52 = vmul.f32 %v7049_v4, %v7049_v4 }
 0x469   : > { %v15966_v27 = vadd.f32 %v7507_v42, %v7458_v6 }
 0x46a   : > { %v7134_v26 = vadd.f32 %v7133_v56, %v7119_v52  ;;  %v13911_v52 = vld [vmem:[#allocation3 + $0x1e4] sm:$0xf0] }
 0x46b   : > { %v6983_v59 = vpop.f32.mrf.mxu0  ;;  %v7032_v45 = vpop.f32.mrf.mxu1 }
 0x46c   : > { %v7033_v10 = vadd.f32 %v7032_v45, %v6983_v59  ;;  %v3141_v59 = vrot.slane %v3139_v41, 4  ;;  %v12556_v41 = vld [vmem:[#allocation3 + $0x1d8] sm:$0xf0] }
 0x46d   : > { %8057 = vmatmul.bf16.gmra.mxu2 %v12443_v37  ;;  %8106 = vmatmul.bf16.gmra.mxu3 %v12447_v24  ;;  %v13910_v24 = vld [vmem:[#allocation3 + $0x1e4] sm:$0xf]  ;;  %v12559_v19 = vor.u32 %v13880_v39, %v12556_v41 }
 0x46e   : > { %v7050_v20 = vadd.f32 %v7033_v10, %v15884_v3  ;;  %v3550_v3 = vrot.slane %v3548_v40, 4  ;;  %3246 = vst [vmem:[#allocation2] sm:$0x11] %v3141_v59  ;;  %v13995_v40 = vld [vmem:[%s15023_s14 + $0x128] sm:$0xff]  ;;  %v13994_v39 = vld [vmem:[%s15023_s14 + $0x120] sm:$0xff] }
 0x46f   : > { %9372 = vmatpush.bf16.msrb.mxu2 %v13995_v40  ;;  %v14002_v41 = vld [vmem:[%s15023_s14 + $0x160] sm:$0xff] }
 0x470   : > { %v7461_v63 = vpop.f32.mrf.mxu2  ;;  %v7510_v18 = vpop.f32.mrf.mxu3  ;;  %v14108_v56 = vpack.c.bf16 %v7050_v20, %v7049_v4  ;;  %v15971_v2 = vadd.f32 %v7096_v54, %v7050_v20  ;;  %v7120_v1 = vmul.f32 %v7050_v20, %v7050_v20  ;;  %v13972_v4 = vld [vmem:[%s15023_s14 + $0x3f0] sm:$0xff]  ;;  %v3552_v6 = vsel %vm15284_vm5, %v3550_v3, %v3551_v22  ;;  %v12706_v54 = vld [vmem:[#allocation3 + $0x1e0] sm:$0xf]  ;;  %9422 = vmatpush.bf16.msrb.mxu3 %v14002_v41  ;;  %v13993_v41 = vld [vmem:[%s15023_s14 + $0x118] sm:$0xff] }
 0x471   : > { %v15973_v46 = vadd.f32 %v7510_v18, %v7461_v63  ;;  %3668 = vst [vmem:[#allocation3 + $0x208] sm:$0xff] %v3552_v6  ;;  %9081 = vmatpush.bf16.msrb.mxu1 %v13972_v4  ;;  %v3378_v63 = vld [vmem:[#allocation2 + $0x1a0] sm:$0xee]  ;;  %v13963_v6 = vld [vmem:[%s15023_s14 + $0x3a8] sm:$0xff] }
 0x472   : > { %14156 = vst [vmem:[%s15894_s21 + $0x38] sm:$0xff] %v14108_v56   ;;  %v15976_v8 = vadd.f32 %v7134_v26, %v7120_v1  ;;  %v12708_v26 = vld [vmem:[#allocation3 + $0x1e8] sm:$0xf0]  ;;  %v3555_v56 = vrot.slane %v3379_v51, 5  ;;  %9033 = vmatpush.bf16.msrb.mxu0 %v13963_v6 }
 0x473   : > { %v7700_v53 = vpop.f32.mrf.mxu0  ;;  %v7749_v43 = vpop.f32.mrf.mxu1  ;;  %v12711_v57 = vor.u32 %v13910_v24, %v12708_v26  ;;  %v12714_v24 = vld [vmem:[#allocation3 + $0x1f0] sm:$0xf]  ;;  %v13913_v26 = vld [vmem:[#allocation3 + $0x1f4] sm:$0xf0]  ;;  %9373 = vmatpush.bf16.msrb.mxu2 %v13994_v39 }
 0x474   : > { %v7701_v42 = vadd.f32 %v7700_v53, %v15890_v55  ;;  %v12707_v55 = vor.u32 %v13911_v52, %v12706_v54  ;;  %v12570_v39 = vld [vmem:[#allocation3 + $0x1f0] sm:$0xf] }
 0x475   : > { %v3380_v18 = vld [vmem:[#allocation2] sm:$0x11] }
 0x476   : > { %v7750_v37 = vadd.f32 %v7749_v43, %v7701_v42  ;;  %8361 = vmatmul.bf16.vlgmr.msra.gmra.mxu0 %v12547_v31  ;;  %8410 = vmatmul.bf16.vlgmr.msra.gmra.mxu1 %v12551_v13  ;;  %v3558_v3 = vrot.slane %v3380_v18, 5  ;;  %v3557_v31 = vrot.slane %v3555_v56, 4  ;;  %v12555_v13 = vor.u32 %v13881_v23, %v12554_v48  ;;  %v13971_v42 = vld [vmem:[%s15023_s14 + $0x3e8] sm:$0xff] }
 0x477   : > { %9082 = vmatpush.bf16.msrb.mxu1 %v13971_v42  ;;  %v3562_v18 = vrot.slane %v3382_v36, 5  ;;  %v14001_v36 = vld [vmem:[%s15023_s14 + $0x158] sm:$0xff]  ;;  %9374 = vmatpush.bf16.msrb.mxu2 %v13993_v41  ;;  %v14000_v41 = vld [vmem:[%s15023_s14 + $0x150] sm:$0xff] }
 0x478   : > { %v7463_v45 = vpop.f32.mrf.mxu2  ;;  %v7512_v10 = vpop.f32.mrf.mxu3  ;;  %v3559_v54 = vsel %vm15284_vm5, %v3557_v31, %v3558_v3  ;;  %9423 = vmatpush.bf16.msrb.mxu3 %v14001_v36 }
 0x479   : > { %v15987_v60 = vadd.f32 %v7512_v10, %v7463_v45  ;;  %3670 = vst [vmem:[#allocation3 + $0x218] sm:$0xff] %v3559_v54  ;;  %v12716_v45 = vld [vmem:[#allocation3 + $0x1f8] sm:$0xf0]  ;;  %v3146_v10 = vrot.slane %v3144_v44, 4  ;;  %v13883_v44 = vld [vmem:[#allocation3 + $0x1e4] sm:$0xf0] }
 0x47a   : > { %v3564_v3 = vrot.slane %v3562_v18, 4  ;;  %v13962_v54 = vld [vmem:[%s15023_s14 + $0x3a0] sm:$0xff] }
 0x47b   : > { %v7702_v16 = vpop.f32.mrf.mxu0  ;;  %v7751_v47 = vpop.f32.mrf.mxu1  ;;  %3249 = vst [vmem:[#allocation2 + $0x10] sm:$0x11] %v3146_v10  ;;  %9034 = vmatpush.bf16.msrb.mxu0 %v13962_v54  ;;  %v13914_v10 = vld [vmem:[#allocation3 + $0x204] sm:$0xf]  ;;  %v13969_v54 = vld [vmem:[%s15023_s14 + $0x3d8] sm:$0xff] }
 0x47c   : > { %v7703_v20 = vadd.f32 %v7702_v16, %v15898_v17  ;;  %v10629_v17 = vrot.slane %v3378_v63, 9  ;;  %v13882_v63 = vld [vmem:[#allocation3 + $0x1e4] sm:$0xf]  ;;  %9424 = vmatpush.bf16.msrb.mxu3 %v14000_v41  ;;  %v3583_v41 = vrot.slane %v3391_v35, 5 }
 0x47d   : > { %8700 = vmatmul.bf16.vlgmr.msra.gmra.mxu2 %v12707_v55  ;;  %8749 = vmatmul.bf16.vlgmr.msra.gmra.mxu3 %v12711_v57 }
 0x47e   : > { %v7752_v32 = vadd.f32 %v7751_v47, %v7703_v20  ;;  %v3556_v53 = vsel %vm15284_vm5, %v10629_v17, %v3555_v56  ;;  %v12564_v56 = vld [vmem:[#allocation3 + $0x1e8] sm:$0xf0] }
 0x47f   : > { %3669 = vst [vmem:[#allocation3 + $0x210] sm:$0xff] %v3556_v53 }
 0x480   : > { %v8023_v1 = vpop.f32.mrf.mxu2  ;;  %v8072_v25 = vpop.f32.mrf.mxu3 }
 0x481   : > { %v8073_v22 = vadd.f32 %v8072_v25, %v8023_v1 }
 0x482   : > { %v3383_v1 = vld [vmem:[#allocation2 + $0x10] sm:$0x11] }
 0x483   : > { %v15994_v43 = vadd.f32 %v8073_v22, %v7750_v37  ;;  %v7705_v12 = vpop.f32.mrf.mxu0  ;;  %v7754_v4 = vpop.f32.mrf.mxu1  ;;  %v13912_v37 = vld [vmem:[#allocation3 + $0x1f4] sm:$0xf]  ;;  %v3565_v22 = vrot.slane %v3383_v1, 5 }
 0x484   : > { %v7706_v52 = vadd.f32 %v7705_v12, %v15903_v9  ;;  %v12715_v9 = vor.u32 %v13913_v26, %v12714_v24  ;;  %v12719_v47 = vor.u32 %v13912_v37, %v12716_v45  ;;  %v12722_v26 = vld [vmem:[#allocation3 + $0x200] sm:$0xf]  ;;  %v13915_v37 = vld [vmem:[#allocation3 + $0x204] sm:$0xf0] }
 0x485   : > { %v3566_v12 = vsel %vm15284_vm5, %v3564_v3, %v3565_v22 }
 0x486   : > { %v7755_v59 = vadd.f32 %v7754_v4, %v7706_v52  ;;  %8366 = vmatmul.bf16.gmra.mxu0 %v12555_v13  ;;  %8415 = vmatmul.bf16.gmra.mxu1 %v12559_v19  ;;  %v12563_v13 = vor.u32 %v13883_v44, %v12562_v21  ;;  %v12567_v19 = vor.u32 %v13882_v63, %v12564_v56  ;;  %v13970_v52 = vld [vmem:[%s15023_s14 + $0x3e0] sm:$0xff]  ;;  %v13884_v63 = vld [vmem:[#allocation3 + $0x1f4] sm:$0xf]  ;;  %v12572_v56 = vld [vmem:[#allocation3 + $0x1f8] sm:$0xf0] }
 0x487   : > { %3672 = vst [vmem:[#allocation3 + $0x228] sm:$0xff] %v3566_v12  ;;  %9083 = vmatpush.bf16.msrb.mxu1 %v13970_v52 }
 0x488   : > { %v8025_v55 = vpop.f32.mrf.mxu2  ;;  %v8074_v57 = vpop.f32.mrf.mxu3 }
 0x489   : > { %v8075_v16 = vadd.f32 %v8074_v57, %v8025_v55  ;;  %v12724_v55 = vld [vmem:[#allocation3 + $0x208] sm:$0xf0] }
 0x48b   : > { %v16003_v20 = vadd.f32 %v8075_v16, %v7752_v32  ;;  %v7707_v48 = vpop.f32.mrf.mxu0  ;;  %v7756_v23 = vpop.f32.mrf.mxu1  ;;  %v3381_v32 = vld [vmem:[#allocation2 + $0x38] sm:$0xee]  ;;  %9084 = vmatpush.bf16.msrb.mxu1 %v13969_v54 }
 0x48c   : > { %v7708_v40 = vadd.f32 %v7707_v48, %v15909_v14  ;;  %v10630_v14 = vrot.slane %v3381_v32, 9 }
 0x48d   : > { %8705 = vmatmul.bf16.gmra.mxu2 %v12715_v9  ;;  %8754 = vmatmul.bf16.gmra.mxu3 %v12719_v47  ;;  %v12727_v47 = vor.u32 %v13914_v10, %v12724_v55  ;;  %v13916_v10 = vld [vmem:[#allocation3 + $0x214] sm:$0xf]  ;;  %v12732_v55 = vld [vmem:[#allocation3 + $0x218] sm:$0xf0] }
 0x48e   : > { %v7757_v51 = vadd.f32 %v7756_v23, %v7708_v40  ;;  %v3563_v53 = vsel %vm15284_vm5, %v10630_v14, %v3562_v18  ;;  %v3569_v18 = vrot.slane %v3385_v61, 5  ;;  %v13886_v61 = vld [vmem:[#allocation3 + $0x204] sm:$0xf]  ;;  %v13919_v54 = vld [vmem:[#allocation3 + $0x224] sm:$0xf0] }
 0x48f   : > { %3671 = vst [vmem:[#allocation3 + $0x220] sm:$0xff] %v3563_v53 }
 0x490   : > { %v8028_v25 = vpop.f32.mrf.mxu2  ;;  %v8077_v17 = vpop.f32.mrf.mxu3 }
 0x491   : > { %v8078_v31 = vadd.f32 %v8077_v17, %v8028_v25  ;;  %v3571_v17 = vrot.slane %v3569_v18, 4 }
 0x493   : > { %v16012_v4 = vadd.f32 %v8078_v31, %v7755_v59  ;;  %v7710_v6 = vpop.f32.mrf.mxu0  ;;  %v7759_v42 = vpop.f32.mrf.mxu1  ;;  %v3151_v59 = vrot.slane %v3149_v11, 4  ;;  %v13885_v11 = vld [vmem:[#allocation3 + $0x1f4] sm:$0xf0]  ;;  %v12575_v31 = vor.u32 %v13884_v63, %v12572_v56  ;;  %v12580_v63 = vld [vmem:[#allocation3 + $0x208] sm:$0xf0] }
 0x494   : > { %v7711_v24 = vadd.f32 %v7710_v6, %v15914_v28  ;;  %v12723_v28 = vor.u32 %v13915_v37, %v12722_v26  ;;  %v12571_v22 = vor.u32 %v13885_v11, %v12570_v39  ;;  %v13917_v26 = vld [vmem:[#allocation3 + $0x214] sm:$0xf0]  ;;  %v13992_v39 = vld [vmem:[%s15023_s14 + $0x110] sm:$0xff]  ;;  %v3576_v11 = vrot.slane %v3388_v58, 5  ;;  %v12588_v58 = vld [vmem:[#allocation3 + $0x218] sm:$0xf0] }
 0x495   : > { %3252 = vst [vmem:[#allocation2 + $0xd0] sm:$0x11] %v3151_v59  ;;  %9375 = vmatpush.bf16.msrb.mxu2 %v13992_v39  ;;  %v13888_v39 = vld [vmem:[#allocation3 + $0x214] sm:$0xf] }
 0x496   : > { %v7760_v45 = vadd.f32 %v7759_v42, %v7711_v24  ;;  %8371 = vmatmul.bf16.gmra.mxu0 %v12563_v13  ;;  %8420 = vmatmul.bf16.gmra.mxu1 %v12567_v19  ;;  %v13961_v42 = vld [vmem:[%s15023_s14 + $0x398] sm:$0xff]  ;;  %v12730_v24 = vld [vmem:[#allocation3 + $0x210] sm:$0xf] }
 0x497   : > { %9035 = vmatpush.bf16.msrb.mxu0 %v13961_v42  ;;  %v12738_v42 = vld [vmem:[#allocation3 + $0x220] sm:$0xf] }
 0x498   : > { %v8030_v57 = vpop.f32.mrf.mxu2  ;;  %v8079_v16 = vpop.f32.mrf.mxu3 }
 0x499   : > { %v8080_v9 = vadd.f32 %v8079_v16, %v8030_v57 }
 0x49b   : > { %v16019_v48 = vadd.f32 %v8080_v9, %v7757_v51  ;;  %v7712_v23 = vpop.f32.mrf.mxu0  ;;  %v7761_v40 = vpop.f32.mrf.mxu1  ;;  %v3384_v51 = vld [vmem:[#allocation2 + $0x58] sm:$0xee]  ;;  %v12735_v9 = vor.u32 %v13916_v10, %v12732_v55 }
 0x49c   : > { %v7713_v21 = vadd.f32 %v7712_v23, %v15920_v62  ;;  %v3386_v32 = vld [vmem:[#allocation2 + $0xd0] sm:$0x11]  ;;  %v10631_v62 = vrot.slane %v3384_v51, 9 }
 0x49d   : > { %8710 = vmatmul.bf16.gmra.mxu2 %v12723_v28  ;;  %8759 = vmatmul.bf16.gmra.mxu3 %v12727_v47  ;;  %v3572_v14 = vrot.slane %v3386_v32, 5  ;;  %v3578_v32 = vrot.slane %v3576_v11, 4 }
 0x49e   : > { %v7762_v44 = vadd.f32 %v7761_v40, %v7713_v21  ;;  %v3570_v13 = vsel %vm15284_vm5, %v10631_v62, %v3569_v18  ;;  %v12578_v21 = vld [vmem:[#allocation3 + $0x200] sm:$0xf] }
 0x49f   : > { %v3573_v19 = vsel %vm15284_vm5, %v3571_v17, %v3572_v14  ;;  %3673 = vst [vmem:[#allocation3 + $0x230] sm:$0xff] %v3570_v13  ;;  %v12583_v17 = vor.u32 %v13886_v61, %v12580_v63  ;;  %v3585_v63 = vrot.slane %v3583_v41, 4 }
 0x4a0   : > { %v8033_v1 = vpop.f32.mrf.mxu2  ;;  %v8082_v25 = vpop.f32.mrf.mxu3  ;;  %3674 = vst [vmem:[#allocation3 + $0x238] sm:$0xff] %v3573_v19  ;;  %v13960_v19 = vld [vmem:[%s15023_s14 + $0x390] sm:$0xff] }
 0x4a1   : > { %v8083_v3 = vadd.f32 %v8082_v25, %v8033_v1  ;;  %9036 = vmatpush.bf16.msrb.mxu0 %v13960_v19 }
 0x4a3   : > { %v16028_v53 = vadd.f32 %v8083_v3, %v7760_v45  ;;  %v7715_v12 = vpop.f32.mrf.mxu0  ;;  %v7764_v6 = vpop.f32.mrf.mxu1  ;;  %v3156_v45 = vrot.slane %v3154_v5, 4  ;;  %v13887_v5 = vld [vmem:[#allocation3 + $0x204] sm:$0xf0] }
 0x4a4   : > { %v7716_v52 = vadd.f32 %v7715_v12, %v15925_v30  ;;  %v12731_v30 = vor.u32 %v13917_v26, %v12730_v24  ;;  %v12579_v62 = vor.u32 %v13887_v5, %v12578_v21  ;;  %v13968_v12 = vld [vmem:[%s15023_s14 + $0x3d0] sm:$0xff]  ;;  %v13918_v24 = vld [vmem:[#allocation3 + $0x224] sm:$0xf]  ;;  %v12740_v26 = vld [vmem:[#allocation3 + $0x228] sm:$0xf0] }
 0x4a5   : > { %3255 = vst [vmem:[#allocation2 + $0x198] sm:$0x11] %v3156_v45  ;;  %9085 = vmatpush.bf16.msrb.mxu1 %v13968_v12 }
 0x4a6   : > { %v7765_v37 = vadd.f32 %v7764_v6, %v7716_v52  ;;  %8376 = vmatmul.bf16.gmra.mxu0 %v12571_v22  ;;  %8425 = vmatmul.bf16.gmra.mxu1 %v12575_v31  ;;  %v13920_v12 = vld [vmem:[#allocation3 + $0x234] sm:$0xf] }
 0x4a7   : > { %v13921_v19 = vld [vmem:[#allocation3 + $0x234] sm:$0xf0] }
 0x4a8   : > { %v8035_v59 = vpop.f32.mrf.mxu2  ;;  %v8084_v57 = vpop.f32.mrf.mxu3 }
 0x4a9   : > { %v8085_v16 = vadd.f32 %v8084_v57, %v8035_v59  ;;  %v12743_v59 = vor.u32 %v13918_v24, %v12740_v26 }
 0x4ab   : > { %v16035_v28 = vadd.f32 %v8085_v16, %v7762_v44  ;;  %v7717_v47 = vpop.f32.mrf.mxu0  ;;  %v7766_v23 = vpop.f32.mrf.mxu1  ;;  %v3387_v44 = vld [vmem:[#allocation2 + $0x68] sm:$0xee] }
 0x4ac   : > { %v7718_v40 = vadd.f32 %v7717_v47, %v15931_v33  ;;  %v3389_v18 = vld [vmem:[#allocation2 + $0x198] sm:$0x11]  ;;  %v10632_v33 = vrot.slane %v3387_v44, 9  ;;  %v12586_v47 = vld [vmem:[#allocation3 + $0x210] sm:$0xf] }
 0x4ad   : > { %8715 = vmatmul.bf16.gmra.mxu2 %v12731_v30  ;;  %8764 = vmatmul.bf16.gmra.mxu3 %v12735_v9  ;;  %v3579_v1 = vrot.slane %v3389_v18, 5 }
 0x4ae   : > { %v7767_v36 = vadd.f32 %v7766_v23, %v7718_v40  ;;  %v3577_v14 = vsel %vm15284_vm5, %v10632_v33, %v3576_v11  ;;  %v13991_v23 = vld [vmem:[%s15023_s14 + $0x108] sm:$0xff] }
 0x4af   : > { %v3580_v3 = vsel %vm15284_vm5, %v3578_v32, %v3579_v1  ;;  %3675 = vst [vmem:[#allocation3 + $0x240] sm:$0xff] %v3577_v14  ;;  %v13999_v40 = vld [vmem:[%s15023_s14 + $0x148] sm:$0xff]  ;;  %9376 = vmatpush.bf16.msrb.mxu2 %v13991_v23 }
 0x4b0   : > { %v8038_v56 = vpop.f32.mrf.mxu2  ;;  %v8087_v51 = vpop.f32.mrf.mxu3  ;;  %3676 = vst [vmem:[#allocation3 + $0x248] sm:$0xff] %v3580_v3  ;;  %9425 = vmatpush.bf16.msrb.mxu3 %v13999_v40  ;;  %v13967_v14 = vld [vmem:[%s15023_s14 + $0x3c8] sm:$0xff] }
 0x4b1   : > { %v8088_v25 = vadd.f32 %v8087_v51, %v8038_v56  ;;  %v12591_v51 = vor.u32 %v13888_v39, %v12588_v58  ;;  %9086 = vmatpush.bf16.msrb.mxu1 %v13967_v14  ;;  %v13958_v58 = vld [vmem:[%s15023_s14 + $0x380] sm:$0xff]  ;;  %v14061_v14 = vld [vmem:[%s15023_s14 + $0x438] sm:$0xff] }
 0x4b3   : > { %v16044_v22 = vadd.f32 %v8088_v25, %v7765_v37  ;;  %v7720_v31 = vpop.f32.mrf.mxu0  ;;  %v7769_v13 = vpop.f32.mrf.mxu1  ;;  %v3161_v37 = vrot.slane %v3159_v7, 4  ;;  %v13889_v7 = vld [vmem:[#allocation3 + $0x214] sm:$0xf0] }
 0x4b4   : > { %v7721_v6 = vadd.f32 %v7720_v31, %v15936_v29  ;;  %v12739_v29 = vor.u32 %v13919_v54, %v12738_v42  ;;  %v12587_v56 = vor.u32 %v13889_v7, %v12586_v47  ;;  %v12746_v31 = vld [vmem:[#allocation3 + $0x230] sm:$0xf]  ;;  %v12596_v47 = vld [vmem:[#allocation3 + $0x228] sm:$0xf0] }
 0x4b5   : > { %3258 = vst [vmem:[#allocation2 + $0x70] sm:$0x11] %v3161_v37  ;;  %v12747_v24 = vor.u32 %v13921_v19, %v12746_v31  ;;  %v13893_v19 = vld [vmem:[#allocation3 + $0x234] sm:$0xf0] }
 0x4b6   : > { %v7770_v52 = vadd.f32 %v7769_v13, %v7721_v6  ;;  %8381 = vmatmul.bf16.gmra.mxu0 %v12579_v62  ;;  %8430 = vmatmul.bf16.gmra.mxu1 %v12583_v17  ;;  %v13959_v17 = vld [vmem:[%s15023_s14 + $0x388] sm:$0xff]  ;;  %v12748_v6 = vld [vmem:[#allocation3 + $0x238] sm:$0xf0] }
 0x4b7   : > { %9037 = vmatpush.bf16.msrb.mxu0 %v13959_v17  ;;  %v12751_v26 = vor.u32 %v13920_v12, %v12748_v6  ;;  %v13892_v12 = vld [vmem:[#allocation3 + $0x234] sm:$0xf]  ;;  %v12604_v6 = vld [vmem:[#allocation3 + $0x238] sm:$0xf0] }
 0x4b8   : > { %v8040_v10 = vpop.f32.mrf.mxu2  ;;  %v8089_v55 = vpop.f32.mrf.mxu3 }
 0x4b9   : > { %v8090_v45 = vadd.f32 %v8089_v55, %v8040_v10 }
 0x4bb   : > { %v16051_v57 = vadd.f32 %v8090_v45, %v7767_v36  ;;  %v7722_v16 = vpop.f32.mrf.mxu0  ;;  %v7771_v30 = vpop.f32.mrf.mxu1  ;;  %v3390_v36 = vld [vmem:[#allocation2 + $0xe8] sm:$0xee]  ;;  %v13990_v45 = vld [vmem:[%s15023_s14 + $0x100] sm:$0xff]  ;;  %9038 = vmatpush.bf16.msrb.mxu0 %v13958_v58 }
 0x4bc   : > { %v7723_v9 = vadd.f32 %v7722_v16, %v15942_v49  ;;  %v3392_v5 = vld [vmem:[#allocation2 + $0x70] sm:$0x11]  ;;  %v10633_v49 = vrot.slane %v3390_v36, 9  ;;  %v12594_v16 = vld [vmem:[#allocation3 + $0x220] sm:$0xf]  ;;  %9377 = vmatpush.bf16.msrb.mxu2 %v13990_v45  ;;  %v14037_v45 = vld [vmem:[%s15023_s14 + $0x2f8] sm:$0xff] }
 0x4bd   : > { %8720 = vmatmul.bf16.gmra.mxu2 %v12739_v29  ;;  %8769 = vmatmul.bf16.gmra.mxu3 %v12743_v59  ;;  %v3586_v44 = vrot.slane %v3392_v5, 5  ;;  %v13998_v29 = vld [vmem:[%s15023_s14 + $0x140] sm:$0xff] }
 0x4be   : > { %v7772_v21 = vadd.f32 %v7771_v30, %v7723_v9  ;;  %v3584_v33 = vsel %vm15284_vm5, %v10633_v49, %v3583_v41  ;;  %v13891_v30 = vld [vmem:[#allocation3 + $0x224] sm:$0xf0]  ;;  %v13890_v9 = vld [vmem:[#allocation3 + $0x224] sm:$0xf]  ;;  %9426 = vmatpush.bf16.msrb.mxu3 %v13998_v29 }
 0x4bf   : > { %v3587_v32 = vsel %vm15284_vm5, %v3585_v63, %v3586_v44  ;;  %3677 = vst [vmem:[#allocation3 + $0x250] sm:$0xff] %v3584_v33  ;;  %v12599_v7 = vor.u32 %v13890_v9, %v12596_v47  ;;  %v13966_v36 = vld [vmem:[%s15023_s14 + $0x3c0] sm:$0xff]  ;;  %v13923_v49 = vld [vmem:[#allocation3 + $0x244] sm:$0xf0]  ;;  %v12756_v44 = vld [vmem:[#allocation3 + $0x248] sm:$0xf0] }
 0x4c0   : > { %v8043_v61 = vpop.f32.mrf.mxu2  ;;  %v8092_v11 = vpop.f32.mrf.mxu3  ;;  %3678 = vst [vmem:[#allocation3 + $0x258] sm:$0xff] %v3587_v32  ;;  %9087 = vmatpush.bf16.msrb.mxu1 %v13966_v36  ;;  %v13922_v63 = vld [vmem:[#allocation3 + $0x244] sm:$0xf]  ;;  %10048 = vmatpush.bf16.msra.mxu2 %v14061_v14  ;;  %v14060_v36 = vld [vmem:[%s15023_s14 + $0x430] sm:$0xff] }
 0x4c1   : > { %v8093_v18 = vadd.f32 %v8092_v11, %v8043_v61  ;;  %v12754_v61 = vld [vmem:[#allocation3 + $0x240] sm:$0xf]  ;;  %v12759_v32 = vor.u32 %v13922_v63, %v12756_v44  ;;  %v13942_v63 = vld [vmem:[#allocation3 + $0x204] sm:$0xf]  ;;  %v12868_v44 = vld [vmem:[#allocation3 + $0x208] sm:$0xf0] }
 0x4c2   : > { %v12755_v33 = vor.u32 %v13923_v49, %v12754_v61  ;;  %v13943_v49 = vld [vmem:[#allocation3 + $0x204] sm:$0xf0]  ;;  %v14036_v14 = vld [vmem:[%s15023_s14 + $0x2f0] sm:$0xff] }
 0x4c3   : > { %v16060_v1 = vadd.f32 %v8093_v18, %v7770_v52  ;;  %v7725_v25 = vpop.f32.mrf.mxu0  ;;  %v7774_v62 = vpop.f32.mrf.mxu1 }
 0x4c4   : > { %v7726_v3 = vadd.f32 %v7725_v25, %v15947_v15  ;;  %9758 = vmatpush.bf16.msra.mxu1 %v14037_v45  ;;  %10049 = vmatpush.bf16.msra.mxu2 %v14060_v36  ;;  %v14027_v36 = vld [vmem:[%s15023_s14 + $0x2a8] sm:$0xff] }
 0x4c6   : > { %v7775_v13 = vadd.f32 %v7774_v62, %v7726_v3  ;;  %8386 = vmatmul.bf16.gmra.mxu0 %v12587_v56  ;;  %8435 = vmatmul.bf16.gmra.mxu1 %v12591_v51  ;;  %v14069_v3 = vld [vmem:[%s15023_s14 + $0x478] sm:$0xff]  ;;  %v13924_v9 = vld [vmem:[#allocation3 + $0x254] sm:$0xf] }
 0x4c7   : > { %10097 = vmatpush.bf16.msra.mxu3 %v14069_v3  ;;  %v12764_v47 = vld [vmem:[#allocation3 + $0x258] sm:$0xf0] }
 0x4c8   : > { %v8045_v42 = vpop.f32.mrf.mxu2  ;;  %v8094_v54 = vpop.f32.mrf.mxu3  ;;  %9759 = vmatpush.bf16.msra.mxu1 %v14036_v14 }
 0x4c9   : > { %v8095_v52 = vadd.f32 %v8094_v54, %v8045_v42 }
 0x4cb   : > { %v16065_v37 = vadd.f32 %v8095_v52, %v7772_v21  ;;  %v7727_v15 = vpop.f32.mrf.mxu0  ;;  %v7776_v10 = vpop.f32.mrf.mxu1  ;;  %v12595_v21 = vor.u32 %v13891_v30, %v12594_v16  ;;  %v13925_v30 = vld [vmem:[#allocation3 + $0x254] sm:$0xf0] }
 0x4cc   : > { %v7728_v55 = vadd.f32 %v7727_v15, %v15953_v0 }
 0x4cd   : > { %8725 = vmatmul.bf16.gmra.mxu2 %v12747_v24  ;;  %8774 = vmatmul.bf16.gmra.mxu3 %v12751_v26  ;;  %v12607_v26 = vor.u32 %v13892_v12, %v12604_v6  ;;  %v13974_v12 = vld [vmem:[#allocation3 + $0x304] sm:$0xf]  ;;  %v13028_v6 = vld [vmem:[#allocation3 + $0x308] sm:$0xf0] }
 0x4ce   : > { %v7777_v59 = vadd.f32 %v7776_v10, %v7728_v55  ;;  %v14029_v55 = vld [vmem:[%s15023_s14 + $0x2b8] sm:$0xff] }
 0x4cf   : > { %9709 = vmatpush.bf16.msra.mxu0 %v14029_v55 }
 0x4d0   : > { %v8048_v23 = vpop.f32.mrf.mxu2  ;;  %v8097_v40 = vpop.f32.mrf.mxu3 }
 0x4d1   : > { %v8098_v35 = vadd.f32 %v8097_v40, %v8048_v23 }
 0x4d3   : > { %v16070_v39 = vadd.f32 %v8098_v35, %v7775_v13  ;;  %v7730_v0 = vpop.f32.mrf.mxu0  ;;  %v7779_v41 = vpop.f32.mrf.mxu1  ;;  %v12602_v13 = vld [vmem:[#allocation3 + $0x230] sm:$0xf] }
 0x4d4   : > { %v7731_v5 = vadd.f32 %v7730_v0, %v15958_v34  ;;  %v12603_v24 = vor.u32 %v13893_v19, %v12602_v13  ;;  %v13975_v19 = vld [vmem:[#allocation3 + $0x304] sm:$0xf0] }
 0x4d6   : > { %v7780_v11 = vadd.f32 %v7779_v41, %v7731_v5  ;;  %8391 = vmatmul.bf16.gmra.mxu0 %v12595_v21  ;;  %8440 = vmatmul.bf16.gmra.mxu1 %v12599_v7  ;;  %v12767_v7 = vor.u32 %v13924_v9, %v12764_v47  ;;  %v14068_v5 = vld [vmem:[%s15023_s14 + $0x470] sm:$0xff]  ;;  %v12876_v47 = vld [vmem:[#allocation3 + $0x218] sm:$0xf0] }
 0x4d7   : > { %10098 = vmatpush.bf16.msra.mxu3 %v14068_v5  ;;  %v13944_v9 = vld [vmem:[#allocation3 + $0x214] sm:$0xf]  ;;  %v14035_v5 = vld [vmem:[%s15023_s14 + $0x2e8] sm:$0xff] }
 0x4d8   : > { %v8050_v18 = vpop.f32.mrf.mxu2  ;;  %v8099_v56 = vpop.f32.mrf.mxu3  ;;  %9760 = vmatpush.bf16.msra.mxu1 %v14035_v5  ;;  %v13044_v5 = vld [vmem:[#allocation3 + $0x328] sm:$0xf0] }
 0x4d9   : > { %v8100_v51 = vadd.f32 %v8099_v56, %v8050_v18 }
 0x4db   : > { %v16075_v25 = vadd.f32 %v8100_v51, %v7777_v59  ;;  %v7732_v62 = vpop.f32.mrf.mxu0  ;;  %v7781_v34 = vpop.f32.mrf.mxu1  ;;  %v12762_v59 = vld [vmem:[#allocation3 + $0x250] sm:$0xf] }
 0x4dc   : > { %v7733_v17 = vadd.f32 %v7732_v62, %v15966_v27  ;;  %v12763_v21 = vor.u32 %v13925_v30, %v12762_v59  ;;  %v13945_v30 = vld [vmem:[#allocation3 + $0x214] sm:$0xf0] }
 0x4dd   : > { %8730 = vmatmul.bf16.gmra.mxu2 %v12755_v33  ;;  %8779 = vmatmul.bf16.gmra.mxu3 %v12759_v32  ;;  %v12871_v32 = vor.u32 %v13942_v63, %v12868_v44  ;;  %v13976_v63 = vld [vmem:[#allocation3 + $0x314] sm:$0xf]  ;;  %v13036_v44 = vld [vmem:[#allocation3 + $0x318] sm:$0xf0] }
 0x4de   : > { %v7782_v31 = vadd.f32 %v7781_v34, %v7733_v17  ;;  %v14028_v17 = vld [vmem:[%s15023_s14 + $0x2b0] sm:$0xff] }
 0x4df   : > { %9710 = vmatpush.bf16.msra.mxu0 %v14028_v17 }
 0x4e0   : > { %v8053_v42 = vpop.f32.mrf.mxu2  ;;  %v8102_v54 = vpop.f32.mrf.mxu3 }
 0x4e1   : > { %v8103_v52 = vadd.f32 %v8102_v54, %v8053_v42 }
 0x4e3   : > { %v16080_v15 = vadd.f32 %v8103_v52, %v7780_v11  ;;  %v7735_v27 = vpop.f32.mrf.mxu0  ;;  %v7784_v10 = vpop.f32.mrf.mxu1  ;;  %v12866_v11 = vld [vmem:[#allocation3 + $0x200] sm:$0xf]  ;;  %9711 = vmatpush.bf16.msra.mxu0 %v14027_v36  ;;  %v13978_v36 = vld [vmem:[#allocation3 + $0x324] sm:$0xf] }
 0x4e4   : > { %v7736_v29 = vadd.f32 %v7735_v27, %v15973_v46  ;;  %v12867_v33 = vor.u32 %v13943_v49, %v12866_v11  ;;  %v13977_v49 = vld [vmem:[#allocation3 + $0x314] sm:$0xf0] }
 0x4e6   : > { %v7785_v16 = vadd.f32 %v7784_v10, %v7736_v29  ;;  %8396 = vmatmul.bf16.gmra.mxu0 %v12603_v24  ;;  %8445 = vmatmul.bf16.gmra.mxu1 %v12607_v26  ;;  %v13031_v26 = vor.u32 %v13974_v12, %v13028_v6  ;;  %v14067_v29 = vld [vmem:[%s15023_s14 + $0x468] sm:$0xff]  ;;  %v13946_v6 = vld [vmem:[#allocation3 + $0x224] sm:$0xf] }
 0x4e7   : > { %10099 = vmatpush.bf16.msra.mxu3 %v14067_v29  ;;  %v13947_v12 = vld [vmem:[#allocation3 + $0x224] sm:$0xf0] }
 0x4e8   : > { %v8055_v23 = vpop.f32.mrf.mxu2  ;;  %v8104_v40 = vpop.f32.mrf.mxu3 }
 0x4e9   : > { %v8105_v35 = vadd.f32 %v8104_v40, %v8055_v23 }
 0x4eb   : > { %v16085_v0 = vadd.f32 %v8105_v35, %v7782_v31  ;;  %v7737_v41 = vpop.f32.mrf.mxu0  ;;  %v7786_v46 = vpop.f32.mrf.mxu1  ;;  %v13026_v31 = vld [vmem:[#allocation3 + $0x300] sm:$0xf] }
 0x4ec   : > { %v7738_v58 = vadd.f32 %v7737_v41, %v15987_v60  ;;  %v13027_v24 = vor.u32 %v13975_v19, %v13026_v31  ;;  %v14066_v31 = vld [vmem:[%s15023_s14 + $0x460] sm:$0xff] }
 0x4ed   : > { %8735 = vmatmul.bf16.gmra.mxu2 %v12763_v21  ;;  %8784 = vmatmul.bf16.gmra.mxu3 %v12767_v7  ;;  %v12879_v7 = vor.u32 %v13944_v9, %v12876_v47 }
 0x4ee   : > { %v7787_v61 = vadd.f32 %v7786_v46, %v7738_v58  ;;  %10100 = vmatpush.bf16.msra.mxu3 %v14066_v31  ;;  %v12892_v31 = vld [vmem:[#allocation3 + $0x238] sm:$0xf0] }
 0x4f0   : > { %v8058_v18 = vpop.f32.mrf.mxu2  ;;  %v8107_v56 = vpop.f32.mrf.mxu3 }
 0x4f1   : > { %v8108_v51 = vadd.f32 %v8107_v56, %v8058_v18 }
 0x4f3   : > { %v16090_v62 = vadd.f32 %v8108_v51, %v7785_v16  ;;  %v8362_v60 = vpop.f32.mrf.mxu0  ;;  %v8411_v34 = vpop.f32.mrf.mxu1  ;;  %v12874_v16 = vld [vmem:[#allocation3 + $0x210] sm:$0xf] }
 0x4f4   : > { %v8412_v3 = vadd.f32 %v8411_v34, %v8362_v60  ;;  %v12875_v21 = vor.u32 %v13945_v30, %v12874_v16 }
 0x4f6   : > { %v8451_v13 = vadd.f32 %v8412_v3, %v15994_v43  ;;  %9039 = vmatmul.bf16.vlgmr.msrb.gmra.mxu0 %v12867_v33  ;;  %9088 = vmatmul.bf16.vlgmr.msrb.gmra.mxu1 %v12871_v32  ;;  %v14059_v43 = vld [vmem:[%s15023_s14 + $0x428] sm:$0xff]  ;;  %v13039_v32 = vor.u32 %v13976_v63, %v13036_v44  ;;  %v14058_v3 = vld [vmem:[%s15023_s14 + $0x420] sm:$0xff]  ;;  %v13047_v63 = vor.u32 %v13978_v36, %v13044_v5 }
 0x4f7   : > { %10050 = vmatpush.bf16.msra.mxu2 %v14059_v43 }
 0x4f8   : > { %v8060_v42 = vpop.f32.mrf.mxu2  ;;  %v8109_v54 = vpop.f32.mrf.mxu3 }
 0x4f9   : > { %v8110_v52 = vadd.f32 %v8109_v54, %v8060_v42  ;;  %v12884_v54 = vld [vmem:[#allocation3 + $0x228] sm:$0xf0] }
 0x4fa   : > { %v12887_v16 = vor.u32 %v13946_v6, %v12884_v54 }
 0x4fb   : > { %v16095_v27 = vadd.f32 %v8110_v52, %v7787_v61  ;;  %v8364_v10 = vpop.f32.mrf.mxu0  ;;  %v8413_v55 = vpop.f32.mrf.mxu1  ;;  %10051 = vmatpush.bf16.msra.mxu2 %v14058_v3  ;;  %v3719_v52 = vld [vmem:[#allocation2 + $0x40] sm:$0xcc] }
 0x4fc   : > { %v8414_v45 = vadd.f32 %v8413_v55, %v8364_v10  ;;  %v10648_v55 = vrot.slane %v3719_v52, 10 }
 0x4fd   : > { %9378 = vmatmul.bf16.vlgmr.msrb.gmra.mxu2 %v13027_v24  ;;  %9427 = vmatmul.bf16.vlgmr.msrb.gmra.mxu3 %v13031_v26  ;;  %v3721_v24 = vld [vmem:[#allocation2 + $0x190] sm:$0x33] }
 0x4fe   : > { %v8452_v59 = vadd.f32 %v8414_v45, %v16003_v20  ;;  %v13034_v20 = vld [vmem:[#allocation3 + $0x310] sm:$0xf]  ;;  %v3895_v43 = vrot.slane %v3721_v24, 6 }
 0x4ff   : > { %v13035_v33 = vor.u32 %v13977_v49, %v13034_v20 }
 0x500   : > { %v8701_v23 = vpop.f32.mrf.mxu2  ;;  %v8750_v40 = vpop.f32.mrf.mxu3 }
 0x501   : > { %v8751_v35 = vadd.f32 %v8750_v40, %v8701_v23  ;;  %v14026_v40 = vld [vmem:[%s15023_s14 + $0x2a0] sm:$0xff] }
 0x502   : > { %9712 = vmatpush.bf16.msra.mxu0 %v14026_v40  ;;  %v13980_v40 = vld [vmem:[#allocation3 + $0x334] sm:$0xf] }
 0x503   : > { %v16100_v41 = vadd.f32 %v8751_v35, %v8451_v13  ;;  %v8367_v46 = vpop.f32.mrf.mxu0  ;;  %v8416_v58 = vpop.f32.mrf.mxu1  ;;  %v3720_v13 = vld [vmem:[#allocation2 + $0xa8] sm:$0xff]  ;;  %v14034_v35 = vld [vmem:[%s15023_s14 + $0x2e0] sm:$0xff] }
 0x504   : > { %v8417_v61 = vadd.f32 %v8416_v58, %v8367_v46  ;;  %v3892_v42 = vrot.slane %v3720_v13, 6  ;;  %9761 = vmatpush.bf16.msra.mxu1 %v14034_v35  ;;  %v13979_v58 = vld [vmem:[#allocation3 + $0x324] sm:$0xf0]  ;;  %v3722_v13 = vld [vmem:[#allocation2 + $0x1a0] sm:$0xcc] }
 0x505   : > { %v13052_v35 = vld [vmem:[#allocation3 + $0x338] sm:$0xf0] }
 0x506   : > { %v8453_v11 = vadd.f32 %v8417_v61, %v16012_v4  ;;  %9044 = vmatmul.bf16.gmra.mxu0 %v12875_v21  ;;  %9093 = vmatmul.bf16.gmra.mxu1 %v12879_v7  ;;  %v12882_v4 = vld [vmem:[#allocation3 + $0x220] sm:$0xf]  ;;  %v3894_v45 = vrot.slane %v3892_v42, 4  ;;  %v13055_v36 = vor.u32 %v13980_v40, %v13052_v35 }
 0x507   : > { %v13042_v7 = vld [vmem:[#allocation3 + $0x320] sm:$0xf] }
 0x508   : > { %v8703_v18 = vpop.f32.mrf.mxu2  ;;  %v8752_v56 = vpop.f32.mrf.mxu3  ;;  %v3896_v30 = vsel %vm15524_vm8, %v3894_v45, %v3895_v43  ;;  %v13043_v49 = vor.u32 %v13979_v58, %v13042_v7 }
 0x509   : > { %v8753_v51 = vadd.f32 %v8752_v56, %v8703_v18  ;;  %4012 = vst [vmem:[#allocation3 + $0x348] sm:$0xff] %v3896_v30  ;;  %v13050_v30 = vld [vmem:[#allocation3 + $0x330] sm:$0xf] }
 0x50b   : > { %v16105_v60 = vadd.f32 %v8753_v51, %v8452_v59  ;;  %v8369_v34 = vpop.f32.mrf.mxu0  ;;  %v8418_v17 = vpop.f32.mrf.mxu1  ;;  %v12883_v59 = vor.u32 %v13947_v12, %v12882_v4  ;;  %v13948_v4 = vld [vmem:[#allocation3 + $0x234] sm:$0xf] }
 0x50c   : > { %v8419_v14 = vadd.f32 %v8418_v17, %v8369_v34  ;;  %v3723_v34 = vld [vmem:[#allocation2 + $0xb8] sm:$0xff] }
 0x50d   : > { %9383 = vmatmul.bf16.gmra.mxu2 %v13035_v33  ;;  %9432 = vmatmul.bf16.gmra.mxu3 %v13039_v32  ;;  %v14057_v33 = vld [vmem:[%s15023_s14 + $0x418] sm:$0xff]  ;;  %v3899_v3 = vrot.slane %v3723_v34, 6 }
 0x50e   : > { %v8454_v19 = vadd.f32 %v8419_v14, %v16019_v48  ;;  %v3893_v48 = vsel %vm15524_vm8, %v10648_v55, %v3892_v42  ;;  %v14065_v32 = vld [vmem:[%s15023_s14 + $0x458] sm:$0xff]  ;;  %10052 = vmatpush.bf16.msra.mxu2 %v14057_v33  ;;  %v10649_v42 = vrot.slane %v3722_v13, 10  ;;  %v12900_v33 = vld [vmem:[#allocation3 + $0x248] sm:$0xf0] }
 0x50f   : > { %4011 = vst [vmem:[#allocation3 + $0x340] sm:$0xff] %v3893_v48  ;;  %v13949_v14 = vld [vmem:[#allocation3 + $0x234] sm:$0xf0]  ;;  %10101 = vmatpush.bf16.msra.mxu3 %v14065_v32  ;;  %v3901_v54 = vrot.slane %v3899_v3, 4  ;;  %v16138_v32 = vld [vmem:[#allocation2 + $0xb0] sm:$0xff] }
 0x510   : > { %v8706_v26 = vpop.f32.mrf.mxu2  ;;  %v8755_v10 = vpop.f32.mrf.mxu3  ;;  %v16141_v34 = vrot.slane %v16138_v32, 5 }
 0x511   : > { %v8756_v29 = vadd.f32 %v8755_v10, %v8706_v26  ;;  %v12895_v10 = vor.u32 %v13948_v4, %v12892_v31  ;;  %v3395_v4 = vld [vmem:[#allocation2 + $0x160] sm:$0x11] }
 0x513   : > { %v16114_v9 = vadd.f32 %v8756_v29, %v8453_v11  ;;  %v8372_v47 = vpop.f32.mrf.mxu0  ;;  %v8421_v23 = vpop.f32.mrf.mxu1 }
 0x514   : > { %v8422_v21 = vadd.f32 %v8421_v23, %v8372_v47  ;;  %v13981_v23 = vld [vmem:[#allocation3 + $0x334] sm:$0xf0] }
 0x515   : > { %v13051_v58 = vor.u32 %v13981_v23, %v13050_v30  ;;  %v14032_v30 = vld [vmem:[%s15023_s14 + $0x2d0] sm:$0xff] }
 0x516   : > { %v8455_v46 = vadd.f32 %v8422_v21, %v16028_v53  ;;  %9049 = vmatmul.bf16.gmra.mxu0 %v12883_v59  ;;  %9098 = vmatmul.bf16.gmra.mxu1 %v12887_v16  ;;  %v12890_v53 = vld [vmem:[#allocation3 + $0x230] sm:$0xf]  ;;  %v14025_v59 = vld [vmem:[%s15023_s14 + $0x298] sm:$0xff]  ;;  %v13058_v35 = vld [vmem:[#allocation3 + $0x340] sm:$0xf] }
 0x517   : > { %v12891_v26 = vor.u32 %v13949_v14, %v12890_v53  ;;  %v14033_v16 = vld [vmem:[%s15023_s14 + $0x2d8] sm:$0xff]  ;;  %9713 = vmatpush.bf16.msra.mxu0 %v14025_v59  ;;  %v13950_v53 = vld [vmem:[#allocation3 + $0x244] sm:$0xf]  ;;  %v3393_v14 = vld [vmem:[#allocation2 + $0x1c8] sm:$0xee] }
 0x518   : > { %v8708_v61 = vpop.f32.mrf.mxu2  ;;  %v8757_v20 = vpop.f32.mrf.mxu3  ;;  %9762 = vmatpush.bf16.msra.mxu1 %v14033_v16 }
 0x519   : > { %v8758_v11 = vadd.f32 %v8757_v20, %v8708_v61 }
 0x51b   : > { %v16119_v44 = vadd.f32 %v8758_v11, %v8454_v19  ;;  %v8374_v18 = vpop.f32.mrf.mxu0  ;;  %v8423_v56 = vpop.f32.mrf.mxu1  ;;  %v3724_v19 = vld [vmem:[#allocation2] sm:$0x33] }
 0x51c   : > { %v8424_v51 = vadd.f32 %v8423_v56, %v8374_v18  ;;  %v3902_v52 = vrot.slane %v3724_v19, 6  ;;  %v14064_v18 = vld [vmem:[%s15023_s14 + $0x450] sm:$0xff]  ;;  %v3726_v56 = vld [vmem:[#allocation2 + $0x20] sm:$0xff]  ;;  %v10634_v19 = vrot.slane %v3393_v14, 9  ;;  %9763 = vmatpush.bf16.msra.mxu1 %v14032_v30  ;;  %v12908_v14 = vld [vmem:[#allocation3 + $0x258] sm:$0xf0] }
 0x51d   : > { %9388 = vmatmul.bf16.gmra.mxu2 %v13043_v49  ;;  %9437 = vmatmul.bf16.gmra.mxu3 %v13047_v63  ;;  %v12898_v49 = vld [vmem:[#allocation3 + $0x240] sm:$0xf]  ;;  %v13951_v63 = vld [vmem:[#allocation3 + $0x244] sm:$0xf0] }
 0x51e   : > { %v8456_v17 = vadd.f32 %v8424_v51, %v16035_v28  ;;  %v3900_v28 = vsel %vm15524_vm8, %v10649_v42, %v3899_v3  ;;  %v3903_v55 = vsel %vm15524_vm8, %v3901_v54, %v3902_v52  ;;  %10102 = vmatpush.bf16.msra.mxu3 %v14064_v18  ;;  %v3725_v3 = vld [vmem:[#allocation2 + $0x38] sm:$0xcc]  ;;  %v12899_v52 = vor.u32 %v13951_v63, %v12898_v49 }
 0x51f   : > { %4013 = vst [vmem:[#allocation3 + $0x350] sm:$0xff] %v3900_v28  ;;  %v10650_v42 = vrot.slane %v3725_v3, 10  ;;  %v3591_v28 = vsel %vm15284_vm5, %v10634_v19, %v16141_v34  ;;  %v3729_v3 = vld [vmem:[#allocation2 + $0x88] sm:$0xff]  ;;  %v3728_v19 = vld [vmem:[#allocation2 + $0x58] sm:$0xcc] }
 0x520   : > { %v8711_v12 = vpop.f32.mrf.mxu2  ;;  %v8760_v6 = vpop.f32.mrf.mxu3  ;;  %4014 = vst [vmem:[#allocation3 + $0x358] sm:$0xff] %v3903_v55 }
 0x521   : > { %v8761_v24 = vadd.f32 %v8760_v6, %v8711_v12  ;;  %v3592_v12 = vrot.slane %v16141_v34, 4  ;;  %v3727_v6 = vld [vmem:[#allocation2 + $0x10] sm:$0x33]  ;;  %3679 = vst [vmem:[#allocation3 + $0x260] sm:$0xff] %v3591_v28 }
 0x523   : > { %v16128_v45 = vadd.f32 %v8761_v24, %v8455_v46  ;;  %v8377_v43 = vpop.f32.mrf.mxu0  ;;  %v8426_v29 = vpop.f32.mrf.mxu1 }
 0x524   : > { %v8427_v48 = vadd.f32 %v8426_v29, %v8377_v43 }
 0x526   : > { %v8457_v47 = vadd.f32 %v8427_v48, %v16044_v22  ;;  %9054 = vmatmul.bf16.gmra.mxu0 %v12891_v26  ;;  %9103 = vmatmul.bf16.gmra.mxu1 %v12895_v10  ;;  %v14056_v22 = vld [vmem:[%s15023_s14 + $0x410] sm:$0xff]  ;;  %v3909_v26 = vrot.slane %v3727_v6, 6  ;;  %v12903_v10 = vor.u32 %v13950_v53, %v12900_v33  ;;  %v14055_v33 = vld [vmem:[%s15023_s14 + $0x408] sm:$0xff] }
 0x527   : > { %10053 = vmatpush.bf16.msra.mxu2 %v14056_v22  ;;  %v14024_v48 = vld [vmem:[%s15023_s14 + $0x290] sm:$0xff] }
 0x528   : > { %v8713_v21 = vpop.f32.mrf.mxu2  ;;  %v8762_v7 = vpop.f32.mrf.mxu3  ;;  %9714 = vmatpush.bf16.msra.mxu0 %v14024_v48  ;;  %v13952_v53 = vld [vmem:[#allocation3 + $0x254] sm:$0xf] }
 0x529   : > { %v8763_v46 = vadd.f32 %v8762_v7, %v8713_v21  ;;  %v13983_v21 = vld [vmem:[#allocation3 + $0x344] sm:$0xf0] }
 0x52b   : > { %v16133_v5 = vadd.f32 %v8763_v46, %v8456_v17  ;;  %v8379_v61 = vpop.f32.mrf.mxu0  ;;  %v8428_v20 = vpop.f32.mrf.mxu1  ;;  %v3906_v17 = vrot.slane %v3726_v56, 6  ;;  %v13060_v46 = vld [vmem:[#allocation3 + $0x348] sm:$0xf0]  ;;  %v12906_v56 = vld [vmem:[#allocation3 + $0x250] sm:$0xf]  ;;  %10054 = vmatpush.bf16.msra.mxu2 %v14055_v33  ;;  %v14062_v33 = vld [vmem:[%s15023_s14 + $0x440] sm:$0xff] }
 0x52c   : > { %v8429_v11 = vadd.f32 %v8428_v20, %v8379_v61  ;;  %v13059_v20 = vor.u32 %v13983_v21, %v13058_v35  ;;  %v14031_v35 = vld [vmem:[%s15023_s14 + $0x2c8] sm:$0xff] }
 0x52d   : > { %9393 = vmatmul.bf16.gmra.mxu2 %v13051_v58  ;;  %9442 = vmatmul.bf16.gmra.mxu3 %v13055_v36  ;;  %v3908_v24 = vrot.slane %v3906_v17, 4  ;;  %v3907_v43 = vsel %vm15524_vm8, %v10650_v42, %v3906_v17 }
 0x52e   : > { %v8458_v51 = vadd.f32 %v8429_v11, %v16051_v57  ;;  %v3593_v57 = vrot.slane %v3395_v4, 5  ;;  %4015 = vst [vmem:[#allocation3 + $0x360] sm:$0xff] %v3907_v43  ;;  %v14063_v4 = vld [vmem:[%s15023_s14 + $0x448] sm:$0xff]  ;;  %9764 = vmatpush.bf16.msra.mxu1 %v14031_v35 }
 0x52f   : > { %v3910_v23 = vsel %vm15524_vm8, %v3908_v24, %v3909_v26  ;;  %10103 = vmatpush.bf16.msra.mxu3 %v14063_v4  ;;  %v3913_v24 = vrot.slane %v3729_v3, 6  ;;  %v13954_v4 = vld [vmem:[#allocation3 + $0x264] sm:$0xf] }
 0x530   : > { %v8716_v31 = vpop.f32.mrf.mxu2  ;;  %v8765_v13 = vpop.f32.mrf.mxu3  ;;  %v3594_v55 = vsel %vm15284_vm5, %v3592_v12, %v3593_v57  ;;  %4016 = vst [vmem:[#allocation3 + $0x368] sm:$0xff] %v3910_v23 }
 0x531   : > { %v8766_v54 = vadd.f32 %v8765_v13, %v8716_v31  ;;  %3680 = vst [vmem:[#allocation3 + $0x268] sm:$0xff] %v3594_v55  ;;  %v3396_v31 = vld [vmem:[#allocation2 + $0x30] sm:$0xee]  ;;  %v3398_v13 = vld [vmem:[#allocation2 + $0x1c0] sm:$0x11] }
 0x532   : > { %v10635_v6 = vrot.slane %v3396_v31, 9  ;;  %v3600_v42 = vrot.slane %v3398_v13, 5 }
 0x533   : > { %v16153_v29 = vadd.f32 %v8766_v54, %v8457_v47  ;;  %v8382_v59 = vpop.f32.mrf.mxu0  ;;  %v8431_v16 = vpop.f32.mrf.mxu1  ;;  %v13982_v47 = vld [vmem:[#allocation3 + $0x344] sm:$0xf]  ;;  %v3730_v54 = vld [vmem:[#allocation2 + $0xd0] sm:$0x33]  ;;  %10104 = vmatpush.bf16.msra.mxu3 %v14062_v33 }
 0x534   : > { %v8432_v40 = vadd.f32 %v8431_v16, %v8382_v59  ;;  %v13063_v11 = vor.u32 %v13982_v47, %v13060_v46  ;;  %v3916_v28 = vrot.slane %v3730_v54, 6  ;;  %v3598_v55 = vsel %vm15284_vm5, %v10635_v6, %v16141_v34  ;;  %v13066_v34 = vld [vmem:[#allocation3 + $0x350] sm:$0xf]  ;;  %v13985_v46 = vld [vmem:[#allocation3 + $0x354] sm:$0xf0]  ;;  %v14022_v54 = vld [vmem:[%s15023_s14 + $0x280] sm:$0xff] }
 0x535   : > { %v3601_v43 = vsel %vm15284_vm5, %v3592_v12, %v3600_v42  ;;  %v3915_v16 = vrot.slane %v3913_v24, 4  ;;  %3681 = vst [vmem:[#allocation3 + $0x270] sm:$0xff] %v3598_v55  ;;  %v13984_v12 = vld [vmem:[#allocation3 + $0x354] sm:$0xf] }
 0x536   : > { %v8459_v7 = vadd.f32 %v8432_v40, %v16060_v1  ;;  %9059 = vmatmul.bf16.gmra.mxu0 %v12899_v52  ;;  %9108 = vmatmul.bf16.gmra.mxu1 %v12903_v10  ;;  %v13953_v1 = vld [vmem:[#allocation3 + $0x254] sm:$0xf0]  ;;  %v10651_v52 = vrot.slane %v3728_v19, 10  ;;  %v14023_v40 = vld [vmem:[%s15023_s14 + $0x288] sm:$0xff]  ;;  %3682 = vst [vmem:[#allocation3 + $0x278] sm:$0xff] %v3601_v43 }
 0x537   : > { %v12907_v10 = vor.u32 %v13953_v1, %v12906_v56  ;;  %v3917_v47 = vsel %vm15524_vm8, %v3915_v16, %v3916_v28  ;;  %9715 = vmatpush.bf16.msra.mxu0 %v14023_v40  ;;  %v13076_v28 = vld [vmem:[#allocation3 + $0x368] sm:$0xf0] }
 0x538   : > { %v8718_v58 = vpop.f32.mrf.mxu2  ;;  %v8767_v36 = vpop.f32.mrf.mxu3  ;;  %v3914_v59 = vsel %vm15524_vm8, %v10651_v52, %v3913_v24  ;;  %4018 = vst [vmem:[#allocation3 + $0x378] sm:$0xff] %v3917_v47  ;;  %v12916_v3 = vld [vmem:[#allocation3 + $0x268] sm:$0xf0]  ;;  %v13074_v24 = vld [vmem:[#allocation3 + $0x360] sm:$0xf] }
 0x539   : > { %v8768_v61 = vadd.f32 %v8767_v36, %v8718_v58  ;;  %4017 = vst [vmem:[#allocation3 + $0x370] sm:$0xff] %v3914_v59 }
 0x53b   : > { %v16160_v49 = vadd.f32 %v8768_v61, %v8458_v51  ;;  %v8384_v63 = vpop.f32.mrf.mxu0  ;;  %v8433_v22 = vpop.f32.mrf.mxu1  ;;  %9716 = vmatpush.bf16.msra.mxu0 %v14022_v54  ;;  %v14006_v54 = vld [vmem:[#allocation3 + $0x324] sm:$0xf] }
 0x53c   : > { %v8434_v18 = vadd.f32 %v8433_v22, %v8384_v63 }
 0x53d   : > { %9398 = vmatmul.bf16.gmra.mxu2 %v13059_v20  ;;  %9447 = vmatmul.bf16.gmra.mxu3 %v13063_v11  ;;  %v13067_v20 = vor.u32 %v13985_v46, %v13066_v34  ;;  %v13957_v34 = vld [vmem:[#allocation3 + $0x274] sm:$0xf0]  ;;  %v13956_v46 = vld [vmem:[#allocation3 + $0x274] sm:$0xf] }
 0x53e   : > { %v8460_v17 = vadd.f32 %v8434_v18, %v16065_v37  ;;  %v12911_v37 = vor.u32 %v13952_v53, %v12908_v14  ;;  %v12914_v53 = vld [vmem:[#allocation3 + $0x260] sm:$0xf]  ;;  %v13955_v14 = vld [vmem:[#allocation3 + $0x264] sm:$0xf0] }
 0x53f   : > { %v12915_v19 = vor.u32 %v13955_v14, %v12914_v53  ;;  %v13084_v53 = vld [vmem:[#allocation3 + $0x378] sm:$0xf0] }
 0x540   : > { %v8721_v51 = vpop.f32.mrf.mxu2  ;;  %v8770_v57 = vpop.f32.mrf.mxu3 }
 0x541   : > { %v8771_v26 = vadd.f32 %v8770_v57, %v8721_v51  ;;  %v12919_v51 = vor.u32 %v13954_v4, %v12916_v3 }
 0x543   : > { %v16174_v48 = vadd.f32 %v8771_v26, %v8459_v7  ;;  %v8387_v30 = vpop.f32.mrf.mxu0  ;;  %v8436_v23 = vpop.f32.mrf.mxu1  ;;  %v13068_v7 = vld [vmem:[#allocation3 + $0x358] sm:$0xf0] }
 0x544   : > { %v8437_v21 = vadd.f32 %v8436_v23, %v8387_v30  ;;  %v13071_v11 = vor.u32 %v13984_v12, %v13068_v7 }
 0x546   : > { %v8461_v38 = vadd.f32 %v8437_v21, %v16070_v39  ;;  %9064 = vmatmul.bf16.gmra.mxu0 %v12907_v10  ;;  %9113 = vmatmul.bf16.gmra.mxu1 %v12911_v37  ;;  %v14054_v39 = vld [vmem:[%s15023_s14 + $0x400] sm:$0xff]  ;;  %v13987_v10 = vld [vmem:[#allocation3 + $0x364] sm:$0xf0] }
 0x547   : > { %10055 = vmatpush.bf16.msra.mxu2 %v14054_v39  ;;  %v13986_v37 = vld [vmem:[#allocation3 + $0x364] sm:$0xf]  ;;  %v13075_v16 = vor.u32 %v13987_v10, %v13074_v24 }
 0x548   : > { %v8723_v58 = vpop.f32.mrf.mxu2  ;;  %v8772_v36 = vpop.f32.mrf.mxu3  ;;  %v13079_v30 = vor.u32 %v13986_v37, %v13076_v28 }
 0x549   : > { %v8773_v61 = vadd.f32 %v8772_v36, %v8723_v58 }
 0x54b   : > { %v16181_v63 = vadd.f32 %v8773_v61, %v8460_v17  ;;  %v8389_v22 = vpop.f32.mrf.mxu0  ;;  %v8438_v18 = vpop.f32.mrf.mxu1 }
 0x54c   : > { %v8439_v56 = vadd.f32 %v8438_v18, %v8389_v22 }
 0x54d   : > { %9403 = vmatmul.bf16.gmra.mxu2 %v13067_v20  ;;  %9452 = vmatmul.bf16.gmra.mxu3 %v13071_v11 }
 0x54e   : > { %v8462_v1 = vadd.f32 %v8439_v56, %v16075_v25  ;;  %v14030_v25 = vld [vmem:[%s15023_s14 + $0x2c0] sm:$0xff]  ;;  %v13082_v56 = vld [vmem:[#allocation3 + $0x370] sm:$0xf]  ;;  %s2675_s14 = scalar_select %p2674_p1, %s14301_s26, 1 }
 0x54f   : > { %9765 = vmatpush.bf16.msra.mxu1 %v14030_v25  ;;  %v13188_v25 = vld [vmem:[#allocation3 + $0x328] sm:$0xf0] }
 0x550   : > { %v8726_v31 = vpop.f32.mrf.mxu2  ;;  %v8775_v13 = vpop.f32.mrf.mxu3  ;;  %v13191_v37 = vor.u32 %v14006_v54, %v13188_v25  ;;  %s2677_s20 = sadd.s32 %s10614_s19, %s2675_s14  ;;  %s13490_s14 = sshll.u32 (%p14419_p9), %s10279_s18, 2 }
 0x551   : > { %v8776_v17 = vadd.f32 %v8775_v13, %v8726_v31  ;;  %s2678_s12 = scalar_lea.vmem %s16411_s5, %s2677_s20  ;;  %s2685_s23 = scalar_lea.vmem %s16412_s6, %s2677_s20 }
 0x552   : > { %s16315_s15 = scalar_lea.vmem (%p14419_p9), %s16410_s4, %s13490_s14 }
 0x553   : > { %v16186_v57 = vadd.f32 %v8776_v17, %v8461_v38  ;;  %v8392_v6 = vpop.f32.mrf.mxu0  ;;  %v8441_v42 = vpop.f32.mrf.mxu1  ;;  %v12924_v38 = vld [vmem:[#allocation3 + $0x278] sm:$0xf0] }
 0x554   : > { %v8442_v52 = vadd.f32 %v8441_v42, %v8392_v6  ;;  %v12927_v61 = vor.u32 %v13956_v46, %v12924_v38  ;;  %v14007_v42 = vld [vmem:[#allocation3 + $0x324] sm:$0xf0] }
 0x556   : > { %v8463_v26 = vadd.f32 %v8442_v52, %v16080_v15  ;;  %9069 = vmatmul.bf16.gmra.mxu0 %v12915_v19  ;;  %9118 = vmatmul.bf16.gmra.mxu1 %v12919_v51  ;;  %v12922_v15 = vld [vmem:[#allocation3 + $0x270] sm:$0xf] }
 0x557   : > { %v12923_v36 = vor.u32 %v13957_v34, %v12922_v15 }
 0x558   : > { %v8728_v55 = vpop.f32.mrf.mxu2  ;;  %v8777_v43 = vpop.f32.mrf.mxu3 }
 0x559   : > { %v8778_v59 = vadd.f32 %v8777_v43, %v8728_v55 }
 0x55b   : > { %v16191_v23 = vadd.f32 %v8778_v59, %v8462_v1  ;;  %v8394_v40 = vpop.f32.mrf.mxu0  ;;  %v8443_v35 = vpop.f32.mrf.mxu1  ;;  %v13988_v1 = vld [vmem:[#allocation3 + $0x374] sm:$0xf] }
 0x55c   : > { %v8444_v21 = vadd.f32 %v8443_v35, %v8394_v40  ;;  %v13087_v31 = vor.u32 %v13988_v1, %v13084_v53  ;;  %v14038_v40 = vld [vmem:[#allocation3 + $0x344] sm:$0xf]  ;;  %v13348_v35 = vld [vmem:[#allocation3 + $0x348] sm:$0xf0] }
 0x55d   : > { %9408 = vmatmul.bf16.gmra.mxu2 %v13075_v16  ;;  %9457 = vmatmul.bf16.gmra.mxu3 %v13079_v30  ;;  %v13346_v16 = vld [vmem:[#allocation3 + $0x340] sm:$0xf]  ;;  %v13351_v46 = vor.u32 %v14038_v40, %v13348_v35 }
 0x55e   : > { %v8464_v47 = vadd.f32 %v8444_v21, %v16085_v0  ;;  %v13989_v0 = vld [vmem:[#allocation3 + $0x374] sm:$0xf0] }
 0x55f   : > { %v13083_v3 = vor.u32 %v13989_v0, %v13082_v56 }
 0x560   : > { %v8731_v12 = vpop.f32.mrf.mxu2  ;;  %v8780_v7 = vpop.f32.mrf.mxu3 }
 0x561   : > { %v8781_v58 = vadd.f32 %v8780_v7, %v8731_v12 }
 0x563   : > { %v16194_v20 = vadd.f32 %v8781_v58, %v8463_v26  ;;  %v8397_v11 = vpop.f32.mrf.mxu0  ;;  %v8446_v22 = vpop.f32.mrf.mxu1 }
 0x564   : > { %v8447_v18 = vadd.f32 %v8446_v22, %v8397_v11  ;;  %v14008_v11 = vld [vmem:[#allocation3 + $0x334] sm:$0xf]  ;;  %v13196_v22 = vld [vmem:[#allocation3 + $0x338] sm:$0xf0] }
 0x565   : > { %v13199_v1 = vor.u32 %v14008_v11, %v13196_v22  ;;  %v13362_v11 = vld [vmem:[#allocation3 + $0x360] sm:$0xf] }
 0x566   : > { %v8465_v39 = vadd.f32 %v8447_v18, %v16090_v62  ;;  %9074 = vmatmul.bf16.gmra.mxu0 %v12923_v36  ;;  %9123 = vmatmul.bf16.gmra.mxu1 %v12927_v61  ;;  %v13186_v62 = vld [vmem:[#allocation3 + $0x320] sm:$0xf]  ;;  %v14009_v61 = vld [vmem:[#allocation3 + $0x334] sm:$0xf0] }
 0x567   : > { %v13187_v10 = vor.u32 %v14007_v42, %v13186_v62 }
 0x568   : > { %v8733_v33 = vpop.f32.mrf.mxu2  ;;  %v8782_v14 = vpop.f32.mrf.mxu3 }
 0x569   : > { %v8783_v4 = vadd.f32 %v8782_v14, %v8733_v33 }
 0x56b   : > { %v16197_v13 = vadd.f32 %v8783_v4, %v8464_v47  ;;  %v8399_v17 = vpop.f32.mrf.mxu0  ;;  %v8448_v19 = vpop.f32.mrf.mxu1 }
 0x56c   : > { %v8449_v51 = vadd.f32 %v8448_v19, %v8399_v17  ;;  %v14040_v17 = vld [vmem:[#allocation3 + $0x354] sm:$0xf]  ;;  %v13356_v19 = vld [vmem:[#allocation3 + $0x358] sm:$0xf0] }
 0x56d   : > { %9413 = vmatmul.bf16.gmra.mxu2 %v13083_v3  ;;  %9462 = vmatmul.bf16.gmra.mxu3 %v13087_v31  ;;  %v13354_v3 = vld [vmem:[#allocation3 + $0x350] sm:$0xf]  ;;  %v13359_v54 = vor.u32 %v14040_v17, %v13356_v19 }
 0x56e   : > { %v8466_v6 = vadd.f32 %v8449_v51, %v16095_v27  ;;  %v14039_v27 = vld [vmem:[#allocation3 + $0x344] sm:$0xf0]  ;;  %v13210_v19 = vld [vmem:[#allocation3 + $0x350] sm:$0xf] }
 0x56f   : > { %v13347_v34 = vor.u32 %v14039_v27, %v13346_v16  ;;  %v13204_v16 = vld [vmem:[#allocation3 + $0x348] sm:$0xf0]  ;;  %v3733_v27 = vld [vmem:[#allocation2 + $0x198] sm:$0x33] }
 0x570   : > { %v8736_v52 = vpop.f32.mrf.mxu2  ;;  %v8785_v24 = vpop.f32.mrf.mxu3 }
 0x571   : > { %v8786_v26 = vadd.f32 %v8785_v24, %v8736_v52 }
 0x573   : > { %v16200_v28 = vadd.f32 %v8786_v26, %v8465_v39  ;;  %v9040_v55 = vpop.f32.mrf.mxu0  ;;  %v9089_v43 = vpop.f32.mrf.mxu1 }
 0x574   : > { %v9090_v59 = vadd.f32 %v9089_v43, %v9040_v55  ;;  %v14011_v55 = vld [vmem:[#allocation3 + $0x344] sm:$0xf0]  ;;  %v14010_v43 = vld [vmem:[#allocation3 + $0x344] sm:$0xf] }
 0x576   : > { %v9129_v30 = vadd.f32 %v9090_v59, %v16100_v41  ;;  %9717 = vmatmul.bf16.vlgmr.msra.gmra.mxu0 %v13187_v10  ;;  %9766 = vmatmul.bf16.vlgmr.msra.gmra.mxu1 %v13191_v37  ;;  %v13194_v41 = vld [vmem:[#allocation3 + $0x330] sm:$0xf]  ;;  %v13202_v10 = vld [vmem:[#allocation3 + $0x340] sm:$0xf]  ;;  %v3732_v37 = vld [vmem:[#allocation2 + $0xc8] sm:$0xff] }
 0x577   : > { %v13195_v0 = vor.u32 %v14009_v61, %v13194_v41  ;;  %v3920_v59 = vrot.slane %v3732_v37, 6 }
 0x578   : > { %v8738_v21 = vpop.f32.mrf.mxu2  ;;  %v8787_v47 = vpop.f32.mrf.mxu3 }
 0x579   : > { %v8788_v15 = vadd.f32 %v8787_v47, %v8738_v21  ;;  %v3922_v47 = vrot.slane %v3920_v59, 4 }
 0x57b   : > { %v16203_v38 = vadd.f32 %v8788_v15, %v8466_v6  ;;  %v9042_v12 = vpop.f32.mrf.mxu0  ;;  %v9091_v7 = vpop.f32.mrf.mxu1  ;;  %v3923_v15 = vrot.slane %v3733_v27, 6 }
 0x57c   : > { %v9092_v58 = vadd.f32 %v9091_v7, %v9042_v12  ;;  %v13207_v12 = vor.u32 %v14010_v43, %v13204_v16 }
 0x57d   : > { %10056 = vmatmul.bf16.vlgmr.msra.gmra.mxu2 %v13347_v34  ;;  %10105 = vmatmul.bf16.vlgmr.msra.gmra.mxu3 %v13351_v46  ;;  %v13203_v46 = vor.u32 %v14011_v55, %v13202_v10 }
 0x57e   : > { %v9130_v36 = vadd.f32 %v9092_v58, %v16105_v60  ;;  %v14041_v60 = vld [vmem:[#allocation3 + $0x354] sm:$0xf0] }
 0x57f   : > { %v13355_v42 = vor.u32 %v14041_v60, %v13354_v3 }
 0x580   : > { %v9379_v18 = vpop.f32.mrf.mxu2  ;;  %v9428_v56 = vpop.f32.mrf.mxu3 }
 0x581   : > { %v9429_v39 = vadd.f32 %v9428_v56, %v9379_v18  ;;  %v14043_v18 = vld [vmem:[#allocation3 + $0x364] sm:$0xf0]  ;;  %v14042_v56 = vld [vmem:[#allocation3 + $0x364] sm:$0xf] }
 0x583   : > { %v16206_v53 = vadd.f32 %v9429_v39, %v9129_v30  ;;  %v9045_v33 = vpop.f32.mrf.mxu0  ;;  %v9094_v14 = vpop.f32.mrf.mxu1  ;;  %v3731_v30 = vld [vmem:[#allocation2 + $0x68] sm:$0xcc] }
 0x584   : > { %v9095_v4 = vadd.f32 %v9094_v14, %v9045_v33  ;;  %v10652_v21 = vrot.slane %v3731_v30, 10  ;;  %v13364_v39 = vld [vmem:[#allocation3 + $0x368] sm:$0xf0]  ;;  %v13363_v14 = vor.u32 %v14043_v18, %v13362_v11 }
 0x586   : > { %v9131_v31 = vadd.f32 %v9095_v4, %v16114_v9  ;;  %9722 = vmatmul.bf16.gmra.mxu0 %v13195_v0  ;;  %9771 = vmatmul.bf16.gmra.mxu1 %v13199_v1  ;;  %v3921_v7 = vsel %vm15524_vm8, %v10652_v21, %v3920_v59  ;;  %v13367_v4 = vor.u32 %v14042_v56, %v13364_v39  ;;  %v13218_v39 = vld [vmem:[#allocation3 + $0x360] sm:$0xf] }
 0x587   : > { %4019 = vst [vmem:[#allocation3 + $0x380] sm:$0xff] %v3921_v7 }
 0x588   : > { %v9381_v51 = vpop.f32.mrf.mxu2  ;;  %v9430_v6 = vpop.f32.mrf.mxu3 }
 0x589   : > { %v9431_v62 = vadd.f32 %v9430_v6, %v9381_v51  ;;  %v3735_v51 = vld [vmem:[#allocation2 + $0x178] sm:$0xff] }
 0x58a   : > { %v14013_v6 = vld [vmem:[#allocation3 + $0x354] sm:$0xf0] }
 0x58b   : > { %v16209_v25 = vadd.f32 %v9431_v62, %v9130_v36  ;;  %v9047_v52 = vpop.f32.mrf.mxu0  ;;  %v9096_v24 = vpop.f32.mrf.mxu1  ;;  %v14012_v62 = vld [vmem:[#allocation3 + $0x354] sm:$0xf]  ;;  %v13211_v59 = vor.u32 %v14013_v6, %v13210_v19 }
 0x58c   : > { %v9097_v26 = vadd.f32 %v9096_v24, %v9047_v52  ;;  %v3734_v52 = vld [vmem:[#allocation2 + $0xe8] sm:$0xcc]  ;;  %v3736_v24 = vld [vmem:[#allocation2 + $0x70] sm:$0x33] }
 0x58d   : > { %10061 = vmatmul.bf16.gmra.mxu2 %v13355_v42  ;;  %10110 = vmatmul.bf16.gmra.mxu3 %v13359_v54  ;;  %v3927_v42 = vrot.slane %v3735_v51, 6  ;;  %v13212_v54 = vld [vmem:[#allocation3 + $0x358] sm:$0xf0]  ;;  %v10653_v37 = vrot.slane %v3734_v52, 10  ;;  %v3930_v55 = vrot.slane %v3736_v24, 6 }
 0x58e   : > { %v9132_v9 = vadd.f32 %v9097_v26, %v16119_v44  ;;  %v3924_v44 = vsel %vm15524_vm8, %v3922_v47, %v3923_v15  ;;  %v13215_v16 = vor.u32 %v14012_v62, %v13212_v54  ;;  %v13370_v47 = vld [vmem:[#allocation3 + $0x370] sm:$0xf] }
 0x58f   : > { %4020 = vst [vmem:[#allocation3 + $0x388] sm:$0xff] %v3924_v44  ;;  %v3928_v30 = vsel %vm15524_vm8, %v10653_v37, %v3927_v42 }
 0x590   : > { %v9384_v40 = vpop.f32.mrf.mxu2  ;;  %v9433_v35 = vpop.f32.mrf.mxu3  ;;  %4021 = vst [vmem:[#allocation3 + $0x390] sm:$0xff] %v3928_v30 }
 0x591   : > { %v9434_v34 = vadd.f32 %v9433_v35, %v9384_v40 }
 0x593   : > { %v16216_v58 = vadd.f32 %v9434_v34, %v9131_v31  ;;  %v9050_v36 = vpop.f32.mrf.mxu0  ;;  %v9099_v41 = vpop.f32.mrf.mxu1  ;;  %v14045_v34 = vld [vmem:[#allocation3 + $0x374] sm:$0xf0] }
 0x594   : > { %v9100_v61 = vadd.f32 %v9099_v41, %v9050_v36  ;;  %v13371_v41 = vor.u32 %v14045_v34, %v13370_v47 }
 0x596   : > { %v9133_v22 = vadd.f32 %v9100_v61, %v16128_v45  ;;  %9727 = vmatmul.bf16.gmra.mxu0 %v13203_v46  ;;  %9776 = vmatmul.bf16.gmra.mxu1 %v13207_v12  ;;  %v14044_v46 = vld [vmem:[#allocation3 + $0x374] sm:$0xf]  ;;  %v13372_v12 = vld [vmem:[#allocation3 + $0x378] sm:$0xf0] }
 0x597   : > { %v13375_v61 = vor.u32 %v14044_v46, %v13372_v12  ;;  %v14017_v46 = vld [vmem:[#allocation3 + $0x374] sm:$0xf0]  ;;  %v14016_v12 = vld [vmem:[#allocation3 + $0x374] sm:$0xf] }
 0x598   : > { %v9386_v0 = vpop.f32.mrf.mxu2  ;;  %v9435_v1 = vpop.f32.mrf.mxu3 }
 0x599   : > { %v9436_v33 = vadd.f32 %v9435_v1, %v9386_v0  ;;  %v14015_v0 = vld [vmem:[#allocation3 + $0x364] sm:$0xf0]  ;;  %v14014_v1 = vld [vmem:[#allocation3 + $0x364] sm:$0xf] }
 0x59a   : > { %v13219_v62 = vor.u32 %v14015_v0, %v13218_v39 }
 0x59b   : > { %v16219_v3 = vadd.f32 %v9436_v33, %v9132_v9  ;;  %v9052_v31 = vpop.f32.mrf.mxu0  ;;  %v9101_v60 = vpop.f32.mrf.mxu1  ;;  %v3929_v9 = vrot.slane %v3927_v42, 4  ;;  %v3934_v33 = vrot.slane %v16138_v32, 6 }
 0x59c   : > { %v9102_v17 = vadd.f32 %v9101_v60, %v9052_v31  ;;  %v3739_v31 = vld [vmem:[#allocation2 + $0x160] sm:$0x33] }
 0x59d   : > { %10066 = vmatmul.bf16.gmra.mxu2 %v13363_v14  ;;  %10115 = vmatmul.bf16.gmra.mxu3 %v13367_v4  ;;  %v13220_v14 = vld [vmem:[#allocation3 + $0x368] sm:$0xf0]  ;;  %v3936_v51 = vrot.slane %v3934_v33, 4 }
 0x59e   : > { %v9134_v45 = vadd.f32 %v9102_v17, %v16133_v5  ;;  %v3931_v5 = vsel %vm15524_vm8, %v3929_v9, %v3930_v55  ;;  %v3737_v4 = vld [vmem:[#allocation2 + $0x1c8] sm:$0xcc]  ;;  %v13223_v42 = vor.u32 %v14014_v1, %v13220_v14  ;;  %v14046_v55 = vld [vmem:[#allocation3 + $0x384] sm:$0xf] }
 0x59f   : > { %4022 = vst [vmem:[#allocation3 + $0x398] sm:$0xff] %v3931_v5  ;;  %v10654_v19 = vrot.slane %v3737_v4, 10  ;;  %v14047_v9 = vld [vmem:[#allocation3 + $0x384] sm:$0xf0] }
 0x5a0   : > { %v9389_v26 = vpop.f32.mrf.mxu2  ;;  %v9438_v10 = vpop.f32.mrf.mxu3 }
 0x5a1   : > { %v9439_v43 = vadd.f32 %v9438_v10, %v9389_v26  ;;  %v3935_v54 = vsel %vm15524_vm8, %v10654_v19, %v3934_v33  ;;  %v13378_v10 = vld [vmem:[#allocation3 + $0x380] sm:$0xf] }
 0x5a2   : > { %4023 = vst [vmem:[#allocation3 + $0x3a0] sm:$0xff] %v3935_v54  ;;  %v13379_v5 = vor.u32 %v14047_v9, %v13378_v10  ;;  %v14019_v10 = vld [vmem:[#allocation3 + $0x384] sm:$0xf0]  ;;  %v13236_v9 = vld [vmem:[#allocation3 + $0x388] sm:$0xf0] }
 0x5a3   : > { %v16226_v27 = vadd.f32 %v9439_v43, %v9133_v22  ;;  %v9055_v40 = vpop.f32.mrf.mxu0  ;;  %v9104_v35 = vpop.f32.mrf.mxu1  ;;  %v13380_v43 = vld [vmem:[#allocation3 + $0x388] sm:$0xf0] }
 0x5a4   : > { %v9105_v21 = vadd.f32 %v9104_v35, %v9055_v40  ;;  %v13383_v40 = vor.u32 %v14046_v55, %v13380_v43 }
 0x5a6   : > { %v9135_v15 = vadd.f32 %v9105_v21, %v16153_v29  ;;  %9732 = vmatmul.bf16.gmra.mxu0 %v13211_v59  ;;  %9781 = vmatmul.bf16.gmra.mxu1 %v13215_v16  ;;  %v14049_v19 = vld [vmem:[#allocation3 + $0x394] sm:$0xf0] }
 0x5a8   : > { %v9391_v7 = vpop.f32.mrf.mxu2  ;;  %v9440_v44 = vpop.f32.mrf.mxu3 }
 0x5a9   : > { %v9441_v36 = vadd.f32 %v9440_v44, %v9391_v7  ;;  %v13228_v7 = vld [vmem:[#allocation3 + $0x378] sm:$0xf0]  ;;  %v3740_v44 = vld [vmem:[#allocation2 + $0x30] sm:$0xcc] }
 0x5ab   : > { %v16229_v11 = vadd.f32 %v9441_v36, %v9134_v45  ;;  %v9057_v22 = vpop.f32.mrf.mxu0  ;;  %v9106_v18 = vpop.f32.mrf.mxu1  ;;  %v3937_v45 = vrot.slane %v3739_v31, 6  ;;  %v3742_v36 = vld [vmem:[#allocation2 + $0x1c0] sm:$0x33] }
 0x5ac   : > { %v9107_v56 = vadd.f32 %v9106_v18, %v9057_v22  ;;  %v10655_v22 = vrot.slane %v3740_v44, 10  ;;  %v3944_v18 = vrot.slane %v3742_v36, 6 }
 0x5ad   : > { %10071 = vmatmul.bf16.gmra.mxu2 %v13371_v41  ;;  %10120 = vmatmul.bf16.gmra.mxu3 %v13375_v61 }
 0x5ae   : > { %v9136_v29 = vadd.f32 %v9107_v56, %v16160_v49  ;;  %v3938_v49 = vsel %vm15524_vm8, %v3936_v51, %v3937_v45  ;;  %v3942_v0 = vsel %vm15524_vm8, %v10655_v22, %v3934_v33  ;;  %v3945_v1 = vsel %vm15524_vm8, %v3936_v51, %v3944_v18  ;;  %v14048_v45 = vld [vmem:[#allocation3 + $0x394] sm:$0xf] }
 0x5af   : > { %4024 = vst [vmem:[#allocation3 + $0x3a8] sm:$0xff] %v3938_v49 }
 0x5b0   : > { %v9394_v60 = vpop.f32.mrf.mxu2  ;;  %v9443_v17 = vpop.f32.mrf.mxu3  ;;  %4025 = vst [vmem:[#allocation3 + $0x3b0] sm:$0xff] %v3942_v0  ;;  %v14020_v0 = vld [vmem:[#allocation3 + $0x394] sm:$0xf] }
 0x5b1   : > { %v9444_v6 = vadd.f32 %v9443_v17, %v9394_v60  ;;  %4026 = vst [vmem:[#allocation3 + $0x3b8] sm:$0xff] %v3945_v1  ;;  %v13386_v60 = vld [vmem:[#allocation3 + $0x390] sm:$0xf]  ;;  %v13244_v1 = vld [vmem:[#allocation3 + $0x398] sm:$0xf0] }
 0x5b2   : > { %v13387_v50 = vor.u32 %v14049_v19, %v13386_v60 }
 0x5b3   : > { %v16237_v52 = vadd.f32 %v9444_v6, %v9135_v15  ;;  %v9060_v32 = vpop.f32.mrf.mxu0  ;;  %v9109_v24 = vpop.f32.mrf.mxu1  ;;  %v13388_v6 = vld [vmem:[#allocation3 + $0x398] sm:$0xf0] }
 0x5b4   : > { %v9110_v26 = vadd.f32 %v9109_v24, %v9060_v32  ;;  %v13391_v51 = vor.u32 %v14048_v45, %v13388_v6 }
 0x5b6   : > { %v9137_v37 = vadd.f32 %v9110_v26, %v16174_v48  ;;  %9737 = vmatmul.bf16.gmra.mxu0 %v13219_v62  ;;  %9786 = vmatmul.bf16.gmra.mxu1 %v13223_v42  ;;  %v13226_v48 = vld [vmem:[#allocation3 + $0x370] sm:$0xf] }
 0x5b7   : > { %v13227_v39 = vor.u32 %v14017_v46, %v13226_v48  ;;  %v14050_v48 = vld [vmem:[#allocation3 + $0x3a4] sm:$0xf]  ;;  %v13396_v46 = vld [vmem:[#allocation3 + $0x3a8] sm:$0xf0] }
 0x5b8   : > { %v9396_v59 = vpop.f32.mrf.mxu2  ;;  %v9445_v16 = vpop.f32.mrf.mxu3 }
 0x5b9   : > { %v9446_v30 = vadd.f32 %v9445_v16, %v9396_v59 }
 0x5bb   : > { %v16240_v35 = vadd.f32 %v9446_v30, %v9136_v29  ;;  %v9062_v21 = vpop.f32.mrf.mxu0  ;;  %v9111_v47 = vpop.f32.mrf.mxu1  ;;  %v13231_v29 = vor.u32 %v14016_v12, %v13228_v7 }
 0x5bc   : > { %v9112_v15 = vadd.f32 %v9111_v47, %v9062_v21 }
 0x5bd   : > { %10076 = vmatmul.bf16.gmra.mxu2 %v13379_v5  ;;  %10125 = vmatmul.bf16.gmra.mxu3 %v13383_v40 }
 0x5be   : > { %v9138_v34 = vadd.f32 %v9112_v15, %v16181_v63  ;;  %v13394_v15 = vld [vmem:[#allocation3 + $0x3a0] sm:$0xf] }
 0x5c0   : > { %v9399_v41 = vpop.f32.mrf.mxu2  ;;  %v9448_v61 = vpop.f32.mrf.mxu3 }
 0x5c1   : > { %v9449_v56 = vadd.f32 %v9448_v61, %v9399_v41  ;;  %v13399_v41 = vor.u32 %v14050_v48, %v13396_v46 }
 0x5c3   : > { %v16247_v63 = vadd.f32 %v9449_v56, %v9137_v37  ;;  %v9065_v14 = vpop.f32.mrf.mxu0  ;;  %v9114_v4 = vpop.f32.mrf.mxu1  ;;  %v14018_v37 = vld [vmem:[#allocation3 + $0x384] sm:$0xf] }
 0x5c4   : > { %v9115_v31 = vadd.f32 %v9114_v4, %v9065_v14  ;;  %v13239_v30 = vor.u32 %v14018_v37, %v13236_v9 }
 0x5c6   : > { %v9139_v17 = vadd.f32 %v9115_v31, %v16186_v57  ;;  %9742 = vmatmul.bf16.gmra.mxu0 %v13227_v39  ;;  %9791 = vmatmul.bf16.gmra.mxu1 %v13231_v29  ;;  %v13234_v57 = vld [vmem:[#allocation3 + $0x380] sm:$0xf]  ;;  %v14021_v29 = vld [vmem:[#allocation3 + $0x394] sm:$0xf0] }
 0x5c7   : > { %v13235_v16 = vor.u32 %v14019_v10, %v13234_v57 }
 0x5c8   : > { %v9401_v62 = vpop.f32.mrf.mxu2  ;;  %v9450_v33 = vpop.f32.mrf.mxu3 }
 0x5c9   : > { %v9451_v42 = vadd.f32 %v9450_v33, %v9401_v62  ;;  %v13402_v33 = vld [vmem:[#allocation3 + $0x3b0] sm:$0xf] }
 0x5cb   : > { %v16250_v54 = vadd.f32 %v9451_v42, %v9138_v34  ;;  %v9067_v49 = vpop.f32.mrf.mxu0  ;;  %v9116_v32 = vpop.f32.mrf.mxu1 }
 0x5cc   : > { %v9117_v24 = vadd.f32 %v9116_v32, %v9067_v49 }
 0x5cd   : > { %10081 = vmatmul.bf16.gmra.mxu2 %v13387_v50  ;;  %10130 = vmatmul.bf16.gmra.mxu3 %v13391_v51  ;;  %v14052_v50 = vld [vmem:[#allocation3 + $0x3b4] sm:$0xf]  ;;  %v13404_v51 = vld [vmem:[#allocation3 + $0x3b8] sm:$0xf0] }
 0x5ce   : > { %v9140_v26 = vadd.f32 %v9117_v24, %v16191_v23  ;;  %v14051_v23 = vld [vmem:[#allocation3 + $0x3a4] sm:$0xf0]  ;;  %v13407_v57 = vor.u32 %v14052_v50, %v13404_v51 }
 0x5cf   : > { %v13395_v36 = vor.u32 %v14051_v23, %v13394_v15 }
 0x5d0   : > { %v9404_v55 = vpop.f32.mrf.mxu2  ;;  %v9453_v43 = vpop.f32.mrf.mxu3 }
 0x5d1   : > { %v9454_v59 = vadd.f32 %v9453_v43, %v9404_v55 }
 0x5d3   : > { %v16253_v5 = vadd.f32 %v9454_v59, %v9139_v17  ;;  %v9070_v40 = vpop.f32.mrf.mxu0  ;;  %v9119_v21 = vpop.f32.mrf.mxu1  ;;  %v13247_v17 = vor.u32 %v14020_v0, %v13244_v1 }
 0x5d4   : > { %v9120_v47 = vadd.f32 %v9119_v21, %v9070_v40 }
 0x5d6   : > { %v9141_v34 = vadd.f32 %v9120_v47, %v16194_v20  ;;  %9747 = vmatmul.bf16.gmra.mxu0 %v13235_v16  ;;  %9796 = vmatmul.bf16.gmra.mxu1 %v13239_v30  ;;  %v13242_v20 = vld [vmem:[#allocation3 + $0x390] sm:$0xf] }
 0x5d7   : > { %v13243_v60 = vor.u32 %v14021_v29, %v13242_v20 }
 0x5d8   : > { %v9406_v12 = vpop.f32.mrf.mxu2  ;;  %v9455_v7 = vpop.f32.mrf.mxu3 }
 0x5d9   : > { %v9456_v44 = vadd.f32 %v9455_v7, %v9406_v12 }
 0x5db   : > { %v16256_v61 = vadd.f32 %v9456_v44, %v9140_v26  ;;  %v9072_v22 = vpop.f32.mrf.mxu0  ;;  %v9121_v18 = vpop.f32.mrf.mxu1 }
 0x5dc   : > { %v9122_v56 = vadd.f32 %v9121_v18, %v9072_v22 }
 0x5dd   : > { %10086 = vmatmul.bf16.gmra.mxu2 %v13395_v36  ;;  %10135 = vmatmul.bf16.gmra.mxu3 %v13399_v41 }
 0x5de   : > { %v9142_v39 = vadd.f32 %v9122_v56, %v16197_v13  ;;  %v14053_v13 = vld [vmem:[#allocation3 + $0x3b4] sm:$0xf0] }
 0x5df   : > { %v13403_v26 = vor.u32 %v14053_v13, %v13402_v33 }
 0x5e0   : > { %v9409_v14 = vpop.f32.mrf.mxu2  ;;  %v9458_v4 = vpop.f32.mrf.mxu3 }
 0x5e1   : > { %v9459_v31 = vadd.f32 %v9458_v4, %v9409_v14 }
 0x5e3   : > { %v16259_v19 = vadd.f32 %v9459_v31, %v9141_v34  ;;  %v9075_v45 = vpop.f32.mrf.mxu0  ;;  %v9124_v6 = vpop.f32.mrf.mxu1 }
 0x5e4   : > { %v9125_v62 = vadd.f32 %v9124_v6, %v9075_v45 }
 0x5e6   : > { %v9143_v42 = vadd.f32 %v9125_v62, %v16200_v28  ;;  %9752 = vmatmul.bf16.gmra.mxu0 %v13243_v60  ;;  %9801 = vmatmul.bf16.gmra.mxu1 %v13247_v17 }
 0x5e8   : > { %v9411_v49 = vpop.f32.mrf.mxu2  ;;  %v9460_v32 = vpop.f32.mrf.mxu3 }
 0x5e9   : > { %v9461_v24 = vadd.f32 %v9460_v32, %v9411_v49 }
 0x5eb   : > { %v16262_v10 = vadd.f32 %v9461_v24, %v9142_v39  ;;  %v9077_v37 = vpop.f32.mrf.mxu0  ;;  %v9126_v9 = vpop.f32.mrf.mxu1 }
 0x5ec   : > { %v9127_v55 = vadd.f32 %v9126_v9, %v9077_v37 }
 0x5ed   : > { %10091 = vmatmul.bf16.gmra.mxu2 %v13403_v26  ;;  %10140 = vmatmul.bf16.gmra.mxu3 %v13407_v57 }
 0x5ee   : > { %v9144_v43 = vadd.f32 %v9127_v55, %v16203_v38 }
 0x5f0   : > { %v9414_v28 = vpop.f32.mrf.mxu2  ;;  %v9463_v59 = vpop.f32.mrf.mxu3 }
 0x5f1   : > { %v9464_v16 = vadd.f32 %v9463_v59, %v9414_v28 }
 0x5f3   : > { %v16265_v30 = vadd.f32 %v9464_v16, %v9143_v42  ;;  %v9718_v40 = vpop.f32.mrf.mxu0  ;;  %v9767_v21 = vpop.f32.mrf.mxu1 }
 0x5f4   : > { %v9768_v44 = vadd.f32 %v9767_v21, %v9718_v40 }
 0x5f6   : > { %v9807_v18 = vadd.f32 %v9768_v44, %v16206_v53 }
 0x5f8   : > { %v9416_v47 = vpop.f32.mrf.mxu2  ;;  %v9465_v15 = vpop.f32.mrf.mxu3 }
 0x5f9   : > { %v9466_v34 = vadd.f32 %v9465_v15, %v9416_v47 }
 0x5fb   : > { %v16267_v23 = vadd.f32 %v9466_v34, %v9144_v43  ;;  %v9720_v48 = vpop.f32.mrf.mxu0  ;;  %v9769_v46 = vpop.f32.mrf.mxu1 }
 0x5fc   : > { %v9770_v22 = vadd.f32 %v9769_v46, %v9720_v48 }
 0x5fe   : > { %v9808_v29 = vadd.f32 %v9770_v22, %v16209_v25 }
 0x600   : > { %v10057_v12 = vpop.f32.mrf.mxu2  ;;  %v10106_v7 = vpop.f32.mrf.mxu3 }
 0x601   : > { %v10107_v38 = vadd.f32 %v10106_v7, %v10057_v12 }
 0x603   : > { %v9723_v36 = vpop.f32.mrf.mxu0  ;;  %v9772_v41 = vpop.f32.mrf.mxu1  ;;  %v10146_v20 = vadd.f32 %v10107_v38, %v9807_v18 }
 0x604   : > { %v9773_v31 = vadd.f32 %v9772_v41, %v9723_v36 }
 0x605   : > { %v10217_v60 = vmul.f32 %v10146_v20, %v10146_v20 }
 0x606   : > { %v9809_v53 = vadd.f32 %v9773_v31, %v16216_v58 }
 0x608   : > { %v10059_v56 = vpop.f32.mrf.mxu2  ;;  %v10108_v39 = vpop.f32.mrf.mxu3 }
 0x609   : > { %v10109_v0 = vadd.f32 %v10108_v39, %v10059_v56 }
 0x60b   : > { %v10147_v1 = vadd.f32 %v10109_v0, %v9808_v29  ;;  %v9725_v14 = vpop.f32.mrf.mxu0  ;;  %v9774_v4 = vpop.f32.mrf.mxu1 }
 0x60c   : > { %v9775_v24 = vadd.f32 %v9774_v4, %v9725_v14 }
 0x60d   : > { %v14113_v17 = vpack.c.bf16 %v10147_v1, %v10146_v20  ;;  %v10195_v45 = vadd.f32 %v10147_v1, %v10146_v20  ;;  %v10218_v6 = vmul.f32 %v10147_v1, %v10147_v1 }
 0x60e   : > { %v9810_v9 = vadd.f32 %v9775_v24, %v16219_v3 }
 0x60f   : > { %14157 = vst [vmem:[%s15894_s21 + $0x40] sm:$0xff] %v14113_v17   ;;  %v10233_v62 = vadd.f32 %v10218_v6, %v10217_v60 }
 0x610   : > { %v10062_v33 = vpop.f32.mrf.mxu2  ;;  %v10111_v42 = vpop.f32.mrf.mxu3 }
 0x611   : > { %v10112_v13 = vadd.f32 %v10111_v42, %v10062_v33 }
 0x613   : > { %v10148_v50 = vadd.f32 %v10112_v13, %v9809_v53  ;;  %v9728_v51 = vpop.f32.mrf.mxu0  ;;  %v9777_v49 = vpop.f32.mrf.mxu1 }
 0x614   : > { %v9778_v21 = vadd.f32 %v9777_v49, %v9728_v51 }
 0x615   : > { %v10196_v25 = vadd.f32 %v10195_v45, %v10148_v50  ;;  %v10219_v32 = vmul.f32 %v10148_v50, %v10148_v50 }
 0x616   : > { %v9811_v48 = vadd.f32 %v9778_v21, %v16226_v27 }
 0x617   : > { %v10234_v26 = vadd.f32 %v10233_v62, %v10219_v32 }
 0x618   : > { %v10064_v57 = vpop.f32.mrf.mxu2  ;;  %v10113_v37 = vpop.f32.mrf.mxu3 }
 0x619   : > { %v10114_v55 = vadd.f32 %v10113_v37, %v10064_v57 }
 0x61b   : > { %v10149_v43 = vadd.f32 %v10114_v55, %v9810_v9  ;;  %v9730_v28 = vpop.f32.mrf.mxu0  ;;  %v9779_v59 = vpop.f32.mrf.mxu1 }
 0x61c   : > { %v9780_v41 = vadd.f32 %v9779_v59, %v9730_v28 }
 0x61d   : > { %v14118_v16 = vpack.c.bf16 %v10149_v43, %v10148_v50  ;;  %v10197_v40 = vadd.f32 %v10196_v25, %v10149_v43  ;;  %v10220_v58 = vmul.f32 %v10149_v43, %v10149_v43 }
 0x61e   : > { %v9812_v56 = vadd.f32 %v9780_v41, %v16229_v11 }
 0x61f   : > { %14158 = vst [vmem:[%s15894_s21 + $0x48] sm:$0xff] %v14118_v16   ;;  %v10235_v47 = vadd.f32 %v10234_v26, %v10220_v58 }
 0x620   : > { %v10067_v15 = vpop.f32.mrf.mxu2  ;;  %v10116_v34 = vpop.f32.mrf.mxu3 }
 0x621   : > { %v10117_v46 = vadd.f32 %v10116_v34, %v10067_v15 }
 0x623   : > { %v10150_v12 = vadd.f32 %v10117_v46, %v9811_v48  ;;  %v9733_v7 = vpop.f32.mrf.mxu0  ;;  %v9782_v44 = vpop.f32.mrf.mxu1 }
 0x624   : > { %v9783_v4 = vadd.f32 %v9782_v44, %v9733_v7 }
 0x625   : > { %v10198_v3 = vadd.f32 %v10197_v40, %v10150_v12  ;;  %v10221_v36 = vmul.f32 %v10150_v12, %v10150_v12 }
 0x626   : > { %v9813_v45 = vadd.f32 %v9783_v4, %v16237_v52 }
 0x627   : > { %v10236_v38 = vadd.f32 %v10235_v47, %v10221_v36 }
 0x628   : > { %v10069_v22 = vpop.f32.mrf.mxu2  ;;  %v10118_v18 = vpop.f32.mrf.mxu3 }
 0x629   : > { %v10119_v39 = vadd.f32 %v10118_v18, %v10069_v22 }
 0x62b   : > { %v10151_v20 = vadd.f32 %v10119_v39, %v9812_v56  ;;  %v9735_v29 = vpop.f32.mrf.mxu0  ;;  %v9784_v0 = vpop.f32.mrf.mxu1 }
 0x62c   : > { %v9785_v13 = vadd.f32 %v9784_v0, %v9735_v29 }
 0x62d   : > { %v14123_v1 = vpack.c.bf16 %v10151_v20, %v10150_v12  ;;  %v10199_v14 = vadd.f32 %v10198_v3, %v10151_v20  ;;  %v10222_v27 = vmul.f32 %v10151_v20, %v10151_v20 }
 0x62e   : > { %v9814_v25 = vadd.f32 %v9785_v13, %v16240_v35 }
 0x62f   : > { %14159 = vst [vmem:[%s15894_s21 + $0x50] sm:$0xff] %v14123_v1   ;;  %v10237_v31 = vadd.f32 %v10236_v38, %v10222_v27 }
 0x630   : > { %v10072_v60 = vpop.f32.mrf.mxu2  ;;  %v10121_v17 = vpop.f32.mrf.mxu3 }
 0x631   : > { %v10122_v6 = vadd.f32 %v10121_v17, %v10072_v60 }
 0x633   : > { %v10152_v62 = vadd.f32 %v10122_v6, %v9813_v45  ;;  %v9738_v33 = vpop.f32.mrf.mxu0  ;;  %v9787_v42 = vpop.f32.mrf.mxu1 }
 0x634   : > { %v9788_v55 = vadd.f32 %v9787_v42, %v9738_v33 }
 0x635   : > { %v10200_v11 = vadd.f32 %v10199_v14, %v10152_v62  ;;  %v10223_v53 = vmul.f32 %v10152_v62, %v10152_v62 }
 0x636   : > { %v9815_v16 = vadd.f32 %v9788_v55, %v16247_v63 }
 0x637   : > { %v10238_v50 = vadd.f32 %v10237_v31, %v10223_v53 }
 0x638   : > { %v10074_v51 = vpop.f32.mrf.mxu2  ;;  %v10123_v49 = vpop.f32.mrf.mxu3 }
 0x639   : > { %v10124_v32 = vadd.f32 %v10123_v49, %v10074_v51 }
 0x63b   : > { %v10153_v24 = vadd.f32 %v10124_v32, %v9814_v25  ;;  %v9740_v26 = vpop.f32.mrf.mxu0  ;;  %v9789_v57 = vpop.f32.mrf.mxu1 }
 0x63c   : > { %v9790_v34 = vadd.f32 %v9789_v57, %v9740_v26 }
 0x63d   : > { %v14128_v37 = vpack.c.bf16 %v10153_v24, %v10152_v62  ;;  %v10201_v9 = vadd.f32 %v10200_v11, %v10153_v24  ;;  %v10224_v52 = vmul.f32 %v10153_v24, %v10153_v24 }
 0x63e   : > { %v9816_v7 = vadd.f32 %v9790_v34, %v16250_v54 }
 0x63f   : > { %14160 = vst [vmem:[%s15894_s21 + $0x58] sm:$0xff] %v14128_v37   ;;  %v10239_v43 = vadd.f32 %v10238_v50, %v10224_v52 }
 0x640   : > { %v10077_v28 = vpop.f32.mrf.mxu2  ;;  %v10126_v59 = vpop.f32.mrf.mxu3 }
 0x641   : > { %v10127_v40 = vadd.f32 %v10126_v59, %v10077_v28 }
 0x643   : > { %v10154_v58 = vadd.f32 %v10127_v40, %v9815_v16  ;;  %v9743_v21 = vpop.f32.mrf.mxu0  ;;  %v9792_v47 = vpop.f32.mrf.mxu1 }
 0x644   : > { %v9793_v18 = vadd.f32 %v9792_v47, %v9743_v21 }
 0x645   : > { %v10202_v35 = vadd.f32 %v10201_v9, %v10154_v58  ;;  %v10225_v15 = vmul.f32 %v10154_v58, %v10154_v58 }
 0x646   : > { %v9817_v29 = vadd.f32 %v9793_v18, %v16253_v5 }
 0x647   : > { %v10240_v48 = vadd.f32 %v10239_v43, %v10225_v15 }
 0x648   : > { %v10079_v46 = vpop.f32.mrf.mxu2  ;;  %v10128_v12 = vpop.f32.mrf.mxu3 }
 0x649   : > { %v10129_v44 = vadd.f32 %v10128_v12, %v10079_v46 }
 0x64b   : > { %v10155_v3 = vadd.f32 %v10129_v44, %v9816_v7  ;;  %v9745_v36 = vpop.f32.mrf.mxu0  ;;  %v9794_v41 = vpop.f32.mrf.mxu1 }
 0x64c   : > { %v9795_v31 = vadd.f32 %v9794_v41, %v9745_v36 }
 0x64d   : > { %v14133_v38 = vpack.c.bf16 %v10155_v3, %v10154_v58  ;;  %v10203_v22 = vadd.f32 %v10202_v35, %v10155_v3  ;;  %v10226_v63 = vmul.f32 %v10155_v3, %v10155_v3  ;;  %v7098_v3 = vrot.slane %v15971_v2, 4 }
 0x64e   : > { %v9818_v6 = vadd.f32 %v9795_v31, %v16256_v61 }
 0x64f   : > { %14161 = vst [vmem:[%s15894_s21 + $0x60] sm:$0xff] %v14133_v38   ;;  %v10241_v56 = vadd.f32 %v10240_v48, %v10226_v63  ;;  %v7136_v38 = vrot.slane %v15976_v8, 4 }
 0x650   : > { %v10082_v39 = vpop.f32.mrf.mxu2  ;;  %v10131_v20 = vpop.f32.mrf.mxu3 }
 0x651   : > { %v10132_v0 = vadd.f32 %v10131_v20, %v10082_v39  ;;  %v7137_v20 = vadd.f32 %v7136_v38, %v15976_v8 }
 0x653   : > { %v10156_v1 = vadd.f32 %v10132_v0, %v9817_v29  ;;  %v9748_v14 = vpop.f32.mrf.mxu0  ;;  %v9797_v27 = vpop.f32.mrf.mxu1 }
 0x654   : > { %v9798_v13 = vadd.f32 %v9797_v27, %v9748_v14 }
 0x655   : > { %v10204_v54 = vadd.f32 %v10203_v22, %v10156_v1  ;;  %v10227_v4 = vmul.f32 %v10156_v1, %v10156_v1 }
 0x656   : > { %v9819_v32 = vadd.f32 %v9798_v13, %v16259_v19 }
 0x657   : > { %v10242_v60 = vadd.f32 %v10241_v56, %v10227_v4  ;;  %v7099_v56 = vadd.f32 %v7098_v3, %v15971_v2  ;;  %v10348_v3 = vld [vmem:[%s15894_s21 + $0x64] sm:$0xf] (%p14419_p9) }
 0x658   : > { %v10084_v17 = vpop.f32.mrf.mxu2  ;;  %v10133_v45 = vpop.f32.mrf.mxu3  ;;  %10349 = vst [vmem:[%s16315_s15 + $0xc8] sm:$0xf] (%p14419_p9), %v10348_v3 }
 0x659   : > { %v10134_v62 = vadd.f32 %v10133_v45, %v10084_v17  ;;  %v7100_v0 = vrot.slane %v7099_v56, 2 }
 0x65b   : > { %v10157_v33 = vadd.f32 %v10134_v62, %v9818_v6  ;;  %v9750_v5 = vpop.f32.mrf.mxu0  ;;  %v9799_v50 = vpop.f32.mrf.mxu1 }
 0x65c   : > { %v9800_v61 = vadd.f32 %v9799_v50, %v9750_v5 }
 0x65d   : > { %v14138_v42 = vpack.c.bf16 %v10157_v33, %v10156_v1  ;;  %v10205_v11 = vadd.f32 %v10204_v54, %v10157_v33  ;;  %v10228_v53 = vmul.f32 %v10157_v33, %v10157_v33  ;;  %v7138_v54 = vrot.slane %v7137_v20, 2 }
 0x65e   : > { %v9820_v59 = vadd.f32 %v9800_v61, %v16262_v10  ;;  %v10306_v61 = vld [vmem:[%s15894_s21 + $0x10] sm:$0xf] (%p14419_p9) }
 0x65f   : > { %14162 = vst [vmem:[%s15894_s21 + $0x68] sm:$0xff] %v14138_v42   ;;  %v10243_v51 = vadd.f32 %v10242_v60, %v10228_v53  ;;  %v7101_v60 = vadd.f32 %v7100_v0, %v7099_v56  ;;  %v7139_v45 = vadd.f32 %v7138_v54, %v7137_v20 }
 0x660   : > { %v10087_v49 = vpop.f32.mrf.mxu2  ;;  %v10136_v25 = vpop.f32.mrf.mxu3  ;;  %10307 = vst [vmem:[%s16315_s15 + $0x20] sm:$0xf] (%p14419_p9), %v10306_v61 }
 0x661   : > { %v10137_v24 = vadd.f32 %v10136_v25, %v10087_v49  ;;  %v7102_v8 = vrot.slane %v7101_v60, 1  ;;  %v7140_v42 = vrot.slane %v7139_v45, 1 }
 0x663   : > { %v10158_v26 = vadd.f32 %v10137_v24, %v9819_v32  ;;  %v9753_v52 = vpop.f32.mrf.mxu0  ;;  %v9802_v55 = vpop.f32.mrf.mxu1  ;;  %v7103_v13 = vadd.f32 %v7102_v8, %v7101_v60  ;;  %v10298_v24 = vld [vmem:[%s15894_s21] sm:$0xf] (%p14419_p9) }
 0x664   : > { %v9803_v35 = vadd.f32 %v9802_v55, %v9753_v52  ;;  %10299 = vst [vmem:[%s16315_s15] sm:$0xf] (%p14419_p9), %v10298_v24  ;;  %v10310_v52 = vld [vmem:[%s15894_s21 + $0x18] sm:$0xf] (%p14419_p9)  ;;  %v10312_v55 = vld [vmem:[%s15894_s21 + $0x1c] sm:$0xf] (%p14419_p9) }
 0x665   : > { %v10206_v57 = vadd.f32 %v10205_v11, %v10158_v26  ;;  %v10229_v37 = vmul.f32 %v10158_v26, %v10158_v26  ;;  %10311 = vst [vmem:[%s16315_s15 + $0x30] sm:$0xf] (%p14419_p9), %v10310_v52 }
 0x666   : > { %v9821_v48 = vadd.f32 %v9803_v35, %v16265_v30  ;;  %10313 = vst [vmem:[%s16315_s15 + $0x38] sm:$0xf] (%p14419_p9), %v10312_v55  ;;  %v10330_v35 = vld [vmem:[%s15894_s21 + $0x40] sm:$0xf] (%p14419_p9) }
 0x667   : > { %v10244_v9 = vadd.f32 %v10243_v51, %v10229_v37  ;;  %v7141_v51 = vadd.f32 %v7140_v42, %v7139_v45  ;;  %v10304_v37 = vld [vmem:[%s15894_s21 + $0xc] sm:$0xf] (%p14419_p9)  ;;  %10331 = vst [vmem:[%s16315_s15 + $0x80] sm:$0xf] (%p14419_p9), %v10330_v35 }
 0x668   : > { %v10089_v43 = vpop.f32.mrf.mxu2  ;;  %v10138_v28 = vpop.f32.mrf.mxu3  ;;  %10305 = vst [vmem:[%s16315_s15 + $0x18] sm:$0xf] (%p14419_p9), %v10304_v37 }
 0x669   : > { %v10139_v16 = vadd.f32 %v10138_v28, %v10089_v43  ;;  %v10314_v43 = vld [vmem:[%s15894_s21 + $0x20] sm:$0xf] (%p14419_p9)  ;;  %v10316_v28 = vld [vmem:[%s15894_s21 + $0x24] sm:$0xf] (%p14419_p9) }
 0x66a   : > { %10315 = vst [vmem:[%s16315_s15 + $0x40] sm:$0xf] (%p14419_p9), %v10314_v43 }
 0x66b   : > { %v10159_v40 = vadd.f32 %v10139_v16, %v9820_v59  ;;  %v9755_v12 = vpop.f32.mrf.mxu0  ;;  %v9804_v7 = vpop.f32.mrf.mxu1  ;;  %v10318_v59 = vld [vmem:[%s15894_s21 + $0x28] sm:$0xf] (%p14419_p9)  ;;  %v10320_v16 = vld [vmem:[%s15894_s21 + $0x2c] sm:$0xf] (%p14419_p9)  ;;  %10317 = vst [vmem:[%s16315_s15 + $0x48] sm:$0xf] (%p14419_p9), %v10316_v28 }
 0x66c   : > { %v9805_v41 = vadd.f32 %v9804_v7, %v9755_v12  ;;  %10319 = vst [vmem:[%s16315_s15 + $0x50] sm:$0xf] (%p14419_p9), %v10318_v59  ;;  %v10342_v12 = vld [vmem:[%s15894_s21 + $0x58] sm:$0xf] (%p14419_p9)  ;;  %v10344_v7 = vld [vmem:[%s15894_s21 + $0x5c] sm:$0xf] (%p14419_p9) }
 0x66d   : > { %v14143_v58 = vpack.c.bf16 %v10159_v40, %v10158_v26  ;;  %v10207_v21 = vadd.f32 %v10206_v57, %v10159_v40  ;;  %v10230_v47 = vmul.f32 %v10159_v40, %v10159_v40  ;;  %v10300_v26 = vld [vmem:[%s15894_s21 + $0x4] sm:$0xf] (%p14419_p9)  ;;  %v10302_v57 = vld [vmem:[%s15894_s21 + $0x8] sm:$0xf] (%p14419_p9)  ;;  %v10322_v40 = vld [vmem:[%s15894_s21 + $0x30] sm:$0xf] (%p14419_p9) }
 0x66e   : > { %v9822_v30 = vadd.f32 %v9805_v41, %v16267_v23  ;;  %10301 = vst [vmem:[%s16315_s15 + $0x8] sm:$0xf] (%p14419_p9), %v10300_v26 }
 0x66f   : > { %14163 = vst [vmem:[%s15894_s21 + $0x70] sm:$0xff] %v14143_v58   ;;  %v10245_v19 = vadd.f32 %v10244_v9, %v10230_v47  ;;  %v10308_v9 = vld [vmem:[%s15894_s21 + $0x14] sm:$0xf] (%p14419_p9)  ;;  %v10328_v47 = vld [vmem:[%s15894_s21 + $0x3c] sm:$0xf] (%p14419_p9) }
 0x670   : > { %v10092_v15 = vpop.f32.mrf.mxu2  ;;  %v10141_v34 = vpop.f32.mrf.mxu3  ;;  %10303 = vst [vmem:[%s16315_s15 + $0x10] sm:$0xf] (%p14419_p9), %v10302_v57  ;;  %v10324_v58 = vld [vmem:[%s15894_s21 + $0x34] sm:$0xf] (%p14419_p9) }
 0x671   : > { %v10142_v46 = vadd.f32 %v10141_v34, %v10092_v15  ;;  %10309 = vst [vmem:[%s16315_s15 + $0x28] sm:$0xf] (%p14419_p9), %v10308_v9  ;;  %v10334_v15 = vld [vmem:[%s15894_s21 + $0x48] sm:$0xf] (%p14419_p9)  ;;  %v10336_v34 = vld [vmem:[%s15894_s21 + $0x4c] sm:$0xf] (%p14419_p9) }
 0x672   : > { %10321 = vst [vmem:[%s16315_s15 + $0x58] sm:$0xf] (%p14419_p9), %v10320_v16 }
 0x673   : > { %v10160_v44 = vadd.f32 %v10142_v46, %v9821_v48  ;;  %10323 = vst [vmem:[%s16315_s15 + $0x60] sm:$0xf] (%p14419_p9), %v10322_v40  ;;  %v10338_v48 = vld [vmem:[%s15894_s21 + $0x50] sm:$0xf] (%p14419_p9)  ;;  %v10340_v46 = vld [vmem:[%s15894_s21 + $0x54] sm:$0xf] (%p14419_p9) }
 0x674   : > { %10325 = vst [vmem:[%s16315_s15 + $0x68] sm:$0xf] (%p14419_p9), %v10324_v58 }
 0x675   : > { %v10208_v36 = vadd.f32 %v10207_v21, %v10160_v44  ;;  %v10231_v10 = vmul.f32 %v10160_v44, %v10160_v44  ;;  %v10326_v21 = vld [vmem:[%s15894_s21 + $0x38] sm:$0xf] (%p14419_p9)  ;;  %10329 = vst [vmem:[%s16315_s15 + $0x78] sm:$0xf] (%p14419_p9), %v10328_v47 }
 0x676   : > { %10327 = vst [vmem:[%s16315_s15 + $0x70] sm:$0xf] (%p14419_p9), %v10326_v21  ;;  %v10354_v41 = vld [vmem:[%s15894_s21 + $0x70] sm:$0xf] (%p14419_p9)  ;;  %v10356_v38 = vld [vmem:[%s15894_s21 + $0x74] sm:$0xf] (%p14419_p9) }
 0x677   : > { %v10246_v22 = vadd.f32 %v10245_v19, %v10231_v10  ;;  %v10332_v19 = vld [vmem:[%s15894_s21 + $0x44] sm:$0xf] (%p14419_p9)  ;;  %10335 = vst [vmem:[%s16315_s15 + $0x90] sm:$0xf] (%p14419_p9), %v10334_v15  ;;  %v10352_v10 = vld [vmem:[%s15894_s21 + $0x6c] sm:$0xf] (%p14419_p9) }
 0x678   : > { %v10094_v63 = vpop.f32.mrf.mxu2  ;;  %v10143_v18 = vpop.f32.mrf.mxu3  ;;  %10333 = vst [vmem:[%s16315_s15 + $0x88] sm:$0xf] (%p14419_p9), %v10332_v19 }
 0x679   : > { %v10144_v39 = vadd.f32 %v10143_v18, %v10094_v63  ;;  %10337 = vst [vmem:[%s16315_s15 + $0x98] sm:$0xf] (%p14419_p9), %v10336_v34 }
 0x67a   : > { %10339 = vst [vmem:[%s16315_s15 + $0xa0] sm:$0xf] (%p14419_p9), %v10338_v48 }
 0x67b   : > { %v10161_v29 = vadd.f32 %v10144_v39, %v9822_v30  ;;  %10341 = vst [vmem:[%s16315_s15 + $0xa8] sm:$0xf] (%p14419_p9), %v10340_v46 }
 0x67c   : > { %10343 = vst [vmem:[%s16315_s15 + $0xb0] sm:$0xf] (%p14419_p9), %v10342_v12 }
 0x67d   : > { %v14148_v1 = vpack.c.bf16 %v10161_v29, %v10160_v44  ;;  %v10209_v14 = vadd.f32 %v10208_v36, %v10161_v29  ;;  %v10232_v27 = vmul.f32 %v10161_v29, %v10161_v29  ;;  %v10346_v44 = vld [vmem:[%s15894_s21 + $0x60] sm:$0xf] (%p14419_p9)  ;;  %10345 = vst [vmem:[%s16315_s15 + $0xb8] sm:$0xf] (%p14419_p9), %v10344_v7  ;;  %v10350_v36 = vld [vmem:[%s15894_s21 + $0x68] sm:$0xf] (%p14419_p9) }
 0x67e   : > { %10347 = vst [vmem:[%s16315_s15 + $0xc0] sm:$0xf] (%p14419_p9), %v10346_v44 }
 0x67f   : > { %14164 = vst [vmem:[%s15894_s21 + $0x78] sm:$0xff] %v14148_v1   ;;  %v10210_v4 = vrot.slane %v10209_v14, 4  ;;  %v10247_v31 = vadd.f32 %v10246_v22, %v10232_v27 }
 0x680   : > { %10351 = vst [vmem:[%s16315_s15 + $0xd0] sm:$0xf] (%p14419_p9), %v10350_v36 }
 0x681   : > { %v10211_v17 = vadd.f32 %v10210_v4, %v10209_v14  ;;  %v10248_v2 = vrot.slane %v10247_v31, 4  ;;  %10353 = vst [vmem:[%s16315_s15 + $0xd8] sm:$0xf] (%p14419_p9), %v10352_v10 }
 0x682   : > { %10355 = vst [vmem:[%s16315_s15 + $0xe0] sm:$0xf] (%p14419_p9), %v10354_v41 }
 0x683   : > { %v10212_v23 = vrot.slane %v10211_v17, 2  ;;  %v10249_v6 = vadd.f32 %v10248_v2, %v10247_v31  ;;  %10357 = vst [vmem:[%s16315_s15 + $0xe8] sm:$0xf] (%p14419_p9), %v10356_v38 }
 0x685   : > { %v10213_v62 = vadd.f32 %v10212_v23, %v10211_v17  ;;  %v10250_v33 = vrot.slane %v10249_v6, 2 }
 0x686   : > { %v10358_v22 = vld [vmem:[%s15894_s21 + $0x78] sm:$0xf] (%p14419_p9)  ;;  %v10360_v63 = vld [vmem:[%s15894_s21 + $0x7c] sm:$0xf] (%p14419_p9) }
 0x687   : > { %v10214_v11 = vrot.slane %v10213_v62, 1  ;;  %v10251_v53 = vadd.f32 %v10250_v33, %v10249_v6  ;;  %10359 = vst [vmem:[%s16315_s15 + $0xf0] sm:$0xf] (%p14419_p9), %v10358_v22 }
 0x688   : > { %10361 = vst [vmem:[%s16315_s15 + $0xf8] sm:$0xf] (%p14419_p9), %v10360_v63 }
 0x689   : > { %v10215_v5 = vadd.f32 %v10214_v11, %v10213_v62  ;;  %v10252_v50 = vrot.slane %v10251_v53, 1 }
 0x68b   : > { %v10216_v49 = vadd.f32 %v10215_v5, %v7103_v13  ;;  %v10253_v25 = vadd.f32 %v10252_v50, %v10251_v53  ;;  %10277 = sbr.rel (!%p14419_p9) target bundleno = 1680 (0x690), region = 92 }
 0x68d   : > { %v10254_v32 = vadd.f32 %v10253_v25, %v7141_v51  ;;  %10255 = vst [vmem:[%s2678_s12] sm:$0x1] %v10216_v49 }
 0x68f   : > { %10256 = vst [vmem:[%s2685_s23] sm:$0x1] %v10254_v32 }
 0x690 PF: > { %s17_s29 = sadd.s32 1, %s14313_s29   ;;  %s16421_s21 = smov %s14285_s22 }
 0x691   : > { %p14_p2 = scmp.ge.s32.totalorder %s17_s29, 6   ;;  %s16422_s22 = smov %s14427_s17 }
 0x692   : > { %s16423_s23 = smov %s14293_s24  ;;  %s16424_s24 = smov %s14424_s16 }
 0x693   : > { %s16425_s25 = smov %s14305_s27  ;;  %s16426_s26 = smov %s14309_s28 }
 0x694   : > { %s16427_s27 = smov %s16430_s30  ;;  %s16428_s28 = smov %s16434_s7 }
 0x695   :  { %16 = sbr.rel (!%p14_p2) target bundleno = 5 (0x5), region = 222 }

</bundles_post_ra>
